<compile_context>
chip_gen: v7x
topology: tpu7x:2x2x1
jax: 0.10.0
libtpu: 0.0.40
codegen_flags: <defaults>
</compile_context>

<pallas_src>
import functools

import numpy as np
import jax
import jax.numpy as jnp
from jax.experimental import pallas as pl
from jax.experimental.pallas import tpu as pltpu


_CONV_CFG = [(1, 32), (32, 32), (32, 64), (64, 64), (64, 128), (128, 128)]
_POOLS = ["none", "avg2", "none", "avg2", "none", "global"]
_BN_EPS = 1e-5


# --------------------------------------------------------------------------
# Kernel
# --------------------------------------------------------------------------
def _avgpool2(y, H, W, C):
    """2x2 stride-2 average pool of a row-major (H*W, C) map -> (H//2, W//2, C).

    Pure VPU adds + reshapes (no pool matrix / MXU work).
    """
    y3 = y.reshape(H * W // 2, 2, C)              # adjacent column (j) pairs
    yw = y3[:, 0, :] + y3[:, 1, :]                # (H * W//2, C), row = i*(W//2)+j2
    z = yw.reshape(H // 2, W, C)                  # cols [0:W//2) = even i, [W//2:) = odd i
    return (z[:, : W // 2, :] + z[:, W // 2:, :]) * 0.25


def fused_cnn_kernel(x_ref, *refs, layer_hw, pools):
    """Whole CNN_MNIST_V1 forward for one batch element, fully VMEM resident.

    refs layout:
      [0:6]   conv weights  (9*Cin_pad, Cout) bf16   (im2col layout, taps row-major)
      [6:12]  BN scales     (1, Cout)         f32    gamma / sqrt(var + eps)
      [12:18] BN biases     (1, Cout)         f32    beta - mean * scale
      [18]    linear weight (128, 10)         f32
      [19]    linear bias   (1, 10)           f32
      [20]    output        (1, 1, 10)        f32
      [21:27] padded-activation scratch (H+2, W+2, Cin_pad) bf16, one per layer
    """
    w_refs = refs[0:6]
    s_refs = refs[6:12]
    b_refs = refs[12:18]
    lw_ref, lb_ref, out_ref = refs[18], refs[19], refs[20]
    pad_refs = refs[21:27]

    a = x_ref[0]                                   # (H, W, 8) f32 (channel-padded input)
    y = None
    for l in range(6):
        H, W = layer_hw[l]
        pad_ref = pad_refs[l]
        Cin = pad_ref.shape[2]
        Cout = w_refs[l].shape[1]

        # Spatial pad=1 (and, for layer 0, the zero channel padding) via a
        # zeroed bf16 scratch -> conv operands are already bf16 for the MXU.
        pad_ref[...] = jnp.zeros(pad_ref.shape, pad_ref.dtype)
        pad_ref[1:H + 1, 1:W + 1, :] = a.astype(pad_ref.dtype)
        xp = pad_ref[...]                          # (H+2, W+2, Cin) bf16

        # im2col: one MXU matmul with contraction depth K = 9*Cin.
        cols = []
        for ky in range(3):
            for kx in range(3):
                cols.append(xp[ky:ky + H, kx:kx + W, :].reshape(H * W, Cin))
        patch = jnp.concatenate(cols, axis=1)      # (H*W, 9*Cin) bf16
        acc = jnp.dot(patch, w_refs[l][...],
                      preferred_element_type=jnp.float32)   # (H*W, Cout) f32

        # Folded (eval-mode) BatchNorm + ReLU in f32 on the VPU.
        y = jnp.maximum(acc * s_refs[l][...] + b_refs[l][...], 0.0)

        pool = pools[l]
        if pool == "none":
            a = y.reshape(H, W, Cout)
        elif pool == "avg2":
            a = _avgpool2(y, H, W, Cout)           # (H//2, W//2, Cout) f32
        # "global" is the last layer; handled below.

    # AdaptiveAvgPool2d(1): mean over the H*W rows (XLU/VPU reduction),
    # then the fused Linear(128, 10).
    feat = jnp.mean(y, axis=0, keepdims=True)                     # (1, 128) f32
    logits = jnp.dot(feat, lw_ref[...],
                     preferred_element_type=jnp.float32) + lb_ref[...]
    out_ref[0] = logits                                           # (1, 10)


# --------------------------------------------------------------------------
# Wrapper
# --------------------------------------------------------------------------
def _prep_conv_weight(w):
    """(3,3,Cin,Cout) f32 HWIO -> (9*max(Cin,8), Cout) bf16, taps row-major (ky,kx)."""
    Cin, Cout = w.shape[2], w.shape[3]
    if Cin < 8:
        w = jnp.pad(w, ((0, 0), (0, 0), (0, 8 - Cin), (0, 0)))
        Cin = 8
    return w.reshape(9 * Cin, Cout).astype(jnp.bfloat16)


def cnn_forward_nhwc(x, conv_params, lw, lb):
    """x: (N, H, W, 1) NHWC f32 -> logits (N, 10). Single fused pallas_call."""
    N, H, W, Cin0 = x.shape
    assert H % 4 == 0 and W % 4 == 0 and Cin0 <= 8
    # One tiny channel pad (1 -> 8) on the raw input so every layer is uniform.
    x = jnp.pad(x, ((0, 0), (0, 0), (0, 0), (0, 8 - Cin0)))

    w_list = [_prep_conv_weight(w) for (w, _, _) in conv_params]
    s_list = [s for (_, s, _) in conv_params]
    b_list = [b for (_, _, b) in conv_params]

    layer_hw = ((H, W), (H, W), (H // 2, W // 2), (H // 2, W // 2),
                (H // 4, W // 4), (H // 4, W // 4))
    pad_cins = tuple(max(cin, 8) for cin, _ in _CONV_CFG)
    scratch = [pltpu.VMEM((h + 2, w + 2, c), jnp.bfloat16)
               for (h, w), c in zip(layer_hw, pad_cins)]

    const2d = lambda b: (0, 0)
    in_specs = ([pl.BlockSpec((1, H, W, 8), lambda b: (b, 0, 0, 0))]
                + [pl.BlockSpec(tuple(arr.shape), const2d)
                   for arr in (*w_list, *s_list, *b_list, lw, lb)])

    out = pl.pallas_call(
        functools.partial(fused_cnn_kernel,
                          layer_hw=layer_hw, pools=tuple(_POOLS)),
        out_shape=jax.ShapeDtypeStruct((N, 1, 10), jnp.float32),
        grid=(N,),
        in_specs=in_specs,
        out_specs=pl.BlockSpec((1, 1, 10), lambda b: (b, 0, 0)),
        scratch_shapes=scratch,
        compiler_params=pltpu.CompilerParams(
            dimension_semantics=("parallel",)),
    )(x, *w_list, *s_list, *b_list, lw, lb)
    return out.reshape(N, 10)


def cnn_forward_nchw(x_nchw, conv_params, lw, lb):
    return cnn_forward_nhwc(jnp.transpose(x_nchw, (0, 2, 3, 1)),
                            conv_params, lw, lb)


# --------------------------------------------------------------------------
# Parameters (BatchNorm treated as eval-mode and folded into scale/bias)
# --------------------------------------------------------------------------
def init_params(key):
    conv_params = []
    for cin, cout in _CONV_CFG:
        key, kw, kg, kb, km, kv = jax.random.split(key, 6)
        w = (jax.random.normal(kw, (3, 3, cin, cout), jnp.float32)
             * (1.0 / np.sqrt(3 * 3 * cin)))
        gamma = 1.0 + 0.1 * jax.random.normal(kg, (cout,), jnp.float32)
        beta = 0.1 * jax.random.normal(kb, (cout,), jnp.float32)
        rmean = 0.1 * jax.random.normal(km, (cout,), jnp.float32)
        rvar = jnp.abs(jax.random.normal(kv, (cout,), jnp.float32)) + 0.5
        scale = gamma / jnp.sqrt(rvar + _BN_EPS)
        bias = beta - rmean * scale
        conv_params.append((w, scale.reshape(1, cout), bias.reshape(1, cout)))
    key, kw, kb = jax.random.split(key, 3)
    lw = jax.random.normal(kw, (128, 10), jnp.float32) / np.sqrt(128.0)
    lb = 0.1 * jax.random.normal(kb, (1, 10), jnp.float32)
    return conv_params, lw, lb


# --------------------------------------------------------------------------
# Pure-JAX reference. Conv operands are cast to bf16 (f32 accumulation) to
# mirror the MXU operand precision the kernel uses; everything else is f32.
# --------------------------------------------------------------------------
def reference_forward_nhwc(x, conv_params, lw, lb):
    for (w, scale, bias), pool in zip(conv_params, _POOLS):
        y = jax.lax.conv_general_dilated(
            x.astype(jnp.bfloat16), w.astype(jnp.bfloat16),
            window_strides=(1, 1), padding="SAME",
            dimension_numbers=("NHWC", "HWIO", "NHWC"),
            preferred_element_type=jnp.float32)
        y = jnp.maximum(y * scale.reshape(1, 1, 1, -1)
                        + bias.reshape(1, 1, 1, -1), 0.0)
        if pool == "avg2":
            Nb, Hh, Ww, C = y.shape
            y = y.reshape(Nb, Hh // 2, 2, Ww // 2, 2, C).mean(axis=(2, 4))
        elif pool == "global":
            y = y.mean(axis=(1, 2), keepdims=True)
        x = y
    feat = x.reshape(x.shape[0], -1)
    return feat @ lw + lb


# --------------------------------------------------------------------------
if __name__ == "__main__":
    key = jax.random.PRNGKey(0)
    key, kx = jax.random.split(key)

    N, H, W = 2, 16, 16                            # small MNIST-like input
    x_nchw = jax.random.normal(kx, (N, 1, H, W), jnp.float32)  # PyTorch layout

    conv_params, lw, lb = init_params(key)

    fwd = jax.jit(cnn_forward_nchw)
    logits = jax.block_until_ready(fwd(x_nchw, conv_params, lw, lb))
    assert logits.shape == (N, 10)

    ref = reference_forward_nhwc(jnp.transpose(x_nchw, (0, 2, 3, 1)),
                                 conv_params, lw, lb)
    np.testing.assert_allclose(np.asarray(logits), np.asarray(ref),
                               rtol=2e-2, atol=2e-2)

    print("KERNEL_OK")
</pallas_src>

<mosaic_0001>
module attributes {stable_mosaic.version = 11 : i64} {
  func.func @fused_cnn_kernel(%arg0: i32, %arg1: memref<1x16x16x8xf32, #tpu.memory_space<vmem>>, %arg2: memref<72x32xbf16, #tpu.memory_space<vmem>>, %arg3: memref<288x32xbf16, #tpu.memory_space<vmem>>, %arg4: memref<288x64xbf16, #tpu.memory_space<vmem>>, %arg5: memref<576x64xbf16, #tpu.memory_space<vmem>>, %arg6: memref<576x128xbf16, #tpu.memory_space<vmem>>, %arg7: memref<1152x128xbf16, #tpu.memory_space<vmem>>, %arg8: memref<1x32xf32, #tpu.memory_space<vmem>>, %arg9: memref<1x32xf32, #tpu.memory_space<vmem>>, %arg10: memref<1x64xf32, #tpu.memory_space<vmem>>, %arg11: memref<1x64xf32, #tpu.memory_space<vmem>>, %arg12: memref<1x128xf32, #tpu.memory_space<vmem>>, %arg13: memref<1x128xf32, #tpu.memory_space<vmem>>, %arg14: memref<1x32xf32, #tpu.memory_space<vmem>>, %arg15: memref<1x32xf32, #tpu.memory_space<vmem>>, %arg16: memref<1x64xf32, #tpu.memory_space<vmem>>, %arg17: memref<1x64xf32, #tpu.memory_space<vmem>>, %arg18: memref<1x128xf32, #tpu.memory_space<vmem>>, %arg19: memref<1x128xf32, #tpu.memory_space<vmem>>, %arg20: memref<128x10xf32, #tpu.memory_space<vmem>>, %arg21: memref<1x10xf32, #tpu.memory_space<vmem>>, %arg22: memref<1x1x10xf32, #tpu.memory_space<vmem>>, %arg23: memref<18x18x8xbf16, #tpu.memory_space<vmem>>, %arg24: memref<18x18x32xbf16, #tpu.memory_space<vmem>>, %arg25: memref<10x10x32xbf16, #tpu.memory_space<vmem>>, %arg26: memref<10x10x64xbf16, #tpu.memory_space<vmem>>, %arg27: memref<6x6x64xbf16, #tpu.memory_space<vmem>>, %arg28: memref<6x6x128xbf16, #tpu.memory_space<vmem>>) attributes {dimension_semantics = [#tpu.dimension_semantics<parallel>], iteration_bounds = array<i64: 2>, scalar_prefetch = 0 : i64, scratch_operands = 6 : i64, tpu.core_type = #tpu.core_type<tc>, window_params = [{transform_indices = @transform_0, window_bounds = array<i64: 1, 16, 16, 8>}, {pipeline_mode = #tpu.pipeline_mode<synchronous>, transform_indices = @transform_1, window_bounds = array<i64: 72, 32>}, {pipeline_mode = #tpu.pipeline_mode<synchronous>, transform_indices = @transform_2, window_bounds = array<i64: 288, 32>}, {pipeline_mode = #tpu.pipeline_mode<synchronous>, transform_indices = @transform_3, window_bounds = array<i64: 288, 64>}, {pipeline_mode = #tpu.pipeline_mode<synchronous>, transform_indices = @transform_4, window_bounds = array<i64: 576, 64>}, {pipeline_mode = #tpu.pipeline_mode<synchronous>, transform_indices = @transform_5, window_bounds = array<i64: 576, 128>}, {pipeline_mode = #tpu.pipeline_mode<synchronous>, transform_indices = @transform_6, window_bounds = array<i64: 1152, 128>}, {pipeline_mode = #tpu.pipeline_mode<synchronous>, transform_indices = @transform_7, window_bounds = array<i64: 1, 32>}, {pipeline_mode = #tpu.pipeline_mode<synchronous>, transform_indices = @transform_8, window_bounds = array<i64: 1, 32>}, {pipeline_mode = #tpu.pipeline_mode<synchronous>, transform_indices = @transform_9, window_bounds = array<i64: 1, 64>}, {pipeline_mode = #tpu.pipeline_mode<synchronous>, transform_indices = @transform_10, window_bounds = array<i64: 1, 64>}, {pipeline_mode = #tpu.pipeline_mode<synchronous>, transform_indices = @transform_11, window_bounds = array<i64: 1, 128>}, {pipeline_mode = #tpu.pipeline_mode<synchronous>, transform_indices = @transform_12, window_bounds = array<i64: 1, 128>}, {pipeline_mode = #tpu.pipeline_mode<synchronous>, transform_indices = @transform_13, window_bounds = array<i64: 1, 32>}, {pipeline_mode = #tpu.pipeline_mode<synchronous>, transform_indices = @transform_14, window_bounds = array<i64: 1, 32>}, {pipeline_mode = #tpu.pipeline_mode<synchronous>, transform_indices = @transform_15, window_bounds = array<i64: 1, 64>}, {pipeline_mode = #tpu.pipeline_mode<synchronous>, transform_indices = @transform_16, window_bounds = array<i64: 1, 64>}, {pipeline_mode = #tpu.pipeline_mode<synchronous>, transform_indices = @transform_17, window_bounds = array<i64: 1, 128>}, {pipeline_mode = #tpu.pipeline_mode<synchronous>, transform_indices = @transform_18, window_bounds = array<i64: 1, 128>}, {pipeline_mode = #tpu.pipeline_mode<synchronous>, transform_indices = @transform_19, window_bounds = array<i64: 128, 10>}, {pipeline_mode = #tpu.pipeline_mode<synchronous>, transform_indices = @transform_20, window_bounds = array<i64: 1, 10>}, {transform_indices = @transform_21, window_bounds = array<i64: 1, 1, 10>}]} {
    %c0 = arith.constant 0 : index
    %c0_0 = arith.constant 0 : index
    %c0_1 = arith.constant 0 : index
    %c0_2 = arith.constant 0 : index
    %0 = vector.load %arg1[%c0, %c0_0, %c0_1, %c0_2] : memref<1x16x16x8xf32, #tpu.memory_space<vmem>>, vector<1x16x16x8xf32>
    %1 = vector.shape_cast %0 : vector<1x16x16x8xf32> to vector<16x16x8xf32>
    %cst = arith.constant 0.000000e+00 : bf16
    %2 = vector.broadcast %cst : bf16 to vector<18x18x8xbf16>
    %c0_3 = arith.constant 0 : index
    %c0_4 = arith.constant 0 : index
    %c0_5 = arith.constant 0 : index
    %3 = vector.load %arg23[%c0_3, %c0_4, %c0_5] : memref<18x18x8xbf16, #tpu.memory_space<vmem>>, vector<18x18x8xbf16>
    tpu.vector_store %arg23[%c0_3, %c0_4, %c0_5], %2 {strides = array<i32>} : memref<18x18x8xbf16, #tpu.memory_space<vmem>>, vector<18x18x8xbf16>,
    %4 = arith.truncf %1 : vector<16x16x8xf32> to vector<16x16x8xbf16>
    %c1 = arith.constant 1 : index
    %c1_6 = arith.constant 1 : index
    %c0_7 = arith.constant 0 : index
    %5 = vector.load %arg23[%c1, %c1_6, %c0_7] : memref<18x18x8xbf16, #tpu.memory_space<vmem>>, vector<16x16x8xbf16>
    tpu.vector_store %arg23[%c1, %c1_6, %c0_7], %4 {strides = array<i32>} : memref<18x18x8xbf16, #tpu.memory_space<vmem>>, vector<16x16x8xbf16>,
    %c0_8 = arith.constant 0 : index
    %c0_9 = arith.constant 0 : index
    %c0_10 = arith.constant 0 : index
    %6 = vector.load %arg23[%c0_8, %c0_9, %c0_10] : memref<18x18x8xbf16, #tpu.memory_space<vmem>>, vector<18x18x8xbf16>
    %7 = vector.extract_strided_slice %6 {offsets = [0, 0, 0], sizes = [16, 16, 8], strides = [1, 1, 1]} : vector<18x18x8xbf16> to vector<16x16x8xbf16>
    %8 = vector.shape_cast %7 : vector<16x16x8xbf16> to vector<256x8xbf16>
    %9 = vector.extract_strided_slice %6 {offsets = [0, 1, 0], sizes = [16, 16, 8], strides = [1, 1, 1]} : vector<18x18x8xbf16> to vector<16x16x8xbf16>
    %10 = vector.shape_cast %9 : vector<16x16x8xbf16> to vector<256x8xbf16>
    %11 = vector.extract_strided_slice %6 {offsets = [0, 2, 0], sizes = [16, 16, 8], strides = [1, 1, 1]} : vector<18x18x8xbf16> to vector<16x16x8xbf16>
    %12 = vector.shape_cast %11 : vector<16x16x8xbf16> to vector<256x8xbf16>
    %13 = vector.extract_strided_slice %6 {offsets = [1, 0, 0], sizes = [16, 16, 8], strides = [1, 1, 1]} : vector<18x18x8xbf16> to vector<16x16x8xbf16>
    %14 = vector.shape_cast %13 : vector<16x16x8xbf16> to vector<256x8xbf16>
    %15 = vector.extract_strided_slice %6 {offsets = [1, 1, 0], sizes = [16, 16, 8], strides = [1, 1, 1]} : vector<18x18x8xbf16> to vector<16x16x8xbf16>
    %16 = vector.shape_cast %15 : vector<16x16x8xbf16> to vector<256x8xbf16>
    %17 = vector.extract_strided_slice %6 {offsets = [1, 2, 0], sizes = [16, 16, 8], strides = [1, 1, 1]} : vector<18x18x8xbf16> to vector<16x16x8xbf16>
    %18 = vector.shape_cast %17 : vector<16x16x8xbf16> to vector<256x8xbf16>
    %19 = vector.extract_strided_slice %6 {offsets = [2, 0, 0], sizes = [16, 16, 8], strides = [1, 1, 1]} : vector<18x18x8xbf16> to vector<16x16x8xbf16>
    %20 = vector.shape_cast %19 : vector<16x16x8xbf16> to vector<256x8xbf16>
    %21 = vector.extract_strided_slice %6 {offsets = [2, 1, 0], sizes = [16, 16, 8], strides = [1, 1, 1]} : vector<18x18x8xbf16> to vector<16x16x8xbf16>
    %22 = vector.shape_cast %21 : vector<16x16x8xbf16> to vector<256x8xbf16>
    %23 = vector.extract_strided_slice %6 {offsets = [2, 2, 0], sizes = [16, 16, 8], strides = [1, 1, 1]} : vector<18x18x8xbf16> to vector<16x16x8xbf16>
    %24 = vector.shape_cast %23 : vector<16x16x8xbf16> to vector<256x8xbf16>
    %25 = tpu.concatenate %8, %10, %12, %14, %16, %18, %20, %22, %24 in 1 : vector<256x8xbf16>, vector<256x8xbf16>, vector<256x8xbf16>, vector<256x8xbf16>, vector<256x8xbf16>, vector<256x8xbf16>, vector<256x8xbf16>, vector<256x8xbf16>, vector<256x8xbf16> -> vector<256x72xbf16>
    %c0_11 = arith.constant 0 : index
    %c0_12 = arith.constant 0 : index
    %26 = vector.load %arg2[%c0_11, %c0_12] : memref<72x32xbf16, #tpu.memory_space<vmem>>, vector<72x32xbf16>
    %cst_13 = arith.constant dense<0.000000e+00> : vector<256x32xf32>
    %27 = tpu.matmul %25, %26, %cst_13 {dimension_numbers = #tpu.dot_dimension_numbers<[1], [0], [0], [1], [0, 0, 1, 1], [], []>} : vector<256x72xbf16>, vector<72x32xbf16>, vector<256x32xf32> -> vector<256x32xf32>
    %c0_14 = arith.constant 0 : index
    %c0_15 = arith.constant 0 : index
    %28 = vector.load %arg8[%c0_14, %c0_15] : memref<1x32xf32, #tpu.memory_space<vmem>>, vector<1x32xf32>
    %29 = vector.broadcast %28 : vector<1x32xf32> to vector<256x32xf32>
    %30 = arith.mulf %27, %29 : vector<256x32xf32>
    %c0_16 = arith.constant 0 : index
    %c0_17 = arith.constant 0 : index
    %31 = vector.load %arg14[%c0_16, %c0_17] : memref<1x32xf32, #tpu.memory_space<vmem>>, vector<1x32xf32>
    %32 = vector.broadcast %31 : vector<1x32xf32> to vector<256x32xf32>
    %33 = arith.addf %30, %32 : vector<256x32xf32>
    %cst_18 = arith.constant 0.000000e+00 : f32
    %34 = vector.broadcast %cst_18 : f32 to vector<256x32xf32>
    %35 = arith.maximumf %33, %34 : vector<256x32xf32>
    %36 = vector.shape_cast %35 : vector<256x32xf32> to vector<16x16x32xf32>
    %cst_19 = arith.constant 0.000000e+00 : bf16
    %37 = vector.broadcast %cst_19 : bf16 to vector<18x18x32xbf16>
    %c0_20 = arith.constant 0 : index
    %c0_21 = arith.constant 0 : index
    %c0_22 = arith.constant 0 : index
    %38 = vector.load %arg24[%c0_20, %c0_21, %c0_22] : memref<18x18x32xbf16, #tpu.memory_space<vmem>>, vector<18x18x32xbf16>
    tpu.vector_store %arg24[%c0_20, %c0_21, %c0_22], %37 {strides = array<i32>} : memref<18x18x32xbf16, #tpu.memory_space<vmem>>, vector<18x18x32xbf16>,
    %39 = arith.truncf %36 : vector<16x16x32xf32> to vector<16x16x32xbf16>
    %c1_23 = arith.constant 1 : index
    %c1_24 = arith.constant 1 : index
    %c0_25 = arith.constant 0 : index
    %40 = vector.load %arg24[%c1_23, %c1_24, %c0_25] : memref<18x18x32xbf16, #tpu.memory_space<vmem>>, vector<16x16x32xbf16>
    tpu.vector_store %arg24[%c1_23, %c1_24, %c0_25], %39 {strides = array<i32>} : memref<18x18x32xbf16, #tpu.memory_space<vmem>>, vector<16x16x32xbf16>,
    %c0_26 = arith.constant 0 : index
    %c0_27 = arith.constant 0 : index
    %c0_28 = arith.constant 0 : index
    %41 = vector.load %arg24[%c0_26, %c0_27, %c0_28] : memref<18x18x32xbf16, #tpu.memory_space<vmem>>, vector<18x18x32xbf16>
    %42 = vector.extract_strided_slice %41 {offsets = [0, 0, 0], sizes = [16, 16, 32], strides = [1, 1, 1]} : vector<18x18x32xbf16> to vector<16x16x32xbf16>
    %43 = vector.shape_cast %42 : vector<16x16x32xbf16> to vector<256x32xbf16>
    %44 = vector.extract_strided_slice %41 {offsets = [0, 1, 0], sizes = [16, 16, 32], strides = [1, 1, 1]} : vector<18x18x32xbf16> to vector<16x16x32xbf16>
    %45 = vector.shape_cast %44 : vector<16x16x32xbf16> to vector<256x32xbf16>
    %46 = vector.extract_strided_slice %41 {offsets = [0, 2, 0], sizes = [16, 16, 32], strides = [1, 1, 1]} : vector<18x18x32xbf16> to vector<16x16x32xbf16>
    %47 = vector.shape_cast %46 : vector<16x16x32xbf16> to vector<256x32xbf16>
    %48 = vector.extract_strided_slice %41 {offsets = [1, 0, 0], sizes = [16, 16, 32], strides = [1, 1, 1]} : vector<18x18x32xbf16> to vector<16x16x32xbf16>
    %49 = vector.shape_cast %48 : vector<16x16x32xbf16> to vector<256x32xbf16>
    %50 = vector.extract_strided_slice %41 {offsets = [1, 1, 0], sizes = [16, 16, 32], strides = [1, 1, 1]} : vector<18x18x32xbf16> to vector<16x16x32xbf16>
    %51 = vector.shape_cast %50 : vector<16x16x32xbf16> to vector<256x32xbf16>
    %52 = vector.extract_strided_slice %41 {offsets = [1, 2, 0], sizes = [16, 16, 32], strides = [1, 1, 1]} : vector<18x18x32xbf16> to vector<16x16x32xbf16>
    %53 = vector.shape_cast %52 : vector<16x16x32xbf16> to vector<256x32xbf16>
    %54 = vector.extract_strided_slice %41 {offsets = [2, 0, 0], sizes = [16, 16, 32], strides = [1, 1, 1]} : vector<18x18x32xbf16> to vector<16x16x32xbf16>
    %55 = vector.shape_cast %54 : vector<16x16x32xbf16> to vector<256x32xbf16>
    %56 = vector.extract_strided_slice %41 {offsets = [2, 1, 0], sizes = [16, 16, 32], strides = [1, 1, 1]} : vector<18x18x32xbf16> to vector<16x16x32xbf16>
    %57 = vector.shape_cast %56 : vector<16x16x32xbf16> to vector<256x32xbf16>
    %58 = vector.extract_strided_slice %41 {offsets = [2, 2, 0], sizes = [16, 16, 32], strides = [1, 1, 1]} : vector<18x18x32xbf16> to vector<16x16x32xbf16>
    %59 = vector.shape_cast %58 : vector<16x16x32xbf16> to vector<256x32xbf16>
    %60 = tpu.concatenate %43, %45, %47, %49, %51, %53, %55, %57, %59 in 1 : vector<256x32xbf16>, vector<256x32xbf16>, vector<256x32xbf16>, vector<256x32xbf16>, vector<256x32xbf16>, vector<256x32xbf16>, vector<256x32xbf16>, vector<256x32xbf16>, vector<256x32xbf16> -> vector<256x288xbf16>
    %c0_29 = arith.constant 0 : index
    %c0_30 = arith.constant 0 : index
    %61 = vector.load %arg3[%c0_29, %c0_30] : memref<288x32xbf16, #tpu.memory_space<vmem>>, vector<288x32xbf16>
    %cst_31 = arith.constant dense<0.000000e+00> : vector<256x32xf32>
    %62 = tpu.matmul %60, %61, %cst_31 {dimension_numbers = #tpu.dot_dimension_numbers<[1], [0], [0], [1], [0, 0, 1, 1], [], []>} : vector<256x288xbf16>, vector<288x32xbf16>, vector<256x32xf32> -> vector<256x32xf32>
    %c0_32 = arith.constant 0 : index
    %c0_33 = arith.constant 0 : index
    %63 = vector.load %arg9[%c0_32, %c0_33] : memref<1x32xf32, #tpu.memory_space<vmem>>, vector<1x32xf32>
    %64 = vector.broadcast %63 : vector<1x32xf32> to vector<256x32xf32>
    %65 = arith.mulf %62, %64 : vector<256x32xf32>
    %c0_34 = arith.constant 0 : index
    %c0_35 = arith.constant 0 : index
    %66 = vector.load %arg15[%c0_34, %c0_35] : memref<1x32xf32, #tpu.memory_space<vmem>>, vector<1x32xf32>
    %67 = vector.broadcast %66 : vector<1x32xf32> to vector<256x32xf32>
    %68 = arith.addf %65, %67 : vector<256x32xf32>
    %cst_36 = arith.constant 0.000000e+00 : f32
    %69 = vector.broadcast %cst_36 : f32 to vector<256x32xf32>
    %70 = arith.maximumf %68, %69 : vector<256x32xf32>
    %71 = vector.shape_cast %70 : vector<256x32xf32> to vector<128x2x32xf32>
    %72 = vector.extract_strided_slice %71 {offsets = [0, 0, 0], sizes = [128, 1, 32], strides = [1, 1, 1]} : vector<128x2x32xf32> to vector<128x1x32xf32>
    %73 = vector.shape_cast %72 : vector<128x1x32xf32> to vector<128x32xf32>
    %74 = vector.extract_strided_slice %71 {offsets = [0, 1, 0], sizes = [128, 1, 32], strides = [1, 1, 1]} : vector<128x2x32xf32> to vector<128x1x32xf32>
    %75 = vector.shape_cast %74 : vector<128x1x32xf32> to vector<128x32xf32>
    %76 = arith.addf %73, %75 : vector<128x32xf32>
    %77 = vector.shape_cast %76 : vector<128x32xf32> to vector<8x16x32xf32>
    %78 = vector.extract_strided_slice %77 {offsets = [0, 0, 0], sizes = [8, 8, 32], strides = [1, 1, 1]} : vector<8x16x32xf32> to vector<8x8x32xf32>
    %79 = vector.extract_strided_slice %77 {offsets = [0, 8, 0], sizes = [8, 8, 32], strides = [1, 1, 1]} : vector<8x16x32xf32> to vector<8x8x32xf32>
    %80 = arith.addf %78, %79 : vector<8x8x32xf32>
    %cst_37 = arith.constant 2.500000e-01 : f32
    %81 = vector.broadcast %cst_37 : f32 to vector<8x8x32xf32>
    %82 = arith.mulf %80, %81 : vector<8x8x32xf32>
    %cst_38 = arith.constant 0.000000e+00 : bf16
    %83 = vector.broadcast %cst_38 : bf16 to vector<10x10x32xbf16>
    %c0_39 = arith.constant 0 : index
    %c0_40 = arith.constant 0 : index
    %c0_41 = arith.constant 0 : index
    %84 = vector.load %arg25[%c0_39, %c0_40, %c0_41] : memref<10x10x32xbf16, #tpu.memory_space<vmem>>, vector<10x10x32xbf16>
    tpu.vector_store %arg25[%c0_39, %c0_40, %c0_41], %83 {strides = array<i32>} : memref<10x10x32xbf16, #tpu.memory_space<vmem>>, vector<10x10x32xbf16>,
    %85 = arith.truncf %82 : vector<8x8x32xf32> to vector<8x8x32xbf16>
    %c1_42 = arith.constant 1 : index
    %c1_43 = arith.constant 1 : index
    %c0_44 = arith.constant 0 : index
    %86 = vector.load %arg25[%c1_42, %c1_43, %c0_44] : memref<10x10x32xbf16, #tpu.memory_space<vmem>>, vector<8x8x32xbf16>
    tpu.vector_store %arg25[%c1_42, %c1_43, %c0_44], %85 {strides = array<i32>} : memref<10x10x32xbf16, #tpu.memory_space<vmem>>, vector<8x8x32xbf16>,
    %c0_45 = arith.constant 0 : index
    %c0_46 = arith.constant 0 : index
    %c0_47 = arith.constant 0 : index
    %87 = vector.load %arg25[%c0_45, %c0_46, %c0_47] : memref<10x10x32xbf16, #tpu.memory_space<vmem>>, vector<10x10x32xbf16>
    %88 = vector.extract_strided_slice %87 {offsets = [0, 0, 0], sizes = [8, 8, 32], strides = [1, 1, 1]} : vector<10x10x32xbf16> to vector<8x8x32xbf16>
    %89 = vector.shape_cast %88 : vector<8x8x32xbf16> to vector<64x32xbf16>
    %90 = vector.extract_strided_slice %87 {offsets = [0, 1, 0], sizes = [8, 8, 32], strides = [1, 1, 1]} : vector<10x10x32xbf16> to vector<8x8x32xbf16>
    %91 = vector.shape_cast %90 : vector<8x8x32xbf16> to vector<64x32xbf16>
    %92 = vector.extract_strided_slice %87 {offsets = [0, 2, 0], sizes = [8, 8, 32], strides = [1, 1, 1]} : vector<10x10x32xbf16> to vector<8x8x32xbf16>
    %93 = vector.shape_cast %92 : vector<8x8x32xbf16> to vector<64x32xbf16>
    %94 = vector.extract_strided_slice %87 {offsets = [1, 0, 0], sizes = [8, 8, 32], strides = [1, 1, 1]} : vector<10x10x32xbf16> to vector<8x8x32xbf16>
    %95 = vector.shape_cast %94 : vector<8x8x32xbf16> to vector<64x32xbf16>
    %96 = vector.extract_strided_slice %87 {offsets = [1, 1, 0], sizes = [8, 8, 32], strides = [1, 1, 1]} : vector<10x10x32xbf16> to vector<8x8x32xbf16>
    %97 = vector.shape_cast %96 : vector<8x8x32xbf16> to vector<64x32xbf16>
    %98 = vector.extract_strided_slice %87 {offsets = [1, 2, 0], sizes = [8, 8, 32], strides = [1, 1, 1]} : vector<10x10x32xbf16> to vector<8x8x32xbf16>
    %99 = vector.shape_cast %98 : vector<8x8x32xbf16> to vector<64x32xbf16>
    %100 = vector.extract_strided_slice %87 {offsets = [2, 0, 0], sizes = [8, 8, 32], strides = [1, 1, 1]} : vector<10x10x32xbf16> to vector<8x8x32xbf16>
    %101 = vector.shape_cast %100 : vector<8x8x32xbf16> to vector<64x32xbf16>
    %102 = vector.extract_strided_slice %87 {offsets = [2, 1, 0], sizes = [8, 8, 32], strides = [1, 1, 1]} : vector<10x10x32xbf16> to vector<8x8x32xbf16>
    %103 = vector.shape_cast %102 : vector<8x8x32xbf16> to vector<64x32xbf16>
    %104 = vector.extract_strided_slice %87 {offsets = [2, 2, 0], sizes = [8, 8, 32], strides = [1, 1, 1]} : vector<10x10x32xbf16> to vector<8x8x32xbf16>
    %105 = vector.shape_cast %104 : vector<8x8x32xbf16> to vector<64x32xbf16>
    %106 = tpu.concatenate %89, %91, %93, %95, %97, %99, %101, %103, %105 in 1 : vector<64x32xbf16>, vector<64x32xbf16>, vector<64x32xbf16>, vector<64x32xbf16>, vector<64x32xbf16>, vector<64x32xbf16>, vector<64x32xbf16>, vector<64x32xbf16>, vector<64x32xbf16> -> vector<64x288xbf16>
    %c0_48 = arith.constant 0 : index
    %c0_49 = arith.constant 0 : index
    %107 = vector.load %arg4[%c0_48, %c0_49] : memref<288x64xbf16, #tpu.memory_space<vmem>>, vector<288x64xbf16>
    %cst_50 = arith.constant dense<0.000000e+00> : vector<64x64xf32>
    %108 = tpu.matmul %106, %107, %cst_50 {dimension_numbers = #tpu.dot_dimension_numbers<[1], [0], [0], [1], [0, 0, 1, 1], [], []>} : vector<64x288xbf16>, vector<288x64xbf16>, vector<64x64xf32> -> vector<64x64xf32>
    %c0_51 = arith.constant 0 : index
    %c0_52 = arith.constant 0 : index
    %109 = vector.load %arg10[%c0_51, %c0_52] : memref<1x64xf32, #tpu.memory_space<vmem>>, vector<1x64xf32>
    %110 = vector.broadcast %109 : vector<1x64xf32> to vector<64x64xf32>
    %111 = arith.mulf %108, %110 : vector<64x64xf32>
    %c0_53 = arith.constant 0 : index
    %c0_54 = arith.constant 0 : index
    %112 = vector.load %arg16[%c0_53, %c0_54] : memref<1x64xf32, #tpu.memory_space<vmem>>, vector<1x64xf32>
    %113 = vector.broadcast %112 : vector<1x64xf32> to vector<64x64xf32>
    %114 = arith.addf %111, %113 : vector<64x64xf32>
    %cst_55 = arith.constant 0.000000e+00 : f32
    %115 = vector.broadcast %cst_55 : f32 to vector<64x64xf32>
    %116 = arith.maximumf %114, %115 : vector<64x64xf32>
    %117 = vector.shape_cast %116 : vector<64x64xf32> to vector<8x8x64xf32>
    %cst_56 = arith.constant 0.000000e+00 : bf16
    %118 = vector.broadcast %cst_56 : bf16 to vector<10x10x64xbf16>
    %c0_57 = arith.constant 0 : index
    %c0_58 = arith.constant 0 : index
    %c0_59 = arith.constant 0 : index
    %119 = vector.load %arg26[%c0_57, %c0_58, %c0_59] : memref<10x10x64xbf16, #tpu.memory_space<vmem>>, vector<10x10x64xbf16>
    tpu.vector_store %arg26[%c0_57, %c0_58, %c0_59], %118 {strides = array<i32>} : memref<10x10x64xbf16, #tpu.memory_space<vmem>>, vector<10x10x64xbf16>,
    %120 = arith.truncf %117 : vector<8x8x64xf32> to vector<8x8x64xbf16>
    %c1_60 = arith.constant 1 : index
    %c1_61 = arith.constant 1 : index
    %c0_62 = arith.constant 0 : index
    %121 = vector.load %arg26[%c1_60, %c1_61, %c0_62] : memref<10x10x64xbf16, #tpu.memory_space<vmem>>, vector<8x8x64xbf16>
    tpu.vector_store %arg26[%c1_60, %c1_61, %c0_62], %120 {strides = array<i32>} : memref<10x10x64xbf16, #tpu.memory_space<vmem>>, vector<8x8x64xbf16>,
    %c0_63 = arith.constant 0 : index
    %c0_64 = arith.constant 0 : index
    %c0_65 = arith.constant 0 : index
    %122 = vector.load %arg26[%c0_63, %c0_64, %c0_65] : memref<10x10x64xbf16, #tpu.memory_space<vmem>>, vector<10x10x64xbf16>
    %123 = vector.extract_strided_slice %122 {offsets = [0, 0, 0], sizes = [8, 8, 64], strides = [1, 1, 1]} : vector<10x10x64xbf16> to vector<8x8x64xbf16>
    %124 = vector.shape_cast %123 : vector<8x8x64xbf16> to vector<64x64xbf16>
    %125 = vector.extract_strided_slice %122 {offsets = [0, 1, 0], sizes = [8, 8, 64], strides = [1, 1, 1]} : vector<10x10x64xbf16> to vector<8x8x64xbf16>
    %126 = vector.shape_cast %125 : vector<8x8x64xbf16> to vector<64x64xbf16>
    %127 = vector.extract_strided_slice %122 {offsets = [0, 2, 0], sizes = [8, 8, 64], strides = [1, 1, 1]} : vector<10x10x64xbf16> to vector<8x8x64xbf16>
    %128 = vector.shape_cast %127 : vector<8x8x64xbf16> to vector<64x64xbf16>
    %129 = vector.extract_strided_slice %122 {offsets = [1, 0, 0], sizes = [8, 8, 64], strides = [1, 1, 1]} : vector<10x10x64xbf16> to vector<8x8x64xbf16>
    %130 = vector.shape_cast %129 : vector<8x8x64xbf16> to vector<64x64xbf16>
    %131 = vector.extract_strided_slice %122 {offsets = [1, 1, 0], sizes = [8, 8, 64], strides = [1, 1, 1]} : vector<10x10x64xbf16> to vector<8x8x64xbf16>
    %132 = vector.shape_cast %131 : vector<8x8x64xbf16> to vector<64x64xbf16>
    %133 = vector.extract_strided_slice %122 {offsets = [1, 2, 0], sizes = [8, 8, 64], strides = [1, 1, 1]} : vector<10x10x64xbf16> to vector<8x8x64xbf16>
    %134 = vector.shape_cast %133 : vector<8x8x64xbf16> to vector<64x64xbf16>
    %135 = vector.extract_strided_slice %122 {offsets = [2, 0, 0], sizes = [8, 8, 64], strides = [1, 1, 1]} : vector<10x10x64xbf16> to vector<8x8x64xbf16>
    %136 = vector.shape_cast %135 : vector<8x8x64xbf16> to vector<64x64xbf16>
    %137 = vector.extract_strided_slice %122 {offsets = [2, 1, 0], sizes = [8, 8, 64], strides = [1, 1, 1]} : vector<10x10x64xbf16> to vector<8x8x64xbf16>
    %138 = vector.shape_cast %137 : vector<8x8x64xbf16> to vector<64x64xbf16>
    %139 = vector.extract_strided_slice %122 {offsets = [2, 2, 0], sizes = [8, 8, 64], strides = [1, 1, 1]} : vector<10x10x64xbf16> to vector<8x8x64xbf16>
    %140 = vector.shape_cast %139 : vector<8x8x64xbf16> to vector<64x64xbf16>
    %141 = tpu.concatenate %124, %126, %128, %130, %132, %134, %136, %138, %140 in 1 : vector<64x64xbf16>, vector<64x64xbf16>, vector<64x64xbf16>, vector<64x64xbf16>, vector<64x64xbf16>, vector<64x64xbf16>, vector<64x64xbf16>, vector<64x64xbf16>, vector<64x64xbf16> -> vector<64x576xbf16>
    %c0_66 = arith.constant 0 : index
    %c0_67 = arith.constant 0 : index
    %142 = vector.load %arg5[%c0_66, %c0_67] : memref<576x64xbf16, #tpu.memory_space<vmem>>, vector<576x64xbf16>
    %cst_68 = arith.constant dense<0.000000e+00> : vector<64x64xf32>
    %143 = tpu.matmul %141, %142, %cst_68 {dimension_numbers = #tpu.dot_dimension_numbers<[1], [0], [0], [1], [0, 0, 1, 1], [], []>} : vector<64x576xbf16>, vector<576x64xbf16>, vector<64x64xf32> -> vector<64x64xf32>
    %c0_69 = arith.constant 0 : index
    %c0_70 = arith.constant 0 : index
    %144 = vector.load %arg11[%c0_69, %c0_70] : memref<1x64xf32, #tpu.memory_space<vmem>>, vector<1x64xf32>
    %145 = vector.broadcast %144 : vector<1x64xf32> to vector<64x64xf32>
    %146 = arith.mulf %143, %145 : vector<64x64xf32>
    %c0_71 = arith.constant 0 : index
    %c0_72 = arith.constant 0 : index
    %147 = vector.load %arg17[%c0_71, %c0_72] : memref<1x64xf32, #tpu.memory_space<vmem>>, vector<1x64xf32>
    %148 = vector.broadcast %147 : vector<1x64xf32> to vector<64x64xf32>
    %149 = arith.addf %146, %148 : vector<64x64xf32>
    %cst_73 = arith.constant 0.000000e+00 : f32
    %150 = vector.broadcast %cst_73 : f32 to vector<64x64xf32>
    %151 = arith.maximumf %149, %150 : vector<64x64xf32>
    %152 = vector.shape_cast %151 : vector<64x64xf32> to vector<32x2x64xf32>
    %153 = vector.extract_strided_slice %152 {offsets = [0, 0, 0], sizes = [32, 1, 64], strides = [1, 1, 1]} : vector<32x2x64xf32> to vector<32x1x64xf32>
    %154 = vector.shape_cast %153 : vector<32x1x64xf32> to vector<32x64xf32>
    %155 = vector.extract_strided_slice %152 {offsets = [0, 1, 0], sizes = [32, 1, 64], strides = [1, 1, 1]} : vector<32x2x64xf32> to vector<32x1x64xf32>
    %156 = vector.shape_cast %155 : vector<32x1x64xf32> to vector<32x64xf32>
    %157 = arith.addf %154, %156 : vector<32x64xf32>
    %158 = vector.shape_cast %157 : vector<32x64xf32> to vector<4x8x64xf32>
    %159 = vector.extract_strided_slice %158 {offsets = [0, 0, 0], sizes = [4, 4, 64], strides = [1, 1, 1]} : vector<4x8x64xf32> to vector<4x4x64xf32>
    %160 = vector.extract_strided_slice %158 {offsets = [0, 4, 0], sizes = [4, 4, 64], strides = [1, 1, 1]} : vector<4x8x64xf32> to vector<4x4x64xf32>
    %161 = arith.addf %159, %160 : vector<4x4x64xf32>
    %cst_74 = arith.constant 2.500000e-01 : f32
    %162 = vector.broadcast %cst_74 : f32 to vector<4x4x64xf32>
    %163 = arith.mulf %161, %162 : vector<4x4x64xf32>
    %cst_75 = arith.constant 0.000000e+00 : bf16
    %164 = vector.broadcast %cst_75 : bf16 to vector<6x6x64xbf16>
    %c0_76 = arith.constant 0 : index
    %c0_77 = arith.constant 0 : index
    %c0_78 = arith.constant 0 : index
    %165 = vector.load %arg27[%c0_76, %c0_77, %c0_78] : memref<6x6x64xbf16, #tpu.memory_space<vmem>>, vector<6x6x64xbf16>
    tpu.vector_store %arg27[%c0_76, %c0_77, %c0_78], %164 {strides = array<i32>} : memref<6x6x64xbf16, #tpu.memory_space<vmem>>, vector<6x6x64xbf16>,
    %166 = arith.truncf %163 : vector<4x4x64xf32> to vector<4x4x64xbf16>
    %c1_79 = arith.constant 1 : index
    %c1_80 = arith.constant 1 : index
    %c0_81 = arith.constant 0 : index
    %167 = vector.load %arg27[%c1_79, %c1_80, %c0_81] : memref<6x6x64xbf16, #tpu.memory_space<vmem>>, vector<4x4x64xbf16>
    tpu.vector_store %arg27[%c1_79, %c1_80, %c0_81], %166 {strides = array<i32>} : memref<6x6x64xbf16, #tpu.memory_space<vmem>>, vector<4x4x64xbf16>,
    %c0_82 = arith.constant 0 : index
    %c0_83 = arith.constant 0 : index
    %c0_84 = arith.constant 0 : index
    %168 = vector.load %arg27[%c0_82, %c0_83, %c0_84] : memref<6x6x64xbf16, #tpu.memory_space<vmem>>, vector<6x6x64xbf16>
    %169 = vector.extract_strided_slice %168 {offsets = [0, 0, 0], sizes = [4, 4, 64], strides = [1, 1, 1]} : vector<6x6x64xbf16> to vector<4x4x64xbf16>
    %170 = vector.shape_cast %169 : vector<4x4x64xbf16> to vector<16x64xbf16>
    %171 = vector.extract_strided_slice %168 {offsets = [0, 1, 0], sizes = [4, 4, 64], strides = [1, 1, 1]} : vector<6x6x64xbf16> to vector<4x4x64xbf16>
    %172 = vector.shape_cast %171 : vector<4x4x64xbf16> to vector<16x64xbf16>
    %173 = vector.extract_strided_slice %168 {offsets = [0, 2, 0], sizes = [4, 4, 64], strides = [1, 1, 1]} : vector<6x6x64xbf16> to vector<4x4x64xbf16>
    %174 = vector.shape_cast %173 : vector<4x4x64xbf16> to vector<16x64xbf16>
    %175 = vector.extract_strided_slice %168 {offsets = [1, 0, 0], sizes = [4, 4, 64], strides = [1, 1, 1]} : vector<6x6x64xbf16> to vector<4x4x64xbf16>
    %176 = vector.shape_cast %175 : vector<4x4x64xbf16> to vector<16x64xbf16>
    %177 = vector.extract_strided_slice %168 {offsets = [1, 1, 0], sizes = [4, 4, 64], strides = [1, 1, 1]} : vector<6x6x64xbf16> to vector<4x4x64xbf16>
    %178 = vector.shape_cast %177 : vector<4x4x64xbf16> to vector<16x64xbf16>
    %179 = vector.extract_strided_slice %168 {offsets = [1, 2, 0], sizes = [4, 4, 64], strides = [1, 1, 1]} : vector<6x6x64xbf16> to vector<4x4x64xbf16>
    %180 = vector.shape_cast %179 : vector<4x4x64xbf16> to vector<16x64xbf16>
    %181 = vector.extract_strided_slice %168 {offsets = [2, 0, 0], sizes = [4, 4, 64], strides = [1, 1, 1]} : vector<6x6x64xbf16> to vector<4x4x64xbf16>
    %182 = vector.shape_cast %181 : vector<4x4x64xbf16> to vector<16x64xbf16>
    %183 = vector.extract_strided_slice %168 {offsets = [2, 1, 0], sizes = [4, 4, 64], strides = [1, 1, 1]} : vector<6x6x64xbf16> to vector<4x4x64xbf16>
    %184 = vector.shape_cast %183 : vector<4x4x64xbf16> to vector<16x64xbf16>
    %185 = vector.extract_strided_slice %168 {offsets = [2, 2, 0], sizes = [4, 4, 64], strides = [1, 1, 1]} : vector<6x6x64xbf16> to vector<4x4x64xbf16>
    %186 = vector.shape_cast %185 : vector<4x4x64xbf16> to vector<16x64xbf16>
    %187 = tpu.concatenate %170, %172, %174, %176, %178, %180, %182, %184, %186 in 1 : vector<16x64xbf16>, vector<16x64xbf16>, vector<16x64xbf16>, vector<16x64xbf16>, vector<16x64xbf16>, vector<16x64xbf16>, vector<16x64xbf16>, vector<16x64xbf16>, vector<16x64xbf16> -> vector<16x576xbf16>
    %c0_85 = arith.constant 0 : index
    %c0_86 = arith.constant 0 : index
    %188 = vector.load %arg6[%c0_85, %c0_86] : memref<576x128xbf16, #tpu.memory_space<vmem>>, vector<576x128xbf16>
    %cst_87 = arith.constant dense<0.000000e+00> : vector<16x128xf32>
    %189 = tpu.matmul %187, %188, %cst_87 {dimension_numbers = #tpu.dot_dimension_numbers<[1], [0], [0], [1], [0, 0, 1, 1], [], []>} : vector<16x576xbf16>, vector<576x128xbf16>, vector<16x128xf32> -> vector<16x128xf32>
    %c0_88 = arith.constant 0 : index
    %c0_89 = arith.constant 0 : index
    %190 = vector.load %arg12[%c0_88, %c0_89] : memref<1x128xf32, #tpu.memory_space<vmem>>, vector<1x128xf32>
    %191 = vector.broadcast %190 : vector<1x128xf32> to vector<16x128xf32>
    %192 = arith.mulf %189, %191 : vector<16x128xf32>
    %c0_90 = arith.constant 0 : index
    %c0_91 = arith.constant 0 : index
    %193 = vector.load %arg18[%c0_90, %c0_91] : memref<1x128xf32, #tpu.memory_space<vmem>>, vector<1x128xf32>
    %194 = vector.broadcast %193 : vector<1x128xf32> to vector<16x128xf32>
    %195 = arith.addf %192, %194 : vector<16x128xf32>
    %cst_92 = arith.constant 0.000000e+00 : f32
    %196 = vector.broadcast %cst_92 : f32 to vector<16x128xf32>
    %197 = arith.maximumf %195, %196 : vector<16x128xf32>
    %198 = vector.shape_cast %197 : vector<16x128xf32> to vector<4x4x128xf32>
    %cst_93 = arith.constant 0.000000e+00 : bf16
    %199 = vector.broadcast %cst_93 : bf16 to vector<6x6x128xbf16>
    %c0_94 = arith.constant 0 : index
    %c0_95 = arith.constant 0 : index
    %c0_96 = arith.constant 0 : index
    %200 = vector.load %arg28[%c0_94, %c0_95, %c0_96] : memref<6x6x128xbf16, #tpu.memory_space<vmem>>, vector<6x6x128xbf16>
    tpu.vector_store %arg28[%c0_94, %c0_95, %c0_96], %199 {strides = array<i32>} : memref<6x6x128xbf16, #tpu.memory_space<vmem>>, vector<6x6x128xbf16>,
    %201 = arith.truncf %198 : vector<4x4x128xf32> to vector<4x4x128xbf16>
    %c1_97 = arith.constant 1 : index
    %c1_98 = arith.constant 1 : index
    %c0_99 = arith.constant 0 : index
    %202 = vector.load %arg28[%c1_97, %c1_98, %c0_99] : memref<6x6x128xbf16, #tpu.memory_space<vmem>>, vector<4x4x128xbf16>
    tpu.vector_store %arg28[%c1_97, %c1_98, %c0_99], %201 {strides = array<i32>} : memref<6x6x128xbf16, #tpu.memory_space<vmem>>, vector<4x4x128xbf16>,
    %c0_100 = arith.constant 0 : index
    %c0_101 = arith.constant 0 : index
    %c0_102 = arith.constant 0 : index
    %203 = vector.load %arg28[%c0_100, %c0_101, %c0_102] : memref<6x6x128xbf16, #tpu.memory_space<vmem>>, vector<6x6x128xbf16>
    %204 = vector.extract_strided_slice %203 {offsets = [0, 0, 0], sizes = [4, 4, 128], strides = [1, 1, 1]} : vector<6x6x128xbf16> to vector<4x4x128xbf16>
    %205 = vector.shape_cast %204 : vector<4x4x128xbf16> to vector<16x128xbf16>
    %206 = vector.extract_strided_slice %203 {offsets = [0, 1, 0], sizes = [4, 4, 128], strides = [1, 1, 1]} : vector<6x6x128xbf16> to vector<4x4x128xbf16>
    %207 = vector.shape_cast %206 : vector<4x4x128xbf16> to vector<16x128xbf16>
    %208 = vector.extract_strided_slice %203 {offsets = [0, 2, 0], sizes = [4, 4, 128], strides = [1, 1, 1]} : vector<6x6x128xbf16> to vector<4x4x128xbf16>
    %209 = vector.shape_cast %208 : vector<4x4x128xbf16> to vector<16x128xbf16>
    %210 = vector.extract_strided_slice %203 {offsets = [1, 0, 0], sizes = [4, 4, 128], strides = [1, 1, 1]} : vector<6x6x128xbf16> to vector<4x4x128xbf16>
    %211 = vector.shape_cast %210 : vector<4x4x128xbf16> to vector<16x128xbf16>
    %212 = vector.extract_strided_slice %203 {offsets = [1, 1, 0], sizes = [4, 4, 128], strides = [1, 1, 1]} : vector<6x6x128xbf16> to vector<4x4x128xbf16>
    %213 = vector.shape_cast %212 : vector<4x4x128xbf16> to vector<16x128xbf16>
    %214 = vector.extract_strided_slice %203 {offsets = [1, 2, 0], sizes = [4, 4, 128], strides = [1, 1, 1]} : vector<6x6x128xbf16> to vector<4x4x128xbf16>
    %215 = vector.shape_cast %214 : vector<4x4x128xbf16> to vector<16x128xbf16>
    %216 = vector.extract_strided_slice %203 {offsets = [2, 0, 0], sizes = [4, 4, 128], strides = [1, 1, 1]} : vector<6x6x128xbf16> to vector<4x4x128xbf16>
    %217 = vector.shape_cast %216 : vector<4x4x128xbf16> to vector<16x128xbf16>
    %218 = vector.extract_strided_slice %203 {offsets = [2, 1, 0], sizes = [4, 4, 128], strides = [1, 1, 1]} : vector<6x6x128xbf16> to vector<4x4x128xbf16>
    %219 = vector.shape_cast %218 : vector<4x4x128xbf16> to vector<16x128xbf16>
    %220 = vector.extract_strided_slice %203 {offsets = [2, 2, 0], sizes = [4, 4, 128], strides = [1, 1, 1]} : vector<6x6x128xbf16> to vector<4x4x128xbf16>
    %221 = vector.shape_cast %220 : vector<4x4x128xbf16> to vector<16x128xbf16>
    %222 = tpu.concatenate %205, %207, %209, %211, %213, %215, %217, %219, %221 in 1 : vector<16x128xbf16>, vector<16x128xbf16>, vector<16x128xbf16>, vector<16x128xbf16>, vector<16x128xbf16>, vector<16x128xbf16>, vector<16x128xbf16>, vector<16x128xbf16>, vector<16x128xbf16> -> vector<16x1152xbf16>
    %c0_103 = arith.constant 0 : index
    %c0_104 = arith.constant 0 : index
    %223 = vector.load %arg7[%c0_103, %c0_104] : memref<1152x128xbf16, #tpu.memory_space<vmem>>, vector<1152x128xbf16>
    %cst_105 = arith.constant dense<0.000000e+00> : vector<16x128xf32>
    %224 = tpu.matmul %222, %223, %cst_105 {dimension_numbers = #tpu.dot_dimension_numbers<[1], [0], [0], [1], [0, 0, 1, 1], [], []>} : vector<16x1152xbf16>, vector<1152x128xbf16>, vector<16x128xf32> -> vector<16x128xf32>
    %c0_106 = arith.constant 0 : index
    %c0_107 = arith.constant 0 : index
    %225 = vector.load %arg13[%c0_106, %c0_107] : memref<1x128xf32, #tpu.memory_space<vmem>>, vector<1x128xf32>
    %226 = vector.broadcast %225 : vector<1x128xf32> to vector<16x128xf32>
    %227 = arith.mulf %224, %226 : vector<16x128xf32>
    %c0_108 = arith.constant 0 : index
    %c0_109 = arith.constant 0 : index
    %228 = vector.load %arg19[%c0_108, %c0_109] : memref<1x128xf32, #tpu.memory_space<vmem>>, vector<1x128xf32>
    %229 = vector.broadcast %228 : vector<1x128xf32> to vector<16x128xf32>
    %230 = arith.addf %227, %229 : vector<16x128xf32>
    %cst_110 = arith.constant 0.000000e+00 : f32
    %231 = vector.broadcast %cst_110 : f32 to vector<16x128xf32>
    %232 = arith.maximumf %230, %231 : vector<16x128xf32>
    %cst_111 = arith.constant dense<0.000000e+00> : vector<128xf32>
    %233 = vector.multi_reduction <add>, %232, %cst_111 [0] : vector<16x128xf32> to vector<128xf32>
    %234 = vector.shape_cast %233 : vector<128xf32> to vector<1x128xf32>
    %cst_112 = arith.constant 1.600000e+01 : f32
    %235 = vector.broadcast %cst_112 : f32 to vector<1x128xf32>
    %236 = arith.divf %234, %235 : vector<1x128xf32>
    %c0_113 = arith.constant 0 : index
    %c0_114 = arith.constant 0 : index
    %237 = vector.load %arg20[%c0_113, %c0_114] : memref<128x10xf32, #tpu.memory_space<vmem>>, vector<128x10xf32>
    %cst_115 = arith.constant dense<0.000000e+00> : vector<1x10xf32>
    %238 = tpu.matmul %236, %237, %cst_115 {dimension_numbers = #tpu.dot_dimension_numbers<[1], [0], [0], [1], [0, 0, 1, 1], [], []>} : vector<1x128xf32>, vector<128x10xf32>, vector<1x10xf32> -> vector<1x10xf32>
    %c0_116 = arith.constant 0 : index
    %c0_117 = arith.constant 0 : index
    %239 = vector.load %arg21[%c0_116, %c0_117] : memref<1x10xf32, #tpu.memory_space<vmem>>, vector<1x10xf32>
    %240 = arith.addf %238, %239 : vector<1x10xf32>
    %c0_118 = arith.constant 0 : index
    %c0_119 = arith.constant 0 : index
    %c0_120 = arith.constant 0 : index
    %241 = vector.load %arg22[%c0_118, %c0_119, %c0_120] : memref<1x1x10xf32, #tpu.memory_space<vmem>>, vector<1x1x10xf32>
    %242 = vector.shape_cast %241 : vector<1x1x10xf32> to vector<1x10xf32>
    %243 = vector.shape_cast %240 : vector<1x10xf32> to vector<1x1x10xf32>
    tpu.vector_store %arg22[%c0_118, %c0_119, %c0_120], %243 {strides = array<i32>} : memref<1x1x10xf32, #tpu.memory_space<vmem>>, vector<1x1x10xf32>,
    return
  }
  func.func @transform_0(%arg0: i32) -> (i32, i32, i32, i32) {
    %c0_i32 = arith.constant 0 : i32
    %c0_i32_0 = arith.constant 0 : i32
    %c0_i32_1 = arith.constant 0 : i32
    %c0_i32_2 = arith.constant 0 : i32
    return %arg0, %c0_i32, %c0_i32_0, %c0_i32_1 : i32, i32, i32, i32
  }
  func.func @transform_1(%arg0: i32) -> (i32, i32) {
    %c0_i32 = arith.constant 0 : i32
    %c0_i32_0 = arith.constant 0 : i32
    %c0_i32_1 = arith.constant 0 : i32
    return %c0_i32, %c0_i32_0 : i32, i32
  }
  func.func @transform_2(%arg0: i32) -> (i32, i32) {
    %c0_i32 = arith.constant 0 : i32
    %c0_i32_0 = arith.constant 0 : i32
    %c0_i32_1 = arith.constant 0 : i32
    return %c0_i32, %c0_i32_0 : i32, i32
  }
  func.func @transform_3(%arg0: i32) -> (i32, i32) {
    %c0_i32 = arith.constant 0 : i32
    %c0_i32_0 = arith.constant 0 : i32
    %c0_i32_1 = arith.constant 0 : i32
    return %c0_i32, %c0_i32_0 : i32, i32
  }
  func.func @transform_4(%arg0: i32) -> (i32, i32) {
    %c0_i32 = arith.constant 0 : i32
    %c0_i32_0 = arith.constant 0 : i32
    %c0_i32_1 = arith.constant 0 : i32
    return %c0_i32, %c0_i32_0 : i32, i32
  }
  func.func @transform_5(%arg0: i32) -> (i32, i32) {
    %c0_i32 = arith.constant 0 : i32
    %c0_i32_0 = arith.constant 0 : i32
    %c0_i32_1 = arith.constant 0 : i32
    return %c0_i32, %c0_i32_0 : i32, i32
  }
  func.func @transform_6(%arg0: i32) -> (i32, i32) {
    %c0_i32 = arith.constant 0 : i32
    %c0_i32_0 = arith.constant 0 : i32
    %c0_i32_1 = arith.constant 0 : i32
    return %c0_i32, %c0_i32_0 : i32, i32
  }
  func.func @transform_7(%arg0: i32) -> (i32, i32) {
    %c0_i32 = arith.constant 0 : i32
    %c0_i32_0 = arith.constant 0 : i32
    %c0_i32_1 = arith.constant 0 : i32
    return %c0_i32, %c0_i32_0 : i32, i32
  }
  func.func @transform_8(%arg0: i32) -> (i32, i32) {
    %c0_i32 = arith.constant 0 : i32
    %c0_i32_0 = arith.constant 0 : i32
    %c0_i32_1 = arith.constant 0 : i32
    return %c0_i32, %c0_i32_0 : i32, i32
  }
  func.func @transform_9(%arg0: i32) -> (i32, i32) {
    %c0_i32 = arith.constant 0 : i32
    %c0_i32_0 = arith.constant 0 : i32
    %c0_i32_1 = arith.constant 0 : i32
    return %c0_i32, %c0_i32_0 : i32, i32
  }
  func.func @transform_10(%arg0: i32) -> (i32, i32) {
    %c0_i32 = arith.constant 0 : i32
    %c0_i32_0 = arith.constant 0 : i32
    %c0_i32_1 = arith.constant 0 : i32
    return %c0_i32, %c0_i32_0 : i32, i32
  }
  func.func @transform_11(%arg0: i32) -> (i32, i32) {
    %c0_i32 = arith.constant 0 : i32
    %c0_i32_0 = arith.constant 0 : i32
    %c0_i32_1 = arith.constant 0 : i32
    return %c0_i32, %c0_i32_0 : i32, i32
  }
  func.func @transform_12(%arg0: i32) -> (i32, i32) {
    %c0_i32 = arith.constant 0 : i32
    %c0_i32_0 = arith.constant 0 : i32
    %c0_i32_1 = arith.constant 0 : i32
    return %c0_i32, %c0_i32_0 : i32, i32
  }
  func.func @transform_13(%arg0: i32) -> (i32, i32) {
    %c0_i32 = arith.constant 0 : i32
    %c0_i32_0 = arith.constant 0 : i32
    %c0_i32_1 = arith.constant 0 : i32
    return %c0_i32, %c0_i32_0 : i32, i32
  }
  func.func @transform_14(%arg0: i32) -> (i32, i32) {
    %c0_i32 = arith.constant 0 : i32
    %c0_i32_0 = arith.constant 0 : i32
    %c0_i32_1 = arith.constant 0 : i32
    return %c0_i32, %c0_i32_0 : i32, i32
  }
  func.func @transform_15(%arg0: i32) -> (i32, i32) {
    %c0_i32 = arith.constant 0 : i32
    %c0_i32_0 = arith.constant 0 : i32
    %c0_i32_1 = arith.constant 0 : i32
    return %c0_i32, %c0_i32_0 : i32, i32
  }
  func.func @transform_16(%arg0: i32) -> (i32, i32) {
    %c0_i32 = arith.constant 0 : i32
    %c0_i32_0 = arith.constant 0 : i32
    %c0_i32_1 = arith.constant 0 : i32
    return %c0_i32, %c0_i32_0 : i32, i32
  }
  func.func @transform_17(%arg0: i32) -> (i32, i32) {
    %c0_i32 = arith.constant 0 : i32
    %c0_i32_0 = arith.constant 0 : i32
    %c0_i32_1 = arith.constant 0 : i32
    return %c0_i32, %c0_i32_0 : i32, i32
  }
  func.func @transform_18(%arg0: i32) -> (i32, i32) {
    %c0_i32 = arith.constant 0 : i32
    %c0_i32_0 = arith.constant 0 : i32
    %c0_i32_1 = arith.constant 0 : i32
    return %c0_i32, %c0_i32_0 : i32, i32
  }
  func.func @transform_19(%arg0: i32) -> (i32, i32) {
    %c0_i32 = arith.constant 0 : i32
    %c0_i32_0 = arith.constant 0 : i32
    %c0_i32_1 = arith.constant 0 : i32
    return %c0_i32, %c0_i32_0 : i32, i32
  }
  func.func @transform_20(%arg0: i32) -> (i32, i32) {
    %c0_i32 = arith.constant 0 : i32
    %c0_i32_0 = arith.constant 0 : i32
    %c0_i32_1 = arith.constant 0 : i32
    return %c0_i32, %c0_i32_0 : i32, i32
  }
  func.func @transform_21(%arg0: i32) -> (i32, i32, i32) {
    %c0_i32 = arith.constant 0 : i32
    %c0_i32_0 = arith.constant 0 : i32
    %c0_i32_1 = arith.constant 0 : i32
    return %arg0, %c0_i32, %c0_i32_0 : i32, i32, i32
  }
}

</mosaic_0001>

<bundles_post_ra>
// kernel: cnn_forward_nchw.1
= control target key start
LH: loop header
LB: loop body
LE: loop exit
PB: predicated region body
PF: predicated region fallthrough
CT: control target
= control target key end

     0   :  { %s18807_s0 = inlined_call_operand.vmem [shape: f32[2,16,16,8], index: 0, kind: input, shape index: {}]   ;;  %s18808_s1 = inlined_call_operand.vmem [shape: bf16[72,32], index: 1, kind: input, shape index: {}]   ;;  %s18809_s2 = inlined_call_operand.vmem [shape: bf16[288,32], index: 2, kind: input, shape index: {}]   ;;  %s18810_s3 = inlined_call_operand.vmem [shape: bf16[288,64], index: 3, kind: input, shape index: {}]   ;;  %s18811_s4 = inlined_call_operand.vmem [shape: bf16[576,64], index: 4, kind: input, shape index: {}]   ;;  %s18812_s5 = inlined_call_operand.vmem [shape: bf16[576,128], index: 5, kind: input, shape index: {}]   ;;  %s18813_s6 = inlined_call_operand.vmem [shape: bf16[1152,128], index: 6, kind: input, shape index: {}]   ;;  %s18814_s7 = inlined_call_operand.vmem [shape: f32[1,32], index: 7, kind: input, shape index: {}]   ;;  %s18815_s8 = inlined_call_operand.vmem [shape: f32[1,32], index: 8, kind: input, shape index: {}]   ;;  %s18816_s9 = inlined_call_operand.vmem [shape: f32[1,64], index: 9, kind: input, shape index: {}]   ;;  %s18817_s10 = inlined_call_operand.vmem [shape: f32[1,64], index: 10, kind: input, shape index: {}]   ;;  %s18818_s11 = inlined_call_operand.vmem [shape: f32[1,128], index: 11, kind: input, shape index: {}]   ;;  %s18819_s12 = inlined_call_operand.vmem [shape: f32[1,128], index: 12, kind: input, shape index: {}]   ;;  %s18820_s13 = inlined_call_operand.vmem [shape: f32[1,32], index: 13, kind: input, shape index: {}]   ;;  %s18821_s14 = inlined_call_operand.vmem [shape: f32[1,32], index: 14, kind: input, shape index: {}]   ;;  %s18822_s15 = inlined_call_operand.vmem [shape: f32[1,64], index: 15, kind: input, shape index: {}]   ;;  %s18823_s16 = inlined_call_operand.vmem [shape: f32[1,64], index: 16, kind: input, shape index: {}]   ;;  %s18824_s17 = inlined_call_operand.vmem [shape: f32[1,128], index: 17, kind: input, shape index: {}]   ;;  %s18825_s18 = inlined_call_operand.vmem [shape: f32[1,128], index: 18, kind: input, shape index: {}]   ;;  %s18826_s19 = inlined_call_operand.vmem [shape: f32[128,10], index: 19, kind: input, shape index: {}]   ;;  %s18827_s20 = inlined_call_operand.vmem [shape: f32[1,10], index: 20, kind: input, shape index: {}]   ;;  %s18828_s21 = inlined_call_operand.hbm [shape: f32[2,1,10], index: 21, kind: output, shape index: {}]  }
   0x1   :  { %18876 = sst [smem:[#allocation27_spill]] %s18807_s0 }
   0x2   :  { %18877 = sst [smem:[#allocation28_spill]] %s18808_s1 }
   0x3   :  { %18878 = sst [smem:[#allocation29_spill]] %s18809_s2 }
   0x4   :  { %18879 = sst [smem:[#allocation30_spill]] %s18810_s3 }
   0x5   :  { %18880 = sst [smem:[#allocation31_spill]] %s18811_s4 }
   0x6   :  { %18881 = sst [smem:[#allocation32_spill]] %s18812_s5 }
   0x7   :  { %18882 = sst [smem:[#allocation33_spill]] %s18814_s7 }
   0x8   :  { %18883 = sst [smem:[#allocation34_spill]] %s18815_s8 }
   0x9   :  { %18884 = sst [smem:[#allocation35_spill]] %s18816_s9 }
   0xa   :  { %18885 = sst [smem:[#allocation36_spill]] %s18817_s10 }
   0xb   :  { %18886 = sst [smem:[#allocation37_spill]] %s18820_s13 }
   0xc   :  { %26 = vsyncpa [#allocation9], 0 }
   0xd   :  { %28 = vsyncpa [#allocation9 + $0x1], 0  ;;  %s13839_s2 = smov 0   ;;  %s13841_s25 = smov 0  }
   0xe   :  { %s13843_s26 = smov 0   ;;  %s13845_s27 = smov 0  }
   0xf LB: > { %18887 = sst [smem:[#allocation11_spill]] %s13708_s26  ;;  %s13860_s3 = sadd.s32 4294967295, %s13712_s27   ;;  %s13712_s27 = sphi %s13845_s27, %s19006_s27   ;;  %s13708_s26 = sphi %s13843_s26, %s19008_s26   ;;  %s13704_s25 = sphi %s13841_s25, %s19010_s25   ;;  %s13700_s2 = sphi %s13839_s2, %s19009_s2  }
  0x10   : > { %s11735_s28 = sadd.s32 4294967294, %s13712_s27   ;;  %s13864_s29 = sadd.s32 1, %s13712_s27  }
  0x11   : > { %18888 = sst [smem:[#allocation12_spill]] %s13864_s29  ;;  %s487_s0 = sadd.s32 1, %s13708_s26 }
  0x12   : > { %s484_s4 = ssub.s32 %s13712_s27, %s13864_s29  ;;  %p497_p0 = scmp.ne.s32.totalorder %s13708_s26, %s13704_s25 }
  0x13   : > { %p485_p1 = scmp.eq.s32.totalorder %s484_s4, 0  ;;  %p498_p2 = scmp.eq.s32.totalorder %s13860_s3, 1 }
  0x14   : > { %p503_p3 = scmp.ne.s32.totalorder %s13704_s25, %s13700_s2  ;;  %p504_p4 = scmp.eq.s32.totalorder %s11735_s28, 1 }
  0x15   : > { %s13875_s30 = scalar_select %p485_p1, %s13708_s26, %s487_s0  }
  0x16   : > { %p13877_p5 = por %p498_p2, %p497_p0  ;;  %p13881_p6 = por %p504_p4, %p503_p3 }
  0x17   : > { %18889 = sst [smem:[#allocation13_spill]] %s13875_s30  ;;  %p11738_p7 = scmp.ge.s32.totalorder %s13712_s27, 1 }
  0x18   : > { %s18891_s22 = scalar_select %p13881_p6, 1, 0 }
  0x19   : > { %p590_p8 = scmp.lt.s32.totalorder %s13712_s27, 3 }
  0x1a   : > { %18892 = sst [smem:[#allocation14_spill]] %s18891_s22 }
  0x1b   : > { %p591_p9 = pnand %p11738_p7, %p590_p8 }
  0x1d   : > { %594 = sbr.rel (%p591_p9) target bundleno = 2906 (0xb5a), region = 104 }
  0x24   : > { %vm687_vm0 = vcmask 60416   ;;  %vm690_vm1 = vcmask 57344   ;;  %v18854_v0 = vmov 0   ;;  %p649_p10 = scmp.lt.s32.totalorder %s13860_s3, 1  ;;  %vm18858_vm2 = vcmask 1042432   ;;  %s18895_s0 = sld [smem:[#allocation27_spill]] }
  0x25   : > { %688 = vst.msk [vmem:[#allocation2] sm:$0xf] %vm687_vm0, %v18854_v0  ;;  %689 = vst.msk [vmem:[#allocation2 + $0x4] sm:$0xf] %vm687_vm0, %v18854_v0  ;;  %vm1770_vm3 = vcmask 1046532   ;;  %vm2994_vm4 = vcmask 257024  }
  0x26   : > { %691 = vst.msk [vmem:[#allocation2 + $0x8] sm:$0x1] %vm690_vm1, %v18854_v0  ;;  %694 = vst.msk [vmem:[#allocation2 + $0x14] sm:$0x1] %vm690_vm1, %v18854_v0  ;;  %s14003_s23 = scalar_select %p649_p10, %s13860_s3, 1  ;;  %vm2719_vm15 = vcmask 1043456  }
  0x27   : > { %692 = vst.msk [vmem:[#allocation2 + $0xc] sm:$0xf] %vm687_vm0, %v18854_v0  ;;  %693 = vst.msk [vmem:[#allocation2 + $0x10] sm:$0xf] %vm687_vm0, %v18854_v0  ;;  %vm1334_vm5 = vsmask.f32 3328 }
  0x28   : > { %695 = vst.msk [vmem:[#allocation2 + $0x18] sm:$0xf] %vm687_vm0, %v18854_v0  ;;  %696 = vst.msk [vmem:[#allocation2 + $0x1c] sm:$0xf] %vm687_vm0, %v18854_v0  ;;  %vm1335_vm6 = vsmask.f32 7440 }
  0x29   : > { %697 = vst.msk [vmem:[#allocation2 + $0x20] sm:$0x1] %vm690_vm1, %v18854_v0  ;;  %700 = vst.msk [vmem:[#allocation2 + $0x2c] sm:$0x1] %vm690_vm1, %v18854_v0  ;;  %s12536_s1 = sshll.u32 %s14003_s23, 8  ;;  %s18844_s23 = smov 16  }
  0x2a   : > { %698 = vst.msk [vmem:[#allocation2 + $0x24] sm:$0xf] %vm687_vm0, %v18854_v0  ;;  %699 = vst.msk [vmem:[#allocation2 + $0x28] sm:$0xf] %vm687_vm0, %v18854_v0  ;;  %vm839_vm7 = vsmask.f32 256  ;;  %s14107_s4 = scalar_lea.vmem %s18895_s0, %s12536_s1 }
  0x2b   : > { %701 = vst.msk [vmem:[#allocation2 + $0x30] sm:$0xf] %vm687_vm0, %v18854_v0  ;;  %702 = vst.msk [vmem:[#allocation2 + $0x34] sm:$0xf] %vm687_vm0, %v18854_v0  ;;  %vm840_vm9 = vsmask.f32 4368 }
  0x2c   : > { %703 = vst.msk [vmem:[#allocation2 + $0x38] sm:$0x1] %vm690_vm1, %v18854_v0  ;;  %706 = vst.msk [vmem:[#allocation2 + $0x44] sm:$0x1] %vm690_vm1, %v18854_v0  ;;  %v657_v2 = vld [vmem:[%s14107_s4 + $0x10] sm:$0xff]  ;;  %v658_v3 = vld [vmem:[%s14107_s4 + $0x18] sm:$0xff] }
  0x2d   : > { %704 = vst.msk [vmem:[#allocation2 + $0x3c] sm:$0xf] %vm687_vm0, %v18854_v0  ;;  %705 = vst.msk [vmem:[#allocation2 + $0x40] sm:$0xf] %vm687_vm0, %v18854_v0  ;;  %vm1164_vm10 = vsmask.f32 7938  ;;  %v12539_v8 = vpack.c.bf16 %v657_v2, %v657_v2  ;;  %v12540_v9 = vpack.c.bf16 %v658_v3, %v658_v3 }
  0x2e   : > { %707 = vst.msk [vmem:[#allocation2 + $0x48] sm:$0xf] %vm687_vm0, %v18854_v0  ;;  %708 = vst.msk [vmem:[#allocation2 + $0x4c] sm:$0xf] %vm687_vm0, %v18854_v0  ;;  %v655_v4 = vld [vmem:[%s14107_s4] sm:$0xff]  ;;  %v656_v27 = vld [vmem:[%s14107_s4 + $0x8] sm:$0xff] }
  0x2f   : > { %709 = vst.msk [vmem:[#allocation2 + $0x50] sm:$0x1] %vm690_vm1, %v18854_v0  ;;  %712 = vst.msk [vmem:[#allocation2 + $0x5c] sm:$0x1] %vm690_vm1, %v18854_v0  ;;  %v14112_v5 = vld [vmem:[#allocation2] sm:$0xf]  ;;  %v12537_v10 = vpack.c.bf16 %v655_v4, %v655_v4  ;;  %v12538_v42 = vpack.c.bf16 %v656_v27, %v656_v27 }
  0x30   : > { %710 = vst.msk [vmem:[#allocation2 + $0x54] sm:$0xf] %vm687_vm0, %v18854_v0  ;;  %711 = vst.msk [vmem:[#allocation2 + $0x58] sm:$0xf] %vm687_vm0, %v18854_v0  ;;  %v14114_v6 = vld [vmem:[#allocation2 + $0x4] sm:$0xf] }
  0x31   : > { %713 = vst.msk [vmem:[#allocation2 + $0x60] sm:$0xf] %vm687_vm0, %v18854_v0  ;;  %714 = vst.msk [vmem:[#allocation2 + $0x64] sm:$0xf] %vm687_vm0, %v18854_v0  ;;  %v1282_v7 = vld [vmem:[#allocation2 + $0x8] sm:$0x1] }
  0x32   : > { %715 = vst.msk [vmem:[#allocation2 + $0x68] sm:$0x1] %vm690_vm1, %v18854_v0  ;;  %718 = vst.msk [vmem:[#allocation2 + $0x74] sm:$0x1] %vm690_vm1, %v18854_v0  ;;  %v11773_v11 = vrot.slane %v14112_v5, 9  ;;  %v1774_v12 = vrot.slane %v14114_v6, 5 }
  0x33   : > { %716 = vst.msk [vmem:[#allocation2 + $0x6c] sm:$0xf] %vm687_vm0, %v18854_v0  ;;  %717 = vst.msk [vmem:[#allocation2 + $0x70] sm:$0xf] %vm687_vm0, %v18854_v0  ;;  %v1777_v13 = vrot.slane %v1282_v7, 5  ;;  %v1338_v14 = vshrl.u32 %v14112_v5, 16 }
  0x34   : > { %719 = vst.msk [vmem:[#allocation2 + $0x78] sm:$0xf] %vm687_vm0, %v18854_v0  ;;  %720 = vst.msk [vmem:[#allocation2 + $0x7c] sm:$0xf] %vm687_vm0, %v18854_v0  ;;  %v1341_v15 = vshll.u32 %v14112_v5, 16  ;;  %v1347_v16 = vshll.u32 %v14114_v6, 16 }
  0x35   : > { %721 = vst.msk [vmem:[#allocation2 + $0x80] sm:$0x1] %vm690_vm1, %v18854_v0  ;;  %724 = vst.msk [vmem:[#allocation2 + $0x8c] sm:$0x1] %vm690_vm1, %v18854_v0  ;;  %v1351_v17 = vshrl.u32 %v14114_v6, 16  ;;  %v1357_v18 = vshll.u32 %v1282_v7, 16 }
  0x36   : > { %722 = vst.msk [vmem:[#allocation2 + $0x84] sm:$0xf] %vm687_vm0, %v18854_v0  ;;  %723 = vst.msk [vmem:[#allocation2 + $0x88] sm:$0xf] %vm687_vm0, %v18854_v0  ;;  %v1776_v20 = vrot.slane %v1774_v12, 4  ;;  %v1340_v21 = vrot.slane %v1338_v14, 4 }
  0x37   : > { %725 = vst.msk [vmem:[#allocation2 + $0x90] sm:$0xf] %vm687_vm0, %v18854_v0  ;;  %726 = vst.msk [vmem:[#allocation2 + $0x94] sm:$0xf] %vm687_vm0, %v18854_v0  ;;  %v860_v22 = vshrl.u32 %v12539_v8, 16  ;;  %v1343_v23 = vrot.slane %v1341_v15, 5 }
  0x38   : > { %727 = vst.msk [vmem:[#allocation2 + $0x98] sm:$0x1] %vm690_vm1, %v18854_v0  ;;  %730 = vst.msk [vmem:[#allocation2 + $0xa4] sm:$0x1] %vm690_vm1, %v18854_v0  ;;  %v1349_v24 = vrot.slane %v1347_v16, 5  ;;  %v1353_v25 = vrot.slane %v1351_v17, 4 }
  0x39   : > { %728 = vst.msk [vmem:[#allocation2 + $0x9c] sm:$0xf] %vm687_vm0, %v18854_v0  ;;  %729 = vst.msk [vmem:[#allocation2 + $0xa0] sm:$0xf] %vm687_vm0, %v18854_v0  ;;  %v1359_v26 = vrot.slane %v1357_v18, 5  ;;  %v862_v29 = vrot.slane %v860_v22, 7  ;;  %v1344_v33 = vor.u32 %v1343_v23, %v1340_v21 }
  0x3a   : > { %731 = vst.msk [vmem:[#allocation2 + $0xa8] sm:$0xf] %vm687_vm0, %v18854_v0  ;;  %732 = vst.msk [vmem:[#allocation2 + $0xac] sm:$0xf] %vm687_vm0, %v18854_v0  ;;  %v863_v30 = vshll.u32 %v12539_v8, 16  ;;  %v868_v31 = vshrl.u32 %v12540_v9, 16  ;;  %v1354_v34 = vor.u32 %v1353_v25, %v1349_v24 }
  0x3b   : > { %733 = vst.msk [vmem:[#allocation2 + $0xb0] sm:$0x1] %vm690_vm1, %v18854_v0  ;;  %736 = vst.msk [vmem:[#allocation2 + $0xbc] sm:$0x1] %vm690_vm1, %v18854_v0  ;;  %v871_v35 = vshll.u32 %v12540_v9, 16  ;;  %v866_v40 = vrot.slane %v862_v29, 4 }
  0x3c   : > { %734 = vst.msk [vmem:[#allocation2 + $0xb4] sm:$0xf] %vm687_vm0, %v18854_v0  ;;  %735 = vst.msk [vmem:[#allocation2 + $0xb8] sm:$0xf] %vm687_vm0, %v18854_v0  ;;  %v1175_v37 = vld [vmem:[#allocation2 + $0x18] sm:$0xf]  ;;  %v865_v39 = vor.u32 %v863_v30, %v862_v29 }
  0x3d   : > { %737 = vst.msk [vmem:[#allocation2 + $0xc0] sm:$0xf] %vm687_vm0, %v18854_v0  ;;  %738 = vst.msk [vmem:[#allocation2 + $0xc4] sm:$0xf] %vm687_vm0, %v18854_v0  ;;  %v870_v41 = vrot.slane %v868_v31, 7  ;;  %v659_v43 = vld [vmem:[%s14107_s4 + $0x20] sm:$0xff] }
  0x3e   : > { %739 = vst.msk [vmem:[#allocation2 + $0xc8] sm:$0x1] %vm690_vm1, %v18854_v0  ;;  %742 = vst.msk [vmem:[#allocation2 + $0xd4] sm:$0x1] %vm690_vm1, %v18854_v0  ;;  %v1345_v44 = vrot.slane %v1344_v33, 4  ;;  %v1355_v45 = vrot.slane %v1354_v34, 4  ;;  %v12541_v57 = vpack.c.bf16 %v659_v43, %v659_v43 }
  0x3f   : > { %740 = vst.msk [vmem:[#allocation2 + $0xcc] sm:$0xf] %vm687_vm0, %v18854_v0  ;;  %741 = vst.msk [vmem:[#allocation2 + $0xd0] sm:$0xf] %vm687_vm0, %v18854_v0  ;;  %v843_v47 = vshrl.u32 %v12537_v10, 16  ;;  %v846_v48 = vshll.u32 %v12537_v10, 16  ;;  %v873_v50 = vor.u32 %v871_v35, %v870_v41 }
  0x40   : > { %10394 = vst [vmem:[#allocation7] sm:$0x7] %v18854_v0  ;;  %10395 = vst [vmem:[#allocation7 + $0x4] sm:$0x7] %v18854_v0  ;;  %v660_v49 = vld [vmem:[%s14107_s4 + $0x28] sm:$0xff]  ;;  %v851_v52 = vshrl.u32 %v12538_v42, 16 }
  0x41   : > { %10396 = vst [vmem:[#allocation7 + $0x8] sm:$0x7] %v18854_v0  ;;  %10397 = vst [vmem:[#allocation7 + $0xc] sm:$0x7] %v18854_v0  ;;  %v854_v53 = vshll.u32 %v12538_v42, 16  ;;  %v845_v56 = vrot.slane %v843_v47, 7  ;;  %v12542_v62 = vpack.c.bf16 %v660_v49, %v660_v49 }
  0x42   : > { %10398 = vst [vmem:[#allocation7 + $0x10] sm:$0x7] %v18854_v0  ;;  %10399 = vst [vmem:[#allocation7 + $0x14] sm:$0x7] %v18854_v0  ;;  %v853_v60 = vrot.slane %v851_v52, 7  ;;  %v661_v63 = vld [vmem:[%s14107_s4 + $0x30] sm:$0xff] }
  0x43   : > { %2995 = vst.msk [vmem:[#allocation3] sm:$0xf] %vm2994_vm4, %v18854_v0  ;;  %2996 = vst.msk [vmem:[#allocation3 + $0x4] sm:$0xf] %vm2994_vm4, %v18854_v0  ;;  %v1166_v61 = vld [vmem:[#allocation2 + $0xc] sm:$0xf]  ;;  %v848_v2 = vor.u32 %v846_v48, %v845_v56 }
  0x44   : > { %2999 = vst.msk [vmem:[#allocation3 + $0xc] sm:$0xf] %vm2994_vm4, %v18854_v0  ;;  %3000 = vst.msk [vmem:[#allocation3 + $0x10] sm:$0xf] %vm2994_vm4, %v18854_v0  ;;  %v849_v3 = vrot.slane %v845_v56, 4  ;;  %v877_v4 = vshrl.u32 %v12541_v57, 16 }
  0x45   : > { %3002 = vst.msk [vmem:[#allocation3 + $0x18] sm:$0xf] %vm2994_vm4, %v18854_v0  ;;  %3003 = vst.msk [vmem:[#allocation3 + $0x1c] sm:$0xf] %vm2994_vm4, %v18854_v0  ;;  %v880_v7 = vshll.u32 %v12541_v57, 16  ;;  %v662_v10 = vld [vmem:[%s14107_s4 + $0x38] sm:$0xff] }
  0x46   : > { %3005 = vst.msk [vmem:[#allocation3 + $0x24] sm:$0xf] %vm2994_vm4, %v18854_v0  ;;  %3006 = vst.msk [vmem:[#allocation3 + $0x28] sm:$0xf] %vm2994_vm4, %v18854_v0  ;;  %v1172_v9 = vld [vmem:[#allocation2 + $0x14] sm:$0x1] }
  0x47   : > { %3008 = vst.msk [vmem:[#allocation3 + $0x30] sm:$0xf] %vm2994_vm4, %v18854_v0  ;;  %3009 = vst.msk [vmem:[#allocation3 + $0x34] sm:$0xf] %vm2994_vm4, %v18854_v0  ;;  %s18834_s1 = smov 8   ;;  %v858_v14 = vrot.slane %v853_v60, 4 }
  0x48   : > { %3011 = vst.msk [vmem:[#allocation3 + $0x3c] sm:$0xf] %vm2994_vm4, %v18854_v0  ;;  %3012 = vst.msk [vmem:[#allocation3 + $0x40] sm:$0xf] %vm2994_vm4, %v18854_v0  ;;  %v1179_v15 = vld [vmem:[#allocation2 + $0x20] sm:$0x1] }
  0x49   : > { %3014 = vst.msk [vmem:[#allocation3 + $0x48] sm:$0xf] %vm2994_vm4, %v18854_v0  ;;  %3015 = vst.msk [vmem:[#allocation3 + $0x4c] sm:$0xf] %vm2994_vm4, %v18854_v0  ;;  %v879_v17 = vrot.slane %v877_v4, 7  ;;  %v875_v18 = vrot.slane %v870_v41, 4 }
  0x4a   : > { %3017 = vst.msk [vmem:[#allocation3 + $0x54] sm:$0xf] %vm2994_vm4, %v18854_v0  ;;  %3018 = vst.msk [vmem:[#allocation3 + $0x58] sm:$0xf] %vm2994_vm4, %v18854_v0  ;;  %v1182_v22 = vld [vmem:[#allocation2 + $0x24] sm:$0xf] }
  0x4b   : > { %3020 = vst.msk [vmem:[#allocation3 + $0x60] sm:$0xf] %vm2994_vm4, %v18854_v0  ;;  %3021 = vst.msk [vmem:[#allocation3 + $0x64] sm:$0xf] %vm2994_vm4, %v18854_v0  ;;  %v882_v25 = vor.u32 %v880_v7, %v879_v17  ;;  %v1189_v47 = vld [vmem:[#allocation2 + $0x30] sm:$0xf] }
  0x4c   : > { %3023 = vst.msk [vmem:[#allocation3 + $0x6c] sm:$0xf] %vm2994_vm4, %v18854_v0  ;;  %3024 = vst.msk [vmem:[#allocation3 + $0x70] sm:$0xf] %vm2994_vm4, %v18854_v0  ;;  %s18836_s24 = smov 24   ;;  %s18838_s28 = smov 48  }
  0x4d   : > { %3026 = vst.msk [vmem:[#allocation3 + $0x78] sm:$0xf] %vm2994_vm4, %v18854_v0  ;;  %3027 = vst.msk [vmem:[#allocation3 + $0x7c] sm:$0xf] %vm2994_vm4, %v18854_v0  ;;  %s18846_s0 = smov 32   ;;  %s18909_s30 = smov 56  }
  0x4e   : > { %3029 = vst.msk [vmem:[#allocation3 + $0x84] sm:$0xf] %vm2994_vm4, %v18854_v0  ;;  %3030 = vst.msk [vmem:[#allocation3 + $0x88] sm:$0xf] %vm2994_vm4, %v18854_v0  ;;  %s18910_s26 = smov 64   ;;  %s18911_s29 = smov 16  }
  0x4f   : > { %3032 = vst.msk [vmem:[#allocation3 + $0x90] sm:$0xf] %vm2994_vm4, %v18854_v0  ;;  %3033 = vst.msk [vmem:[#allocation3 + $0x94] sm:$0xf] %vm2994_vm4, %v18854_v0  ;;  %s18912_s22 = smov 32   ;;  %s18929_s7 = sld [smem:[#allocation33_spill]] }
  0x50   : > { %3035 = vst.msk [vmem:[#allocation3 + $0x9c] sm:$0xf] %vm2994_vm4, %v18854_v0  ;;  %3036 = vst.msk [vmem:[#allocation3 + $0xa0] sm:$0xf] %vm2994_vm4, %v18854_v0  ;;  %s18930_s13 = sld [smem:[#allocation37_spill]]  ;;  %s18961_s8 = sld [smem:[#allocation34_spill]] }
  0x51   : > { %3038 = vst.msk [vmem:[#allocation3 + $0xa8] sm:$0xf] %vm2994_vm4, %v18854_v0  ;;  %3039 = vst.msk [vmem:[#allocation3 + $0xac] sm:$0xf] %vm2994_vm4, %v18854_v0  ;;  %s18986_s9 = sld [smem:[#allocation35_spill]]  ;;  %s18995_s10 = sld [smem:[#allocation36_spill]] }
  0x52   : > { %3041 = vst.msk [vmem:[#allocation3 + $0xb4] sm:$0xf] %vm2994_vm4, %v18854_v0  ;;  %3042 = vst.msk [vmem:[#allocation3 + $0xb8] sm:$0xf] %vm2994_vm4, %v18854_v0 }
  0x53   : > { %3044 = vst.msk [vmem:[#allocation3 + $0xc0] sm:$0xf] %vm2994_vm4, %v18854_v0  ;;  %3045 = vst.msk [vmem:[#allocation3 + $0xc4] sm:$0xf] %vm2994_vm4, %v18854_v0 }
  0x54   : > { %3047 = vst.msk [vmem:[#allocation3 + $0xcc] sm:$0xf] %vm2994_vm4, %v18854_v0  ;;  %3048 = vst.msk [vmem:[#allocation3 + $0xd0] sm:$0xf] %vm2994_vm4, %v18854_v0 }
  0x55   : > { %6828 = vst.msk [vmem:[#allocation4] sm:$0xf] %vm2994_vm4, %v18854_v0  ;;  %6830 = vst.msk [vmem:[#allocation4 + $0x8] sm:$0xf] %vm2994_vm4, %v18854_v0 }
  0x56   : > { %6832 = vst.msk [vmem:[#allocation4 + $0x10] sm:$0xf] %vm2994_vm4, %v18854_v0  ;;  %6834 = vst.msk [vmem:[#allocation4 + $0x18] sm:$0xf] %vm2994_vm4, %v18854_v0 }
  0x57   : > { %6836 = vst.msk [vmem:[#allocation4 + $0x20] sm:$0xf] %vm2994_vm4, %v18854_v0  ;;  %6838 = vst.msk [vmem:[#allocation4 + $0x28] sm:$0xf] %vm2994_vm4, %v18854_v0 }
  0x58   : > { %6840 = vst.msk [vmem:[#allocation4 + $0x30] sm:$0xf] %vm2994_vm4, %v18854_v0  ;;  %6842 = vst.msk [vmem:[#allocation4 + $0x38] sm:$0xf] %vm2994_vm4, %v18854_v0 }
  0x59   : > { %6844 = vst.msk [vmem:[#allocation4 + $0x40] sm:$0xf] %vm2994_vm4, %v18854_v0  ;;  %6846 = vst.msk [vmem:[#allocation4 + $0x48] sm:$0xf] %vm2994_vm4, %v18854_v0 }
  0x5a   : > { %vm14100_vm8 = vmor %vm18858_vm2, %vm1770_vm3  ;;  %vm2419_vm3 = vcmask 130048   ;;  %vm2997_vm2 = vcmask 253952  }
  0x5b   : > { %v1775_v19 = vsel %vm14100_vm8, %v11773_v11, %v1774_v12  ;;  %v1778_v28 = vsel %vm14100_vm8, %v1776_v20, %v1777_v13  ;;  %vm14129_vm11 = vmand %vm687_vm0, %vm1164_vm10  ;;  %v856_v11 = vor.u32 %v854_v53, %v853_v60  ;;  %v885_v12 = vshrl.u32 %v12542_v62, 16  ;;  %v16382_v46 = vld [vmem:[#allocation3 + $0xcc] sm:$0xf] }
  0x5c   : > { %v11823_v32 = vcombine.low %v1775_v19, %v1778_v28  ;;  %vm14135_vm12 = vmor %vm1334_vm5, %vm1335_vm6  ;;  %v1176_v51 = vsel %vm14129_vm11, %v865_v39, %v1175_v37  ;;  %v888_v13 = vshll.u32 %v12542_v62, 16  ;;  %v1167_v16 = vsel %vm14129_vm11, %v848_v2, %v1166_v61  ;;  %v1186_v28 = vld [vmem:[#allocation2 + $0x2c] sm:$0x1] }
  0x5d   : > { %vm14143_vm13 = vmor %vm839_vm7, %vm840_vm9  ;;  %v1350_v54 = vsel %vm14135_vm12, %v1345_v44, %v1349_v24  ;;  %v1360_v55 = vsel %vm14135_vm12, %v1355_v45, %v1359_v26  ;;  %1177 = vst [vmem:[#allocation2 + $0x18] sm:$0xf] %v1176_v51  ;;  %v12543_v19 = vpack.c.bf16 %v661_v63, %v661_v63  ;;  %v887_v21 = vrot.slane %v885_v12, 7 }
  0x5e   : > { %2128 = vrot.lane.b32.xlu1 %v11823_v32, %s18844_s23  ;;  %v11807_v58 = vcombine.low %v1350_v54, %v1360_v55  ;;  %v874_v59 = vsel %vm14143_vm13, %v866_v40, %v873_v50  ;;  %vm14160_vm14 = vmand %vm690_vm1, %vm839_vm7  ;;  %v857_v20 = vsel %vm14143_vm13, %v849_v3, %v856_v11  ;;  %1168 = vst [vmem:[#allocation2 + $0xc] sm:$0xf] %v1167_v16  ;;  %v883_v26 = vrot.slane %v879_v17, 4 }
  0x5f   : > { %1178 = vst.msk [vmem:[#allocation2 + $0x1c] sm:$0xf] %vm687_vm0, %v874_v59  ;;  %v1173_v23 = vsel %vm14160_vm14, %v858_v14, %v1172_v9  ;;  %v14172_v24 = vpack.c.bf16 %v662_v10, %v662_v10  ;;  %1169 = vst.msk [vmem:[#allocation2 + $0x10] sm:$0xf] %vm687_vm0, %v857_v20  ;;  %v1180_v27 = vsel %vm14160_vm14, %v875_v18, %v1179_v15  ;;  %v894_v29 = vshrl.u32 %v12543_v19, 16 }
  0x60   : > { %2048 = vrot.lane.b32.xlu0 %v11807_v58, %s18834_s1  ;;  %1174 = vst [vmem:[#allocation2 + $0x14] sm:$0x1] %v1173_v23  ;;  %v890_v31 = vor.u32 %v888_v13, %v887_v21  ;;  %1181 = vst [vmem:[#allocation2 + $0x20] sm:$0x1] %v1180_v27  ;;  %v892_v32 = vrot.slane %v887_v21, 4  ;;  %v897_v33 = vshll.u32 %v12543_v19, 16  ;;  %v1183_v39 = vsel %vm14129_vm11, %v882_v25, %v1182_v22 }
  0x61   : > { %v902_v34 = vshrl.u32 %v14172_v24, 16  ;;  %1184 = vst [vmem:[#allocation2 + $0x24] sm:$0xf] %v1183_v39  ;;  %v14189_v44 = vrot.slane %v894_v29, 7  ;;  %v905_v59 = vshll.u32 %v14172_v24, 16  ;;  %s18904_s1 = sld [smem:[#allocation28_spill]] }
  0x62   : > { %v891_v42 = vsel %vm14143_vm13, %v883_v26, %v890_v31  ;;  %v1187_v43 = vsel %vm14160_vm14, %v892_v32, %v1186_v28  ;;  %vm2370_vm1 = vcmask 64512   ;;  %vm2452_vm5 = vcmask 195584  }
  0x63   : > { %v14191_v45 = vrot.slane %v902_v34, 7  ;;  %1185 = vst.msk [vmem:[#allocation2 + $0x28] sm:$0xf] %vm687_vm0, %v891_v42  ;;  %1188 = vst [vmem:[#allocation2 + $0x2c] sm:$0x1] %v1187_v43  ;;  %v899_v54 = vor.u32 %v897_v33, %v14189_v44  ;;  %v900_v55 = vrot.slane %v14189_v44, 4 }
  0x64   : > { %v14177_v30 = vld [vmem:[#allocation2 + $0x18] sm:$0xf]  ;;  %vm2485_vm6 = vcmask 261120   ;;  %vm2518_vm9 = vcmask 326656  }
  0x65   : > { %v1386_v35 = vshrl.u32 %v14177_v30, 16  ;;  %v1389_v37 = vshll.u32 %v14177_v30, 16  ;;  %v11775_v40 = vrot.slane %v14177_v30, 9  ;;  %v1283_v56 = vld [vmem:[#allocation2 + $0xc] sm:$0xf]  ;;  %v1190_v4 = vsel %vm14129_vm11, %v899_v54, %v1189_v47 }
  0x66   : > { %v1287_v41 = vld [vmem:[#allocation2 + $0x1c] sm:$0xf]  ;;  %v14205_v61 = vld [vmem:[#allocation2 + $0x10] sm:$0xf]  ;;  %v1362_v62 = vshrl.u32 %v1283_v56, 16  ;;  %v1365_v63 = vshll.u32 %v1283_v56, 16 }
  0x67   : > { %v1399_v48 = vshrl.u32 %v1287_v41, 16  ;;  %v14194_v49 = vcombine.low %v14177_v30, %v1287_v41  ;;  %v1788_v50 = vrot.slane %v1287_v41, 5  ;;  %v1388_v51 = vrot.slane %v1386_v35, 4  ;;  %v13409_v60 = vld [vmem:[%s18904_s1] sm:$0xff]   ;;  %v14207_v2 = vld [vmem:[#allocation2 + $0x14] sm:$0x1] }
  0x68   : > { %v1391_v52 = vrot.slane %v1389_v37, 5  ;;  %v1395_v53 = vshll.u32 %v1287_v41, 16  ;;  %v1375_v7 = vshrl.u32 %v14205_v61, 16  ;;  %v14213_v9 = vcombine.low %v1283_v56, %v14205_v61  ;;  %v1288_v12 = vld [vmem:[#allocation2 + $0x20] sm:$0x1]  ;;  %13149 = vmatprep.subr.bf16.mxu0 %v13409_v60  ;;  %v13410_v22 = vld [vmem:[%s18904_s1 + $0x8] sm:$0xff]  }
  0x69   : > { %2165 = vrot.lane.b32.xlu1 %v14194_v49, %s18836_s24  ;;  %v1790_v57 = vrot.slane %v1788_v50, 4  ;;  %v1401_v58 = vrot.slane %v1399_v48, 4  ;;  %v11774_v10 = vrot.slane %v1283_v56, 9  ;;  %v1781_v11 = vrot.slane %v14205_v61, 5  ;;  %1191 = vst [vmem:[#allocation2 + $0x30] sm:$0xf] %v1190_v4  ;;  %13150 = vmatpush3.bf16.msra.mxu0 %v13409_v60 }
  0x6a   : > { %v1392_v3 = vor.u32 %v1391_v52, %v1388_v51  ;;  %v1784_v13 = vrot.slane %v14207_v2, 5  ;;  %v1791_v14 = vrot.slane %v1288_v12, 5  ;;  %v14219_v16 = vrot.slane %v1395_v53, 5  ;;  %2163 = vrot.lane.b32.xlu0 %v14213_v9, %s18836_s24  ;;  %v1289_v17 = vld [vmem:[#allocation2 + $0x24] sm:$0xf]  ;;  %13151 = vmatprep.subr.bf16.mxu0 %v13410_v22  ;;  %v13412_v43 = vld [vmem:[%s18904_s1 + $0x10] sm:$0xff]  }
  0x6b   : > { %v1782_v18 = vsel %vm14100_vm8, %v11774_v10, %v1781_v11  ;;  %v1783_v19 = vrot.slane %v1781_v11, 4  ;;  %v1405_v20 = vshll.u32 %v1288_v12, 16  ;;  %v1364_v21 = vrot.slane %v1362_v62, 4  ;;  %v1290_v23 = vld [vmem:[#allocation2 + $0x28] sm:$0xf]  ;;  %s18842_s24 = smov 40  }
  0x6c   : > { %v14217_v15 = vrot.slane %v1392_v3, 4  ;;  %v1410_v25 = vshrl.u32 %v1289_v17, 16  ;;  %v1413_v26 = vshll.u32 %v1289_v17, 16  ;;  %v1789_v27 = vsel %vm14100_vm8, %v11775_v40, %v1788_v50  ;;  %v1291_v28 = vld [vmem:[#allocation2 + $0x2c] sm:$0x1] }
  0x6d   : > { %v1423_v29 = vshrl.u32 %v1290_v23, 16  ;;  %v14230_v30 = vcombine.low %v1289_v17, %v1290_v23  ;;  %v1785_v31 = vsel %vm14100_vm8, %v1783_v19, %v1784_v13  ;;  %v1792_v32 = vsel %vm14100_vm8, %v1790_v57, %v1791_v14  ;;  %13152 = vmatpush3.bf16.msra.mxu0 %v13410_v22  ;;  %v1193_v14 = vld [vmem:[#allocation2 + $0x38] sm:$0x1] }
  0x6e   : > { %v11824_v33 = vcombine.low %v1782_v18, %v1785_v31  ;;  %v11776_v34 = vrot.slane %v1289_v17, 9  ;;  %v1795_v35 = vrot.slane %v1290_v23, 5  ;;  %v1798_v37 = vrot.slane %v1291_v28, 5  ;;  %2268 = vrot.lane.b32.xlu0 %v14194_v49, %s18838_s28  ;;  %13153 = vmatprep.subr.bf16.mxu0 %v13412_v43 }
  0x6f   : > { %2270 = vrot.lane.b32.xlu1 %v14230_v30, %s18838_s28  ;;  %v1402_v39 = vor.u32 %v1401_v58, %v14219_v16  ;;  %v1407_v40 = vrot.slane %v1405_v20, 5  ;;  %v1412_v41 = vrot.slane %v1410_v25, 4  ;;  %v1415_v42 = vrot.slane %v1413_v26, 5  ;;  %s18840_s28 = smov 64   ;;  %v664_v26 = vld [vmem:[%s14107_s4 + $0x48] sm:$0xff] }
  0x70   : > { %v1796_v47 = vsel %vm14100_vm8, %v11776_v34, %v1795_v35  ;;  %v1797_v48 = vrot.slane %v1795_v35, 4  ;;  %v1419_v50 = vshll.u32 %v1290_v23, 16  ;;  %v1425_v51 = vrot.slane %v1423_v29, 4  ;;  %v14270_v23 = vld [vmem:[#allocation2 + $0x30] sm:$0xf] }
  0x71   : > { %v1403_v52 = vrot.slane %v1402_v39, 4  ;;  %v1416_v53 = vor.u32 %v1415_v42, %v1412_v41  ;;  %v1429_v54 = vshll.u32 %v1291_v28, 16  ;;  %v1367_v56 = vrot.slane %v1365_v63, 5  ;;  %13154 = vmatpush3.bf16.msra.mxu0 %v13412_v43 }
  0x72   : > { %v1799_v57 = vsel %vm14100_vm8, %v1797_v48, %v1798_v37  ;;  %v1421_v58 = vrot.slane %v1419_v50, 5  ;;  %v1371_v60 = vshll.u32 %v14205_v61, 16  ;;  %v1377_v62 = vrot.slane %v1375_v7, 4  ;;  %2233 = vrot.lane.b32.xlu0 %v11824_v33, %s18842_s24  ;;  %v13413_v61 = vld [vmem:[%s18904_s1 + $0x18] sm:$0xff]  }
  0x73   : > { %2130 = vrot.lane.b32.xlu1 %v11824_v33, %s18844_s23  ;;  %v14251_v3 = vcombine.low %v1789_v27, %v1792_v32  ;;  %v1398_v63 = vsel %vm14135_vm12, %v14217_v15, %v14219_v16  ;;  %v1408_v4 = vsel %vm14135_vm12, %v1403_v52, %v1407_v40  ;;  %v1417_v10 = vrot.slane %v1416_v53, 4  ;;  %13155 = vmatprep.subr.bf16.mxu0 %v13413_v61  ;;  %v665_v27 = vld [vmem:[%s14107_s4 + $0x50] sm:$0xff]  ;;  %v666_v32 = vld [vmem:[%s14107_s4 + $0x58] sm:$0xff] }
  0x74   : > { %v1426_v7 = vor.u32 %v1425_v51, %v1421_v58  ;;  %v1431_v11 = vrot.slane %v1429_v54, 5  ;;  %v1368_v12 = vor.u32 %v1367_v56, %v1364_v21  ;;  %v1373_v13 = vrot.slane %v1371_v60, 5  ;;  %v663_v21 = vld [vmem:[%s14107_s4 + $0x40] sm:$0xff]  ;;  %v1196_v48 = vld [vmem:[#allocation2 + $0x3c] sm:$0xf] }
  0x75   : > { %v14262_v17 = vcombine.low %v1796_v47, %v1799_v57  ;;  %v1381_v18 = vshll.u32 %v14207_v2, 16  ;;  %v907_v15 = vor.u32 %v905_v59, %v14191_v45  ;;  %v14268_v16 = vcombine.low %v1398_v63, %v1408_v4  ;;  %13156 = vmatpush3.bf16.msra.mxu0 %v13413_v61  ;;  %v1200_v60 = vld [vmem:[#allocation2 + $0x44] sm:$0x1] }
  0x76   : > { %v1427_v19 = vrot.slane %v1426_v7, 4  ;;  %v1369_v20 = vrot.slane %v1368_v12, 4  ;;  %v1378_v22 = vor.u32 %v1377_v62, %v1373_v13  ;;  %2338 = vrot.lane.b32.xlu0 %v14251_v3, %s18840_s28  ;;  %v1422_v24 = vsel %vm14135_vm12, %v1417_v10, %v1421_v58  ;;  %v667_v61 = vld [vmem:[%s14107_s4 + $0x60] sm:$0xff] }
  0x77   : > { %2235 = vrot.lane.b32.xlu1 %v14251_v3, %s18842_s24  ;;  %v1383_v59 = vrot.slane %v1381_v18, 5  ;;  %v908_v2 = vsel %vm14143_vm13, %v900_v55, %v907_v15  ;;  %v909_v25 = vrot.slane %v14191_v45, 4  ;;  %v1434_v33 = vshrl.u32 %v14270_v23, 16  ;;  %s18905_s24 = smov 8  }
  0x78   : > { %v1432_v28 = vsel %vm14135_vm12, %v1427_v19, %v1431_v11  ;;  %v1374_v29 = vsel %vm14135_vm12, %v1369_v20, %v1373_v13  ;;  %v1379_v31 = vrot.slane %v1378_v22, 4  ;;  %1192 = vst.msk [vmem:[#allocation2 + $0x34] sm:$0xf] %vm687_vm0, %v908_v2  ;;  %v1437_v44 = vshll.u32 %v14270_v23, 16  ;;  %v668_v22 = vld [vmem:[%s14107_s4 + $0x68] sm:$0xff] }
  0x79   : > { %v1194_v55 = vsel %vm14160_vm14, %v909_v25, %v1193_v14  ;;  %v12545_v45 = vpack.c.bf16 %v663_v21, %v663_v21  ;;  %v14296_v34 = vcombine.low %v1422_v24, %v1432_v28  ;;  %v12546_v37 = vpack.c.bf16 %v664_v26, %v664_v26  ;;  %v1203_v25 = vld [vmem:[#allocation2 + $0x48] sm:$0xf]  ;;  %v1207_v28 = vld [vmem:[#allocation2 + $0x50] sm:$0x1] }
  0x7a   : > { %v1384_v35 = vsel %vm14135_vm12, %v1379_v31, %v1383_v59  ;;  %1195 = vst [vmem:[#allocation2 + $0x38] sm:$0x1] %v1194_v55  ;;  %v12547_v39 = vpack.c.bf16 %v665_v27, %v665_v27  ;;  %2340 = vrot.lane.b32.xlu0 %v14262_v17, %s18840_s28  ;;  %v12548_v43 = vpack.c.bf16 %v666_v32, %v666_v32  ;;  %v1436_v56 = vrot.slane %v1434_v33, 4  ;;  %s18848_s28 = smov 56  }
  0x7b   : > { %2200 = vrot.lane.b32.xlu1 %v14268_v16, %s18846_s0  ;;  %v11808_v40 = vcombine.low %v1374_v29, %v1384_v35  ;;  %v911_v41 = vshrl.u32 %v12545_v45, 16  ;;  %v914_v42 = vshll.u32 %v12545_v45, 16  ;;  %v919_v47 = vshrl.u32 %v12546_v37, 16 }
  0x7c   : > { %v928_v50 = vshrl.u32 %v12547_v39, 16  ;;  %v922_v52 = vshll.u32 %v12546_v37, 16  ;;  %v931_v53 = vshll.u32 %v12547_v39, 16  ;;  %v936_v54 = vshrl.u32 %v12548_v43, 16 }
  0x7d   : > { %v913_v51 = vrot.slane %v911_v41, 7  ;;  %v1439_v57 = vrot.slane %v1437_v44, 5  ;;  %v921_v58 = vrot.slane %v919_v47, 7  ;;  %v939_v13 = vshll.u32 %v12548_v43, 16 }
  0x7e   : > { %v930_v62 = vrot.slane %v928_v50, 7  ;;  %2050 = vrot.lane.b32.xlu0 %v11808_v40, %s18905_s24  ;;  %v938_v12 = vrot.slane %v936_v54, 7  ;;  %v12549_v29 = vpack.c.bf16 %v667_v61, %v667_v61  ;;  %v12550_v33 = vpack.c.bf16 %v668_v22, %v668_v22 }
  0x7f   : > { %2305 = vrot.lane.b32.xlu1 %v14296_v34, %s18848_s28  ;;  %v14307_v63 = vld [vmem:[#allocation2 + $0x34] sm:$0xf]  ;;  %v916_v4 = vor.u32 %v914_v42, %v913_v51  ;;  %v917_v10 = vrot.slane %v913_v51, 4  ;;  %v924_v18 = vor.u32 %v922_v52, %v921_v58  ;;  %v926_v19 = vrot.slane %v921_v58, 4 }
  0x80   : > { %v1447_v7 = vshrl.u32 %v14307_v63, 16  ;;  %v1443_v11 = vshll.u32 %v14307_v63, 16  ;;  %v933_v20 = vor.u32 %v931_v53, %v930_v62  ;;  %v1440_v21 = vor.u32 %v1439_v57, %v1436_v56 }
  0x81   : > { %v14312_v14 = vld [vmem:[#allocation2 + $0x38] sm:$0x1]  ;;  %v1197_v15 = vsel %vm14129_vm11, %v916_v4, %v1196_v48  ;;  %v925_v26 = vsel %vm14143_vm13, %v917_v10, %v924_v18  ;;  %v1201_v27 = vsel %vm14160_vm14, %v926_v19, %v1200_v60  ;;  %v934_v32 = vrot.slane %v930_v62, 4 }
  0x82   : > { %v1445_v24 = vrot.slane %v1443_v11, 5  ;;  %v1449_v59 = vrot.slane %v1447_v7, 4  ;;  %v1453_v2 = vshll.u32 %v14312_v14, 16  ;;  %1198 = vst [vmem:[#allocation2 + $0x3c] sm:$0xf] %v1197_v15  ;;  %2198 = vrot.lane.b32.xlu0 %v11808_v40, %s18846_s0  ;;  %v941_v44 = vor.u32 %v939_v13, %v938_v12 }
  0x83   : > { %2052 = vrot.lane.b32.xlu1 %v14268_v16, %s18905_s24  ;;  %1199 = vst.msk [vmem:[#allocation2 + $0x40] sm:$0xf] %vm687_vm0, %v925_v26  ;;  %1202 = vst [vmem:[#allocation2 + $0x44] sm:$0x1] %v1201_v27  ;;  %v1204_v55 = vsel %vm14129_vm11, %v933_v20, %v1203_v25  ;;  %v943_v45 = vrot.slane %v938_v12, 4  ;;  %v1441_v35 = vrot.slane %v1440_v21, 4  ;;  %v14340_v48 = vcombine.low %v14270_v23, %v14307_v63 }
  0x84   : > { %v1450_v31 = vor.u32 %v1449_v59, %v1445_v24  ;;  %v1455_v37 = vrot.slane %v1453_v2, 5  ;;  %v1802_v39 = vrot.slane %v14307_v63, 5  ;;  %1205 = vst [vmem:[#allocation2 + $0x48] sm:$0xf] %v1204_v55  ;;  %v942_v41 = vsel %vm14143_vm13, %v934_v32, %v941_v44  ;;  %v669_v63 = vld [vmem:[%s14107_s4 + $0x70] sm:$0xff]  ;;  %v670_v2 = vld [vmem:[%s14107_s4 + $0x78] sm:$0xff] }
  0x85   : > { %v1208_v42 = vsel %vm14160_vm14, %v943_v45, %v1207_v28  ;;  %v945_v43 = vshrl.u32 %v12549_v29, 16  ;;  %1206 = vst.msk [vmem:[#allocation2 + $0x4c] sm:$0xf] %vm687_vm0, %v942_v41  ;;  %v953_v47 = vshrl.u32 %v12550_v33, 16  ;;  %v11777_v50 = vrot.slane %v14270_v23, 9  ;;  %v671_v55 = vld [vmem:[%s14107_s4 + $0x80] sm:$0xff] }
  0x86   : > { %2303 = vrot.lane.b32.xlu0 %v14268_v16, %s18848_s28  ;;  %v1451_v40 = vrot.slane %v1450_v31, 4  ;;  %1209 = vst [vmem:[#allocation2 + $0x50] sm:$0x1] %v1208_v42  ;;  %v1804_v52 = vrot.slane %v1802_v39, 4  ;;  %v1805_v53 = vrot.slane %v14312_v14, 5  ;;  %v1446_v23 = vsel %vm14135_vm12, %v1441_v35, %v1445_v24  ;;  %s18908_s28 = smov 48  }
  0x87   : > { %2054 = vrot.lane.b32.xlu1 %v14296_v34, %s18905_s24  ;;  %v947_v60 = vrot.slane %v945_v43, 7  ;;  %v956_v62 = vshll.u32 %v12550_v33, 16  ;;  %v955_v7 = vrot.slane %v953_v47, 7  ;;  %v948_v12 = vshll.u32 %v12549_v29, 16  ;;  %v1210_v27 = vld [vmem:[#allocation2 + $0x54] sm:$0xf] }
  0x88   : > { %v1456_v57 = vsel %vm14135_vm12, %v1451_v40, %v1455_v37  ;;  %v12551_v14 = vpack.c.bf16 %v669_v63, %v669_v63  ;;  %v1803_v15 = vsel %vm14100_vm8, %v11777_v50, %v1802_v39  ;;  %v1806_v19 = vsel %vm14100_vm8, %v1804_v52, %v1805_v53  ;;  %v1214_v28 = vld [vmem:[#allocation2 + $0x5c] sm:$0x1]  ;;  %v1217_v50 = vld [vmem:[#allocation2 + $0x60] sm:$0xf] }
  0x89   : > { %v14343_v16 = vld [vmem:[#allocation2 + $0x3c] sm:$0xf]  ;;  %v14369_v18 = vcombine.low %v1446_v23, %v1456_v57  ;;  %v951_v24 = vrot.slane %v947_v60, 4  ;;  %v958_v59 = vor.u32 %v956_v62, %v955_v7  ;;  %v950_v26 = vor.u32 %v948_v12, %v947_v60 }
  0x8a   : > { %v1458_v54 = vshrl.u32 %v14343_v16, 16  ;;  %v1461_v56 = vshll.u32 %v14343_v16, 16  ;;  %2132 = vrot.lane.b32.xlu0 %v14251_v3, %s18844_s23  ;;  %v14358_v58 = vld [vmem:[#allocation2 + $0x40] sm:$0xf]  ;;  %v14362_v11 = vld [vmem:[#allocation2 + $0x44] sm:$0x1]  ;;  %v14381_v31 = vcombine.low %v1803_v15, %v1806_v19  ;;  %v12552_v33 = vpack.c.bf16 %v670_v2, %v670_v2 }
  0x8b   : > { %2134 = vrot.lane.b32.xlu1 %v14262_v17, %s18844_s23  ;;  %v1471_v4 = vshrl.u32 %v14358_v58, 16  ;;  %v1467_v3 = vshll.u32 %v14358_v58, 16  ;;  %s18906_s23 = smov 24   ;;  %v1477_v21 = vshll.u32 %v14362_v11, 16  ;;  %v960_v29 = vrot.slane %v955_v7, 4 }
  0x8c   : > { %v1460_v10 = vrot.slane %v1458_v54, 4  ;;  %v1463_v61 = vrot.slane %v1461_v56, 5  ;;  %v1809_v32 = vrot.slane %v14358_v58, 5  ;;  %v962_v44 = vshrl.u32 %v12551_v14, 16  ;;  %v14403_v56 = vld [vmem:[#allocation2 + $0x48] sm:$0xf] }
  0x8d   : > { %v1473_v13 = vrot.slane %v1471_v4, 4  ;;  %v1469_v20 = vrot.slane %v1467_v3, 5  ;;  %v1479_v37 = vrot.slane %v1477_v21, 5  ;;  %v959_v39 = vsel %vm14143_vm13, %v951_v24, %v958_v59  ;;  %v14409_v60 = vld [vmem:[#allocation2 + $0x4c] sm:$0xf] }
  0x8e   : > { %2167 = vrot.lane.b32.xlu0 %v14230_v30, %s18906_s23  ;;  %v1464_v22 = vor.u32 %v1463_v61, %v1460_v10  ;;  %v1211_v40 = vsel %vm14129_vm11, %v950_v26, %v1210_v27  ;;  %1213 = vst.msk [vmem:[#allocation2 + $0x58] sm:$0xf] %vm687_vm0, %v959_v39  ;;  %v965_v41 = vshll.u32 %v12551_v14, 16  ;;  %v14393_v42 = vcombine.low %v14343_v16, %v14358_v58  ;;  %v1221_v59 = vld [vmem:[#allocation2 + $0x68] sm:$0x1] }
  0x8f   : > { %2169 = vrot.lane.b32.xlu1 %v14340_v48, %s18906_s23  ;;  %v1474_v25 = vor.u32 %v1473_v13, %v1469_v20  ;;  %v11778_v43 = vrot.slane %v14343_v16, 9  ;;  %1212 = vst [vmem:[#allocation2 + $0x54] sm:$0xf] %v1211_v40  ;;  %v1215_v47 = vsel %vm14160_vm14, %v960_v29, %v1214_v28  ;;  %v12553_v52 = vpack.c.bf16 %v671_v55, %v671_v55  ;;  %v1228_v39 = vld [vmem:[#allocation2 + $0x74] sm:$0x1] }
  0x90   : > { %v1465_v45 = vrot.slane %v1464_v22, 4  ;;  %v1811_v53 = vrot.slane %v1809_v32, 4  ;;  %v1812_v54 = vrot.slane %v14362_v11, 5  ;;  %1216 = vst [vmem:[#allocation2 + $0x5c] sm:$0x1] %v1215_v47  ;;  %v964_v23 = vrot.slane %v962_v44, 7 }
  0x91   : > { %v1475_v35 = vrot.slane %v1474_v25, 4  ;;  %v970_v16 = vshrl.u32 %v12552_v33, 16  ;;  %v973_v4 = vshll.u32 %v12552_v33, 16  ;;  %v979_v61 = vshrl.u32 %v12553_v52, 16 }
  0x92   : > { %2202 = vrot.lane.b32.xlu0 %v14296_v34, %s18846_s0  ;;  %v672_v34 = vld [vmem:[%s14107_s4 + $0x88] sm:$0xff]  ;;  %v1470_v57 = vsel %vm14135_vm12, %v1465_v45, %v1469_v20  ;;  %v967_v63 = vor.u32 %v965_v41, %v964_v23  ;;  %v1485_v11 = vshll.u32 %v14403_v56, 16  ;;  %v1810_v13 = vsel %vm14100_vm8, %v11778_v43, %v1809_v32  ;;  %v14427_v20 = vld [vmem:[#allocation2 + $0x50] sm:$0x1] }
  0x93   : > { %2204 = vrot.lane.b32.xlu1 %v14369_v18, %s18846_s0  ;;  %s18907_s0 = smov 40   ;;  %v1480_v58 = vsel %vm14135_vm12, %v1475_v35, %v1479_v37  ;;  %v12554_v62 = vpack.c.bf16 %v672_v34, %v672_v34  ;;  %v972_v10 = vrot.slane %v970_v16, 7  ;;  %v1813_v14 = vsel %vm14100_vm8, %v1811_v53, %v1812_v54  ;;  %v1224_v45 = vld [vmem:[#allocation2 + $0x6c] sm:$0xf] }
  0x94   : > { %v14416_v7 = vcombine.low %v1470_v57, %v1480_v58  ;;  %v1218_v3 = vsel %vm14129_vm11, %v967_v63, %v1217_v50  ;;  %v1495_v15 = vshrl.u32 %v14409_v60, 16  ;;  %v1491_v19 = vshll.u32 %v14409_v60, 16  ;;  %v673_v50 = vld [vmem:[%s14107_s4 + $0x90] sm:$0xff]  ;;  %v14458_v58 = vld [vmem:[%s18904_s1 + $0x20] ss:$0 sps:$4 sm:$0xff]   ;;  %s12533_s1 = sshll.u32 %s13860_s3, 4 }
  0x95   : > { %v987_v12 = vshrl.u32 %v12554_v62, 16  ;;  %1219 = vst [vmem:[#allocation2 + $0x60] sm:$0xf] %v1218_v3  ;;  %v968_v22 = vrot.slane %v964_v23, 4  ;;  %v975_v21 = vor.u32 %v973_v4, %v972_v10  ;;  %v977_v24 = vrot.slane %v972_v10, 4  ;;  %13346 = vmatprep.subr.msk.bf16.mxu0 %vm2719_vm15, %v14458_v58  ;;  %s13728_s3 = smov [#allocation8]  }
  0x96   : > { %2237 = vrot.lane.b32.xlu0 %v14262_v17, %s18907_s0  ;;  %v1482_v17 = vshrl.u32 %v14403_v56, 16  ;;  %v981_v2 = vrot.slane %v979_v61, 7  ;;  %v982_v25 = vshll.u32 %v12553_v52, 16  ;;  %v14433_v26 = vcombine.low %v1810_v13, %v1813_v14  ;;  %v14447_v34 = vld [vmem:[#allocation2 + $0x58] sm:$0xf] }
  0x97   : > { %2239 = vrot.lane.b32.xlu1 %v14381_v31, %s18907_s0  ;;  %v989_v28 = vrot.slane %v987_v12, 7  ;;  %v990_v29 = vshll.u32 %v12554_v62, 16  ;;  %v1487_v32 = vrot.slane %v1485_v11, 5  ;;  %v14435_v33 = vrot.slane %v1491_v19, 5  ;;  %v674_v52 = vld [vmem:[%s14107_s4 + $0x98] sm:$0xff] }
  0x98   : > { %v1484_v27 = vrot.slane %v1482_v17, 4  ;;  %v1497_v44 = vrot.slane %v1495_v15, 4  ;;  %v1501_v55 = vshll.u32 %v14427_v20, 16  ;;  %v976_v35 = vsel %vm14143_vm13, %v968_v22, %v975_v21  ;;  %v14453_v57 = vld [vmem:[#allocation2 + $0x54] sm:$0xf] }
  0x99   : > { %v1222_v37 = vsel %vm14160_vm14, %v977_v24, %v1221_v59  ;;  %1220 = vst.msk [vmem:[#allocation2 + $0x64] sm:$0xf] %vm687_vm0, %v976_v35  ;;  %v984_v40 = vor.u32 %v982_v25, %v981_v2  ;;  %v985_v41 = vrot.slane %v981_v2, 4  ;;  %v992_v43 = vor.u32 %v990_v29, %v989_v28  ;;  %v14489_v59 = vld [vmem:[#allocation2 + $0x5c] sm:$0x1] }
  0x9a   : > { %2272 = vrot.lane.b32.xlu0 %v14340_v48, %s18908_s28  ;;  %1223 = vst [vmem:[#allocation2 + $0x68] sm:$0x1] %v1222_v37  ;;  %v994_v47 = vrot.slane %v989_v28, 4  ;;  %v1488_v53 = vor.u32 %v1487_v32, %v1484_v27  ;;  %v1498_v54 = vor.u32 %v1497_v44, %v14435_v33  ;;  %v1503_v23 = vrot.slane %v1501_v55, 5 }
  0x9b   : > { %2274 = vrot.lane.b32.xlu1 %v14393_v42, %s18908_s28  ;;  %v1816_v16 = vrot.slane %v14409_v60, 5  ;;  %v993_v62 = vsel %vm14143_vm13, %v985_v41, %v992_v43  ;;  %v1225_v63 = vsel %vm14129_vm11, %v984_v40, %v1224_v45  ;;  %v1519_v17 = vshrl.u32 %v14447_v34, 16  ;;  %v1231_v40 = vld [vmem:[#allocation2 + $0x78] sm:$0xf]  ;;  %v675_v41 = vld [vmem:[%s14107_s4 + $0xa0] sm:$0xff] }
  0x9c   : > { %v1229_v4 = vsel %vm14160_vm14, %v994_v47, %v1228_v39  ;;  %v1515_v10 = vshll.u32 %v14447_v34, 16  ;;  %1226 = vst [vmem:[#allocation2 + $0x6c] sm:$0xf] %v1225_v63  ;;  %1227 = vst.msk [vmem:[#allocation2 + $0x70] sm:$0xf] %vm687_vm0, %v993_v62  ;;  %v12555_v61 = vpack.c.bf16 %v673_v50, %v673_v50  ;;  %v1506_v11 = vshrl.u32 %v14453_v57, 16 }
  0x9d   : > { %1230 = vst [vmem:[#allocation2 + $0x74] sm:$0x1] %v1229_v4  ;;  %v1509_v3 = vshll.u32 %v14453_v57, 16  ;;  %v1489_v12 = vrot.slane %v1488_v53, 4  ;;  %v1499_v13 = vrot.slane %v1498_v54, 4  ;;  %v12556_v14 = vpack.c.bf16 %v674_v52, %v674_v52  ;;  %v676_v52 = vld [vmem:[%s14107_s4 + $0xa8] sm:$0xff] }
  0x9e   : > { %2307 = vrot.lane.b32.xlu0 %v14369_v18, %s18909_s30  ;;  %v996_v15 = vshrl.u32 %v12555_v61, 16  ;;  %v14479_v19 = vcombine.low %v14403_v56, %v14409_v60  ;;  %v14481_v22 = vrot.slane %v1515_v10, 5  ;;  %v1521_v21 = vrot.slane %v1519_v17, 4  ;;  %v14511_v47 = vld [vmem:[#allocation2 + $0x60] sm:$0xf] }
  0x9f   : > { %2309 = vrot.lane.b32.xlu1 %v14416_v7, %s18909_s30  ;;  %v1819_v24 = vrot.slane %v14427_v20, 5  ;;  %v1508_v2 = vrot.slane %v1506_v11, 4  ;;  %v1511_v25 = vrot.slane %v1509_v3, 5  ;;  %v1494_v60 = vsel %vm14135_vm12, %v1489_v12, %v14435_v33  ;;  %v677_v3 = vld [vmem:[%s14107_s4 + $0xb0] sm:$0xff] }
  0xa0   : > { %v1504_v27 = vsel %vm14135_vm12, %v1499_v13, %v1503_v23  ;;  %v1818_v28 = vrot.slane %v1816_v16, 4  ;;  %v1004_v29 = vshrl.u32 %v12556_v14, 16  ;;  %v998_v32 = vrot.slane %v996_v15, 7  ;;  %v1235_v23 = vld [vmem:[#allocation2 + $0x80] sm:$0x1] }
  0xa1   : > { %v1525_v20 = vshll.u32 %v14489_v59, 16  ;;  %v14502_v33 = vcombine.low %v1494_v60, %v1504_v27  ;;  %v1512_v55 = vor.u32 %v1511_v25, %v1508_v2  ;;  %v1823_v35 = vrot.slane %v14447_v34, 5  ;;  %v14526_v13 = vld [vmem:[#allocation2 + $0x64] sm:$0xf]  ;;  %v678_v25 = vld [vmem:[%s14107_s4 + $0xb8] sm:$0xff] }
  0xa2   : > { %2342 = vrot.lane.b32.xlu0 %v14381_v31, %s18910_s26  ;;  %v1820_v45 = vsel %vm14100_vm8, %v1818_v28, %v1819_v24  ;;  %v1006_v37 = vrot.slane %v1004_v29, 7  ;;  %v1007_v39 = vshll.u32 %v12556_v14, 16  ;;  %v11780_v43 = vrot.slane %v14453_v57, 9  ;;  %v1238_v29 = vld [vmem:[#allocation2 + $0x84] sm:$0xf] }
  0xa3   : > { %2344 = vrot.lane.b32.xlu1 %v14433_v26, %s18910_s26  ;;  %v1527_v54 = vrot.slane %v1525_v20, 5  ;;  %v1513_v62 = vrot.slane %v1512_v55, 4  ;;  %v1002_v63 = vrot.slane %v998_v32, 4  ;;  %v12557_v4 = vpack.c.bf16 %v675_v41, %v675_v41  ;;  %v679_v20 = vld [vmem:[%s14107_s4 + $0xc0] sm:$0xff] }
  0xa4   : > { %v1825_v17 = vrot.slane %v1823_v35, 4  ;;  %v1530_v10 = vshrl.u32 %v14511_v47, 16  ;;  %v12558_v11 = vpack.c.bf16 %v676_v52, %v676_v52  ;;  %v14524_v12 = vcombine.low %v14453_v57, %v14447_v34  ;;  %v14564_v52 = vld [vmem:[#allocation2 + $0x68] sm:$0x1] }
  0xa5   : > { %v1011_v15 = vrot.slane %v1006_v37, 4  ;;  %v2721_v34 = vsel %vm2719_vm15, %v14458_v58, 0  ;;  %v1518_v57 = vsel %vm14135_vm12, %v1513_v62, %v14481_v22  ;;  %v1013_v58 = vshrl.u32 %v12557_v4, 16 }
  0xa6   : > { %2056 = vrot.lane.b32.xlu0 %v14369_v18, %s18905_s24  ;;  %v11779_v18 = vrot.slane %v14403_v56, 9  ;;  %v1522_v56 = vor.u32 %v1521_v21, %v14481_v22  ;;  %v1824_v21 = vsel %vm14100_vm8, %v11780_v43, %v1823_v35  ;;  %v1532_v60 = vrot.slane %v1530_v10, 4  ;;  %13158 = vmatpush3.bf16.msra.mxu0 %v2721_v34 }
  0xa7   : > { %2058 = vrot.lane.b32.xlu1 %v14416_v7, %s18905_s24  ;;  %v1236_v2 = vsel %vm14160_vm14, %v1011_v15, %v1235_v23  ;;  %v1016_v27 = vshll.u32 %v12557_v4, 16  ;;  %v1024_v28 = vshll.u32 %v12558_v11, 16  ;;  %v1543_v22 = vshrl.u32 %v14526_v13, 16  ;;  %v14578_v15 = vld [vmem:[#allocation2 + $0x6c] sm:$0xf] }
  0xa8   : > { %v1817_v44 = vsel %vm14100_vm8, %v11779_v18, %v1816_v16  ;;  %v1523_v53 = vrot.slane %v1522_v56, 4  ;;  %v1826_v18 = vrot.slane %v14489_v59, 5  ;;  %1237 = vst [vmem:[#allocation2 + $0x80] sm:$0x1] %v1236_v2  ;;  %v12559_v56 = vpack.c.bf16 %v677_v3, %v677_v3 }
  0xa9   : > { %v14518_v16 = vcombine.low %v1817_v44, %v1820_v45  ;;  %v1539_v45 = vshll.u32 %v14526_v13, 16  ;;  %vm2686_vm15 = vcmask 588800  }
  0xaa   : > { %2136 = vrot.lane.b32.xlu0 %v14381_v31, %s18911_s29  ;;  %v999_v31 = vshll.u32 %v12555_v61, 16  ;;  %v1009_v61 = vor.u32 %v1007_v39, %v1006_v37  ;;  %v1528_v59 = vsel %vm14135_vm12, %v1523_v53, %v1527_v54  ;;  %v1827_v55 = vsel %vm14100_vm8, %v1825_v17, %v1826_v18  ;;  %v680_v18 = vld [vmem:[%s14107_s4 + $0xc8] sm:$0xff] }
  0xab   : > { %2138 = vrot.lane.b32.xlu1 %v14433_v26, %s18911_s29  ;;  %v14553_v44 = vcombine.low %v1518_v57, %v1528_v59  ;;  %v1030_v41 = vshrl.u32 %v12559_v56, 16  ;;  %v12561_v54 = vpack.c.bf16 %v679_v20, %v679_v20  ;;  %v1033_v4 = vshll.u32 %v12559_v56, 16 }
  0xac   : > { %v1001_v50 = vor.u32 %v999_v31, %v998_v32  ;;  %v1010_v24 = vsel %vm14143_vm13, %v1002_v63, %v1009_v61  ;;  %v1015_v31 = vrot.slane %v1013_v58, 7  ;;  %v14574_v10 = vrot.slane %v1539_v45, 5  ;;  %v14588_v58 = vld [vmem:[#allocation2 + $0x70] sm:$0xf] }
  0xad   : > { %1234 = vst.msk [vmem:[#allocation2 + $0x7c] sm:$0xf] %vm687_vm0, %v1010_v24  ;;  %v1032_v63 = vrot.slane %v1030_v41, 7  ;;  %v1545_v61 = vrot.slane %v1543_v22, 4  ;;  %v1047_v57 = vshrl.u32 %v12561_v54, 16  ;;  %v1557_v56 = vshll.u32 %v14578_v15, 16 }
  0xae   : > { %2171 = vrot.lane.b32.xlu0 %v14393_v42, %s18906_s23  ;;  %v1232_v14 = vsel %vm14129_vm11, %v1001_v50, %v1231_v40  ;;  %v1018_v37 = vor.u32 %v1016_v27, %v1015_v31  ;;  %v1019_v39 = vrot.slane %v1015_v31, 4  ;;  %v12560_v40 = vpack.c.bf16 %v678_v25, %v678_v25 }
  0xaf   : > { %2173 = vrot.lane.b32.xlu1 %v14479_v19, %s18906_s23  ;;  %1233 = vst [vmem:[#allocation2 + $0x78] sm:$0xf] %v1232_v14  ;;  %v14562_v50 = vcombine.low %v1824_v21, %v1827_v55  ;;  %v1245_v14 = vld [vmem:[#allocation2 + $0x90] sm:$0xf]  ;;  %v1035_v34 = vor.u32 %v1033_v4, %v1032_v63  ;;  %v1546_v2 = vor.u32 %v1545_v61, %v14574_v10  ;;  %v1830_v27 = vrot.slane %v14526_v13, 5 }
  0xb0   : > { %v1239_v53 = vsel %vm14129_vm11, %v1018_v37, %v1238_v29  ;;  %v1038_v3 = vshrl.u32 %v12560_v40, 16  ;;  %v1041_v21 = vshll.u32 %v12560_v40, 16  ;;  %v1554_v29 = vshrl.u32 %v14578_v15, 16  ;;  %v1249_v55 = vld [vmem:[#allocation2 + $0x98] sm:$0x1] }
  0xb1   : > { %1240 = vst [vmem:[#allocation2 + $0x84] sm:$0xf] %v1239_v53  ;;  %v1036_v22 = vrot.slane %v1032_v63, 4  ;;  %v1567_v20 = vshrl.u32 %v14588_v58, 16  ;;  %v1049_v45 = vrot.slane %v1047_v57, 7  ;;  %v1547_v37 = vrot.slane %v1546_v2, 4 }
  0xb2   : > { %2206 = vrot.lane.b32.xlu0 %v14416_v7, %s18912_s22  ;;  %v1533_v7 = vshll.u32 %v14511_v47, 16  ;;  %v1040_v25 = vrot.slane %v1038_v3, 7  ;;  %v11781_v40 = vrot.slane %v14511_v47, 9  ;;  %v1832_v53 = vrot.slane %v1830_v27, 4  ;;  %v681_v57 = vld [vmem:[%s14107_s4 + $0xd0] sm:$0xff] }
  0xb3   : > { %2208 = vrot.lane.b32.xlu1 %v14502_v33, %s18912_s22  ;;  %v14609_v63 = vcombine.low %v14511_v47, %v14526_v13  ;;  %v1556_v4 = vrot.slane %v1554_v29, 4 }
  0xb4   : > { %v1535_v32 = vrot.slane %v1533_v7, 5  ;;  %v1549_v7 = vshll.u32 %v14564_v52, 16  ;;  %v1045_v31 = vrot.slane %v1040_v25, 4 }
  0xb6   : > { %2241 = vrot.lane.b32.xlu0 %v14433_v26, %s18907_s0  ;;  %v1021_v26 = vshrl.u32 %v12558_v11, 16  ;;  %v1536_v17 = vor.u32 %v1535_v32, %v1532_v60  ;;  %v1242_v11 = vld [vmem:[#allocation2 + $0x8c] sm:$0x1]  ;;  %v1551_v60 = vrot.slane %v1549_v7, 5  ;;  %v1043_v32 = vor.u32 %v1041_v21, %v1040_v25  ;;  %v14625_v3 = vld [vmem:[#allocation2 + $0x78] sm:$0xf] }
  0xb7   : > { %2243 = vrot.lane.b32.xlu1 %v14518_v16, %s18907_s0 }
  0xb8   : > { %v1023_v35 = vrot.slane %v1021_v26, 7  ;;  %v1537_v59 = vrot.slane %v1536_v17, 4  ;;  %v1246_v26 = vsel %vm14129_vm11, %v1035_v34, %v1245_v14  ;;  %v1559_v17 = vrot.slane %v1557_v56, 5 }
  0xb9   : > { %1247 = vst [vmem:[#allocation2 + $0x90] sm:$0xf] %v1246_v26  ;;  %v1552_v13 = vsel %vm14135_vm12, %v1547_v37, %v1551_v60  ;;  %v1053_v34 = vrot.slane %v1049_v45, 4  ;;  %v1578_v60 = vshrl.u32 %v14625_v3, 16  ;;  %v1581_v26 = vshll.u32 %v14625_v3, 16 }
  0xba   : > { %2276 = vrot.lane.b32.xlu0 %v14479_v19, %s18908_s28  ;;  %v1026_v43 = vor.u32 %v1024_v28, %v1023_v35  ;;  %v1028_v62 = vrot.slane %v1023_v35, 4  ;;  %v12562_v28 = vpack.c.bf16 %v680_v18, %v680_v18  ;;  %v1050_v35 = vshll.u32 %v12561_v54, 16  ;;  %v1256_v18 = vld [vmem:[#allocation2 + $0xa4] sm:$0x1] }
  0xbb   : > { %2278 = vrot.lane.b32.xlu1 %v14524_v12, %s18908_s28  ;;  %v1250_v54 = vsel %vm14160_vm14, %v1045_v31, %v1249_v55  ;;  %v1542_v47 = vsel %vm14135_vm12, %v1537_v59, %v14574_v10  ;;  %v1560_v2 = vor.u32 %v1559_v17, %v1556_v4  ;;  %v12563_v31 = vpack.c.bf16 %v681_v57, %v681_v57  ;;  %v14665_v4 = vld [vmem:[#allocation2 + $0x80] sm:$0x1] }
  0xbc   : > { %v1027_v23 = vsel %vm14143_vm13, %v1019_v39, %v1026_v43  ;;  %v1243_v24 = vsel %vm14160_vm14, %v1028_v62, %v1242_v11  ;;  %v1563_v39 = vshll.u32 %v14588_v58, 16  ;;  %v1055_v41 = vshrl.u32 %v12562_v28, 16  ;;  %v1252_v43 = vld [vmem:[#allocation2 + $0x9c] sm:$0xf]  ;;  %1251 = vst [vmem:[#allocation2 + $0x98] sm:$0x1] %v1250_v54 }
  0xbd   : > { %1241 = vst.msk [vmem:[#allocation2 + $0x88] sm:$0xf] %vm687_vm0, %v1027_v23  ;;  %1244 = vst [vmem:[#allocation2 + $0x8c] sm:$0x1] %v1243_v24  ;;  %v1833_v23 = vrot.slane %v14564_v52, 5  ;;  %v1044_v62 = vsel %vm14143_vm13, %v1036_v22, %v1043_v32  ;;  %v1052_v61 = vor.u32 %v1050_v35, %v1049_v45  ;;  %v1569_v11 = vrot.slane %v1567_v20, 4 }
  0xbe   : > { %2311 = vrot.lane.b32.xlu0 %v14502_v33, %s18909_s30  ;;  %1248 = vst.msk [vmem:[#allocation2 + $0x94] sm:$0xf] %vm687_vm0, %v1044_v62  ;;  %v14623_v52 = vrot.slane %v1563_v39, 5  ;;  %v1057_v7 = vrot.slane %v1055_v41, 7  ;;  %v1058_v14 = vshll.u32 %v12562_v28, 16  ;;  %v14636_v59 = vcombine.low %v1542_v47, %v1552_v13  ;;  %v682_v35 = vld [vmem:[%s14107_s4 + $0xd8] sm:$0xff] }
  0xbf   : > { %2313 = vrot.lane.b32.xlu1 %v14553_v44, %s18909_s30  ;;  %v1253_v21 = vsel %vm14129_vm11, %v1052_v61, %v1252_v43  ;;  %v1834_v10 = vsel %vm14100_vm8, %v1832_v53, %v1833_v23  ;;  %v14633_v24 = vld [vmem:[#allocation2 + $0x7c] sm:$0xf]  ;;  %v1837_v45 = vrot.slane %v14588_v58, 5  ;;  %v1561_v37 = vrot.slane %v1560_v2, 4 }
  0xc0   : > { %1254 = vst [vmem:[#allocation2 + $0x9c] sm:$0xf] %v1253_v21  ;;  %v1060_v28 = vor.u32 %v1058_v14, %v1057_v7  ;;  %v1062_v29 = vrot.slane %v1057_v7, 4  ;;  %v1591_v22 = vshrl.u32 %v14633_v24, 16  ;;  %v1587_v32 = vshll.u32 %v14633_v24, 16 }
  0xc1   : > { %v1580_v41 = vrot.slane %v1578_v60, 4  ;;  %v1583_v43 = vrot.slane %v1581_v26, 5  ;;  %v1064_v62 = vshrl.u32 %v12563_v31, 16  ;;  %v12564_v17 = vpack.c.bf16 %v682_v35, %v682_v35 }
  0xc2   : > { %2346 = vrot.lane.b32.xlu0 %v14518_v16, %s18910_s26  ;;  %v1061_v56 = vsel %vm14143_vm13, %v1053_v34, %v1060_v28  ;;  %v1257_v20 = vsel %vm14160_vm14, %v1062_v29, %v1256_v18  ;;  %v14661_v53 = vrot.slane %v1587_v32, 5  ;;  %v1593_v23 = vrot.slane %v1591_v22, 4  ;;  %v14687_v34 = vld [vmem:[#allocation2 + $0x84] sm:$0xf]  ;;  %v1259_v28 = vld [vmem:[#allocation2 + $0xa8] sm:$0xf] }
  0xc3   : > { %2348 = vrot.lane.b32.xlu1 %v14562_v50, %s18910_s26  ;;  %1255 = vst.msk [vmem:[#allocation2 + $0xa0] sm:$0xf] %vm687_vm0, %v1061_v56  ;;  %1258 = vst [vmem:[#allocation2 + $0xa4] sm:$0x1] %v1257_v20  ;;  %v11782_v61 = vrot.slane %v14578_v15, 9  ;;  %v1839_v47 = vrot.slane %v1837_v45, 4  ;;  %v1566_v7 = vsel %vm14135_vm12, %v1561_v37, %v14623_v52  ;;  %v1584_v18 = vor.u32 %v1583_v43, %v1580_v41 }
  0xc4   : > { %v1066_v14 = vrot.slane %v1064_v62, 7  ;;  %v1067_v21 = vshll.u32 %v12563_v31, 16  ;;  %v14694_v2 = vld [vmem:[#allocation2 + $0x88] sm:$0xf]  ;;  %v685_v22 = vld [vmem:[%s14107_s4 + $0xf0] sm:$0xff]  ;;  %v1602_v20 = vshrl.u32 %v14687_v34, 16 }
  0xc5   : > { %v1838_v57 = vsel %vm14100_vm8, %v11782_v61, %v1837_v45  ;;  %v14706_v32 = vrot.slane %v1584_v18, 4  ;;  %v1263_v45 = vld [vmem:[#allocation2 + $0xb0] sm:$0x1]  ;;  %v1605_v37 = vshll.u32 %v14687_v34, 16  ;;  %v686_v43 = vld [vmem:[%s14107_s4 + $0xf8] sm:$0xff]  ;;  %v1075_v62 = vshll.u32 %v12564_v17, 16 }
  0xc6   : > { %2060 = vrot.lane.b32.xlu0 %v14502_v33, %s18905_s24  ;;  %v14611_v33 = vld [vmem:[#allocation2 + $0x74] sm:$0x1]  ;;  %v1069_v26 = vor.u32 %v1067_v21, %v1066_v14  ;;  %v12567_v61 = vpack.c.bf16 %v685_v22, %v685_v22  ;;  %v12568_v22 = vpack.c.bf16 %v686_v43, %v686_v43 }
  0xc7   : > { %2062 = vrot.lane.b32.xlu1 %v14553_v44, %s18905_s24  ;;  %v1573_v25 = vshll.u32 %v14611_v33, 16  ;;  %v1590_v36 = vsel %vm14135_vm12, %v14706_v32, %v14661_v53 }
  0xca   : > { %2140 = vrot.lane.b32.xlu0 %v14518_v16, %s18911_s29  ;;  %v1831_v16 = vsel %vm14100_vm8, %v11781_v40, %v1830_v27  ;;  %v1570_v27 = vor.u32 %v1569_v11, %v14623_v52  ;;  %v1575_v40 = vrot.slane %v1573_v25, 5  ;;  %v14677_v11 = vcombine.low %v14578_v15, %v14588_v58  ;;  %v684_v58 = vld [vmem:[%s14107_s4 + $0xe8] sm:$0xff] }
  0xcb   : > { %2142 = vrot.lane.b32.xlu1 %v14562_v50, %s18911_s29  ;;  %v14652_v55 = vcombine.low %v1831_v16, %v1834_v10  ;;  %v1594_v16 = vor.u32 %v1593_v23, %v14661_v53  ;;  %v683_v10 = vld [vmem:[%s14107_s4 + $0xe0] sm:$0xff]  ;;  %v1072_v15 = vshrl.u32 %v12564_v17, 16  ;;  %v12566_v41 = vpack.c.bf16 %v684_v58, %v684_v58  ;;  %v1266_v17 = vld [vmem:[#allocation2 + $0xb4] sm:$0xf]  ;;  %s18935_s4 = smov 96  }
  0xcc   : > { %v1571_v39 = vrot.slane %v1570_v27, 4  ;;  %v12565_v29 = vpack.c.bf16 %v683_v10, %v683_v10  ;;  %v1070_v23 = vrot.slane %v1066_v14, 4  ;;  %v14731_v10 = vld [vmem:[#allocation2 + $0x90] sm:$0xf] }
  0xcd   : > { %v14708_v31 = vrot.slane %v1594_v16, 4 }
  0xce   : > { %2175 = vrot.lane.b32.xlu0 %v14524_v12, %s18906_s23  ;;  %v1081_v21 = vshrl.u32 %v12565_v29, 16  ;;  %v1084_v14 = vshll.u32 %v12565_v29, 16  ;;  %v1270_v29 = vld [vmem:[#allocation2 + $0xbc] sm:$0x1] }
  0xcf   : > { %2177 = vrot.lane.b32.xlu1 %v14609_v63, %s18906_s23 }
  0xd0   : > { %v14663_v54 = vpop.permute.xlu1 %2128  ;;  %v1083_v58 = vrot.slane %v1081_v21, 7  ;;  %v1109_v21 = vshll.u32 %v12568_v22, 16 }
  0xd2   : > { %2210 = vrot.lane.b32.xlu0 %v14553_v44, %s18912_s22  ;;  %v1840_v44 = vrot.slane %v14611_v33, 5  ;;  %v14673_v13 = vpop.permute.xlu0 %2048  ;;  %v1576_v33 = vsel %vm14135_vm12, %v1571_v39, %v1575_v40  ;;  %v1615_v39 = vshrl.u32 %v14694_v2, 16  ;;  %v1074_v40 = vrot.slane %v1072_v15, 7 }
  0xd3   : > { %2212 = vrot.lane.b32.xlu1 %v14636_v59, %s18912_s22  ;;  %v14702_v60 = vcombine.low %v1566_v7, %v1576_v33  ;;  %v1611_v33 = vshll.u32 %v14694_v2, 16 }
  0xd4   : > { %v1841_v52 = vsel %vm14100_vm8, %v1839_v47, %v1840_v44  ;;  %v1260_v44 = vsel %vm14129_vm11, %v1069_v26, %v1259_v28  ;;  %v1079_v7 = vrot.slane %v1074_v40, 4  ;;  %v1077_v18 = vor.u32 %v1075_v62, %v1074_v40 }
  0xd5   : > { %v14722_v47 = vcombine.low %v1838_v57, %v1841_v52  ;;  %1261 = vst [vmem:[#allocation2 + $0xa8] sm:$0xf] %v1260_v44  ;;  %v1089_v57 = vshrl.u32 %v12566_v41, 16  ;;  %v1092_v52 = vshll.u32 %v12566_v41, 16  ;;  %v14735_v26 = vrot.slane %v1602_v20, 4 }
  0xd6   : > { %2245 = vrot.lane.b32.xlu0 %v14562_v50, %s18907_s0  ;;  %v1597_v50 = vshll.u32 %v14665_v4, 16  ;;  %v1264_v15 = vsel %vm14160_vm14, %v1079_v7, %v1263_v45  ;;  %v1078_v28 = vsel %vm14143_vm13, %v1070_v23, %v1077_v18  ;;  %v1098_v40 = vshrl.u32 %v12567_v61, 16  ;;  %v1273_v23 = vld [vmem:[#allocation2 + $0xc0] sm:$0xf] }
  0xd7   : > { %2247 = vrot.lane.b32.xlu1 %v14652_v55, %s18907_s0  ;;  %1265 = vst [vmem:[#allocation2 + $0xb0] sm:$0x1] %v1264_v15  ;;  %1262 = vst.msk [vmem:[#allocation2 + $0xac] sm:$0xf] %vm687_vm0, %v1078_v28  ;;  %v1086_v45 = vor.u32 %v1084_v14, %v1083_v58  ;;  %v1087_v62 = vrot.slane %v1083_v58, 4  ;;  %v1091_v41 = vrot.slane %v1089_v57, 7 }
  0xd8   : > { %v14710_v56 = vrot.slane %v1597_v50, 5  ;;  %v1100_v20 = vrot.slane %v1098_v40, 7  ;;  %v1101_v44 = vshll.u32 %v12567_v61, 16  ;;  %v1106_v7 = vshrl.u32 %v12568_v22, 16 }
  0xd9   : > { %v1607_v15 = vrot.slane %v1605_v37, 5  ;;  %v1094_v0 = vor.u32 %v1092_v52, %v1091_v41  ;;  %v1267_v51 = vsel %vm14129_vm11, %v1086_v45, %v1266_v17  ;;  %v1096_v27 = vrot.slane %v1091_v41, 4  ;;  %v1277_v41 = vld [vmem:[#allocation2 + $0xc8] sm:$0x1] }
  0xda   : > { %2280 = vrot.lane.b32.xlu0 %v14609_v63, %s18908_s28  ;;  %v1626_v14 = vshrl.u32 %v14731_v10, 16  ;;  %v1629_v58 = vshll.u32 %v14731_v10, 16  ;;  %1268 = vst [vmem:[#allocation2 + $0xb4] sm:$0xf] %v1267_v51  ;;  %v1103_v61 = vor.u32 %v1101_v44, %v1100_v20  ;;  %v1108_v57 = vrot.slane %v1106_v7, 7 }
  0xdb   : > { %2282 = vrot.lane.b32.xlu1 %v14677_v11, %s18908_s28  ;;  %v14700_v25 = vpop.permute.xlu1 %2165  ;;  %v14756_v28 = vrot.slane %v1611_v33, 5  ;;  %v1617_v37 = vrot.slane %v1615_v39, 4  ;;  %v1095_v17 = vsel %vm14143_vm13, %v1087_v62, %v1094_v0  ;;  %v1271_v52 = vsel %vm14160_vm14, %v1096_v27, %v1270_v29 }
  0xdc   : > { %v14713_v35 = vpop.permute.xlu0 %2163  ;;  %v11783_v51 = vrot.slane %v14625_v3, 9  ;;  %v1847_v22 = vrot.slane %v14665_v4, 5  ;;  %1269 = vst.msk [vmem:[#allocation2 + $0xb8] sm:$0xf] %vm687_vm0, %v1095_v17  ;;  %1272 = vst [vmem:[#allocation2 + $0xbc] sm:$0x1] %v1271_v52  ;;  %v1111_v45 = vor.u32 %v1109_v21, %v1108_v57  ;;  %v1274_v27 = vsel %vm14129_vm11, %v1103_v61, %v1273_v23 }
  0xdd   : > { %v1104_v40 = vrot.slane %v1100_v20, 4  ;;  %v18913_v39 = vrot.slane %v14633_v24, 5  ;;  %v1851_v62 = vrot.slane %v14694_v2, 5  ;;  %v1113_v29 = vrot.slane %v1108_v57, 4  ;;  %v14778_v20 = vld [vmem:[#allocation2 + $0x8c] sm:$0x1] }
  0xde   : > { %2315 = vrot.lane.b32.xlu0 %v14636_v59, %s18909_s30  ;;  %v14776_v4 = vcombine.low %v14625_v3, %v14633_v24  ;;  %v1608_v44 = vor.u32 %v1607_v15, %v14735_v26  ;;  %v1628_v7 = vrot.slane %v1626_v14, 4  ;;  %v1631_v21 = vrot.slane %v1629_v58, 5  ;;  %1275 = vst [vmem:[#allocation2 + $0xc0] sm:$0xf] %v1274_v27  ;;  %v14794_v23 = vld [vmem:[#allocation2 + $0x94] sm:$0xf] }
  0xdf   : > { %2317 = vrot.lane.b32.xlu1 %v14702_v60, %s18909_s30  ;;  %v1846_v0 = vrot.slane %v18913_v39, 4  ;;  %v1600_v3 = vsel %vm14135_vm12, %v14708_v31, %v14710_v56  ;;  %v1618_v26 = vor.u32 %v1617_v37, %v14756_v28  ;;  %v18914_v15 = vmov %v18913_v39  ;;  %v14800_v14 = vld [vmem:[#allocation2 + $0x98] sm:$0x1] }
  0xe0   : > { %v14729_v50 = vpop.permute.xlu0 %2268  ;;  %vm2551_vm11 = vcmask 392192   ;;  %v1112_v53 = vsel %vm14143_vm13, %v1104_v40, %v1111_v45  ;;  %v1278_v32 = vsel %vm14160_vm14, %v1113_v29, %v1277_v41  ;;  %v1621_v24 = vshll.u32 %v14778_v20, 16  ;;  %v14840_v41 = vld [vmem:[#allocation2 + $0xa0] sm:$0xf] }
  0xe1   : > { %v14727_v16 = vpop.permute.xlu1 %2270  ;;  %v1848_v58 = vsel %vm14100_vm8, %v1846_v0, %v1847_v22  ;;  %v11784_v61 = vrot.slane %v14687_v34, 9  ;;  %v14814_v57 = vrot.slane %v1851_v62, 4  ;;  %1276 = vst.msk [vmem:[#allocation2 + $0xc4] sm:$0xf] %vm687_vm0, %v1112_v53  ;;  %1279 = vst [vmem:[#allocation2 + $0xc8] sm:$0x1] %v1278_v32  ;;  %v14817_v37 = vcombine.low %v1590_v36, %v1600_v3 }
  0xe2   : > { %2350 = vrot.lane.b32.xlu0 %v14652_v55, %s18910_s26  ;;  %vm2584_vm14 = vcmask 457728   ;;  %v14819_v8 = vrot.slane %v1608_v44, 4  ;;  %v1854_v17 = vrot.slane %v14778_v20, 5  ;;  %v1632_v52 = vor.u32 %v1631_v21, %v1628_v7 }
  0xe3   : > { %2352 = vrot.lane.b32.xlu1 %v14722_v47, %s18910_s26  ;;  %v14828_v22 = vrot.slane %v1618_v26, 4  ;;  %v1639_v40 = vshrl.u32 %v14794_v23, 16  ;;  %v1635_v45 = vshll.u32 %v14794_v23, 16  ;;  %v1645_v39 = vshll.u32 %v14800_v14, 16 }
  0xe4   : > { %v14744_v18 = vpop.permute.xlu0 %2233  ;;  %v18915_v0 = vcombine.low %v14112_v5, %v14114_v6  ;;  %vm2617_vm0 = vcmask 523264   ;;  %v1623_v21 = vrot.slane %v1621_v24, 5  ;;  %v11785_v36 = vrot.slane %v14731_v10, 9 }
  0xe5   : > { %v14746_v43 = vpop.permute.xlu1 %2130  ;;  %v14847_v6 = vrot.slane %v1632_v52, 4  ;;  %v1659_v32 = vshll.u32 %v14840_v41, 16  ;;  %v14863_v24 = vrot.slane %v1635_v45, 5  ;;  %v1641_v52 = vrot.slane %v1639_v40, 4  ;;  %v14879_v45 = vld [vmem:[#allocation2 + $0xa4] sm:$0x1] }
  0xe6   : > { %2064 = vrot.lane.b32.xlu0 %v14636_v59, %s18905_s24  ;;  %v2373_v27 = vsel %vm2370_vm1, %v18915_v0, %v14673_v13  ;;  %v1858_v13 = vrot.slane %v14794_v23, 5 }
  0xe7   : > { %2066 = vrot.lane.b32.xlu1 %v14702_v60, %s18905_s24 }
  0xe8   : > { %v14765_v59 = vpop.permute.xlu0 %2338 }
  0xe9   : > { %v14767_v33 = vpop.permute.xlu1 %2235 }
  0xea   : > { %2144 = vrot.lane.b32.xlu0 %v14652_v55, %s18911_s29  ;;  %v1845_v55 = vsel %vm14100_vm8, %v11783_v51, %v18914_v15  ;;  %v14822_v51 = vld [vmem:[#allocation2 + $0x9c] sm:$0xf] }
  0xeb   : > { %2146 = vrot.lane.b32.xlu1 %v14722_v47, %s18911_s29  ;;  %v14838_v29 = vcombine.low %v1845_v55, %v1848_v58  ;;  %v1650_v3 = vshrl.u32 %v14822_v51, 16  ;;  %v1653_v26 = vshll.u32 %v14822_v51, 16  ;;  %v2421_v55 = vsel %vm2419_vm3, %v2373_v27, %v14663_v54 }
  0xec   : > { %v14806_v31 = vpop.permute.xlu0 %2340  ;;  %v14865_v54 = vrot.slane %v1645_v39, 5  ;;  %v14889_v39 = vrot.slane %v1659_v32, 5 }
  0xed   : > { %v2201_v56 = vpop.permute.xlu1 %2200 }
  0xee   : > { %2179 = vrot.lane.b32.xlu0 %v14677_v11, %s18906_s23 }
  0xef   : > { %2181 = vrot.lane.b32.xlu1 %v14776_v4, %s18906_s23 }
  0xf0   : > { %v2051_v7 = vpop.permute.xlu0 %2050 }
  0xf1   : > { %v2306_v44 = vpop.permute.xlu1 %2305  ;;  %v2376_v5 = vsel %vm2370_vm1, %v14213_v9, %v2051_v7  ;;  %v1663_v9 = vshrl.u32 %v14840_v41, 16  ;;  %v1652_v7 = vrot.slane %v1650_v3, 4  ;;  %v1624_v3 = vsel %vm14135_vm12, %v14828_v22, %v1623_v21 }
  0xf2   : > { %v2423_v53 = vsel %vm2419_vm3, %v2376_v5, %v14746_v43  ;;  %2214 = vrot.lane.b32.xlu0 %v14702_v60, %s18912_s22  ;;  %v2454_v43 = vsel %vm2452_vm5, %v2421_v55, %v14713_v35  ;;  %v1655_v5 = vrot.slane %v1653_v26, 5  ;;  %v1642_v55 = vor.u32 %v1641_v52, %v14863_v24 }
  0xf3   : > { %2216 = vrot.lane.b32.xlu1 %v14817_v37, %s18912_s22  ;;  %v2456_v58 = vsel %vm2452_vm5, %v2423_v53, %v14700_v25  ;;  %v14875_v25 = vcombine.low %v14687_v34, %v14694_v2  ;;  %v1665_v34 = vrot.slane %v1663_v9, 4  ;;  %v1855_v2 = vsel %vm14100_vm8, %v14814_v57, %v1854_v17  ;;  %v14932_v57 = vld [vmem:[#allocation2 + $0xcc] sm:$0xf]  ;;  %v14934_v17 = vld [vmem:[#allocation2 + $0xd0] sm:$0xf] }
  0xf4   : > { %v2489_v0 = vsel %vm2485_vm6, %v2456_v58, %v2201_v56  ;;  %v2199_v60 = vpop.permute.xlu0 %2198  ;;  %v14940_v58 = vld [vmem:[#allocation2 + $0xac] sm:$0xf] }
  0xf5   : > { %v14870_v27 = vpop.permute.xlu1 %2052  ;;  %v2487_v15 = vsel %vm2485_vm6, %v2454_v43, %v2199_v60  ;;  %v2522_v40 = vsel %vm2518_vm9, %v2489_v0, %v14767_v33  ;;  %v1666_v32 = vor.u32 %v1665_v34, %v14889_v39  ;;  %v1643_v0 = vrot.slane %v1642_v55, 4 }
  0xf6   : > { %v2520_v35 = vsel %vm2518_vm9, %v2487_v15, %v14744_v18  ;;  %2249 = vrot.lane.b32.xlu0 %v14722_v47, %s18907_s0  ;;  %v2555_v56 = vsel %vm2551_vm11, %v2522_v40, %v14727_v16  ;;  %v1614_v18 = vsel %vm14135_vm12, %v14819_v8, %v14756_v28  ;;  %v1852_v47 = vsel %vm14100_vm8, %v11784_v61, %v1851_v62  ;;  %v14904_v16 = vld [vmem:[#allocation2 + $0xa8] sm:$0xf] }
  0xf7   : > { %2251 = vrot.lane.b32.xlu1 %v14838_v29, %s18907_s0  ;;  %v2553_v33 = vsel %vm2551_vm11, %v2520_v35, %v14729_v50  ;;  %v2588_v50 = vsel %vm2584_vm14, %v2555_v56, %v2306_v44  ;;  %v14912_v28 = vrot.slane %v1858_v13, 4  ;;  %v1656_v8 = vor.u32 %v1655_v5, %v1652_v7 }
  0xf8   : > { %v2304_v15 = vpop.permute.xlu0 %2303  ;;  %v1669_v62 = vshll.u32 %v14879_v45, 16  ;;  %v18857_v61 = vrot.slane %v14840_v41, 5  ;;  %v14928_v21 = vcombine.low %v1614_v18, %v1624_v3  ;;  %v1674_v20 = vshrl.u32 %v14904_v16, 16 }
  0xf9   : > { %v14906_v26 = vpop.permute.xlu1 %2054  ;;  %v2586_v22 = vsel %vm2584_vm14, %v2553_v33, %v2304_v15  ;;  %v1677_v53 = vshll.u32 %v14904_v16, 16  ;;  %v2621_v9 = vsel %vm2617_vm0, %v2588_v50, %v14806_v31  ;;  %v14945_v60 = vrot.slane %v1656_v8, 4 }
  0xfa   : > { %2284 = vrot.lane.b32.xlu0 %v14776_v4, %s18908_s28  ;;  %v2619_v44 = vsel %vm2617_vm0, %v2586_v22, %v14765_v59  ;;  %v14942_v59 = vld [vmem:[#allocation2 + $0xb0] sm:$0x1]  ;;  %v14949_v40 = vcombine.low %v1852_v47, %v1855_v2  ;;  %v14951_v31 = vrot.slane %v1669_v62, 5  ;;  %v14955_v35 = vrot.slane %v18857_v61, 4 }
  0xfb   : > { %2286 = vrot.lane.b32.xlu1 %v14875_v25, %s18908_s28  ;;  %13159 = vmatprep.mubr.msk.bf16.mxu0 %vm2686_vm15, %v2619_v44  ;;  %v1676_v56 = vrot.slane %v1674_v20, 4  ;;  %v1679_v34 = vrot.slane %v1677_v53, 5  ;;  %v1683_v33 = vshll.u32 %v14940_v58, 16  ;;  %v1693_v18 = vshll.u32 %v14942_v59, 16 }
  0xfc   : > { %13160 = vmatmul.mubr.msk.bf16.vlgmr.msra.gmra.mrb[0].mxu0 %vm2686_vm15, %v2621_v9  ;;  %v2133_v43 = vpop.permute.xlu0 %2132  ;;  %v14963_v3 = vrot.slane %v1666_v32, 4  ;;  %v1687_v22 = vshrl.u32 %v14940_v58, 16  ;;  %v18856_v2 = vrot.slane %v14940_v58, 5  ;;  %v14980_v32 = vld [vmem:[#allocation2 + $0xb4] sm:$0xf] }
  0xfd   : > { %v2135_v52 = vpop.permute.xlu1 %2134  ;;  %v1680_v20 = vor.u32 %v1679_v34, %v1676_v56  ;;  %v14976_v53 = vrot.slane %v1683_v33, 5  ;;  %v14978_v9 = vrot.slane %v1693_v18, 5  ;;  %v1698_v34 = vshrl.u32 %v14980_v32, 16 }
  0xfe   : > { %2319 = vrot.lane.b32.xlu0 %v14817_v37, %s18909_s30  ;;  %v1689_v47 = vrot.slane %v1687_v22, 4  ;;  %v14984_v62 = vrot.slane %v18856_v2, 4  ;;  %v14999_v22 = vcombine.low %v14731_v10, %v14794_v23  ;;  %v1701_v44 = vshll.u32 %v14980_v32, 16  ;;  %v15031_v23 = vld [vmem:[#allocation2 + $0xb8] sm:$0xf] }
  0xff   : > { %2321 = vrot.lane.b32.xlu1 %v14928_v21, %s18909_s30  ;;  %v14990_v56 = vrot.slane %v1680_v20, 4  ;;  %v1638_v20 = vsel %vm14135_vm12, %v14847_v6, %v14863_v24  ;;  %v1648_v2 = vsel %vm14135_vm12, %v1643_v0, %v14865_v54  ;;  %v2379_v6 = vsel %vm2370_vm1, %v14194_v49, %v14870_v27 }
 0x100   : > { %v2168_v8 = vpop.permute.xlu0 %2167  ;;  %v2382_v24 = vsel %vm2370_vm1, %v14230_v30, %v14906_v26  ;;  %v11819_v10 = vcombine.low %v1638_v20, %v1648_v2  ;;  %v1690_v0 = vor.u32 %v1689_v47, %v14976_v53  ;;  %v1662_v20 = vsel %vm14135_vm12, %v14945_v60, %v14889_v39 }
 0x101   : > { %v2170_v55 = vpop.permute.xlu1 %2169  ;;  %v1707_v39 = vshll.u32 %v15031_v23, 16  ;;  %v18917_v60 = vrot.slane %v14840_v41, 5 }
 0x102   : > { %2354 = vrot.lane.b32.xlu0 %v14838_v29, %s18910_s26 }
 0x103   : > { %2356 = vrot.lane.b32.xlu1 %v14949_v40, %s18910_s26 }
 0x104   : > { %v2203_v15 = vpop.permute.xlu0 %2202 }
 0x105   : > { %v2205_v50 = vpop.permute.xlu1 %2204 }
 0x106   : > { %2068 = vrot.lane.b32.xlu0 %v14817_v37, %s18905_s24  ;;  %v18916_v37 = vrot.slane %v14800_v14, 5  ;;  %v2427_v14 = vsel %vm2419_vm3, %v2382_v24, %v2135_v52  ;;  %v1711_v52 = vshrl.u32 %v15031_v23, 16  ;;  %v15070_v24 = vld [vmem:[#allocation2 + $0xbc] sm:$0x1] }
 0x107   : > { %2070 = vrot.lane.b32.xlu1 %v14928_v21, %s18905_s24 }
 0x108   : > { %v2238_v18 = vpop.permute.xlu0 %2237  ;;  %v1862_v61 = vsel %vm14100_vm8, %v14912_v28, %v18916_v37 }
 0x109   : > { %v2240_v33 = vpop.permute.xlu1 %2239 }
 0x10a   : > { %2148 = vrot.lane.b32.xlu0 %v14838_v29, %s18911_s29  ;;  %v1859_v29 = vsel %vm14100_vm8, %v11785_v36, %v1858_v13  ;;  %v2425_v36 = vsel %vm2419_vm3, %v2379_v6, %v2133_v43  ;;  %v2460_v13 = vsel %vm2452_vm5, %v2427_v14, %v2170_v55  ;;  %v1928_v43 = vshll.u32 %v14934_v17, 16 }
 0x10b   : > { %2150 = vrot.lane.b32.xlu1 %v14949_v40, %s18911_s29  ;;  %v2458_v49 = vsel %vm2452_vm5, %v2425_v36, %v2168_v8  ;;  %v2493_v30 = vsel %vm2485_vm6, %v2460_v13, %v2205_v50  ;;  %v11835_v28 = vcombine.low %v1859_v29, %v1862_v61  ;;  %v1672_v29 = vsel %vm14135_vm12, %v14963_v3, %v14951_v31 }
 0x10c   : > { %v2273_v7 = vpop.permute.xlu0 %2272  ;;  %v2491_v26 = vsel %vm2485_vm6, %v2458_v49, %v2203_v15  ;;  %v2526_v2 = vsel %vm2518_vm9, %v2493_v30, %v2240_v33  ;;  %v1703_v14 = vrot.slane %v1701_v44, 5  ;;  %v18918_v31 = vrot.slane %v14822_v51, 9 }
 0x10d   : > { %v2275_v5 = vpop.permute.xlu1 %2274  ;;  %v2524_v37 = vsel %vm2518_vm9, %v2491_v26, %v2238_v18  ;;  %v18919_v36 = vrot.slane %v14879_v45, 5  ;;  %v1879_v26 = vrot.slane %v15031_v23, 5 }
 0x10e   : > { %2183 = vrot.lane.b32.xlu0 %v14875_v25, %s18906_s23  ;;  %v2559_v50 = vsel %vm2551_vm11, %v2526_v2, %v2275_v5  ;;  %v2557_v15 = vsel %vm2551_vm11, %v2524_v37, %v2273_v7  ;;  %v1691_v7 = vrot.slane %v1690_v0, 4  ;;  %v1700_v5 = vrot.slane %v1698_v34, 4 }
 0x10f   : > { %2185 = vrot.lane.b32.xlu1 %v14999_v22, %s18906_s23  ;;  %v11820_v34 = vcombine.low %v1662_v20, %v1672_v29  ;;  %v1866_v3 = vsel %vm14100_vm8, %v18918_v31, %v18917_v60  ;;  %v1869_v13 = vsel %vm14100_vm8, %v14955_v35, %v18919_v36  ;;  %v15096_v35 = vrot.slane %v1707_v39, 5 }
 0x110   : > { %v2308_v27 = vpop.permute.xlu0 %2307  ;;  %v15090_v44 = vcombine.low %v1866_v3, %v1869_v13  ;;  %v1704_v45 = vor.u32 %v1703_v14, %v1700_v5  ;;  %v18920_v20 = vrot.slane %v14940_v58, 5  ;;  %v18921_v29 = vrot.slane %v14904_v16, 9  ;;  %v15136_v14 = vld [vmem:[#allocation2 + $0xc4] sm:$0xf] }
 0x111   : > { %v2310_v54 = vpop.permute.xlu1 %2309  ;;  %v2590_v47 = vsel %vm2584_vm14, %v2557_v15, %v2308_v27 }
 0x112   : > { %2218 = vrot.lane.b32.xlu0 %v14928_v21, %s18912_s22  ;;  %v2592_v61 = vsel %vm2584_vm14, %v2559_v50, %v2310_v54  ;;  %v15058_v21 = vcombine.low %v14822_v51, %v14840_v41  ;;  %v1713_v41 = vrot.slane %v1711_v52, 4  ;;  %v1717_v51 = vshll.u32 %v15070_v24, 16 }
 0x113   : > { %2220 = vrot.lane.b32.xlu1 %v11819_v10, %s18912_s22  ;;  %v15101_v37 = vrot.slane %v1704_v45, 4 }
 0x114   : > { %v2343_v8 = vpop.permute.xlu0 %2342  ;;  %v1719_v52 = vrot.slane %v1717_v51, 5 }
 0x115   : > { %v2345_v55 = vpop.permute.xlu1 %2344  ;;  %v2623_v18 = vsel %vm2617_vm0, %v2590_v47, %v2343_v8  ;;  %v1686_v47 = vsel %vm14135_vm12, %v14990_v56, %v14976_v53  ;;  %v1714_v8 = vor.u32 %v1713_v41, %v15096_v35 }
 0x116   : > { %v2625_v33 = vsel %vm2617_vm0, %v2592_v61, %v2345_v55  ;;  %2253 = vrot.lane.b32.xlu0 %v14949_v40, %s18907_s0  ;;  %13163 = vmatprep.mubr.msk.bf16.mxu0 %vm2686_vm15, %v2623_v18  ;;  %v15105_v61 = vcombine.low %v14904_v16, %v14940_v58  ;;  %v15111_v55 = vld [vmem:[#allocation2 + $0xc0] sm:$0xf]  ;;  %v1882_v18 = vrot.slane %v15070_v24, 5 }
 0x117   : > { %2255 = vrot.lane.b32.xlu1 %v11835_v28, %s18907_s0  ;;  %13164 = vmatmul.mubr.msk.bf16.gmra.mrb[4].mxu0 %vm2686_vm15, %v2625_v33  ;;  %v1881_v33 = vrot.slane %v1879_v26, 4  ;;  %v1715_v16 = vrot.slane %v1714_v8, 4  ;;  %v1885_v58 = vshrl.u32 %v15111_v55, 16 }
 0x118   : > { %v2057_v6 = vpop.permute.xlu0 %2056 }
 0x119   : > { %v2059_v40 = vpop.permute.xlu1 %2058  ;;  %v2385_v39 = vsel %vm2370_vm1, %v14340_v48, %v2057_v6  ;;  %v1720_v8 = vsel %vm14135_vm12, %v1715_v16, %v1719_v52  ;;  %v1883_v52 = vsel %vm14100_vm8, %v1881_v33, %v1882_v18 }
 0x11a   : > { %2288 = vrot.lane.b32.xlu0 %v14999_v22, %s18908_s28  ;;  %v2388_v24 = vsel %vm2370_vm1, %v14393_v42, %v2059_v40 }
 0x11b   : > { %2290 = vrot.lane.b32.xlu1 %v15058_v21, %s18908_s28 }
 0x11c   : > { %v2137_v54 = vpop.permute.xlu0 %2136 }
 0x11d   : > { %v2139_v49 = vpop.permute.xlu1 %2138 }
 0x11e   : > { %2323 = vrot.lane.b32.xlu0 %v11819_v10, %s18909_s30 }
 0x11f   : > { %2325 = vrot.lane.b32.xlu1 %v11820_v34, %s18909_s30 }
 0x120   : > { %v2172_v30 = vpop.permute.xlu0 %2171 }
 0x121   : > { %v2174_v27 = vpop.permute.xlu1 %2173 }
 0x122   : > { %2358 = vrot.lane.b32.xlu0 %v11835_v28, %s18910_s26 }
 0x123   : > { %2360 = vrot.lane.b32.xlu1 %v15090_v44, %s18910_s26 }
 0x124   : > { %v2207_v2 = vpop.permute.xlu0 %2206 }
 0x125   : > { %v2209_v0 = vpop.permute.xlu1 %2208 }
 0x126   : > { %2072 = vrot.lane.b32.xlu0 %v11819_v10, %s18905_s24  ;;  %v1696_v10 = vsel %vm14135_vm12, %v1691_v7, %v14978_v9  ;;  %v18922_v9 = vrot.slane %v14942_v59, 5  ;;  %v2431_v59 = vsel %vm2419_vm3, %v2388_v24, %v2139_v49  ;;  %v1888_v49 = vshll.u32 %v15111_v55, 16 }
 0x127   : > { %2074 = vrot.lane.b32.xlu1 %v11820_v34, %s18905_s24  ;;  %v15123_v56 = vcombine.low %v1686_v47, %v1696_v10  ;;  %v2464_v60 = vsel %vm2452_vm5, %v2431_v59, %v2174_v27  ;;  %v1710_v10 = vsel %vm14135_vm12, %v15101_v37, %v15096_v35  ;;  %v18923_v35 = vrot.slane %v14980_v32, 9 }
 0x128   : > { %v2242_v15 = vpop.permute.xlu0 %2241  ;;  %v1876_v7 = vsel %vm14100_vm8, %v14984_v62, %v18922_v9  ;;  %v2429_v62 = vsel %vm2419_vm3, %v2385_v39, %v2137_v54  ;;  %v2497_v48 = vsel %vm2485_vm6, %v2464_v60, %v2209_v0  ;;  %v1898_v54 = vshrl.u32 %v15136_v14, 16 }
 0x129   : > { %v2244_v50 = vpop.permute.xlu1 %2243  ;;  %v2462_v42 = vsel %vm2452_vm5, %v2429_v62, %v2172_v30  ;;  %v1890_v47 = vrot.slane %v1888_v49, 5  ;;  %v1880_v37 = vsel %vm14100_vm8, %v18923_v35, %v1879_v26 }
 0x12a   : > { %2152 = vrot.lane.b32.xlu0 %v11835_v28, %s18911_s29  ;;  %v1873_v28 = vsel %vm14100_vm8, %v18921_v29, %v18920_v20  ;;  %v2495_v6 = vsel %vm2485_vm6, %v2462_v42, %v2207_v2  ;;  %v2530_v36 = vsel %vm2518_vm9, %v2497_v48, %v2244_v50  ;;  %v15185_v20 = vcombine.low %v1710_v10, %v1720_v8 }
 0x12b   : > { %2154 = vrot.lane.b32.xlu1 %v15090_v44, %s18911_s29  ;;  %v11837_v3 = vcombine.low %v1873_v28, %v1876_v7  ;;  %v2528_v13 = vsel %vm2518_vm9, %v2495_v6, %v2242_v15  ;;  %v1887_v15 = vrot.slane %v1885_v58, 4  ;;  %v1894_v29 = vshll.u32 %v15136_v14, 16 }
 0x12c   : > { %v2277_v53 = vpop.permute.xlu0 %2276  ;;  %v1900_v28 = vrot.slane %v1898_v54, 4  ;;  %v15200_v24 = vcombine.low %v1880_v37, %v1883_v52  ;;  %v1913_v58 = vrot.slane %v15136_v14, 5  ;;  %v11789_v48 = vrot.slane %v15111_v55, 9 }
 0x12d   : > { %v2279_v5 = vpop.permute.xlu1 %2278  ;;  %v2561_v51 = vsel %vm2551_vm11, %v2528_v13, %v2277_v53  ;;  %v1330_v53 = vld [vmem:[#allocation2 + $0xc8] sm:$0x1]  ;;  %v1896_v39 = vrot.slane %v1894_v29, 5  ;;  %v1891_v26 = vor.u32 %v1890_v47, %v1887_v15  ;;  %v18924_v6 = vshrl.u32 %v14932_v57, 16 }
 0x12e   : > { %2187 = vrot.lane.b32.xlu0 %v15058_v21, %s18906_s23  ;;  %v2563_v41 = vsel %vm2551_vm11, %v2530_v36, %v2279_v5  ;;  %v18925_v13 = vshll.u32 %v14932_v57, 16  ;;  %v1915_v54 = vrot.slane %v1913_v58, 4 }
 0x12f   : > { %2189 = vrot.lane.b32.xlu1 %v15105_v61, %s18906_s23  ;;  %v1901_v33 = vor.u32 %v1900_v28, %v1896_v39  ;;  %v1892_v60 = vrot.slane %v1891_v26, 4  ;;  %v1921_v36 = vrot.slane %v18924_v6, 4 }
 0x130   : > { %v2312_v31 = vpop.permute.xlu0 %2311  ;;  %v1924_v49 = vrot.slane %v18925_v13, 5 }
 0x131   : > { %v2314_v40 = vpop.permute.xlu1 %2313  ;;  %v2594_v30 = vsel %vm2584_vm14, %v2561_v51, %v2312_v31  ;;  %v1902_v42 = vrot.slane %v1901_v33, 4  ;;  %v1897_v51 = vsel %vm14135_vm12, %v1892_v60, %v1896_v39 }
 0x132   : > { %2222 = vrot.lane.b32.xlu0 %v11820_v34, %s18912_s22  ;;  %v2596_v27 = vsel %vm2584_vm14, %v2563_v41, %v2314_v40  ;;  %v15171_v34 = vcombine.low %v14980_v32, %v15031_v23  ;;  %v1904_v23 = vshll.u32 %v1330_v53, 16  ;;  %v1916_v41 = vrot.slane %v1330_v53, 5 }
 0x133   : > { %2224 = vrot.lane.b32.xlu1 %v15123_v56, %s18912_s22 }
 0x134   : > { %v2347_v0 = vpop.permute.xlu0 %2346  ;;  %v1906_v18 = vrot.slane %v1904_v23, 5  ;;  %v1947_v23 = vrot.slane %v14934_v17, 5 }
 0x135   : > { %v2349_v45 = vpop.permute.xlu1 %2348  ;;  %v2627_v50 = vsel %vm2617_vm0, %v2594_v30, %v2347_v0  ;;  %v15226_v30 = vld [vmem:[#allocation2 + $0xd4] sm:$0x1] }
 0x136   : > { %v2629_v2 = vsel %vm2617_vm0, %v2596_v27, %v2349_v45  ;;  %2257 = vrot.lane.b32.xlu0 %v15090_v44, %s18907_s0  ;;  %13167 = vmatprep.mubr.msk.bf16.mxu0 %vm2686_vm15, %v2627_v50  ;;  %v1907_v27 = vsel %vm14135_vm12, %v1902_v42, %v1906_v18  ;;  %v15230_v45 = vrot.slane %v1928_v43, 5  ;;  %v1925_v50 = vor.u32 %v1924_v49, %v1921_v36 }
 0x137   : > { %2259 = vrot.lane.b32.xlu1 %v11837_v3, %s18907_s0  ;;  %13168 = vmatmul.mubr.msk.bf16.gmra.mrb[8].mxu0 %vm2686_vm15, %v2629_v2  ;;  %v15244_v43 = vcombine.low %v1897_v51, %v1907_v27  ;;  %v1938_v10 = vshll.u32 %v15226_v30, 16  ;;  %v18927_v42 = vmov 0   ;;  %v1949_v36 = vrot.slane %v1947_v23, 4 }
 0x138   : > { %v2061_v44 = vpop.permute.xlu0 %2060  ;;  %v15256_v52 = vrot.slane %v1925_v50, 4  ;;  %3004 = vst.msk [vmem:[#allocation3 + $0x20] sm:$0x1] %vm2997_vm2, %v18927_v42  ;;  %2998 = vst.msk [vmem:[#allocation3 + $0x8] sm:$0x1] %vm2997_vm2, %v18927_v42  ;;  %v1950_v13 = vrot.slane %v15226_v30, 5 }
 0x139   : > { %v2063_v5 = vpop.permute.xlu1 %2062  ;;  %v2391_v47 = vsel %vm2370_vm1, %v14479_v19, %v2061_v44  ;;  %v1940_v33 = vrot.slane %v1938_v10, 5  ;;  %3001 = vst.msk [vmem:[#allocation3 + $0x14] sm:$0x1] %vm2997_vm2, %v18927_v42  ;;  %3007 = vst.msk [vmem:[#allocation3 + $0x2c] sm:$0x1] %vm2997_vm2, %v18927_v42 }
 0x13a   : > { %2292 = vrot.lane.b32.xlu0 %v15105_v61, %s18908_s28  ;;  %v2394_v15 = vsel %vm2370_vm1, %v14524_v12, %v2063_v5  ;;  %v1917_v12 = vsel %vm14100_vm8, %v1915_v54, %v1916_v41  ;;  %3010 = vst.msk [vmem:[#allocation3 + $0x38] sm:$0x1] %vm2997_vm2, %v18927_v42  ;;  %3013 = vst.msk [vmem:[#allocation3 + $0x44] sm:$0x1] %vm2997_vm2, %v18927_v42  ;;  %v3584_v54 = vld [vmem:[#allocation3 + $0x4] sm:$0xf]  ;;  %v1951_v30 = vsel %vm14100_vm8, %v1949_v36, %v1950_v13 }
 0x13b   : > { %2294 = vrot.lane.b32.xlu1 %v15171_v34, %s18908_s28  ;;  %3016 = vst.msk [vmem:[#allocation3 + $0x50] sm:$0x1] %vm2997_vm2, %v18927_v42  ;;  %3019 = vst.msk [vmem:[#allocation3 + $0x5c] sm:$0x1] %vm2997_vm2, %v18927_v42  ;;  %v3647_v27 = vshll.u32 %v3584_v54, 16 }
 0x13c   : > { %v2141_v7 = vpop.permute.xlu0 %2140  ;;  %3022 = vst.msk [vmem:[#allocation3 + $0x68] sm:$0x1] %vm2997_vm2, %v18927_v42  ;;  %3025 = vst.msk [vmem:[#allocation3 + $0x74] sm:$0x1] %vm2997_vm2, %v18927_v42 }
 0x13d   : > { %v2143_v9 = vpop.permute.xlu1 %2142  ;;  %v2433_v53 = vsel %vm2419_vm3, %v2391_v47, %v2141_v7  ;;  %3028 = vst.msk [vmem:[#allocation3 + $0x80] sm:$0x1] %vm2997_vm2, %v18927_v42  ;;  %3031 = vst.msk [vmem:[#allocation3 + $0x8c] sm:$0x1] %vm2997_vm2, %v18927_v42 }
 0x13e   : > { %2327 = vrot.lane.b32.xlu0 %v15123_v56, %s18909_s30  ;;  %v2435_v8 = vsel %vm2419_vm3, %v2394_v15, %v2143_v9  ;;  %3034 = vst.msk [vmem:[#allocation3 + $0x98] sm:$0x1] %vm2997_vm2, %v18927_v42  ;;  %3037 = vst.msk [vmem:[#allocation3 + $0xa4] sm:$0x1] %vm2997_vm2, %v18927_v42  ;;  %v3649_v15 = vrot.slane %v3647_v27, 5 }
 0x13f   : > { %2329 = vrot.lane.b32.xlu1 %v15185_v20, %s18909_s30  ;;  %3040 = vst.msk [vmem:[#allocation3 + $0xb0] sm:$0x1] %vm2997_vm2, %v18927_v42  ;;  %3043 = vst.msk [vmem:[#allocation3 + $0xbc] sm:$0x1] %vm2997_vm2, %v18927_v42  ;;  %v3585_v50 = vld [vmem:[#allocation3 + $0x8] sm:$0x1] }
 0x140   : > { %v2176_v32 = vpop.permute.xlu0 %2175  ;;  %3046 = vst.msk [vmem:[#allocation3 + $0xc8] sm:$0x1] %vm2997_vm2, %v18927_v42  ;;  %3049 = vst.msk [vmem:[#allocation3 + $0xd4] sm:$0x1] %vm2997_vm2, %v18927_v42 }
 0x141   : > { %v2178_v16 = vpop.permute.xlu1 %2177  ;;  %v2466_v44 = vsel %vm2452_vm5, %v2433_v53, %v2176_v32  ;;  %6829 = vst.msk [vmem:[#allocation4 + $0x4] sm:$0x1] %vm2997_vm2, %v18927_v42  ;;  %6831 = vst.msk [vmem:[#allocation4 + $0xc] sm:$0x1] %vm2997_vm2, %v18927_v42 }
 0x142   : > { %2362 = vrot.lane.b32.xlu0 %v11837_v3, %s18910_s26  ;;  %v2468_v19 = vsel %vm2452_vm5, %v2435_v8, %v2178_v16  ;;  %6833 = vst.msk [vmem:[#allocation4 + $0x14] sm:$0x1] %vm2997_vm2, %v18927_v42  ;;  %6835 = vst.msk [vmem:[#allocation4 + $0x1c] sm:$0x1] %vm2997_vm2, %v18927_v42  ;;  %v3657_v8 = vshll.u32 %v3585_v50, 16 }
 0x143   : > { %2364 = vrot.lane.b32.xlu1 %v15200_v24, %s18910_s26  ;;  %6837 = vst.msk [vmem:[#allocation4 + $0x24] sm:$0x1] %vm2997_vm2, %v18927_v42  ;;  %6839 = vst.msk [vmem:[#allocation4 + $0x2c] sm:$0x1] %vm2997_vm2, %v18927_v42 }
 0x144   : > { %v2211_v62 = vpop.permute.xlu0 %2210  ;;  %6841 = vst.msk [vmem:[#allocation4 + $0x34] sm:$0x1] %vm2997_vm2, %v18927_v42  ;;  %6843 = vst.msk [vmem:[#allocation4 + $0x3c] sm:$0x1] %vm2997_vm2, %v18927_v42 }
 0x145   : > { %v2213_v59 = vpop.permute.xlu1 %2212  ;;  %v2499_v37 = vsel %vm2485_vm6, %v2466_v44, %v2211_v62  ;;  %6845 = vst.msk [vmem:[#allocation4 + $0x44] sm:$0x1] %vm2997_vm2, %v18927_v42  ;;  %6847 = vst.msk [vmem:[#allocation4 + $0x4c] sm:$0x1] %vm2997_vm2, %v18927_v42  ;;  %v3552_v42 = vld [vmem:[#allocation3 + $0x98] sm:$0x1] }
 0x146   : > { %2076 = vrot.lane.b32.xlu0 %v15123_v56, %s18905_s24  ;;  %v15220_v56 = vcombine.low %v15111_v55, %v15136_v14  ;;  %v1914_v14 = vsel %vm14100_vm8, %v11789_v48, %v1913_v58  ;;  %v2501_v35 = vsel %vm2485_vm6, %v2468_v19, %v2213_v59  ;;  %v1931_v48 = vsel %vm14135_vm12, %v15256_v52, %v15230_v45 }
 0x147   : > { %2078 = vrot.lane.b32.xlu1 %v15185_v20, %s18905_s24  ;;  %v15264_v39 = vcombine.low %v1914_v14, %v1917_v12  ;;  %v4074_v52 = vrot.slane %v3585_v50, 5  ;;  %s18859_s24 = smov 96  }
 0x148   : > { %v2246_v31 = vpop.permute.xlu0 %2245 }
 0x149   : > { %v2248_v40 = vpop.permute.xlu1 %2247  ;;  %v2532_v7 = vsel %vm2518_vm9, %v2499_v37, %v2246_v31  ;;  %v11790_v31 = vrot.slane %v14932_v57, 9 }
 0x14a   : > { %2156 = vrot.lane.b32.xlu0 %v11837_v3, %s18911_s29  ;;  %v18926_v3 = vshrl.u32 %v14934_v17, 16  ;;  %v2534_v9 = vsel %vm2518_vm9, %v2501_v35, %v2248_v40  ;;  %v11842_v40 = vcombine.low %v14932_v57, %v14934_v17  ;;  %v3583_v17 = vld [vmem:[#allocation3] sm:$0xf]  ;;  %v4071_v35 = vrot.slane %v3584_v54, 5 }
 0x14b   : > { %2158 = vrot.lane.b32.xlu1 %v15200_v24, %s18911_s29  ;;  %v3638_v57 = vshrl.u32 %v3583_v17, 16  ;;  %v3641_v41 = vshll.u32 %v3583_v17, 16  ;;  %s18992_s29 = sld [smem:[#allocation32_spill]] }
 0x14c   : > { %v1934_v0 = vrot.slane %v18926_v3, 4  ;;  %v2281_v55 = vpop.permute.xlu0 %2280  ;;  %v1948_v3 = vsel %vm14100_vm8, %v11790_v31, %v1947_v23 }
 0x14d   : > { %v2283_v2 = vpop.permute.xlu1 %2282  ;;  %v2565_v32 = vsel %vm2551_vm11, %v2532_v7, %v2281_v55  ;;  %v4073_v7 = vrot.slane %v4071_v35, 4 }
 0x14e   : > { %2191 = vrot.lane.b32.xlu0 %v15171_v34, %s18906_s23  ;;  %v1935_v5 = vor.u32 %v1934_v0, %v15230_v45  ;;  %v2567_v16 = vsel %vm2551_vm11, %v2534_v9, %v2283_v2  ;;  %v3651_v45 = vshrl.u32 %v3584_v54, 16  ;;  %v3640_v0 = vrot.slane %v3638_v57, 4 }
 0x14f   : > { %2193 = vrot.lane.b32.xlu1 %v15220_v56, %s18906_s23  ;;  %v3643_v2 = vrot.slane %v3641_v41, 5  ;;  %s18928_s23 = sld [smem:[#allocation29_spill]] }
 0x150   : > { %v2316_v28 = vpop.permute.xlu0 %2315  ;;  %v1936_v26 = vrot.slane %v1935_v5, 4  ;;  %v3653_v47 = vrot.slane %v3651_v45, 4  ;;  %v3659_v5 = vrot.slane %v3657_v8, 5 }
 0x151   : > { %v2318_v29 = vpop.permute.xlu1 %2317  ;;  %v2598_v58 = vsel %vm2584_vm14, %v2565_v32, %v2316_v28  ;;  %v3644_v10 = vor.u32 %v3643_v2, %v3640_v0 }
 0x152   : > { %2226 = vrot.lane.b32.xlu0 %v15185_v20, %s18912_s22  ;;  %v2600_v18 = vsel %vm2584_vm14, %v2567_v16, %v2318_v29  ;;  %v1941_v6 = vsel %vm14135_vm12, %v1936_v26, %v1940_v33  ;;  %v3654_v53 = vor.u32 %v3653_v47, %v3649_v15  ;;  %v4075_v26 = vsel %vm14100_vm8, %v4073_v7, %v4074_v52 }
 0x153   : > { %2228 = vrot.lane.b32.xlu1 %v15244_v43, %s18912_s22  ;;  %v11843_v51 = vcombine.low %v1931_v48, %v1941_v6  ;;  %v3645_v12 = vrot.slane %v3644_v10, 4 }
 0x154   : > { %v2351_v62 = vpop.permute.xlu0 %2350  ;;  %v3655_v29 = vrot.slane %v3654_v53, 4 }
 0x155   : > { %v2353_v59 = vpop.permute.xlu1 %2352  ;;  %v2631_v20 = vsel %vm2617_vm0, %v2598_v58, %v2351_v62  ;;  %v3650_v28 = vsel %vm14135_vm12, %v3645_v12, %v3649_v15  ;;  %v13426_v10 = vld [vmem:[%s18928_s23 + $0x88] sm:$0xff]  }
 0x156   : > { %v2633_v60 = vsel %vm2617_vm0, %v2600_v18, %v2353_v59  ;;  %2261 = vrot.lane.b32.xlu0 %v15200_v24, %s18907_s0  ;;  %13171 = vmatprep.mubr.msk.bf16.mxu0 %vm2686_vm15, %v2631_v20  ;;  %v3660_v37 = vsel %vm14135_vm12, %v3655_v29, %v3659_v5 }
 0x157   : > { %2263 = vrot.lane.b32.xlu1 %v15264_v39, %s18907_s0  ;;  %13172 = vmatmul.mubr.msk.bf16.gmra.mrb[12].mxu0 %vm2686_vm15, %v2633_v60  ;;  %v11934_v9 = vcombine.low %v3650_v28, %v3660_v37 }
 0x158   : > { %v2065_v49 = vpop.permute.xlu0 %2064 }
 0x159   : > { %v2067_v24 = vpop.permute.xlu1 %2066  ;;  %v2397_v60 = vsel %vm2370_vm1, %v14609_v63, %v2065_v49 }
 0x15a   : > { %2296 = vrot.lane.b32.xlu0 %v15220_v56, %s18908_s28  ;;  %v11844_v56 = vcombine.low %v1948_v3, %v1951_v30  ;;  %v2400_v62 = vsel %vm2370_vm1, %v14677_v11, %v2067_v24 }
 0x15b   : > { %2298 = vrot.lane.b32.xlu1 %v11842_v40, %s18908_s28 }
 0x15c   : > { %v2145_v14 = vpop.permute.xlu0 %2144 }
 0x15d   : > { %v2147_v55 = vpop.permute.xlu1 %2146  ;;  %v2437_v40 = vsel %vm2419_vm3, %v2397_v60, %v2145_v14 }
 0x15e   : > { %2331 = vrot.lane.b32.xlu0 %v15244_v43, %s18909_s30  ;;  %v11900_v43 = vrot.slane %v3583_v17, 9  ;;  %v2439_v20 = vsel %vm2419_vm3, %v2400_v62, %v2147_v55  ;;  %v13424_v55 = vld [vmem:[%s18928_s23 + $0x80] sm:$0xff]  }
 0x15f   : > { %2333 = vrot.lane.b32.xlu1 %v11843_v51, %s18909_s30  ;;  %13191 = vmatprep.subr.bf16.mxu0 %v13424_v55  ;;  %s18972_s30 = sld [smem:[#allocation30_spill]] }
 0x160   : > { %v2180_v44 = vpop.permute.xlu0 %2179  ;;  %v4072_v32 = vsel %vm14100_vm8, %v11900_v43, %v4071_v35  ;;  %13192 = vmatpush3.bf16.msra.mxu0 %v13424_v55 }
 0x161   : > { %v2182_v19 = vpop.permute.xlu1 %2181  ;;  %v11950_v33 = vcombine.low %v4072_v32, %v4075_v26  ;;  %v2470_v48 = vsel %vm2452_vm5, %v2437_v40, %v2180_v44  ;;  %13193 = vmatprep.subr.bf16.mxu0 %v13426_v10 }
 0x162   : > { %2366 = vrot.lane.b32.xlu0 %v15264_v39, %s18910_s26  ;;  %v2472_v31 = vsel %vm2452_vm5, %v2439_v20, %v2182_v19 }
 0x163   : > { %2368 = vrot.lane.b32.xlu1 %v11844_v56, %s18910_s26 }
 0x164   : > { %v2215_v16 = vpop.permute.xlu0 %2214  ;;  %13194 = vmatpush3.bf16.msra.mxu0 %v13426_v10 }
 0x165   : > { %v2217_v23 = vpop.permute.xlu1 %2216  ;;  %v2503_v17 = vsel %vm2485_vm6, %v2470_v48, %v2215_v16 }
 0x166   : > { %v2505_v13 = vsel %vm2485_vm6, %v2472_v31, %v2217_v23 }
 0x167   : > { %4345 = vrot.lane.b32.xlu1 %v11934_v9, %s18912_s22 }
 0x168   : > { %v2250_v39 = vpop.permute.xlu0 %2249 }
 0x169   : > { %v2252_v18 = vpop.permute.xlu1 %2251  ;;  %v2536_v11 = vsel %vm2518_vm9, %v2503_v17, %v2250_v39 }
 0x16a   : > { %v2538_v54 = vsel %vm2518_vm9, %v2505_v13, %v2252_v18 }
 0x16b   : > { %4425 = vrot.lane.b32.xlu1 %v11950_v33, %s18910_s26 }
 0x16c   : > { %v2285_v59 = vpop.permute.xlu0 %2284 }
 0x16d   : > { %v2287_v58 = vpop.permute.xlu1 %2286  ;;  %v2569_v24 = vsel %vm2551_vm11, %v2536_v11, %v2285_v59 }
 0x16e   : > { %v2571_v63 = vsel %vm2551_vm11, %v2538_v54, %v2287_v58 }
 0x170   : > { %v2320_v36 = vpop.permute.xlu0 %2319 }
 0x171   : > { %v2322_v6 = vpop.permute.xlu1 %2321  ;;  %v2602_v57 = vsel %vm2584_vm14, %v2569_v24, %v2320_v36 }
 0x172   : > { %v2604_v49 = vsel %vm2584_vm14, %v2571_v63, %v2322_v6 }
 0x174   : > { %v2355_v51 = vpop.permute.xlu0 %2354 }
 0x175   : > { %v2357_v41 = vpop.permute.xlu1 %2356  ;;  %v2635_v45 = vsel %vm2617_vm0, %v2602_v57, %v2355_v51 }
 0x176   : > { %v2637_v27 = vsel %vm2617_vm0, %v2604_v49, %v2357_v41  ;;  %13175 = vmatprep.mubr.msk.bf16.mxu0 %vm2686_vm15, %v2635_v45 }
 0x177   : > { %13176 = vmatmul.mubr.msk.bf16.gmra.mrb[16].mxu0 %vm2686_vm15, %v2637_v27 }
 0x178   : > { %v2069_v30 = vpop.permute.xlu0 %2068 }
 0x179   : > { %v2071_v3 = vpop.permute.xlu1 %2070  ;;  %v2403_v19 = vsel %vm2370_vm1, %v14776_v4, %v2069_v30 }
 0x17a   : > { %v2406_v5 = vsel %vm2370_vm1, %v14875_v25, %v2071_v3 }
 0x17c   : > { %v2149_v2 = vpop.permute.xlu0 %2148 }
 0x17d   : > { %v2151_v0 = vpop.permute.xlu1 %2150  ;;  %v2441_v29 = vsel %vm2419_vm3, %v2403_v19, %v2149_v2 }
 0x17e   : > { %v2443_v44 = vsel %vm2419_vm3, %v2406_v5, %v2151_v0 }
 0x180   : > { %v2184_v50 = vpop.permute.xlu0 %2183 }
 0x181   : > { %v2186_v14 = vpop.permute.xlu1 %2185  ;;  %v2474_v35 = vsel %vm2452_vm5, %v2441_v29, %v2184_v50 }
 0x182   : > { %v2476_v28 = vsel %vm2452_vm5, %v2443_v44, %v2186_v14 }
 0x184   : > { %v2219_v47 = vpop.permute.xlu0 %2218 }
 0x185   : > { %v2221_v15 = vpop.permute.xlu1 %2220  ;;  %v2507_v9 = vsel %vm2485_vm6, %v2474_v35, %v2219_v47 }
 0x186   : > { %v2509_v52 = vsel %vm2485_vm6, %v2476_v28, %v2221_v15 }
 0x188   : > { %v2254_v56 = vpop.permute.xlu0 %2253 }
 0x189   : > { %v2256_v8 = vpop.permute.xlu1 %2255  ;;  %v2540_v25 = vsel %vm2518_vm9, %v2507_v9, %v2254_v56 }
 0x18a   : > { %v2542_v7 = vsel %vm2518_vm9, %v2509_v52, %v2256_v8 }
 0x18c   : > { %v2289_v12 = vpop.permute.xlu0 %2288 }
 0x18d   : > { %v2291_v53 = vpop.permute.xlu1 %2290  ;;  %v2573_v23 = vsel %vm2551_vm11, %v2540_v25, %v2289_v12  ;;  %v15447_v25 = vld [vmem:[%s18930_s13] ss:$0 sm:$0xff] }
 0x18e   : > { %v2575_v4 = vsel %vm2551_vm11, %v2542_v7, %v2291_v53 }
 0x190   : > { %v2324_v43 = vpop.permute.xlu0 %2323 }
 0x191   : > { %v2326_v37 = vpop.permute.xlu1 %2325  ;;  %v2606_v32 = vsel %vm2584_vm14, %v2573_v23, %v2324_v43 }
 0x192   : > { %v2608_v16 = vsel %vm2584_vm14, %v2575_v4, %v2326_v37  ;;  %v15437_v37 = vld [vmem:[%s18929_s7] ss:$0 sm:$0xff] }
 0x194   : > { %v2359_v33 = vpop.permute.xlu0 %2358 }
 0x195   : > { %v2361_v26 = vpop.permute.xlu1 %2360  ;;  %v2639_v39 = vsel %vm2617_vm0, %v2606_v32, %v2359_v33 }
 0x196   : > { %v2641_v18 = vsel %vm2617_vm0, %v2608_v16, %v2361_v26  ;;  %13179 = vmatprep.mubr.msk.bf16.mxu0 %vm2686_vm15, %v2639_v39 }
 0x197   : > { %13180 = vmatmul.mubr.msk.bf16.gmra.mrb[20].mxu0 %vm2686_vm15, %v2641_v18 }
 0x198   : > { %v2073_v59 = vpop.permute.xlu0 %2072 }
 0x199   : > { %v2075_v58 = vpop.permute.xlu1 %2074  ;;  %v2409_v11 = vsel %vm2370_vm1, %v14999_v22, %v2073_v59 }
 0x19a   : > { %v2412_v54 = vsel %vm2370_vm1, %v15058_v21, %v2075_v58 }
 0x19c   : > { %v2153_v60 = vpop.permute.xlu0 %2152 }
 0x19d   : > { %v2155_v62 = vpop.permute.xlu1 %2154  ;;  %v2445_v24 = vsel %vm2419_vm3, %v2409_v11, %v2153_v60 }
 0x19e   : > { %v2447_v63 = vsel %vm2419_vm3, %v2412_v54, %v2155_v62 }
 0x1a0   : > { %v2188_v40 = vpop.permute.xlu0 %2187 }
 0x1a1   : > { %v2190_v20 = vpop.permute.xlu1 %2189  ;;  %v2478_v57 = vsel %vm2452_vm5, %v2445_v24, %v2188_v40 }
 0x1a2   : > { %v2480_v49 = vsel %vm2452_vm5, %v2447_v63, %v2190_v20 }
 0x1a4   : > { %v2223_v48 = vpop.permute.xlu0 %2222 }
 0x1a5   : > { %v2225_v31 = vpop.permute.xlu1 %2224  ;;  %v2511_v45 = vsel %vm2485_vm6, %v2478_v57, %v2223_v48 }
 0x1a6   : > { %v2513_v27 = vsel %vm2485_vm6, %v2480_v49, %v2225_v31 }
 0x1a8   : > { %v2258_v36 = vpop.permute.xlu0 %2257 }
 0x1a9   : > { %v2260_v6 = vpop.permute.xlu1 %2259  ;;  %v2544_v21 = vsel %vm2518_vm9, %v2511_v45, %v2258_v36 }
 0x1aa   : > { %v2546_v3 = vsel %vm2518_vm9, %v2513_v27, %v2260_v6 }
 0x1ac   : > { %v2293_v17 = vpop.permute.xlu0 %2292 }
 0x1ad   : > { %v2295_v13 = vpop.permute.xlu1 %2294  ;;  %v2577_v30 = vsel %vm2551_vm11, %v2544_v21, %v2293_v17 }
 0x1ae   : > { %v2579_v22 = vsel %vm2551_vm11, %v2546_v3, %v2295_v13 }
 0x1b0   : > { %v2328_v51 = vpop.permute.xlu0 %2327 }
 0x1b1   : > { %v2330_v41 = vpop.permute.xlu1 %2329  ;;  %v2610_v2 = vsel %vm2584_vm14, %v2577_v30, %v2328_v51 }
 0x1b2   : > { %v2612_v0 = vsel %vm2584_vm14, %v2579_v22, %v2330_v41 }
 0x1b4   : > { %v2363_v14 = vpop.permute.xlu0 %2362 }
 0x1b5   : > { %v2365_v55 = vpop.permute.xlu1 %2364  ;;  %v2643_v15 = vsel %vm2617_vm0, %v2610_v2, %v2363_v14 }
 0x1b6   : > { %v2645_v50 = vsel %vm2617_vm0, %v2612_v0, %v2365_v55  ;;  %13183 = vmatprep.mubr.msk.bf16.mxu0 %vm2686_vm15, %v2643_v15 }
 0x1b7   : > { %13184 = vmatmul.mubr.msk.bf16.gmra.mrb[24].mxu0 %vm2686_vm15, %v2645_v50 }
 0x1b8   : > { %v2077_v10 = vpop.permute.xlu0 %2076 }
 0x1b9   : > { %v2079_v47 = vpop.permute.xlu1 %2078  ;;  %v2415_v52 = vsel %vm2370_vm1, %v15105_v61, %v2077_v10 }
 0x1ba   : > { %v2418_v43 = vsel %vm2370_vm1, %v15171_v34, %v2079_v47  ;;  %vm15474_vm1 = vmand %vm2994_vm4, %vm1164_vm10  ;;  %v3478_v47 = vld [vmem:[#allocation3 + $0x18] sm:$0xf] }
 0x1bc   : > { %v2157_v56 = vpop.permute.xlu0 %2156 }
 0x1bd   : > { %v2159_v8 = vpop.permute.xlu1 %2158  ;;  %v2449_v4 = vsel %vm2419_vm3, %v2415_v52, %v2157_v56  ;;  %v13429_v52 = vld [vmem:[%s18928_s23 + $0x40] sm:$0xff]  }
 0x1be   : > { %v2451_v9 = vsel %vm2419_vm3, %v2418_v43, %v2159_v8  ;;  %vm15480_vm3 = vmand %vm2997_vm2, %vm839_vm7  ;;  %12722 = vmatprep.subr.bf16.mxu1 %v13429_v52  ;;  %vm4683_vm2 = vcmask 785408  }
 0x1c0   : > { %v2192_v12 = vpop.permute.xlu0 %2191 }
 0x1c1   : > { %v2194_v53 = vpop.permute.xlu1 %2193  ;;  %v2482_v34 = vsel %vm2452_vm5, %v2449_v4, %v2192_v12  ;;  %v3469_v12 = vld [vmem:[#allocation3 + $0xc] sm:$0xf] }
 0x1c2   : > { %v2484_v23 = vsel %vm2452_vm5, %v2451_v9, %v2194_v53  ;;  %v13430_v9 = vld [vmem:[%s18928_s23] sm:$0xff]   ;;  %vm7176_vm5 = vcmask 1044484  }
 0x1c3   : > { %12723 = vmatpush3.bf16.msra.mxu1 %v13430_v9 }
 0x1c4   : > { %v2227_v19 = vpop.permute.xlu0 %2226 }
 0x1c5   : > { %v2229_v5 = vpop.permute.xlu1 %2228  ;;  %v2515_v58 = vsel %vm2485_vm6, %v2482_v34, %v2227_v19 }
 0x1c6   : > { %v2517_v61 = vsel %vm2485_vm6, %v2484_v23, %v2229_v5 }
 0x1c8   : > { %v2262_v29 = vpop.permute.xlu0 %2261 }
 0x1c9   : > { %v2264_v44 = vpop.permute.xlu1 %2263  ;;  %v2548_v40 = vsel %vm2518_vm9, %v2515_v58, %v2262_v29 }
 0x1ca   : > { %v2550_v59 = vsel %vm2518_vm9, %v2517_v61, %v2264_v44  ;;  %vm7179_vm9 = vcmask 1045509  }
 0x1cc   : > { %v2297_v35 = vpop.permute.xlu0 %2296 }
 0x1cd   : > { %v2299_v28 = vpop.permute.xlu1 %2298  ;;  %v2581_v36 = vsel %vm2551_vm11, %v2548_v40, %v2297_v35 }
 0x1ce   : > { %v2583_v31 = vsel %vm2551_vm11, %v2550_v59, %v2299_v28  ;;  %v3482_v28 = vld [vmem:[#allocation3 + $0x20] sm:$0x1]  ;;  %vm7182_vm11 = vcmask 1046534  }
 0x1cf   : > { %v13161_v7 = vpop.f32.mrb[0].mxu0 }
 0x1d0   : > { %v2893_v16 = vmul.f32 %v13161_v7, %v15437_v37  ;;  %v2757_v26 = vpop.f32.mrb[1].mxu0  ;;  %v2332_v18 = vpop.permute.xlu0 %2331 }
 0x1d1   : > { %v2334_v32 = vpop.permute.xlu1 %2333  ;;  %v2891_v33 = vmul.f32 %v15437_v37, %v2757_v26  ;;  %v13162_v39 = vpop.f32.mrb[2].mxu0  ;;  %v2614_v24 = vsel %vm2584_vm14, %v2581_v36, %v2332_v18 }
 0x1d2   : > { %v2932_v62 = vadd.f32 %v15447_v25, %v2893_v16  ;;  %v2894_v60 = vmul.f32 %v13162_v39, %v15437_v37  ;;  %v2760_v20 = vpop.f32.mrb[3].mxu0  ;;  %v2616_v17 = vsel %vm2584_vm14, %v2583_v31, %v2334_v32  ;;  %v3475_v32 = vld [vmem:[#allocation3 + $0x14] sm:$0x1]  ;;  %vm7185_vm14 = vcmask 1047559  }
 0x1d3   : > { %v2930_v48 = vadd.f32 %v15447_v25, %v2891_v33  ;;  %v2892_v6 = vmul.f32 %v15437_v37, %v2760_v20  ;;  %v13434_v20 = vld [vmem:[%s18928_s23 + $0x50] sm:$0xff]  }
 0x1d4   : > { %v2964_v13 = vmax.f32 %v2932_v62, 0.0  ;;  %v2933_v54 = vadd.f32 %v15447_v25, %v2894_v60  ;;  %v2367_v41 = vpop.permute.xlu0 %2366  ;;  %v13431_v62 = vld [vmem:[%s18928_s23 + $0x48] sm:$0xff]  }
 0x1d5   : > { %v2369_v11 = vpop.permute.xlu1 %2368  ;;  %v2962_v63 = vmax.f32 %v2930_v48, 0.0  ;;  %v2931_v49 = vadd.f32 %v15447_v25, %v2892_v6  ;;  %v2647_v45 = vsel %vm2617_vm0, %v2614_v24, %v2367_v41  ;;  %v13432_v60 = vld [vmem:[%s18928_s23 + $0x8] sm:$0xff]   ;;  %12724 = vmatprep.subr.bf16.mxu1 %v13431_v62 }
 0x1d6   : > { %v2649_v57 = vsel %vm2617_vm0, %v2616_v17, %v2369_v11  ;;  %v12571_v51 = vpack.c.bf16 %v2964_v13, %v2964_v13  ;;  %v2965_v27 = vmax.f32 %v2933_v54, 0.0  ;;  %13187 = vmatprep.mubr.msk.bf16.mxu0 %vm2686_vm15, %v2647_v45  ;;  %12725 = vmatpush3.bf16.msra.mxu1 %v13432_v60  ;;  %v13435_v17 = vld [vmem:[%s18928_s23 + $0x10] sm:$0xff]   ;;  %v3492_v62 = vld [vmem:[#allocation3 + $0x30] sm:$0xf] }
 0x1d7   : > { %v12569_v3 = vpack.c.bf16 %v2962_v63, %v2962_v63  ;;  %v2963_v21 = vmax.f32 %v2931_v49, 0.0  ;;  %13188 = vmatmul.mubr.msk.bf16.gmra.mrb[28].mxu0 %vm2686_vm15, %v2649_v57  ;;  %12726 = vmatprep.subr.bf16.mxu1 %v13434_v20  ;;  %vm8072_vm15 = vcmask 519168  }
 0x1d8   : > { %v3164_v22 = vshrl.u32 %v12571_v51, 16  ;;  %v12572_v30 = vpack.c.bf16 %v2965_v27, %v2965_v27  ;;  %v3167_v14 = vshll.u32 %v12571_v51, 16 }
 0x1d9   : > { %v3147_v0 = vshrl.u32 %v12569_v3, 16  ;;  %v12570_v2 = vpack.c.bf16 %v2963_v21, %v2963_v21  ;;  %v3150_v8 = vshll.u32 %v12569_v3, 16 }
 0x1da   : > { %v3166_v55 = vrot.slane %v3164_v22, 7  ;;  %v3172_v50 = vshrl.u32 %v12572_v30, 16  ;;  %v3175_v19 = vshll.u32 %v12572_v30, 16  ;;  %12727 = vmatpush3.bf16.msra.mxu1 %v13435_v17 }
 0x1db   : > { %v3149_v10 = vrot.slane %v3147_v0, 7  ;;  %v3155_v56 = vshrl.u32 %v12570_v2, 16  ;;  %v3158_v43 = vshll.u32 %v12570_v2, 16 }
 0x1dc   : > { %v3169_v53 = vor.u32 %v3167_v14, %v3166_v55  ;;  %v3174_v5 = vrot.slane %v3172_v50, 7  ;;  %v3170_v7 = vrot.slane %v3166_v55, 4 }
 0x1dd   : > { %v3152_v29 = vor.u32 %v3150_v8, %v3149_v10  ;;  %v3157_v35 = vrot.slane %v3155_v56, 7  ;;  %v3153_v26 = vrot.slane %v3149_v10, 4 }
 0x1de   : > { %v3479_v4 = vsel %vm15474_vm1, %v3169_v53, %v3478_v47  ;;  %v3177_v23 = vor.u32 %v3175_v19, %v3174_v5  ;;  %v3179_v16 = vrot.slane %v3174_v5, 4 }
 0x1df   : > { %3480 = vst [vmem:[#allocation3 + $0x18] sm:$0xf] %v3479_v4  ;;  %v3470_v34 = vsel %vm15474_vm1, %v3152_v29, %v3469_v12  ;;  %v3160_v61 = vor.u32 %v3158_v43, %v3157_v35  ;;  %v3162_v33 = vrot.slane %v3157_v35, 4 }
 0x1e0   : > { %3471 = vst [vmem:[#allocation3 + $0xc] sm:$0xf] %v3470_v34  ;;  %v3178_v18 = vsel %vm14143_vm13, %v3170_v7, %v3177_v23  ;;  %v3483_v39 = vsel %vm15480_vm3, %v3179_v16, %v3482_v28 }
 0x1e1   : > { %3481 = vst.msk [vmem:[#allocation3 + $0x1c] sm:$0xf] %vm2994_vm4, %v3178_v18  ;;  %3484 = vst [vmem:[#allocation3 + $0x20] sm:$0x1] %v3483_v39  ;;  %v3161_v58 = vsel %vm14143_vm13, %v3153_v26, %v3160_v61  ;;  %v3476_v59 = vsel %vm15480_vm3, %v3162_v33, %v3475_v32 }
 0x1e2   : > { %3472 = vst.msk [vmem:[#allocation3 + $0x10] sm:$0xf] %vm2994_vm4, %v3161_v58  ;;  %3477 = vst [vmem:[#allocation3 + $0x14] sm:$0x1] %v3476_v59 }
 0x1e6   : > { %v15513_v40 = vld [vmem:[#allocation3 + $0x18] sm:$0xf] }
 0x1e7   : > { %v15536_v24 = vld [vmem:[#allocation3 + $0xc] sm:$0xf]  ;;  %v11902_v49 = vrot.slane %v15513_v40, 9  ;;  %v3686_v43 = vshrl.u32 %v15513_v40, 16  ;;  %v3689_v7 = vshll.u32 %v15513_v40, 16 }
 0x1e8   : > { %v15515_v31 = vld [vmem:[#allocation3 + $0x1c] sm:$0xf]  ;;  %v15517_v48 = vld [vmem:[#allocation3 + $0x20] sm:$0x1]  ;;  %v11901_v56 = vrot.slane %v15536_v24, 9 }
 0x1e9   : > { %v15521_v6 = vcombine.low %v15513_v40, %v15515_v31  ;;  %v15523_v36 = vld [vmem:[#allocation3 + $0x10] sm:$0xf]  ;;  %v4085_v13 = vrot.slane %v15515_v31, 5  ;;  %v15529_v54 = vld [vmem:[#allocation3 + $0x14] sm:$0x1]  ;;  %v4088_v41 = vrot.slane %v15517_v48, 5 }
 0x1ea   : > { %v4078_v11 = vrot.slane %v15523_v36, 5  ;;  %v13165_v63 = vpop.f32.mrb[4].mxu0  ;;  %v15543_v45 = vcombine.low %v15536_v24, %v15523_v36  ;;  %v4081_v2 = vrot.slane %v15529_v54, 5  ;;  %v3699_v32 = vshrl.u32 %v15515_v31, 16 }
 0x1eb   : > { %4462 = vrot.lane.b32.xlu1 %v15521_v6, %s18859_s24  ;;  %4533 = vrot.lane.b32.xlu0 %v15521_v6, %s18910_s26  ;;  %v4087_v57 = vrot.slane %v4085_v13, 4  ;;  %v2897_v51 = vmul.f32 %v13165_v63, %v15437_v37  ;;  %v2773_v27 = vpop.f32.mrb[5].mxu0  ;;  %v4086_v30 = vsel %vm14100_vm8, %v11902_v49, %v4085_v13  ;;  %v3695_v33 = vshll.u32 %v15515_v31, 16 }
 0x1ec   : > { %v4080_v3 = vrot.slane %v4078_v11, 4  ;;  %v2895_v21 = vmul.f32 %v15437_v37, %v2773_v27  ;;  %v13166_v22 = vpop.f32.mrb[6].mxu0  ;;  %v4079_v28 = vsel %vm14100_vm8, %v11901_v56, %v4078_v11  ;;  %v3688_v59 = vrot.slane %v3686_v43, 4  ;;  %v3485_v11 = vld [vmem:[#allocation3 + $0x24] sm:$0xf] }
 0x1ed   : > { %v4089_v0 = vsel %vm14100_vm8, %v4087_v57, %v4088_v41  ;;  %v2936_v55 = vadd.f32 %v15447_v25, %v2897_v51  ;;  %v2898_v14 = vmul.f32 %v13166_v22, %v15437_v37  ;;  %v2776_v50 = vpop.f32.mrb[7].mxu0  ;;  %v3691_v13 = vrot.slane %v3689_v7, 5  ;;  %v3496_v51 = vld [vmem:[#allocation3 + $0x38] sm:$0x1] }
 0x1ee   : > { %v11952_v47 = vcombine.low %v4086_v30, %v4089_v0  ;;  %v2934_v10 = vadd.f32 %v15447_v25, %v2895_v21  ;;  %v2896_v8 = vmul.f32 %v15437_v37, %v2776_v50  ;;  %v4082_v53 = vsel %vm14100_vm8, %v4080_v3, %v4081_v2  ;;  %v3489_v2 = vld [vmem:[#allocation3 + $0x2c] sm:$0x1] }
 0x1ef   : > { %4460 = vrot.lane.b32.xlu1 %v15543_v45, %s18859_s24  ;;  %v2968_v12 = vmax.f32 %v2936_v55, 0.0  ;;  %v2937_v5 = vadd.f32 %v15447_v25, %v2898_v14  ;;  %v11951_v9 = vcombine.low %v4079_v28, %v4082_v53  ;;  %v3701_v57 = vrot.slane %v3699_v32, 4  ;;  %v13437_v53 = vld [vmem:[%s18928_s23 + $0x18] sm:$0xff]  }
 0x1f0   : > { %4500 = vrot.lane.b32.xlu0 %v11952_v47, %s18912_s22  ;;  %13195 = vmatprep.mubr.msk.bf16.mxu0 %vm2485_vm6, %v11952_v47  ;;  %v2966_v19 = vmax.f32 %v2934_v10, 0.0  ;;  %v2935_v29 = vadd.f32 %v15447_v25, %v2896_v8  ;;  %v15573_v3 = vrot.slane %v3695_v33, 5  ;;  %v13436_v10 = vld [vmem:[%s18928_s23 + $0x58] sm:$0xff]   ;;  %v3692_v28 = vor.u32 %v3691_v13, %v3688_v59 }
 0x1f1   : > { %v12575_v35 = vpack.c.bf16 %v2968_v12, %v2968_v12  ;;  %v2969_v52 = vmax.f32 %v2937_v5, 0.0  ;;  %12728 = vmatprep.subr.bf16.mxu1 %v13436_v10  ;;  %v3671_v43 = vshll.u32 %v15523_v36, 16  ;;  %v3665_v7 = vshll.u32 %v15536_v24, 16 }
 0x1f2   : > { %v12573_v4 = vpack.c.bf16 %v2966_v19, %v2966_v19  ;;  %v2967_v23 = vmax.f32 %v2935_v29, 0.0  ;;  %v13438_v19 = vld [vmem:[%s18928_s23 + $0x60] sm:$0xff]   ;;  %v3675_v29 = vshrl.u32 %v15523_v36, 16  ;;  %12729 = vmatpush3.bf16.msra.mxu1 %v13437_v53 }
 0x1f3   : > { %4429 = vrot.lane.b32.xlu1 %v11952_v47, %s18910_s26  ;;  %v3198_v16 = vshrl.u32 %v12575_v35, 16  ;;  %v12576_v26 = vpack.c.bf16 %v2969_v52, %v2969_v52  ;;  %v3201_v39 = vshll.u32 %v12575_v35, 16  ;;  %v3702_v35 = vor.u32 %v3701_v57, %v15573_v3  ;;  %v13439_v52 = vld [vmem:[%s18928_s23 + $0x20] sm:$0xff]   ;;  %12730 = vmatprep.subr.bf16.mxu1 %v13438_v19 }
 0x1f4   : > { %4498 = vrot.lane.b32.xlu0 %v11951_v9, %s18912_s22  ;;  %v3181_v34 = vshrl.u32 %v12573_v4, 16  ;;  %v12574_v61 = vpack.c.bf16 %v2967_v23, %v2967_v23  ;;  %v3184_v20 = vshll.u32 %v12573_v4, 16  ;;  %v3705_v4 = vshll.u32 %v15517_v48, 16  ;;  %v13440_v23 = vld [vmem:[%s18928_s23 + $0x68] sm:$0xff]  }
 0x1f5   : > { %v3200_v18 = vrot.slane %v3198_v16, 7  ;;  %v3206_v58 = vshrl.u32 %v12576_v26, 16  ;;  %v3209_v49 = vshll.u32 %v12576_v26, 16  ;;  %v3693_v16 = vrot.slane %v3692_v28, 4 }
 0x1f6   : > { %v3183_v60 = vrot.slane %v3181_v34, 7  ;;  %v3189_v40 = vshrl.u32 %v12574_v61, 16  ;;  %v3192_v31 = vshll.u32 %v12574_v61, 16  ;;  %v3703_v32 = vrot.slane %v3702_v35, 4  ;;  %12731 = vmatpush3.bf16.msra.mxu1 %v13439_v52  ;;  %v13441_v34 = vld [vmem:[%s18928_s23 + $0x28] sm:$0xff]  }
 0x1f7   : > { %4427 = vrot.lane.b32.xlu1 %v11951_v9, %s18910_s26  ;;  %v3203_v17 = vor.u32 %v3201_v39, %v3200_v18  ;;  %v3208_v63 = vrot.slane %v3206_v58, 7  ;;  %v3204_v21 = vrot.slane %v3200_v18, 4  ;;  %v3662_v9 = vshrl.u32 %v15536_v24, 16  ;;  %12732 = vmatprep.subr.bf16.mxu1 %v13440_v23  ;;  %v13442_v18 = vld [vmem:[%s18928_s23 + $0x70] sm:$0xff]  }
 0x1f8   : > { %v3186_v41 = vor.u32 %v3184_v20, %v3183_v60  ;;  %v3191_v27 = vrot.slane %v3189_v40, 7  ;;  %v3187_v55 = vrot.slane %v3183_v60, 4  ;;  %v15610_v26 = vrot.slane %v3671_v43, 5 }
 0x1f9   : > { %v3493_v22 = vsel %vm15474_vm1, %v3203_v17, %v3492_v62  ;;  %v3211_v30 = vor.u32 %v3209_v49, %v3208_v63  ;;  %v3213_v0 = vrot.slane %v3208_v63, 4  ;;  %v3677_v36 = vrot.slane %v3675_v29, 4  ;;  %v13443_v63 = vld [vmem:[%s18928_s23 + $0x30] sm:$0xff]  }
 0x1fa   : > { %3494 = vst [vmem:[#allocation3 + $0x30] sm:$0xf] %v3493_v22  ;;  %v3486_v14 = vsel %vm15474_vm1, %v3186_v41, %v3485_v11  ;;  %v3194_v50 = vor.u32 %v3192_v31, %v3191_v27  ;;  %v3196_v47 = vrot.slane %v3191_v27, 4  ;;  %v3707_v24 = vrot.slane %v3705_v4, 5  ;;  %12733 = vmatpush3.bf16.msra.mxu1 %v13441_v34 }
 0x1fb   : > { %3487 = vst [vmem:[#allocation3 + $0x24] sm:$0xf] %v3486_v14  ;;  %v3212_v8 = vsel %vm14143_vm13, %v3204_v21, %v3211_v30  ;;  %v3497_v56 = vsel %vm15480_vm3, %v3213_v0, %v3496_v51  ;;  %v3664_v33 = vrot.slane %v3662_v9, 4  ;;  %v3667_v48 = vrot.slane %v3665_v7, 5  ;;  %12734 = vmatprep.subr.bf16.mxu1 %v13442_v18  ;;  %v13444_v30 = vld [vmem:[%s18928_s23 + $0x78] sm:$0xff]  }
 0x1fc   : > { %3495 = vst.msk [vmem:[#allocation3 + $0x34] sm:$0xf] %vm2994_vm4, %v3212_v8  ;;  %3498 = vst [vmem:[#allocation3 + $0x38] sm:$0x1] %v3497_v56  ;;  %v3195_v12 = vsel %vm14143_vm13, %v3187_v55, %v3194_v50  ;;  %v3490_v5 = vsel %vm15480_vm3, %v3196_v47, %v3489_v2  ;;  %v3708_v13 = vsel %vm14135_vm12, %v3703_v32, %v3707_v24  ;;  %v3681_v22 = vshll.u32 %v15529_v54, 16  ;;  %v13445_v54 = vld [vmem:[%s18928_s23 + $0x38] sm:$0xff]  }
 0x1fd   : > { %3488 = vst.msk [vmem:[#allocation3 + $0x28] sm:$0xf] %vm2994_vm4, %v3195_v12  ;;  %3491 = vst [vmem:[#allocation3 + $0x2c] sm:$0x1] %v3490_v5  ;;  %v3678_v11 = vor.u32 %v3677_v36, %v15610_v26  ;;  %v3698_v49 = vsel %vm14135_vm12, %v3693_v16, %v15573_v3  ;;  %v3668_v51 = vor.u32 %v3667_v48, %v3664_v33 }
 0x1fe   : > { %v15656_v0 = vcombine.low %v3698_v49, %v3708_v13  ;;  %12735 = vmatpush3.bf16.msra.mxu1 %v13443_v63  ;;  %v3683_v19 = vrot.slane %v3681_v22, 5 }
 0x1ff   : > { %v3679_v50 = vrot.slane %v3678_v11, 4  ;;  %v3669_v5 = vrot.slane %v3668_v51, 4  ;;  %12736 = vmatprep.subr.bf16.mxu1 %v13444_v30 }
 0x201   : > { %v15615_v61 = vld [vmem:[#allocation3 + $0x30] sm:$0xf]  ;;  %v3684_v7 = vsel %vm14135_vm12, %v3679_v50, %v3683_v19  ;;  %v3674_v36 = vsel %vm14135_vm12, %v3669_v5, %v15610_v26  ;;  %v3499_v50 = vld [vmem:[#allocation3 + $0x3c] sm:$0xf] }
 0x202   : > { %v15622_v58 = vld [vmem:[#allocation3 + $0x24] sm:$0xf]  ;;  %v11904_v3 = vrot.slane %v15615_v61, 9  ;;  %12737 = vmatpush3.bf16.msra.mxu1 %v13445_v54  ;;  %v15700_v33 = vcombine.low %v3674_v36, %v3684_v7  ;;  %v3734_v48 = vshrl.u32 %v15615_v61, 16  ;;  %v3737_v13 = vshll.u32 %v15615_v61, 16 }
 0x203   : > { %v15620_v39 = vld [vmem:[#allocation3 + $0x34] sm:$0xf]  ;;  %v15624_v59 = vld [vmem:[#allocation3 + $0x38] sm:$0x1]  ;;  %v11903_v27 = vrot.slane %v15622_v58, 9 }
 0x204   : > { %v15628_v62 = vcombine.low %v15615_v61, %v15620_v39  ;;  %v15630_v60 = vld [vmem:[#allocation3 + $0x28] sm:$0xf]  ;;  %v15632_v20 = vld [vmem:[#allocation3 + $0x2c] sm:$0x1]  ;;  %v4099_v40 = vrot.slane %v15620_v39, 5  ;;  %v4102_v41 = vrot.slane %v15624_v59, 5 }
 0x205   : > { %v4092_v17 = vrot.slane %v15630_v60, 5  ;;  %v4095_v21 = vrot.slane %v15632_v20, 5  ;;  %v15682_v35 = vcombine.low %v15622_v58, %v15630_v60  ;;  %v3747_v26 = vshrl.u32 %v15620_v39, 16  ;;  %v3506_v61 = vld [vmem:[#allocation3 + $0x48] sm:$0xf] }
 0x206   : > { %4466 = vrot.lane.b32.xlu1 %v15628_v62, %s18935_s4  ;;  %4537 = vrot.lane.b32.xlu0 %v15628_v62, %s18910_s26  ;;  %v4101_v57 = vrot.slane %v4099_v40, 4  ;;  %v4100_v8 = vsel %vm14100_vm8, %v11904_v3, %v4099_v40  ;;  %v3743_v51 = vshll.u32 %v15620_v39, 16  ;;  %v3736_v22 = vrot.slane %v3734_v48, 4 }
 0x207   : > { %v4094_v31 = vrot.slane %v4092_v17, 4  ;;  %v4093_v55 = vsel %vm14100_vm8, %v11903_v27, %v4092_v17  ;;  %v3723_v48 = vshrl.u32 %v15630_v60, 16 }
 0x208   : > { %v4103_v2 = vsel %vm14100_vm8, %v4101_v57, %v4102_v41  ;;  %v3745_v19 = vrot.slane %v3743_v51, 5 }
 0x209   : > { %v4096_v14 = vsel %vm14100_vm8, %v4094_v31, %v4095_v21  ;;  %v11954_v12 = vcombine.low %v4100_v8, %v4103_v2  ;;  %v3749_v8 = vrot.slane %v3747_v26, 4 }
 0x20a   : > { %4349 = vrot.lane.b32.xlu1 %v15656_v0, %s18912_s22  ;;  %4568 = vrot.lane.b32.xlu0 %v15656_v0, %s18935_s4  ;;  %v13169_v47 = vpop.f32.mrb[8].mxu0  ;;  %v15672_v10 = vcombine.low %v4093_v55, %v4096_v14  ;;  %v3739_v55 = vrot.slane %v3737_v13, 5  ;;  %v3710_v13 = vshrl.u32 %v15622_v58, 16 }
 0x20b   : > { %v2901_v56 = vmul.f32 %v13169_v47, %v15437_v37  ;;  %v2789_v53 = vpop.f32.mrb[9].mxu0 }
 0x20c   : > { %v2899_v29 = vmul.f32 %v15437_v37, %v2789_v53  ;;  %v13170_v28 = vpop.f32.mrb[10].mxu0  ;;  %13196 = vmatmul.mubr.msk.bf16.vlgmr.msra.gmra.mrb[32].mxu0 %vm2485_vm6, %v15672_v10  ;;  %v3712_v51 = vrot.slane %v3710_v13, 4 }
 0x20d   : > { %v2940_v43 = vadd.f32 %v15447_v25, %v2901_v56  ;;  %v2902_v52 = vmul.f32 %v13170_v28, %v15437_v37  ;;  %v2792_v9 = vpop.f32.mrb[11].mxu0  ;;  %13199 = vmatprep.mubr.msk.bf16.mxu0 %vm2485_vm6, %v11954_v12  ;;  %v3510_v56 = vld [vmem:[#allocation3 + $0x50] sm:$0x1] }
 0x20e   : > { %v2938_v4 = vadd.f32 %v15447_v25, %v2899_v29  ;;  %v2900_v23 = vmul.f32 %v15437_v37, %v2792_v9  ;;  %4464 = vrot.lane.b32.xlu1 %v15682_v35, %s18935_s4  ;;  %4535 = vrot.lane.b32.xlu0 %v15682_v35, %s18910_s26 }
 0x20f   : > { %v2972_v16 = vmax.f32 %v2940_v43, 0.0  ;;  %v2941_v32 = vadd.f32 %v15447_v25, %v2902_v52  ;;  %v3503_v52 = vld [vmem:[#allocation3 + $0x44] sm:$0x1] }
 0x210   : > { %v2970_v34 = vmax.f32 %v2938_v4, 0.0  ;;  %v2939_v24 = vadd.f32 %v15447_v25, %v2900_v23 }
 0x211   : > { %v12579_v18 = vpack.c.bf16 %v2972_v16, %v2972_v16  ;;  %v2973_v40 = vmax.f32 %v2941_v32, 0.0 }
 0x212   : > { %v12577_v17 = vpack.c.bf16 %v2970_v34, %v2970_v34  ;;  %v2971_v11 = vmax.f32 %v2939_v24, 0.0  ;;  %4347 = vrot.lane.b32.xlu1 %v15700_v33, %s18912_s22  ;;  %4504 = vrot.lane.b32.xlu0 %v11954_v12, %s18912_s22  ;;  %v3719_v24 = vshll.u32 %v15630_v60, 16 }
 0x213   : > { %v3232_v63 = vshrl.u32 %v12579_v18, 16  ;;  %v12580_v49 = vpack.c.bf16 %v2973_v40, %v2973_v40  ;;  %v3235_v31 = vshll.u32 %v12579_v18, 16  ;;  %v3740_v18 = vor.u32 %v3739_v55, %v3736_v22 }
 0x214   : > { %v3215_v57 = vshrl.u32 %v12577_v17, 16  ;;  %v12578_v41 = vpack.c.bf16 %v2971_v11, %v2971_v11  ;;  %v3218_v3 = vshll.u32 %v12577_v17, 16  ;;  %v3753_v40 = vshll.u32 %v15624_v59, 16 }
 0x215   : > { %v3234_v27 = vrot.slane %v3232_v63, 7  ;;  %v3240_v21 = vshrl.u32 %v12580_v49, 16  ;;  %v3243_v47 = vshll.u32 %v12580_v49, 16  ;;  %v3713_v17 = vshll.u32 %v15622_v58, 16 }
 0x216   : > { %v3217_v30 = vrot.slane %v3215_v57, 7  ;;  %v3223_v2 = vshrl.u32 %v12578_v41, 16  ;;  %4433 = vrot.lane.b32.xlu1 %v11954_v12, %s18910_s26  ;;  %4502 = vrot.lane.b32.xlu0 %v15672_v10, %s18912_s22  ;;  %v3226_v5 = vshll.u32 %v12578_v41, 16  ;;  %v3721_v26 = vrot.slane %v3719_v24, 5 }
 0x217   : > { %v3237_v14 = vor.u32 %v3235_v31, %v3234_v27  ;;  %v3242_v54 = vrot.slane %v3240_v21, 7  ;;  %v3238_v29 = vrot.slane %v3234_v27, 4  ;;  %v3725_v63 = vrot.slane %v3723_v48, 4 }
 0x218   : > { %v3220_v39 = vor.u32 %v3218_v3, %v3217_v30  ;;  %v3225_v53 = vrot.slane %v3223_v2, 7  ;;  %v3221_v9 = vrot.slane %v3217_v30, 4  ;;  %v3741_v57 = vrot.slane %v3740_v18, 4 }
 0x219   : > { %v3507_v28 = vsel %vm15474_vm1, %v3237_v14, %v3506_v61  ;;  %v3245_v43 = vor.u32 %v3243_v47, %v3242_v54  ;;  %v3247_v12 = vrot.slane %v3242_v54, 4  ;;  %v3755_v41 = vrot.slane %v3753_v40, 5 }
 0x21a   : > { %3508 = vst [vmem:[#allocation3 + $0x48] sm:$0xf] %v3507_v28  ;;  %v3500_v7 = vsel %vm15474_vm1, %v3220_v39, %v3499_v50  ;;  %v3228_v4 = vor.u32 %v3226_v5, %v3225_v53  ;;  %v3230_v23 = vrot.slane %v3225_v53, 4  ;;  %4431 = vrot.lane.b32.xlu1 %v15672_v10, %s18910_s26  ;;  %v3750_v10 = vor.u32 %v3749_v8, %v3745_v19 }
 0x21b   : > { %3501 = vst [vmem:[#allocation3 + $0x3c] sm:$0xf] %v3500_v7  ;;  %v3246_v16 = vsel %vm14143_vm13, %v3238_v29, %v3245_v43  ;;  %v3511_v32 = vsel %vm15480_vm3, %v3247_v12, %v3510_v56  ;;  %v3715_v27 = vrot.slane %v3713_v17, 5  ;;  %v3726_v2 = vor.u32 %v3725_v63, %v3721_v26 }
 0x21c   : > { %3509 = vst.msk [vmem:[#allocation3 + $0x4c] sm:$0xf] %vm2994_vm4, %v3246_v16  ;;  %3512 = vst [vmem:[#allocation3 + $0x50] sm:$0x1] %v3511_v32  ;;  %v3229_v36 = vsel %vm14143_vm13, %v3221_v9, %v3228_v4  ;;  %v3504_v34 = vsel %vm15480_vm3, %v3230_v23, %v3503_v52  ;;  %v3751_v11 = vrot.slane %v3750_v10, 4  ;;  %v3746_v55 = vsel %vm14135_vm12, %v3741_v57, %v3745_v19 }
 0x21d   : > { %3502 = vst.msk [vmem:[#allocation3 + $0x40] sm:$0xf] %vm2994_vm4, %v3229_v36  ;;  %3505 = vst [vmem:[#allocation3 + $0x44] sm:$0x1] %v3504_v34  ;;  %v3729_v54 = vshll.u32 %v15632_v20, 16  ;;  %v3716_v56 = vor.u32 %v3715_v27, %v3712_v51  ;;  %v3727_v20 = vrot.slane %v3726_v2, 4 }
 0x21e   : > { %v3756_v30 = vsel %vm14135_vm12, %v3751_v11, %v3755_v41 }
 0x21f   : > { %v15763_v53 = vcombine.low %v3746_v55, %v3756_v30  ;;  %v3717_v23 = vrot.slane %v3716_v56, 4  ;;  %v3731_v16 = vrot.slane %v3729_v54, 5 }
 0x221   : > { %v15733_v49 = vld [vmem:[#allocation3 + $0x48] sm:$0xf]  ;;  %v3732_v18 = vsel %vm14135_vm12, %v3727_v20, %v3731_v16  ;;  %v3722_v63 = vsel %vm14135_vm12, %v3717_v23, %v3721_v26 }
 0x222   : > { %v15737_v21 = vld [vmem:[#allocation3 + $0x3c] sm:$0xf]  ;;  %v11906_v5 = vrot.slane %v15733_v49, 9  ;;  %v15803_v51 = vcombine.low %v3722_v63, %v3732_v18  ;;  %v3782_v27 = vshrl.u32 %v15733_v49, 16 }
 0x223   : > { %v15735_v31 = vld [vmem:[#allocation3 + $0x4c] sm:$0xf]  ;;  %v15739_v60 = vld [vmem:[#allocation3 + $0x50] sm:$0x1]  ;;  %v11905_v47 = vrot.slane %v15737_v21, 9 }
 0x224   : > { %v15743_v59 = vcombine.low %v15733_v49, %v15735_v31  ;;  %v15745_v58 = vld [vmem:[#allocation3 + $0x40] sm:$0xf]  ;;  %v15747_v22 = vld [vmem:[#allocation3 + $0x44] sm:$0x1]  ;;  %v4113_v61 = vrot.slane %v15735_v31, 5  ;;  %v4116_v50 = vrot.slane %v15739_v60, 5 }
 0x225   : > { %v4106_v3 = vrot.slane %v15745_v58, 5  ;;  %v4109_v39 = vrot.slane %v15747_v22, 5  ;;  %v15786_v34 = vcombine.low %v15737_v21, %v15745_v58  ;;  %v3795_v26 = vshrl.u32 %v15735_v31, 16 }
 0x226   : > { %18936 = vst [vmem:[#allocation15_spill] sm:$0xff] %v15743_v59  ;;  %4470 = vrot.lane.b32.xlu1 %v15743_v59, %s18935_s4  ;;  %4541 = vrot.lane.b32.xlu0 %v15743_v59, %s18910_s26  ;;  %v4115_v14 = vrot.slane %v4113_v61, 4  ;;  %v4114_v52 = vsel %vm14100_vm8, %v11906_v5, %v4113_v61 }
 0x227   : > { %v4108_v8 = vrot.slane %v4106_v3, 4  ;;  %v4107_v19 = vsel %vm14100_vm8, %v11905_v47, %v4106_v3  ;;  %v3785_v3 = vshll.u32 %v15733_v49, 16  ;;  %v3784_v49 = vrot.slane %v3782_v27, 4 }
 0x228   : > { %v4117_v29 = vsel %vm14100_vm8, %v4115_v14, %v4116_v50  ;;  %v3797_v16 = vrot.slane %v3795_v26, 4  ;;  %v3801_v26 = vshll.u32 %v15739_v60, 16 }
 0x229   : > { %v4110_v28 = vsel %vm14100_vm8, %v4108_v8, %v4109_v39  ;;  %v11956_v4 = vcombine.low %v4114_v52, %v4117_v29  ;;  %v3791_v8 = vshll.u32 %v15735_v31, 16  ;;  %v3520_v29 = vld [vmem:[#allocation3 + $0x60] sm:$0xf]  ;;  %v3524_v31 = vld [vmem:[#allocation3 + $0x68] sm:$0x1] }
 0x22a   : > { %4353 = vrot.lane.b32.xlu1 %v15763_v53, %s18912_s22  ;;  %4572 = vrot.lane.b32.xlu0 %v15763_v53, %s18935_s4  ;;  %v13173_v43 = vpop.f32.mrb[12].mxu0  ;;  %v15776_v12 = vcombine.low %v4107_v19, %v4110_v28 }
 0x22b   : > { %v2905_v9 = vmul.f32 %v13173_v43, %v15437_v37  ;;  %v2805_v7 = vpop.f32.mrb[13].mxu0  ;;  %v3787_v43 = vrot.slane %v3785_v3, 5  ;;  %v3767_v3 = vshll.u32 %v15745_v58, 16 }
 0x22c   : > { %v2903_v32 = vmul.f32 %v15437_v37, %v2805_v7  ;;  %v13174_v36 = vpop.f32.mrb[14].mxu0  ;;  %13200 = vmatmul.mubr.msk.bf16.gmra.mrb[36].mxu0 %vm2485_vm6, %v15776_v12 }
 0x22d   : > { %v2944_v10 = vadd.f32 %v15447_v25, %v2905_v9  ;;  %v2906_v24 = vmul.f32 %v13174_v36, %v15437_v37  ;;  %v2808_v48 = vpop.f32.mrb[15].mxu0  ;;  %13203 = vmatprep.mubr.msk.bf16.mxu0 %vm2485_vm6, %v11956_v4  ;;  %v3513_v9 = vld [vmem:[#allocation3 + $0x54] sm:$0xf] }
 0x22e   : > { %v2942_v40 = vadd.f32 %v15447_v25, %v2903_v32  ;;  %v2904_v13 = vmul.f32 %v15437_v37, %v2808_v48  ;;  %4468 = vrot.lane.b32.xlu1 %v15786_v34, %s18935_s4  ;;  %4539 = vrot.lane.b32.xlu0 %v15786_v34, %s18910_s26 }
 0x22f   : > { %v2976_v17 = vmax.f32 %v2944_v10, 0.0  ;;  %v2945_v11 = vadd.f32 %v15447_v25, %v2906_v24  ;;  %v3793_v24 = vrot.slane %v3791_v8, 5 }
 0x230   : > { %v2974_v57 = vmax.f32 %v2942_v40, 0.0  ;;  %v2943_v41 = vadd.f32 %v15447_v25, %v2904_v13 }
 0x231   : > { %v12583_v61 = vpack.c.bf16 %v2976_v17, %v2976_v17  ;;  %v2977_v30 = vmax.f32 %v2945_v11, 0.0  ;;  %v3517_v17 = vld [vmem:[#allocation3 + $0x5c] sm:$0x1] }
 0x232   : > { %v12581_v2 = vpack.c.bf16 %v2974_v57, %v2974_v57  ;;  %v2975_v55 = vmax.f32 %v2943_v41, 0.0  ;;  %4351 = vrot.lane.b32.xlu1 %v15803_v51, %s18912_s22  ;;  %4570 = vrot.lane.b32.xlu0 %v15803_v51, %s18935_s4 }
 0x233   : > { %v3266_v14 = vshrl.u32 %v12583_v61, 16  ;;  %v12584_v50 = vpack.c.bf16 %v2977_v30, %v2977_v30  ;;  %v3269_v56 = vshll.u32 %v12583_v61, 16 }
 0x234   : > { %v3249_v54 = vshrl.u32 %v12581_v2, 16  ;;  %v12582_v47 = vpack.c.bf16 %v2975_v55, %v2975_v55  ;;  %v3252_v28 = vshll.u32 %v12581_v2, 16  ;;  %v3771_v2 = vshrl.u32 %v15745_v58, 16 }
 0x235   : > { %v3268_v39 = vrot.slane %v3266_v14, 7  ;;  %v3274_v5 = vshrl.u32 %v12584_v50, 16  ;;  %v3277_v23 = vshll.u32 %v12584_v50, 16  ;;  %v3788_v55 = vor.u32 %v3787_v43, %v3784_v49 }
 0x236   : > { %v3251_v19 = vrot.slane %v3249_v54, 7  ;;  %v3257_v20 = vshrl.u32 %v12582_v47, 16  ;;  %4437 = vrot.lane.b32.xlu1 %v11956_v4, %s18910_s26  ;;  %4508 = vrot.lane.b32.xlu0 %v11956_v4, %s18912_s22  ;;  %v3260_v10 = vshll.u32 %v12582_v47, 16  ;;  %v3758_v14 = vshrl.u32 %v15737_v21, 16 }
 0x237   : > { %v3271_v52 = vor.u32 %v3269_v56, %v3268_v39  ;;  %v3276_v7 = vrot.slane %v3274_v5, 7  ;;  %v3272_v48 = vrot.slane %v3268_v39, 4  ;;  %v3761_v50 = vshll.u32 %v15737_v21, 16 }
 0x238   : > { %v3254_v32 = vor.u32 %v3252_v28, %v3251_v19  ;;  %v3259_v36 = vrot.slane %v3257_v20, 7  ;;  %v3255_v4 = vrot.slane %v3251_v19, 4  ;;  %v15838_v47 = vrot.slane %v3767_v3, 5 }
 0x239   : > { %v3521_v18 = vsel %vm15474_vm1, %v3271_v52, %v3520_v29  ;;  %v3279_v40 = vor.u32 %v3277_v23, %v3276_v7  ;;  %v3281_v13 = vrot.slane %v3276_v7, 4  ;;  %v3773_v8 = vrot.slane %v3771_v2, 4 }
 0x23a   : > { %3522 = vst [vmem:[#allocation3 + $0x60] sm:$0xf] %v3521_v18  ;;  %v3514_v11 = vsel %vm15474_vm1, %v3254_v32, %v3513_v9  ;;  %v3262_v63 = vor.u32 %v3260_v10, %v3259_v36  ;;  %v3264_v57 = vrot.slane %v3259_v36, 4  ;;  %4435 = vrot.lane.b32.xlu1 %v15776_v12, %s18910_s26  ;;  %4506 = vrot.lane.b32.xlu0 %v15776_v12, %s18912_s22  ;;  %v3789_v56 = vrot.slane %v3788_v55, 4 }
 0x23b   : > { %3515 = vst [vmem:[#allocation3 + $0x54] sm:$0xf] %v3514_v11  ;;  %v3280_v41 = vsel %vm14143_vm13, %v3272_v48, %v3279_v40  ;;  %v3525_v27 = vsel %vm15480_vm3, %v3281_v13, %v3524_v31  ;;  %v3798_v12 = vor.u32 %v3797_v16, %v3793_v24  ;;  %v3803_v5 = vrot.slane %v3801_v26, 5  ;;  %v15894_v26 = vld [vmem:[%s18929_s7] ss:$0 sm:$0xff] }
 0x23c   : > { %3523 = vst.msk [vmem:[#allocation3 + $0x64] sm:$0xf] %vm2994_vm4, %v3280_v41  ;;  %3526 = vst [vmem:[#allocation3 + $0x68] sm:$0x1] %v3525_v27  ;;  %v3263_v61 = vsel %vm14143_vm13, %v3255_v4, %v3262_v63  ;;  %v3518_v30 = vsel %vm15480_vm3, %v3264_v57, %v3517_v17  ;;  %v3760_v29 = vrot.slane %v3758_v14, 4  ;;  %v3763_v19 = vrot.slane %v3761_v50, 5 }
 0x23d   : > { %3516 = vst.msk [vmem:[#allocation3 + $0x58] sm:$0xf] %vm2994_vm4, %v3263_v61  ;;  %3519 = vst [vmem:[#allocation3 + $0x5c] sm:$0x1] %v3518_v30  ;;  %v3799_v54 = vrot.slane %v3798_v12, 4  ;;  %v3774_v7 = vor.u32 %v3773_v8, %v15838_v47  ;;  %v3794_v23 = vsel %vm14135_vm12, %v3789_v56, %v3793_v24  ;;  %v3777_v31 = vshll.u32 %v15747_v22, 16 }
 0x23e   : > { %v3764_v18 = vor.u32 %v3763_v19, %v3760_v29 }
 0x23f   : > { %v3804_v52 = vsel %vm14135_vm12, %v3799_v54, %v3803_v5  ;;  %v3775_v11 = vrot.slane %v3774_v7, 4  ;;  %v3779_v2 = vrot.slane %v3777_v31, 5  ;;  %v15906_v54 = vld [vmem:[%s18930_s13] ss:$0 sm:$0xff]  ;;  %s13654_s13 = sshll.u32 %s13728_s3, 4  ;;  %s13655_s13 = int_to_ptr.vmem [resolvable:$false] %s13654_s13 }
 0x240   : > { %v15871_v40 = vcombine.low %v3794_v23, %v3804_v52  ;;  %v3765_v3 = vrot.slane %v3764_v18, 4  ;;  %s13656_s24 = scalar_lea.vmem %s13655_s13, 32 }
 0x241   : > { %v15840_v39 = vld [vmem:[#allocation3 + $0x60] sm:$0xf]  ;;  %v3780_v56 = vsel %vm14135_vm12, %v3775_v11, %v3779_v2  ;;  %v3534_v11 = vld [vmem:[#allocation3 + $0x78] sm:$0xf] }
 0x242   : > { %v15844_v58 = vld [vmem:[#allocation3 + $0x54] sm:$0xf]  ;;  %18938 = vst [vmem:[#allocation17_spill] sm:$0xff] %v15871_v40  ;;  %v11908_v13 = vrot.slane %v15840_v39, 9  ;;  %v3770_v52 = vsel %vm14135_vm12, %v3765_v3, %v15838_v47  ;;  %v3527_v3 = vld [vmem:[#allocation3 + $0x6c] sm:$0xf] }
 0x243   : > { %v15842_v28 = vld [vmem:[#allocation3 + $0x64] sm:$0xf]  ;;  %v15846_v49 = vld [vmem:[#allocation3 + $0x68] sm:$0x1]  ;;  %v11907_v36 = vrot.slane %v15844_v58, 9 }
 0x244   : > { %v15850_v60 = vcombine.low %v15840_v39, %v15842_v28  ;;  %v15852_v21 = vld [vmem:[#allocation3 + $0x58] sm:$0xf]  ;;  %v15854_v20 = vld [vmem:[#allocation3 + $0x5c] sm:$0x1]  ;;  %v4127_v43 = vrot.slane %v15842_v28, 5  ;;  %v4130_v32 = vrot.slane %v15846_v49, 5 }
 0x245   : > { %v4120_v9 = vrot.slane %v15852_v21, 5  ;;  %v4123_v48 = vrot.slane %v15854_v20, 5 }
 0x246   : > { %18937 = vst [vmem:[#allocation16_spill] sm:$0xff] %v15850_v60  ;;  %4474 = vrot.lane.b32.xlu1 %v15850_v60, %s18935_s4  ;;  %4545 = vrot.lane.b32.xlu0 %v15850_v60, %s18910_s26  ;;  %v4129_v16 = vrot.slane %v4127_v43, 4  ;;  %v4128_v27 = vsel %vm14100_vm8, %v11908_v13, %v4127_v43 }
 0x247   : > { %v4122_v10 = vrot.slane %v4120_v9, 4  ;;  %v4121_v24 = vsel %vm14100_vm8, %v11907_v36, %v4120_v9  ;;  %v3830_v9 = vshrl.u32 %v15840_v39, 16 }
 0x248   : > { %v4131_v17 = vsel %vm14100_vm8, %v4129_v16, %v4130_v32  ;;  %v15923_v16 = vcombine.low %v3770_v52, %v3780_v56  ;;  %v3833_v32 = vshll.u32 %v15840_v39, 16 }
 0x249   : > { %v4124_v22 = vsel %vm14100_vm8, %v4122_v10, %v4123_v48  ;;  %v11958_v12 = vcombine.low %v4128_v27, %v4131_v17  ;;  %v3843_v10 = vshrl.u32 %v15842_v28, 16  ;;  %v3839_v17 = vshll.u32 %v15842_v28, 16 }
 0x24a   : > { %v13177_v4 = vpop.f32.mrb[16].mxu0  ;;  %4357 = vrot.lane.b32.xlu1 %v15871_v40, %s18912_s22  ;;  %4576 = vrot.lane.b32.xlu0 %v15871_v40, %s18935_s4  ;;  %v15885_v41 = vcombine.low %v4121_v24, %v4124_v22  ;;  %v3832_v39 = vrot.slane %v3830_v9, 4  ;;  %v3531_v9 = vld [vmem:[#allocation3 + $0x74] sm:$0x1]  ;;  %v3559_v40 = vld [vmem:[#allocation3 + $0xa4] sm:$0x1] }
 0x24b   : > { %v2909_v63 = vmul.f32 %v13177_v4, %v15437_v37  ;;  %v2821_v57 = vpop.f32.mrb[17].mxu0  ;;  %v3845_v28 = vrot.slane %v3843_v10, 4 }
 0x24c   : > { %v2907_v61 = vmul.f32 %v15437_v37, %v2821_v57  ;;  %v13178_v30 = vpop.f32.mrb[18].mxu0  ;;  %13204 = vmatmul.mubr.msk.bf16.gmra.mrb[40].mxu0 %vm2485_vm6, %v15885_v41  ;;  %v15901_v37 = vcombine.low %v15844_v58, %v15852_v21 }
 0x24d   : > { %v2948_v55 = vadd.f32 %v15447_v25, %v2909_v63  ;;  %v2910_v14 = vmul.f32 %v15894_v26, %v13178_v30  ;;  %v2824_v50 = vpop.f32.mrb[19].mxu0  ;;  %13207 = vmatprep.mubr.msk.bf16.mxu0 %vm2485_vm6, %v11958_v12 }
 0x24e   : > { %18939 = vst [vmem:[#allocation18_spill] sm:$0xff] %v15901_v37  ;;  %v2946_v25 = vadd.f32 %v15906_v54, %v2907_v61  ;;  %v2908_v8 = vmul.f32 %v15894_v26, %v2824_v50  ;;  %4472 = vrot.lane.b32.xlu1 %v15901_v37, %s18935_s4  ;;  %4543 = vrot.lane.b32.xlu0 %v15901_v37, %s18910_s26  ;;  %v3835_v61 = vrot.slane %v3833_v32, 5  ;;  %v3566_v37 = vld [vmem:[#allocation3 + $0xb0] sm:$0x1] }
 0x24f   : > { %v2980_v5 = vmax.f32 %v2948_v55, 0.0  ;;  %v2949_v29 = vadd.f32 %v15906_v54, %v2910_v14  ;;  %v15932_v14 = vpop.permute.xlu1 %4345 }
 0x250   : > { %v2978_v19 = vmax.f32 %v2946_v25, 0.0  ;;  %v2947_v43 = vadd.f32 %v15906_v54, %v2908_v8  ;;  %v3538_v25 = vld [vmem:[#allocation3 + $0x80] sm:$0x1] }
 0x251   : > { %v12587_v7 = vpack.c.bf16 %v2980_v5, %v2980_v5  ;;  %v2981_v23 = vmax.f32 %v2949_v29, 0.0  ;;  %v3841_v5 = vrot.slane %v3839_v17, 5  ;;  %v3819_v17 = vshrl.u32 %v15852_v21, 16 }
 0x252   : > { %v12585_v31 = vpack.c.bf16 %v2978_v19, %v2978_v19  ;;  %v2979_v36 = vmax.f32 %v2947_v43, 0.0  ;;  %4355 = vrot.lane.b32.xlu1 %v15923_v16, %s18912_s22  ;;  %4574 = vrot.lane.b32.xlu0 %v15923_v16, %s18935_s4 }
 0x253   : > { %v3300_v48 = vshrl.u32 %v12587_v7, 16  ;;  %v12588_v18 = vpack.c.bf16 %v2981_v23, %v2981_v23  ;;  %v3303_v24 = vshll.u32 %v12587_v7, 16 }
 0x254   : > { %v3283_v47 = vshrl.u32 %v12585_v31, 16  ;;  %v12586_v13 = vpack.c.bf16 %v2979_v36, %v2979_v36  ;;  %v3286_v57 = vshll.u32 %v12585_v31, 16 }
 0x255   : > { %v3302_v4 = vrot.slane %v3300_v48, 7  ;;  %v3308_v22 = vshrl.u32 %v12588_v18, 16  ;;  %v3311_v55 = vshll.u32 %v12588_v18, 16  ;;  %v15954_v18 = vpop.permute.xlu1 %4425 }
 0x256   : > { %v3285_v63 = vrot.slane %v3283_v47, 7  ;;  %v3291_v27 = vshrl.u32 %v12586_v13, 16  ;;  %4441 = vrot.lane.b32.xlu1 %v11958_v12, %s18910_s26  ;;  %4512 = vrot.lane.b32.xlu0 %v11958_v12, %s18912_s22  ;;  %v3294_v56 = vshll.u32 %v12586_v13, 16  ;;  %v3846_v47 = vor.u32 %v3845_v28, %v3841_v5 }
 0x257   : > { %v3305_v30 = vor.u32 %v3303_v24, %v3302_v4  ;;  %v3310_v2 = vrot.slane %v3308_v22, 7  ;;  %v3306_v29 = vrot.slane %v3302_v4, 4  ;;  %v3815_v13 = vshll.u32 %v15852_v21, 16 }
 0x258   : > { %v3288_v50 = vor.u32 %v3286_v57, %v3285_v63  ;;  %v3293_v8 = vrot.slane %v3291_v27, 7  ;;  %v3289_v7 = vrot.slane %v3285_v63, 4  ;;  %v3849_v4 = vshll.u32 %v15846_v49, 16 }
 0x259   : > { %v3535_v19 = vsel %vm15474_vm1, %v3305_v30, %v3534_v11  ;;  %v3313_v43 = vor.u32 %v3311_v55, %v3310_v2  ;;  %v3315_v52 = vrot.slane %v3310_v2, 4  ;;  %v3806_v24 = vshrl.u32 %v15844_v58, 16 }
 0x25a   : > { %3536 = vst [vmem:[#allocation3 + $0x78] sm:$0xf] %v3535_v19  ;;  %v3528_v23 = vsel %vm15474_vm1, %v3288_v50, %v3527_v3  ;;  %v3296_v32 = vor.u32 %v3294_v56, %v3293_v8  ;;  %v3298_v12 = vrot.slane %v3293_v8, 4  ;;  %4439 = vrot.lane.b32.xlu1 %v15885_v41, %s18910_s26  ;;  %4510 = vrot.lane.b32.xlu0 %v15885_v41, %s18912_s22  ;;  %v3809_v22 = vshll.u32 %v15844_v58, 16 }
 0x25b   : > { %3529 = vst [vmem:[#allocation3 + $0x6c] sm:$0xf] %v3528_v23  ;;  %v3314_v31 = vsel %vm14143_vm13, %v3306_v29, %v3313_v43  ;;  %v3539_v36 = vsel %vm15480_vm3, %v3315_v52, %v3538_v25  ;;  %v3836_v41 = vor.u32 %v3835_v61, %v3832_v39  ;;  %v3847_v11 = vrot.slane %v3846_v47, 4 }
 0x25c   : > { %3537 = vst.msk [vmem:[#allocation3 + $0x7c] sm:$0xf] %vm2994_vm4, %v3314_v31  ;;  %3540 = vst [vmem:[#allocation3 + $0x80] sm:$0x1] %v3539_v36  ;;  %v3297_v10 = vsel %vm14143_vm13, %v3289_v7, %v3296_v32  ;;  %v3532_v48 = vsel %vm15480_vm3, %v3298_v12, %v3531_v9  ;;  %v15961_v63 = vrot.slane %v3815_v13, 5  ;;  %v3821_v57 = vrot.slane %v3819_v17, 4 }
 0x25d   : > { %3530 = vst.msk [vmem:[#allocation3 + $0x70] sm:$0xf] %vm2994_vm4, %v3297_v10  ;;  %3533 = vst [vmem:[#allocation3 + $0x74] sm:$0x1] %v3532_v48  ;;  %v3837_v30 = vrot.slane %v3836_v41, 4  ;;  %v3851_v3 = vrot.slane %v3849_v4, 5  ;;  %v15965_v28 = vpop.permute.xlu1 %4462  ;;  %v15982_v8 = vpop.permute.xlu0 %4533 }
 0x25e   : > { %v3808_v2 = vrot.slane %v3806_v24, 4  ;;  %v3811_v55 = vrot.slane %v3809_v22, 5  ;;  %v3822_v19 = vor.u32 %v3821_v57, %v15961_v63  ;;  %v3825_v31 = vshll.u32 %v15854_v20, 16 }
 0x25f   : > { %v3852_v56 = vsel %vm14135_vm12, %v3847_v11, %v3851_v3  ;;  %v3842_v43 = vsel %vm14135_vm12, %v3837_v30, %v3841_v5 }
 0x260   : > { %v3812_v7 = vor.u32 %v3811_v55, %v3808_v2  ;;  %v15998_v36 = vcombine.low %v3842_v43, %v3852_v56  ;;  %v3823_v17 = vrot.slane %v3822_v19, 4  ;;  %v3827_v3 = vrot.slane %v3825_v31, 5 }
 0x261   : > { %v15963_v27 = vld [vmem:[#allocation3 + $0x78] sm:$0xf]  ;;  %v16003_v47 = vpop.permute.xlu1 %4460 }
 0x262   : > { %v15969_v39 = vld [vmem:[#allocation3 + $0x6c] sm:$0xf]  ;;  %18941 = vst [vmem:[#allocation20_spill] sm:$0xff] %v15998_v36  ;;  %v11910_v10 = vrot.slane %v15963_v27, 9  ;;  %v16017_v24 = vpop.permute.xlu0 %4500  ;;  %v3813_v30 = vrot.slane %v3812_v7, 4  ;;  %v3828_v7 = vsel %vm14135_vm12, %v3823_v17, %v3827_v3 }
 0x263   : > { %v15967_v21 = vld [vmem:[#allocation3 + $0x7c] sm:$0xf]  ;;  %v15971_v49 = vld [vmem:[#allocation3 + $0x80] sm:$0x1]  ;;  %v11909_v23 = vrot.slane %v15969_v39, 9 }
 0x264   : > { %v15975_v58 = vcombine.low %v15963_v27, %v15967_v21  ;;  %v15977_v61 = vld [vmem:[#allocation3 + $0x70] sm:$0xf]  ;;  %v15979_v50 = vld [vmem:[#allocation3 + $0x74] sm:$0x1]  ;;  %v4141_v25 = vrot.slane %v15967_v21, 5  ;;  %v4144_v9 = vrot.slane %v15971_v49, 5  ;;  %v3818_v17 = vsel %vm14135_vm12, %v3813_v30, %v15961_v63 }
 0x265   : > { %v4134_v29 = vrot.slane %v15977_v61, 5  ;;  %v4137_v12 = vrot.slane %v15979_v50, 5  ;;  %v16025_v56 = vcombine.low %v15969_v39, %v15977_v61  ;;  %v3887_v31 = vshll.u32 %v15967_v21, 16 }
 0x266   : > { %18940 = vst [vmem:[#allocation19_spill] sm:$0xff] %v15975_v58  ;;  %4478 = vrot.lane.b32.xlu1 %v15975_v58, %s18935_s4  ;;  %4549 = vrot.lane.b32.xlu0 %v15975_v58, %s18910_s26  ;;  %v4143_v52 = vrot.slane %v4141_v25, 4  ;;  %v4142_v4 = vsel %vm14100_vm8, %v11910_v10, %v4141_v25  ;;  %v13643_v25 = vld [vmem:[#allocation3 + $0x4] sm:$0xf]  ;;  %v16040_v10 = vpop.permute.xlu1 %4429  ;;  %v4499_v3 = vpop.permute.xlu0 %4498 }
 0x267   : > { %v4136_v32 = vrot.slane %v4134_v29, 4  ;;  %v4135_v5 = vsel %vm14100_vm8, %v11909_v23, %v4134_v29  ;;  %18942 = vst [vmem:[#allocation21_spill] sm:$0xff] %v16025_v56  ;;  %v13642_v29 = vld [vmem:[#allocation3] sm:$0xf]  ;;  %v3891_v23 = vshrl.u32 %v15967_v21, 16  ;;  %v16057_v63 = vrot.slane %v3887_v31, 5 }
 0x268   : > { %v4145_v48 = vsel %vm14100_vm8, %v4143_v52, %v4144_v9  ;;  %v11918_v19 = vcombine.low %v13642_v29, %v13643_v25 }
 0x269   : > { %v4138_v13 = vsel %vm14100_vm8, %v4136_v32, %v4137_v12  ;;  %v11960_v57 = vcombine.low %v4142_v4, %v4145_v48  ;;  %v3878_v48 = vshrl.u32 %v15963_v27, 16 }
 0x26a   : > { %4361 = vrot.lane.b32.xlu1 %v15998_v36, %s18912_s22  ;;  %4580 = vrot.lane.b32.xlu0 %v15998_v36, %s18935_s4  ;;  %v13181_v20 = vpop.f32.mrb[20].mxu0  ;;  %v16013_v41 = vcombine.low %v4135_v5, %v4138_v13  ;;  %v4605_v21 = vsel %vm2485_vm6, %v11918_v19, %v15932_v14  ;;  %v3854_v14 = vshrl.u32 %v15969_v39, 16  ;;  %v4734_v19 = vsel %vm2485_vm6, %v15700_v33, %v4499_v3  ;;  %v3545_v36 = vld [vmem:[#allocation3 + $0x8c] sm:$0x1] }
 0x26b   : > { %v2913_v22 = vmul.f32 %v15894_v26, %v13181_v20  ;;  %v2837_v11 = vpop.f32.mrb[21].mxu0  ;;  %v3881_v20 = vshll.u32 %v15963_v27, 16  ;;  %v16059_v27 = vrot.slane %v3891_v23, 4  ;;  %v3857_v23 = vshll.u32 %v15969_v39, 16 }
 0x26c   : > { %v2911_v2 = vmul.f32 %v15894_v26, %v2837_v11  ;;  %v13182_v55 = vpop.f32.mrb[22].mxu0  ;;  %13208 = vmatmul.mubr.msk.bf16.gmra.mrb[44].mxu0 %vm2485_vm6, %v16013_v41  ;;  %v16049_v11 = vcombine.low %v3818_v17, %v3828_v7  ;;  %v3548_v17 = vld [vmem:[#allocation3 + $0x90] sm:$0xf] }
 0x26d   : > { %v2952_v43 = vadd.f32 %v15906_v54, %v2913_v22  ;;  %v2914_v52 = vmul.f32 %v15894_v26, %v13182_v55  ;;  %v2840_v9 = vpop.f32.mrb[23].mxu0  ;;  %13211 = vmatprep.mubr.msk.bf16.mxu0 %vm2485_vm6, %v11960_v57  ;;  %v3894_v33 = vor.u32 %v16059_v27, %v16057_v63 }
 0x26e   : > { %v2950_v32 = vadd.f32 %v15906_v54, %v2911_v2  ;;  %v2912_v12 = vmul.f32 %v15894_v26, %v2840_v9  ;;  %4476 = vrot.lane.b32.xlu1 %v16025_v56, %s18935_s4  ;;  %4547 = vrot.lane.b32.xlu0 %v16025_v56, %s18910_s26  ;;  %18943 = vst [vmem:[#allocation22_spill] sm:$0xff] %v16049_v11 }
 0x26f   : > { %v2984_v5 = vmax.f32 %v2952_v43, 0.0  ;;  %v2953_v13 = vadd.f32 %v15906_v54, %v2914_v52  ;;  %v16061_v52 = vrot.slane %v3878_v48, 4 }
 0x270   : > { %v2982_v4 = vmax.f32 %v2950_v32, 0.0  ;;  %v2951_v22 = vadd.f32 %v15906_v54, %v2912_v12  ;;  %v3883_v32 = vrot.slane %v3881_v20, 5  ;;  %v16066_v12 = vpop.permute.xlu1 %4427  ;;  %v3541_v20 = vld [vmem:[#allocation3 + $0x84] sm:$0xf] }
 0x271   : > { %v12591_v2 = vpack.c.bf16 %v2984_v5, %v2984_v5  ;;  %v2985_v55 = vmax.f32 %v2953_v13, 0.0 }
 0x272   : > { %v12589_v29 = vpack.c.bf16 %v2982_v4, %v2982_v4  ;;  %v2983_v25 = vmax.f32 %v2951_v22, 0.0  ;;  %4359 = vrot.lane.b32.xlu1 %v16049_v11, %s18912_s22  ;;  %4578 = vrot.lane.b32.xlu0 %v16049_v11, %s18935_s4 }
 0x273   : > { %v3334_v30 = vshrl.u32 %v12591_v2, 16  ;;  %v12592_v43 = vpack.c.bf16 %v2985_v55, %v2985_v55  ;;  %v3337_v13 = vshll.u32 %v12591_v2, 16  ;;  %v3863_v2 = vshll.u32 %v15977_v61, 16 }
 0x274   : > { %v3317_v9 = vshrl.u32 %v12589_v29, 16  ;;  %v12590_v7 = vpack.c.bf16 %v2983_v25, %v2983_v25  ;;  %v3320_v22 = vshll.u32 %v12589_v29, 16  ;;  %v3867_v29 = vshrl.u32 %v15977_v61, 16 }
 0x275   : > { %v3336_v5 = vrot.slane %v3334_v30, 7  ;;  %v3342_v31 = vshrl.u32 %v12592_v43, 16  ;;  %v3345_v25 = vshll.u32 %v12592_v43, 16  ;;  %v4652_v61 = vsel %vm2617_vm0, %v4605_v21, %v15954_v18 }
 0x276   : > { %v3319_v4 = vrot.slane %v3317_v9, 7  ;;  %v3325_v48 = vshrl.u32 %v12590_v7, 16  ;;  %4445 = vrot.lane.b32.xlu1 %v11960_v57, %s18910_s26  ;;  %4516 = vrot.lane.b32.xlu0 %v11960_v57, %s18912_s22  ;;  %v3328_v58 = vshll.u32 %v12590_v7, 16  ;;  %v3897_v18 = vshll.u32 %v15971_v49, 16 }
 0x277   : > { %v3339_v3 = vor.u32 %v3337_v13, %v3336_v5  ;;  %v3344_v55 = vrot.slane %v3342_v31, 7  ;;  %v3340_v9 = vrot.slane %v3336_v5, 4  ;;  %v4685_v49 = vsel %vm4683_vm2, %v4652_v61, %v16003_v47 }
 0x278   : > { %v3322_v30 = vor.u32 %v3320_v22, %v3319_v4  ;;  %v3327_v39 = vrot.slane %v3325_v48, 7  ;;  %v16077_v27 = vpop.permute.xlu1 %4466  ;;  %v16079_v13 = vpop.permute.xlu0 %4537  ;;  %v3323_v43 = vrot.slane %v3319_v4, 4  ;;  %v3856_v4 = vrot.slane %v3854_v14, 4 }
 0x279   : > { %v3549_v56 = vsel %vm15474_vm1, %v3339_v3, %v3548_v17  ;;  %v3347_v57 = vor.u32 %v3345_v25, %v3344_v55  ;;  %v3349_v60 = vrot.slane %v3344_v55, 4  ;;  %v3884_v17 = vor.u32 %v3883_v32, %v16061_v52 }
 0x27a   : > { %3550 = vst [vmem:[#allocation3 + $0x90] sm:$0xf] %v3549_v56  ;;  %v3542_v31 = vsel %vm15474_vm1, %v3322_v30, %v3541_v20  ;;  %v3330_v22 = vor.u32 %v3328_v58, %v3327_v39  ;;  %v3332_v7 = vrot.slane %v3327_v39, 4  ;;  %4443 = vrot.lane.b32.xlu1 %v16013_v41, %s18910_s26  ;;  %4514 = vrot.lane.b32.xlu0 %v16013_v41, %s18912_s22  ;;  %v3859_v48 = vrot.slane %v3857_v23, 5 }
 0x27b   : > { %3543 = vst [vmem:[#allocation3 + $0x84] sm:$0xf] %v3542_v31  ;;  %v3348_v5 = vsel %vm14143_vm13, %v3340_v9, %v3347_v57  ;;  %v3553_v56 = vsel %vm15480_vm3, %v3349_v60, %v3552_v42  ;;  %v4781_v60 = vsel %vm2617_vm0, %v4734_v19, %v15982_v8  ;;  %v3895_v20 = vrot.slane %v3894_v33, 4 }
 0x27c   : > { %3551 = vst.msk [vmem:[#allocation3 + $0x94] sm:$0xf] %vm2994_vm4, %v3348_v5  ;;  %3554 = vst [vmem:[#allocation3 + $0x98] sm:$0x1] %v3553_v56  ;;  %v3331_v58 = vsel %vm14143_vm13, %v3323_v43, %v3330_v22  ;;  %v3546_v41 = vsel %vm15480_vm3, %v3332_v7, %v3545_v36  ;;  %v16101_v21 = vpop.permute.xlu1 %4349  ;;  %v4569_v42 = vpop.permute.xlu0 %4568  ;;  %v16106_v55 = vrot.slane %v3863_v2, 5  ;;  %v3869_v36 = vrot.slane %v3867_v29, 4 }
 0x27d   : > { %3544 = vst.msk [vmem:[#allocation3 + $0x88] sm:$0xf] %vm2994_vm4, %v3331_v58  ;;  %3547 = vst [vmem:[#allocation3 + $0x8c] sm:$0x1] %v3546_v41  ;;  %v4813_v3 = vsel %vm4683_vm2, %v4781_v60, %v4569_v42  ;;  %v3885_v52 = vrot.slane %v3884_v17, 4  ;;  %v3899_v32 = vrot.slane %v3897_v18, 5  ;;  %v3860_v25 = vor.u32 %v3859_v48, %v3856_v4 }
 0x27e   : > { %5084 = vmatprep.mubr.bf16.mxu1 %v4813_v3  ;;  %v3870_v14 = vor.u32 %v3869_v36, %v16106_v55  ;;  %v3873_v43 = vshll.u32 %v15979_v50, 16 }
 0x27f   : > { %5085 = vmatmul.mubr.bf16.vlgmr.msra.gmra.mrb[0].mxu1 %v4685_v49  ;;  %v3900_v8 = vsel %vm14135_vm12, %v3895_v20, %v3899_v32  ;;  %v3890_v47 = vsel %vm14135_vm12, %v3885_v52, %v16057_v63  ;;  %v3861_v61 = vrot.slane %v3860_v25, 4 }
 0x280   : > { %v16113_v19 = vpop.permute.xlu1 %4464  ;;  %v16129_v22 = vcombine.low %v3890_v47, %v3900_v8  ;;  %v3871_v58 = vrot.slane %v3870_v14, 4  ;;  %v3875_v4 = vrot.slane %v3873_v43, 5  ;;  %v16141_v3 = vpop.permute.xlu0 %4535 }
 0x281   : > { %v3619_v30 = vld [vmem:[#allocation3 + $0x90] sm:$0xf] }
 0x282   : > { %v16115_v33 = vld [vmem:[#allocation3 + $0x84] sm:$0xf]  ;;  %18945 = vst [vmem:[#allocation24_spill] sm:$0xff] %v16129_v22  ;;  %v3926_v5 = vshrl.u32 %v3619_v30, 16  ;;  %v3929_v41 = vshll.u32 %v3619_v30, 16  ;;  %v11912_v42 = vrot.slane %v3619_v30, 9  ;;  %v3876_v8 = vsel %vm14135_vm12, %v3871_v58, %v3875_v4 }
 0x283   : > { %v3620_v23 = vld [vmem:[#allocation3 + $0x94] sm:$0xf]  ;;  %v16117_v2 = vld [vmem:[#allocation3 + $0x98] sm:$0x1]  ;;  %v11911_v50 = vrot.slane %v16115_v33, 9  ;;  %v3866_v58 = vsel %vm14135_vm12, %v3861_v61, %v16106_v55  ;;  %v3902_v55 = vshrl.u32 %v16115_v33, 16 }
 0x284   : > { %v16119_v39 = vcombine.low %v3619_v30, %v3620_v23  ;;  %v16124_v29 = vld [vmem:[#allocation3 + $0x88] sm:$0xf]  ;;  %v16126_v9 = vld [vmem:[#allocation3 + $0x8c] sm:$0x1]  ;;  %v4155_v57 = vrot.slane %v3620_v23, 5  ;;  %v3939_v31 = vshrl.u32 %v3620_v23, 16  ;;  %v16143_v20 = vpop.permute.xlu1 %4347  ;;  %v16186_v4 = vpop.permute.xlu0 %4504 }
 0x285   : > { %v4148_v7 = vrot.slane %v16124_v29, 5  ;;  %v4158_v56 = vrot.slane %v16117_v2, 5  ;;  %v4151_v18 = vrot.slane %v16126_v9, 5  ;;  %v3935_v48 = vshll.u32 %v3620_v23, 16 }
 0x286   : > { %18944 = vst [vmem:[#allocation23_spill] sm:$0xff] %v16119_v39  ;;  %4482 = vrot.lane.b32.xlu1 %v16119_v39, %s18935_s4  ;;  %4553 = vrot.lane.b32.xlu0 %v16119_v39, %s18910_s26  ;;  %v4157_v63 = vrot.slane %v4155_v57, 4  ;;  %v3941_v52 = vrot.slane %v3939_v31, 4  ;;  %v4156_v30 = vsel %vm14100_vm8, %v11912_v42, %v4155_v57  ;;  %v3928_v31 = vrot.slane %v3926_v5, 4 }
 0x287   : > { %v4150_v17 = vrot.slane %v4148_v7, 4  ;;  %v4149_v36 = vsel %vm14100_vm8, %v11911_v50, %v4148_v7  ;;  %v16159_v14 = vrot.slane %v3935_v48, 5  ;;  %v3931_v7 = vrot.slane %v3929_v41, 5 }
 0x288   : > { %v4159_v60 = vsel %vm14100_vm8, %v4157_v63, %v4158_v56  ;;  %v16167_v57 = vcombine.low %v16115_v33, %v16124_v29  ;;  %v16175_v41 = vcombine.low %v3866_v58, %v3876_v8  ;;  %v3905_v61 = vshll.u32 %v16115_v33, 16  ;;  %v16188_v48 = vpop.permute.xlu1 %4433 }
 0x289   : > { %v4152_v49 = vsel %vm14100_vm8, %v4150_v17, %v4151_v18  ;;  %v11962_v43 = vcombine.low %v4156_v30, %v4159_v60  ;;  %v3942_v18 = vor.u32 %v3941_v52, %v16159_v14  ;;  %v3932_v52 = vor.u32 %v3931_v7, %v3928_v31 }
 0x28a   : > { %4365 = vrot.lane.b32.xlu1 %v16129_v22, %s18912_s22  ;;  %4584 = vrot.lane.b32.xlu0 %v16129_v22, %s18935_s4  ;;  %v13185_v32 = vpop.f32.mrb[24].mxu0  ;;  %v16153_v25 = vcombine.low %v4149_v36, %v4152_v49  ;;  %18946 = vst [vmem:[#allocation25_spill] sm:$0xff] %v16167_v57  ;;  %18947 = vst [vmem:[#allocation26_spill] sm:$0xff] %v16175_v41  ;;  %v16199_v31 = vrot.slane %v3902_v55, 4  ;;  %v3562_v22 = vld [vmem:[#allocation3 + $0xa8] sm:$0xf] }
 0x28b   : > { %v2917_v23 = vmul.f32 %v15894_v26, %v13185_v32  ;;  %v2853_v47 = vpop.f32.mrb[25].mxu0  ;;  %v3945_v32 = vshll.u32 %v16117_v2, 16  ;;  %v3943_v33 = vrot.slane %v3942_v18, 4  ;;  %v3907_v2 = vrot.slane %v3905_v61, 5 }
 0x28c   : > { %v2915_v63 = vmul.f32 %v15894_v26, %v2853_v47  ;;  %v13186_v56 = vpop.f32.mrb[26].mxu0  ;;  %13212 = vmatmul.mubr.msk.bf16.gmra.mrb[48].mxu0 %vm2485_vm6, %v16153_v25  ;;  %v3915_v47 = vshrl.u32 %v16124_v29, 16  ;;  %v16203_v39 = vpop.permute.xlu1 %4431 }
 0x28d   : > { %v2956_v50 = vadd.f32 %v15906_v54, %v2917_v23  ;;  %v2918_v17 = vmul.f32 %v15894_v26, %v13186_v56  ;;  %v2856_v5 = vpop.f32.mrb[27].mxu0  ;;  %13215 = vmatprep.mubr.msk.bf16.mxu0 %vm2485_vm6, %v11962_v43  ;;  %v3911_v23 = vshll.u32 %v16124_v29, 16 }
 0x28e   : > { %v2954_v42 = vadd.f32 %v15906_v54, %v2915_v63  ;;  %v2916_v60 = vmul.f32 %v15894_v26, %v2856_v5  ;;  %4480 = vrot.lane.b32.xlu1 %v16167_v57, %s18935_s4  ;;  %4551 = vrot.lane.b32.xlu0 %v16167_v57, %s18910_s26  ;;  %v3917_v18 = vrot.slane %v3915_v47, 4 }
 0x28f   : > { %v2988_v36 = vmax.f32 %v2956_v50, 0.0  ;;  %v2957_v49 = vadd.f32 %v15906_v54, %v2918_v17  ;;  %v3933_v17 = vrot.slane %v3932_v52, 4  ;;  %v3908_v52 = vor.u32 %v3907_v2, %v16199_v31 }
 0x290   : > { %v2986_v30 = vmax.f32 %v2954_v42, 0.0  ;;  %v2955_v8 = vadd.f32 %v15906_v54, %v2916_v60  ;;  %v3947_v42 = vrot.slane %v3945_v32, 5 }
 0x291   : > { %v12595_v63 = vpack.c.bf16 %v2988_v36, %v2988_v36  ;;  %v2989_v56 = vmax.f32 %v2957_v49, 0.0  ;;  %v16201_v36 = vrot.slane %v3911_v23, 5  ;;  %v4503_v49 = vpop.permute.xlu0 %4502  ;;  %v3555_v23 = vld [vmem:[#allocation3 + $0x9c] sm:$0xf] }
 0x292   : > { %v12593_v58 = vpack.c.bf16 %v2986_v30, %v2986_v30  ;;  %v2987_v5 = vmax.f32 %v2955_v8, 0.0  ;;  %4363 = vrot.lane.b32.xlu1 %v16175_v41, %s18912_s22  ;;  %4582 = vrot.lane.b32.xlu0 %v16175_v41, %s18935_s4  ;;  %v3948_v55 = vsel %vm14135_vm12, %v3943_v33, %v3947_v42 }
 0x293   : > { %v3368_v7 = vshrl.u32 %v12595_v63, 16  ;;  %v12596_v50 = vpack.c.bf16 %v2989_v56, %v2989_v56  ;;  %v3371_v8 = vshll.u32 %v12595_v63, 16  ;;  %v3918_v42 = vor.u32 %v3917_v18, %v16201_v36 }
 0x294   : > { %v3351_v60 = vshrl.u32 %v12593_v58, 16  ;;  %v12594_v29 = vpack.c.bf16 %v2987_v5, %v2987_v5  ;;  %v3354_v41 = vshll.u32 %v12593_v58, 16  ;;  %v3921_v5 = vshll.u32 %v16126_v9, 16 }
 0x295   : > { %v3370_v30 = vrot.slane %v3368_v7, 7  ;;  %v3376_v57 = vshrl.u32 %v12596_v50, 16  ;;  %v3379_v63 = vshll.u32 %v12596_v50, 16 }
 0x296   : > { %v3353_v61 = vrot.slane %v3351_v60, 7  ;;  %v3359_v56 = vshrl.u32 %v12594_v29, 16  ;;  %4449 = vrot.lane.b32.xlu1 %v11962_v43, %s18910_s26  ;;  %4520 = vrot.lane.b32.xlu0 %v11962_v43, %s18912_s22  ;;  %v3362_v33 = vshll.u32 %v12594_v29, 16 }
 0x297   : > { %v3373_v32 = vor.u32 %v3371_v8, %v3370_v30  ;;  %v3378_v47 = vrot.slane %v3376_v57, 7  ;;  %v3374_v58 = vrot.slane %v3370_v30, 4  ;;  %v3919_v30 = vrot.slane %v3918_v42, 4 }
 0x298   : > { %v3356_v7 = vor.u32 %v3354_v41, %v3353_v61  ;;  %v3361_v59 = vrot.slane %v3359_v56, 7  ;;  %v16214_v31 = vpop.permute.xlu1 %4470  ;;  %v16216_v2 = vpop.permute.xlu0 %4541  ;;  %v3357_v57 = vrot.slane %v3353_v61, 4  ;;  %v4737_v61 = vsel %vm2485_vm6, %v15656_v0, %v16017_v24 }
 0x299   : > { %v3563_v60 = vsel %vm15474_vm1, %v3373_v32, %v3562_v22  ;;  %v3381_v11 = vor.u32 %v3379_v63, %v3378_v47  ;;  %v3383_v43 = vrot.slane %v3378_v47, 4  ;;  %v4608_v22 = vsel %vm2485_vm6, %v15543_v45, %v16143_v20 }
 0x29a   : > { %3564 = vst [vmem:[#allocation3 + $0xa8] sm:$0xf] %v3563_v60  ;;  %v3556_v9 = vsel %vm15474_vm1, %v3356_v7, %v3555_v23  ;;  %v3364_v41 = vor.u32 %v3362_v33, %v3361_v59  ;;  %v3366_v50 = vrot.slane %v3361_v59, 4  ;;  %4447 = vrot.lane.b32.xlu1 %v16153_v25, %s18910_s26  ;;  %4518 = vrot.lane.b32.xlu0 %v16153_v25, %s18912_s22 }
 0x29b   : > { %3557 = vst [vmem:[#allocation3 + $0x9c] sm:$0xf] %v3556_v9  ;;  %v3382_v29 = vsel %vm14143_vm13, %v3374_v58, %v3381_v11  ;;  %v3567_v18 = vsel %vm15480_vm3, %v3383_v43, %v3566_v37  ;;  %v3938_v59 = vsel %vm14135_vm12, %v3933_v17, %v16159_v14  ;;  %v3909_v14 = vrot.slane %v3908_v52, 4 }
 0x29c   : > { %3565 = vst.msk [vmem:[#allocation3 + $0xac] sm:$0xf] %vm2994_vm4, %v3382_v29  ;;  %3568 = vst [vmem:[#allocation3 + $0xb0] sm:$0x1] %v3567_v18  ;;  %v3365_v25 = vsel %vm14143_vm13, %v3357_v57, %v3364_v41  ;;  %v3560_v45 = vsel %vm15480_vm3, %v3366_v50, %v3559_v40  ;;  %v16239_v20 = vcombine.low %v3938_v59, %v3948_v55  ;;  %v16242_v37 = vpop.permute.xlu1 %4353  ;;  %v4573_v11 = vpop.permute.xlu0 %4572  ;;  %v3923_v17 = vrot.slane %v3921_v5, 5 }
 0x29d   : > { %3558 = vst.msk [vmem:[#allocation3 + $0xa0] sm:$0xf] %vm2994_vm4, %v3365_v25  ;;  %3561 = vst [vmem:[#allocation3 + $0xa4] sm:$0x1] %v3560_v45  ;;  %v4654_v8 = vsel %vm2617_vm0, %v4608_v22, %v16066_v12  ;;  %v4740_v40 = vsel %vm2485_vm6, %v15803_v51, %v4503_v49  ;;  %v4611_v52 = vsel %vm2485_vm6, %v15521_v6, %v16101_v21 }
 0x29e   : > { %4369 = vrot.lane.b32.xlu1 %v16239_v20, %s18912_s22  ;;  %v3924_v55 = vsel %vm14135_vm12, %v3919_v30, %v3923_v17  ;;  %v4783_v12 = vsel %vm2617_vm0, %v4737_v61, %v16141_v3  ;;  %v4688_v51 = vsel %vm4683_vm2, %v4654_v8, %v15965_v28  ;;  %v3914_v49 = vsel %vm14135_vm12, %v3909_v14, %v16201_v36 }
 0x29f   : > { %v4785_v5 = vsel %vm2617_vm0, %v4740_v40, %v16079_v13  ;;  %v16271_v6 = vcombine.low %v3914_v49, %v3924_v55 }
 0x2a0   : > { %v16255_v56 = vpop.permute.xlu0 %4539  ;;  %v16267_v47 = vpop.permute.xlu1 %4468  ;;  %v4819_v7 = vsel %vm4683_vm2, %v4785_v5, %v4573_v11 }
 0x2a1   : > { %v3625_v32 = vld [vmem:[#allocation3 + $0xa8] sm:$0xf] }
 0x2a2   : > { %v3622_v23 = vld [vmem:[#allocation3 + $0x9c] sm:$0xf]  ;;  %v3974_v24 = vshrl.u32 %v3625_v32, 16  ;;  %v3977_v63 = vshll.u32 %v3625_v32, 16  ;;  %v11914_v33 = vrot.slane %v3625_v32, 9 }
 0x2a3   : > { %v3626_v0 = vld [vmem:[#allocation3 + $0xac] sm:$0xf]  ;;  %v3950_v60 = vshrl.u32 %v3622_v23, 16  ;;  %v3627_v9 = vld [vmem:[#allocation3 + $0xb0] sm:$0x1]  ;;  %v3953_v41 = vshll.u32 %v3622_v23, 16 }
 0x2a4   : > { %v16273_v21 = vcombine.low %v3625_v32, %v3626_v0  ;;  %v3623_v3 = vld [vmem:[#allocation3 + $0xa0] sm:$0xf]  ;;  %v16276_v28 = vld [vmem:[#allocation3 + $0xa4] sm:$0x1]  ;;  %v4169_v42 = vrot.slane %v3626_v0, 5  ;;  %v4571_v36 = vpop.permute.xlu0 %4570  ;;  %v3987_v58 = vshrl.u32 %v3626_v0, 16  ;;  %v16288_v17 = vpop.permute.xlu1 %4351 }
 0x2a5   : > { %v16278_v43 = vcombine.low %v3622_v23, %v3623_v3  ;;  %v4162_v57 = vrot.slane %v3623_v3, 5  ;;  %v4816_v13 = vsel %vm4683_vm2, %v4783_v12, %v4571_v36  ;;  %v11913_v50 = vrot.slane %v3622_v23, 9 }
 0x2a6   : > { %4557 = vrot.lane.b32.xlu0 %v16273_v21, %s18910_s26  ;;  %v4171_v22 = vrot.slane %v4169_v42, 4  ;;  %5092 = vmatprep.mubr.bf16.mxu1 %v4816_v13  ;;  %v4165_v18 = vrot.slane %v16276_v28, 5  ;;  %v4172_v59 = vrot.slane %v3627_v9, 5  ;;  %v3976_v25 = vrot.slane %v3974_v24, 4 }
 0x2a7   : > { %4484 = vrot.lane.b32.xlu1 %v16278_v43, %s18935_s4  ;;  %v4164_v29 = vrot.slane %v4162_v57, 4  ;;  %v3963_v45 = vshrl.u32 %v3623_v3, 16  ;;  %5093 = vmatmul.mubr.bf16.gmra.mrb[4].mxu1 %v4688_v51  ;;  %v4170_v30 = vsel %vm14100_vm8, %v11914_v33, %v4169_v42  ;;  %v3979_v11 = vrot.slane %v3977_v63, 5 }
 0x2a8   : > { %v3983_v14 = vshll.u32 %v3626_v0, 16  ;;  %5100 = vmatprep.mubr.bf16.mxu1 %v4819_v7  ;;  %v4163_v8 = vsel %vm14100_vm8, %v11913_v50, %v4162_v57  ;;  %v4173_v55 = vsel %vm14100_vm8, %v4171_v22, %v4172_v59  ;;  %v3989_v61 = vrot.slane %v3987_v58, 4  ;;  %v16318_v22 = vpop.permute.xlu1 %4437 }
 0x2a9   : > { %v4166_v40 = vsel %vm14100_vm8, %v4164_v29, %v4165_v18  ;;  %v3993_v12 = vshll.u32 %v3627_v9, 16  ;;  %v3952_v23 = vrot.slane %v3950_v60, 4  ;;  %v3955_v51 = vrot.slane %v3953_v41, 5  ;;  %v16320_v29 = vpop.permute.xlu0 %4508 }
 0x2aa   : > { %4588 = vrot.lane.b32.xlu0 %v16239_v20, %s18935_s4  ;;  %v16298_v32 = vcombine.low %v4163_v8, %v4166_v40  ;;  %v13189_v49 = vpop.f32.mrb[28].mxu0  ;;  %v16302_v0 = vcombine.low %v4170_v30, %v4173_v55  ;;  %v3980_v24 = vor.u32 %v3979_v11, %v3976_v25  ;;  %v3985_v63 = vrot.slane %v3983_v14, 5 }
 0x2ab   : > { %4367 = vrot.lane.b32.xlu1 %v16271_v6, %s18912_s22  ;;  %v3959_v5 = vshll.u32 %v3623_v3, 16  ;;  %v2921_v7 = vmul.f32 %v15894_v26, %v13189_v49  ;;  %v2869_v33 = vpop.f32.mrb[29].mxu0  ;;  %v4656_v42 = vsel %vm2617_vm0, %v4611_v52, %v16040_v10  ;;  %v3965_v36 = vrot.slane %v3963_v45, 4 }
 0x2ac   : > { %13216 = vmatmul.mubr.msk.bf16.gmra.mrb[52].mxu0 %vm2485_vm6, %v16298_v32  ;;  %v2919_v58 = vmul.f32 %v15894_v26, %v2869_v33  ;;  %v13190_v60 = vpop.f32.mrb[30].mxu0  ;;  %v4691_v57 = vsel %vm4683_vm2, %v4656_v42, %v16113_v19  ;;  %v3990_v3 = vor.u32 %v3989_v61, %v3985_v63  ;;  %v3995_v10 = vrot.slane %v3993_v12, 5  ;;  %v16337_v33 = vpop.permute.xlu1 %4435 }
 0x2ad   : > { %13219 = vmatprep.mubr.msk.bf16.mxu0 %vm2485_vm6, %v16302_v0  ;;  %v3961_v9 = vrot.slane %v3959_v5, 5  ;;  %v2960_v13 = vadd.f32 %v15906_v54, %v2921_v7  ;;  %v2922_v41 = vmul.f32 %v15894_v26, %v13190_v60  ;;  %v2872_v50 = vpop.f32.mrb[31].mxu0  ;;  %v3956_v52 = vor.u32 %v3955_v51, %v3952_v23  ;;  %v4507_v42 = vpop.permute.xlu0 %4506 }
 0x2ae   : > { %4555 = vrot.lane.b32.xlu0 %v16278_v43, %s18910_s26  ;;  %v2958_v18 = vadd.f32 %v15906_v54, %v2919_v58  ;;  %v2920_v19 = vmul.f32 %v15894_v26, %v2872_v50  ;;  %v3981_v59 = vrot.slane %v3980_v24, 4  ;;  %v3991_v25 = vrot.slane %v3990_v3, 4 }
 0x2af   : > { %4451 = vrot.lane.b32.xlu1 %v16298_v32, %s18910_s26  ;;  %v2992_v45 = vmax.f32 %v2960_v13, 0.0  ;;  %v2961_v30 = vadd.f32 %v15906_v54, %v2922_v41  ;;  %5101 = vmatmul.mubr.bf16.gmra.mrb[8].mxu1 %v4691_v57  ;;  %v3966_v11 = vor.u32 %v3965_v36, %v3961_v9  ;;  %v3969_v14 = vshll.u32 %v16276_v28, 16  ;;  %v3576_v41 = vld [vmem:[#allocation3 + $0xc0] sm:$0xf] }
 0x2b0   : > { %v2990_v8 = vmax.f32 %v2958_v18, 0.0  ;;  %v2959_v40 = vadd.f32 %v15906_v54, %v2920_v19  ;;  %v3996_v26 = vsel %vm14135_vm12, %v3991_v25, %v3995_v10  ;;  %v3957_v49 = vrot.slane %v3956_v52, 4  ;;  %v3569_v18 = vld [vmem:[#allocation3 + $0xb4] sm:$0xf] }
 0x2b1   : > { %v12599_v55 = vpack.c.bf16 %v2992_v45, %v2992_v45  ;;  %v2993_v61 = vmax.f32 %v2961_v30, 0.0  ;;  %v3967_v12 = vrot.slane %v3966_v11, 4  ;;  %v3986_v54 = vsel %vm14135_vm12, %v3981_v59, %v3985_v63  ;;  %v3580_v30 = vld [vmem:[#allocation3 + $0xc8] sm:$0x1] }
 0x2b2   : > { %4586 = vrot.lane.b32.xlu0 %v16271_v6, %s18935_s4  ;;  %v12597_v23 = vpack.c.bf16 %v2990_v8, %v2990_v8  ;;  %v2991_v51 = vmax.f32 %v2959_v40, 0.0  ;;  %v3971_v5 = vrot.slane %v3969_v14, 5  ;;  %v16339_v58 = vcombine.low %v3986_v54, %v3996_v26 }
 0x2b3   : > { %4486 = vrot.lane.b32.xlu1 %v16273_v21, %s18935_s4  ;;  %v3402_v24 = vshrl.u32 %v12599_v55, 16  ;;  %v12600_v28 = vpack.c.bf16 %v2993_v61, %v2993_v61  ;;  %v3405_v57 = vshll.u32 %v12599_v55, 16  ;;  %v3962_v25 = vsel %vm14135_vm12, %v3957_v49, %v3961_v9 }
 0x2b4   : > { %v3385_v7 = vshrl.u32 %v12597_v23, 16  ;;  %v12598_v36 = vpack.c.bf16 %v2991_v51, %v2991_v51  ;;  %v3972_v13 = vsel %vm14135_vm12, %v3967_v12, %v3971_v5  ;;  %v3388_v63 = vshll.u32 %v12597_v23, 16  ;;  %v3573_v51 = vld [vmem:[#allocation3 + $0xbc] sm:$0x1] }
 0x2b5   : > { %v3404_v60 = vrot.slane %v3402_v24, 7  ;;  %v3410_v3 = vshrl.u32 %v12600_v28, 16  ;;  %v3413_v59 = vshll.u32 %v12600_v28, 16  ;;  %v16353_v55 = vcombine.low %v3962_v25, %v3972_v13 }
 0x2b6   : > { %4524 = vrot.lane.b32.xlu0 %v16302_v0, %s18912_s22  ;;  %v3387_v50 = vrot.slane %v3385_v7, 7  ;;  %v3393_v10 = vshrl.u32 %v12598_v36, 16  ;;  %v3396_v14 = vshll.u32 %v12598_v36, 16  ;;  %v4746_v13 = vsel %vm2485_vm6, %v15923_v16, %v4507_v42 }
 0x2b7   : > { %4373 = vrot.lane.b32.xlu1 %v16339_v58, %s18912_s22  ;;  %v3407_v52 = vor.u32 %v3405_v57, %v3404_v60  ;;  %v3412_v19 = vrot.slane %v3410_v3, 7  ;;  %v3408_v61 = vrot.slane %v3404_v60, 4  ;;  %v4614_v57 = vsel %vm2485_vm6, %v15682_v35, %v16288_v17  ;;  %v16384_v3 = vld [vmem:[#allocation3 + $0xd0] sm:$0xf] }
 0x2b8   : > { %v3390_v45 = vor.u32 %v3388_v63, %v3387_v50  ;;  %v3395_v11 = vrot.slane %v3393_v10, 7  ;;  %v16349_v8 = vpop.permute.xlu1 %4474  ;;  %v16351_v40 = vpop.permute.xlu0 %4545  ;;  %v3391_v9 = vrot.slane %v3387_v50, 4  ;;  %v4658_v35 = vsel %vm2617_vm0, %v4614_v57, %v16203_v39 }
 0x2b9   : > { %v3577_v26 = vsel %vm15474_vm1, %v3407_v52, %v3576_v41  ;;  %v3415_v12 = vor.u32 %v3413_v59, %v3412_v19  ;;  %v3417_v23 = vrot.slane %v3412_v19, 4  ;;  %v4743_v17 = vsel %vm2485_vm6, %v15763_v53, %v16186_v4 }
 0x2ba   : > { %4522 = vrot.lane.b32.xlu0 %v16298_v32, %s18912_s22  ;;  %3578 = vst [vmem:[#allocation3 + $0xc0] sm:$0xf] %v3577_v26  ;;  %v3570_v49 = vsel %vm15474_vm1, %v3390_v45, %v3569_v18  ;;  %v3398_v24 = vor.u32 %v3396_v14, %v3395_v11  ;;  %v3400_v28 = vrot.slane %v3395_v11, 4  ;;  %v4216_v63 = vshrl.u32 %v16382_v46, 16 }
 0x2bb   : > { %4371 = vrot.lane.b32.xlu1 %v16353_v55, %s18912_s22  ;;  %3571 = vst [vmem:[#allocation3 + $0xb4] sm:$0xf] %v3570_v49  ;;  %v3416_v54 = vsel %vm14143_vm13, %v3408_v61, %v3415_v12  ;;  %v3581_v5 = vsel %vm15480_vm3, %v3417_v23, %v3580_v30  ;;  %v4219_v10 = vshll.u32 %v16382_v46, 16  ;;  %v16404_v16 = vsel %vm2485_vm6, %v15628_v62, %v16242_v37 }
 0x2bc   : > { %3579 = vst.msk [vmem:[#allocation3 + $0xc4] sm:$0xf] %vm2994_vm4, %v3416_v54  ;;  %3582 = vst [vmem:[#allocation3 + $0xc8] sm:$0x1] %v3581_v5  ;;  %v3399_v32 = vsel %vm14143_vm13, %v3391_v9, %v3398_v24  ;;  %v3574_v7 = vsel %vm15480_vm3, %v3400_v28, %v3573_v51  ;;  %v16372_v36 = vpop.permute.xlu1 %4357  ;;  %v4577_v60 = vpop.permute.xlu0 %4576  ;;  %v4787_v39 = vsel %vm2617_vm0, %v4743_v17, %v16255_v56  ;;  %v4229_v53 = vshrl.u32 %v16384_v3, 16 }
 0x2bd   : > { %3572 = vst.msk [vmem:[#allocation3 + $0xb8] sm:$0xf] %vm2994_vm4, %v3399_v32  ;;  %3575 = vst [vmem:[#allocation3 + $0xbc] sm:$0x1] %v3574_v7  ;;  %v4225_v4 = vshll.u32 %v16384_v3, 16  ;;  %v4694_v19 = vsel %vm4683_vm2, %v4658_v35, %v16077_v27  ;;  %v4789_v59 = vsel %vm2617_vm0, %v4746_v13, %v16216_v2  ;;  %vm7170_vm4 = vcmask 1042434  }
 0x2be   : > { %4592 = vrot.lane.b32.xlu0 %v16339_v58, %s18935_s4  ;;  %v4825_v37 = vsel %vm4683_vm2, %v4789_v59, %v4577_v60  ;;  %vm7173_vm13 = vcmask 1043459  }
 0x2bf   : > { %4453 = vrot.lane.b32.xlu1 %v16302_v0, %s18910_s26 }
 0x2c0   : > { %v16388_v41 = vpop.permute.xlu0 %4543  ;;  %v16395_v50 = vpop.permute.xlu1 %4472 }
 0x2c1   : > { %v3631_v0 = vld [vmem:[#allocation3 + $0xc0] sm:$0xf] }
 0x2c2   : > { %4590 = vrot.lane.b32.xlu0 %v16353_v55, %s18935_s4  ;;  %v3628_v42 = vld [vmem:[#allocation3 + $0xb4] sm:$0xf]  ;;  %v4182_v30 = vshrl.u32 %v3631_v0, 16  ;;  %v4185_v56 = vshll.u32 %v3631_v0, 16  ;;  %v11916_v51 = vrot.slane %v3631_v0, 9 }
 0x2c3   : > { %v3998_v52 = vshrl.u32 %v3628_v42, 16  ;;  %v4001_v18 = vshll.u32 %v3628_v42, 16  ;;  %v3632_v25 = vld [vmem:[#allocation3 + $0xc4] sm:$0xf]  ;;  %v3633_v23 = vld [vmem:[#allocation3 + $0xc8] sm:$0x1] }
 0x2c4   : > { %v4575_v45 = vpop.permute.xlu0 %4574  ;;  %v3629_v62 = vld [vmem:[#allocation3 + $0xb8] sm:$0xf]  ;;  %v4210_v11 = vrot.slane %v3632_v25, 5  ;;  %v3630_v12 = vld [vmem:[#allocation3 + $0xbc] sm:$0x1]  ;;  %v4195_v27 = vshrl.u32 %v3632_v25, 16  ;;  %v16418_v24 = vpop.permute.xlu1 %4355  ;;  %v11966_v7 = vcombine.low %v3631_v0, %v3632_v25 }
 0x2c5   : > { %v4822_v14 = vsel %vm4683_vm2, %v4787_v39, %v4575_v45  ;;  %v16416_v61 = vcombine.low %v3628_v42, %v3629_v62  ;;  %v4011_v26 = vshrl.u32 %v3629_v62, 16  ;;  %v11915_v9 = vrot.slane %v3628_v42, 9 }
 0x2c6   : > { %5108 = vmatprep.mubr.bf16.mxu1 %v4822_v14  ;;  %v4176_v2 = vrot.slane %v3629_v62, 5  ;;  %v4212_v49 = vrot.slane %v4210_v11, 4  ;;  %v4213_v28 = vrot.slane %v3633_v23, 5  ;;  %v4000_v54 = vrot.slane %v3998_v52, 4 }
 0x2c7   : > { %4488 = vrot.lane.b32.xlu1 %v16416_v61, %s18935_s4  ;;  %4559 = vrot.lane.b32.xlu0 %v16416_v61, %s18910_s26  ;;  %v4003_v5 = vrot.slane %v4001_v18, 5  ;;  %v4007_v32 = vshll.u32 %v3629_v62, 16  ;;  %v4179_v57 = vrot.slane %v3630_v12, 5  ;;  %v4013_v13 = vrot.slane %v4011_v26, 4 }
 0x2c8   : > { %5109 = vmatmul.mubr.bf16.gmra.mrb[12].mxu1 %v4694_v19  ;;  %v4178_v60 = vrot.slane %v4176_v2, 4  ;;  %v4214_v35 = vsel %vm14100_vm8, %v4212_v49, %v4213_v28  ;;  %v4017_v42 = vshll.u32 %v3630_v12, 16  ;;  %v4177_v59 = vsel %vm14100_vm8, %v11915_v9, %v4176_v2  ;;  %v16433_v28 = vpop.permute.xlu1 %4441  ;;  %v16435_v9 = vpop.permute.xlu0 %4512 }
 0x2c9   : > { %5116 = vmatprep.mubr.bf16.mxu1 %v4825_v37  ;;  %v4004_v17 = vor.u32 %v4003_v5, %v4000_v54  ;;  %v4009_v39 = vrot.slane %v4007_v32, 5  ;;  %v4211_v18 = vsel %vm14100_vm8, %v11916_v51, %v4210_v11  ;;  %v4184_v0 = vrot.slane %v4182_v30, 4 }
 0x2ca   : > { %v4180_v52 = vsel %vm14100_vm8, %v4178_v60, %v4179_v57  ;;  %v4187_v37 = vrot.slane %v4185_v56, 5  ;;  %v11968_v14 = vcombine.low %v4211_v18, %v4214_v35  ;;  %v4191_v26 = vshll.u32 %v3632_v25, 16 }
 0x2cb   : > { %4561 = vrot.lane.b32.xlu0 %v11966_v7, %s18910_s26  ;;  %v11965_v19 = vcombine.low %v4177_v59, %v4180_v52  ;;  %v4005_v45 = vrot.slane %v4004_v17, 4  ;;  %v4014_v62 = vor.u32 %v4013_v13, %v4009_v39  ;;  %v4197_v49 = vrot.slane %v4195_v27, 4 }
 0x2cc   : > { %v4218_v12 = vrot.slane %v4216_v63, 4  ;;  %v4019_v30 = vrot.slane %v4017_v42, 5  ;;  %v4188_v51 = vor.u32 %v4187_v37, %v4184_v0  ;;  %v4201_v2 = vshll.u32 %v3633_v23, 16  ;;  %v16462_v17 = vpop.permute.xlu1 %4439 }
 0x2cd   : > { %4455 = vrot.lane.b32.xlu1 %v11965_v19, %s18910_s26  ;;  %13220 = vmatmul.mubr.msk.bf16.gmra.mrb[56].mxu0 %vm2485_vm6, %v11965_v19  ;;  %v4015_v11 = vrot.slane %v4014_v62, 4  ;;  %v4660_v25 = vsel %vm2617_vm0, %v16404_v16, %v16188_v48  ;;  %v4193_v56 = vrot.slane %v4191_v26, 5  ;;  %v4221_v63 = vrot.slane %v4219_v10, 5 }
 0x2ce   : > { %13223 = vmatprep.mubr.msk.bf16.mxu0 %vm2485_vm6, %v11968_v14  ;;  %v4227_v27 = vrot.slane %v4225_v4, 5  ;;  %v4697_v54 = vsel %vm4683_vm2, %v4660_v25, %v16267_v47  ;;  %v4010_v23 = vsel %vm14135_vm12, %v4005_v45, %v4009_v39  ;;  %v4231_v48 = vrot.slane %v4229_v53, 4  ;;  %v3636_v4 = vld [vmem:[#allocation3 + $0xd4] sm:$0x1]  ;;  %v4511_v39 = vpop.permute.xlu0 %4510 }
 0x2cf   : > { %4526 = vrot.lane.b32.xlu0 %v11965_v19, %s18912_s22  ;;  %v4020_v5 = vsel %vm14135_vm12, %v4015_v11, %v4019_v30  ;;  %v4189_v10 = vrot.slane %v4188_v51, 4  ;;  %v4198_v32 = vor.u32 %v4197_v49, %v4193_v56  ;;  %v4203_v60 = vrot.slane %v4201_v2, 5 }
 0x2d0   : > { %5117 = vmatmul.mubr.bf16.gmra.mrb[16].mxu1 %v4697_v54  ;;  %v16456_v16 = vcombine.low %v4010_v23, %v4020_v5  ;;  %v11917_v57 = vrot.slane %v16382_v46, 9  ;;  %v4244_v13 = vrot.slane %v16384_v3, 5  ;;  %v4247_v35 = vrot.slane %v3636_v4, 5 }
 0x2d1   : > { %v4199_v47 = vrot.slane %v4198_v32, 4  ;;  %v4222_v53 = vor.u32 %v4221_v63, %v4218_v12  ;;  %v4232_v42 = vor.u32 %v4231_v48, %v4227_v27  ;;  %v4235_v59 = vshll.u32 %v3636_v4, 16  ;;  %v18949_v32 = vld [vmem:[#allocation22_spill] sm:$0xff] }
 0x2d2   : > { %4375 = vrot.lane.b32.xlu1 %v16456_v16, %s18912_s22  ;;  %v4194_v52 = vsel %vm14135_vm12, %v4189_v10, %v4193_v56  ;;  %v4245_v0 = vsel %vm14100_vm8, %v11917_v57, %v4244_v13  ;;  %v4246_v19 = vrot.slane %v4244_v13, 4  ;;  %v11969_v2 = vcombine.low %v16382_v46, %v16384_v3 }
 0x2d3   : > { %4594 = vrot.lane.b32.xlu0 %v16456_v16, %s18935_s4  ;;  %v4204_v18 = vsel %vm14135_vm12, %v4199_v47, %v4203_v60  ;;  %v4223_v12 = vrot.slane %v4222_v53, 4  ;;  %v4233_v11 = vrot.slane %v4232_v42, 4  ;;  %v4237_v30 = vrot.slane %v4235_v59, 5 }
 0x2d4   : > { %v16472_v45 = vcombine.low %v4194_v52, %v4204_v18  ;;  %v4248_v62 = vsel %vm14100_vm8, %v4246_v19, %v4247_v35  ;;  %v4752_v4 = vsel %vm2485_vm6, %v18949_v32, %v4511_v39 }
 0x2d5   : > { %v11971_v49 = vcombine.low %v4245_v0, %v4248_v62  ;;  %v4228_v25 = vsel %vm14135_vm12, %v4223_v12, %v4227_v27  ;;  %v4238_v56 = vsel %vm14135_vm12, %v4233_v11, %v4237_v30  ;;  %v18948_v27 = vld [vmem:[#allocation17_spill] sm:$0xff] }
 0x2d6   : > { %4490 = vrot.lane.b32.xlu1 %v11966_v7, %s18935_s4  ;;  %v11970_v54 = vcombine.low %v4228_v25, %v4238_v56  ;;  %v4749_v10 = vsel %vm2485_vm6, %v18948_v27, %v16320_v29  ;;  %v4793_v29 = vsel %vm2617_vm0, %v4752_v4, %v16351_v40  ;;  %v18953_v25 = vld [vmem:[#allocation26_spill] sm:$0xff] }
 0x2d7   : > { %4596 = vrot.lane.b32.xlu0 %v16472_v45, %s18935_s4  ;;  %13224 = vmatmul.mubr.msk.bf16.gmra.mrb[60].mxu0 %vm2485_vm6, %v11971_v49  ;;  %v18951_v49 = vld [vmem:[#allocation18_spill] sm:$0xff] }
 0x2d8   : > { %v16479_v37 = vpop.permute.xlu1 %4478  ;;  %v16481_v26 = vpop.permute.xlu0 %4549 }
 0x2db   : > { %4528 = vrot.lane.b32.xlu0 %v11968_v14, %s18912_s22  ;;  %v4620_v14 = vsel %vm2485_vm6, %v15786_v34, %v16418_v24  ;;  %v4791_v24 = vsel %vm2617_vm0, %v4749_v10, %v16388_v41 }
 0x2dc   : > { %v4362_v51 = vpop.permute.xlu1 %4361  ;;  %v4581_v7 = vpop.permute.xlu0 %4580  ;;  %v4662_v34 = vsel %vm2617_vm0, %v4620_v14, %v16337_v33  ;;  %v18950_v33 = vld [vmem:[#allocation15_spill] sm:$0xff] }
 0x2dd   : > { %v4700_v57 = vsel %vm4683_vm2, %v4662_v34, %v16214_v31  ;;  %v4831_v35 = vsel %vm4683_vm2, %v4793_v29, %v4581_v7  ;;  %v4623_v39 = vsel %vm2485_vm6, %v18950_v33, %v16372_v36  ;;  %v18952_v7 = vld [vmem:[#allocation20_spill] sm:$0xff] }
 0x2de   : > { %v4664_v42 = vsel %vm2617_vm0, %v4623_v39, %v16318_v22  ;;  %v18955_v39 = vld [vmem:[#allocation21_spill] sm:$0xff] }
 0x2df   : > { %v16491_v63 = vpop.f32.mrb[32].mxu0  ;;  %4563 = vrot.lane.b32.xlu0 %v11969_v2, %s18910_s26  ;;  %v4703_v31 = vsel %vm4683_vm2, %v4664_v42, %v16395_v50  ;;  %v4755_v2 = vsel %vm2485_vm6, %v18952_v7, %v16435_v9 }
 0x2e0   : > { %v16497_v23 = vpop.f32.mrb[33].mxu0  ;;  %v4548_v5 = vpop.permute.xlu0 %4547 }
 0x2e1   : > { %v4477_v48 = vpop.permute.xlu1 %4476  ;;  %v16499_v46 = vpop.f32.mrb[34].mxu0  ;;  %v4795_v14 = vsel %vm2617_vm0, %v4755_v2, %v4548_v5 }
 0x2e2   : > { %v16501_v3 = vpop.f32.mrb[35].mxu0 }
 0x2e3   : > { %4598 = vrot.lane.b32.xlu0 %v11970_v54, %s18935_s4 }
 0x2e4   : > { %v4579_v60 = vpop.permute.xlu0 %4578 }
 0x2e5   : > { %v4828_v47 = vsel %vm4683_vm2, %v4791_v24, %v4579_v60  ;;  %v4360_v13 = vpop.permute.xlu1 %4359  ;;  %v18954_v24 = vld [vmem:[#allocation16_spill] sm:$0xff] }
 0x2e6   : > { %5124 = vmatprep.mubr.bf16.mxu1 %v4828_v47  ;;  %v4626_v12 = vsel %vm2485_vm6, %v18951_v49, %v4360_v13 }
 0x2e7   : > { %5125 = vmatmul.mubr.bf16.gmra.mrb[20].mxu1 %v4700_v57  ;;  %v4666_v54 = vsel %vm2617_vm0, %v4626_v12, %v16462_v17  ;;  %v4629_v17 = vsel %vm2485_vm6, %v18954_v24, %v4362_v51 }
 0x2e8   : > { %5132 = vmatprep.mubr.bf16.mxu1 %v4831_v35  ;;  %v4517_v53 = vpop.permute.xlu0 %4516  ;;  %v4706_v4 = vsel %vm4683_vm2, %v4666_v54, %v16349_v8  ;;  %v4668_v47 = vsel %vm2617_vm0, %v4629_v17, %v16433_v28  ;;  %v18956_v28 = vld [vmem:[#allocation24_spill] sm:$0xff] }
 0x2e9   : > { %v16522_v41 = vpop.permute.xlu1 %4445  ;;  %v4709_v57 = vsel %vm4683_vm2, %v4668_v47, %v4477_v48  ;;  %v4761_v48 = vsel %vm2485_vm6, %v18956_v28, %v4517_v53 }
 0x2ec   : > { %v4515_v59 = vpop.permute.xlu0 %4514 }
 0x2ed   : > { %v4444_v40 = vpop.permute.xlu1 %4443  ;;  %v4758_v56 = vsel %vm2485_vm6, %v18953_v25, %v4515_v59 }
 0x2ee   : > { %v4797_v34 = vsel %vm2617_vm0, %v4758_v56, %v16481_v26 }
 0x2ef   : > { %5133 = vmatmul.mubr.bf16.gmra.mrb[24].mxu1 %v4703_v31 }
 0x2f8   : > { %v16528_v52 = vpop.permute.xlu1 %4482  ;;  %v4554_v18 = vpop.permute.xlu0 %4553 }
 0x2fc   : > { %v4366_v0 = vpop.permute.xlu1 %4365  ;;  %v4585_v19 = vpop.permute.xlu0 %4584 }
 0x2fd   : > { %v4837_v9 = vsel %vm4683_vm2, %v4797_v34, %v4585_v19 }
 0x2ff   : > { %v16530_v62 = vpop.f32.mrb[36].mxu0 }
 0x300   : > { %v4481_v36 = vpop.permute.xlu1 %4480  ;;  %v16534_v11 = vpop.f32.mrb[37].mxu0 }
 0x301   : > { %v4552_v22 = vpop.permute.xlu0 %4551  ;;  %v16536_v30 = vpop.f32.mrb[38].mxu0 }
 0x302   : > { %v16538_v50 = vpop.f32.mrb[39].mxu0  ;;  %v4799_v25 = vsel %vm2617_vm0, %v4761_v48, %v4552_v22 }
 0x304   : > { %v4364_v27 = vpop.permute.xlu1 %4363 }
 0x305   : > { %v4583_v10 = vpop.permute.xlu0 %4582  ;;  %v4632_v42 = vsel %vm2485_vm6, %v18955_v39, %v4364_v27 }
 0x306   : > { %v4834_v32 = vsel %vm4683_vm2, %v4795_v14, %v4583_v10  ;;  %v4670_v2 = vsel %vm2617_vm0, %v4632_v42, %v4444_v40  ;;  %v18959_v42 = vld [vmem:[#allocation23_spill] sm:$0xff] }
 0x307   : > { %5140 = vmatprep.mubr.bf16.mxu1 %v4834_v32  ;;  %v4712_v14 = vsel %vm4683_vm2, %v4670_v2, %v16479_v37  ;;  %v18957_v32 = vld [vmem:[#allocation19_spill] sm:$0xff]  ;;  %v18958_v37 = vld [vmem:[#allocation25_spill] sm:$0xff] }
 0x308   : > { %5141 = vmatmul.mubr.bf16.gmra.mrb[28].mxu1 %v4706_v4  ;;  %v4450_v60 = vpop.permute.xlu1 %4449  ;;  %v4635_v40 = vsel %vm2485_vm6, %v18957_v32, %v4366_v0 }
 0x309   : > { %5148 = vmatprep.mubr.bf16.mxu1 %v4837_v9  ;;  %v4521_v5 = vpop.permute.xlu0 %4520  ;;  %v4672_v34 = vsel %vm2617_vm0, %v4635_v40, %v16522_v41 }
 0x30a   : > { %v4715_v9 = vsel %vm4683_vm2, %v4672_v34, %v4481_v36  ;;  %v4767_v17 = vsel %vm2485_vm6, %v16239_v20, %v4521_v5 }
 0x30c   : > { %v4448_v29 = vpop.permute.xlu1 %4447 }
 0x30d   : > { %v4519_v8 = vpop.permute.xlu0 %4518 }
 0x30e   : > { %v4764_v12 = vsel %vm2485_vm6, %v16271_v6, %v4519_v8 }
 0x30f   : > { %v4801_v27 = vsel %vm2617_vm0, %v4764_v12, %v4554_v18 }
 0x310   : > { %5149 = vmatmul.mubr.bf16.gmra.mrb[32].mxu1 %v4709_v57  ;;  %v4370_v13 = vpop.permute.xlu1 %4369 }
 0x318   : > { %v4558_v35 = vpop.permute.xlu0 %4557 }
 0x319   : > { %v4485_v26 = vpop.permute.xlu1 %4484 }
 0x31c   : > { %v4589_v33 = vpop.permute.xlu0 %4588 }
 0x31d   : > { %v4368_v59 = vpop.permute.xlu1 %4367  ;;  %v4843_v53 = vsel %vm4683_vm2, %v4801_v27, %v4589_v33 }
 0x31e   : > { %v4638_v18 = vsel %vm2485_vm6, %v18958_v37, %v4368_v59 }
 0x31f   : > { %v16561_v31 = vpop.f32.mrb[40].mxu0  ;;  %v4674_v0 = vsel %vm2617_vm0, %v4638_v18, %v4448_v29 }
 0x320   : > { %v4556_v51 = vpop.permute.xlu0 %4555  ;;  %v16563_v19 = vpop.f32.mrb[41].mxu0  ;;  %v4718_v36 = vsel %vm4683_vm2, %v4674_v0, %v16528_v52 }
 0x321   : > { %v16565_v49 = vpop.f32.mrb[42].mxu0  ;;  %v4452_v10 = vpop.permute.xlu1 %4451  ;;  %v4803_v8 = vsel %vm2617_vm0, %v4767_v17, %v4556_v51 }
 0x322   : > { %v16571_v7 = vpop.f32.mrb[43].mxu0 }
 0x324   : > { %v4587_v56 = vpop.permute.xlu0 %4586 }
 0x325   : > { %v4840_v54 = vsel %vm4683_vm2, %v4799_v25, %v4587_v56  ;;  %v4487_v22 = vpop.permute.xlu1 %4486 }
 0x326   : > { %5156 = vmatprep.mubr.bf16.mxu1 %v4840_v54 }
 0x327   : > { %5157 = vmatmul.mubr.bf16.gmra.mrb[36].mxu1 %v4712_v14 }
 0x328   : > { %5164 = vmatprep.mubr.bf16.mxu1 %v4843_v53  ;;  %v4525_v6 = vpop.permute.xlu0 %4524 }
 0x329   : > { %v4374_v47 = vpop.permute.xlu1 %4373 }
 0x32c   : > { %v4523_v4 = vpop.permute.xlu0 %4522 }
 0x32d   : > { %v4770_v57 = vsel %vm2485_vm6, %v16353_v55, %v4523_v4  ;;  %v4372_v5 = vpop.permute.xlu1 %4371  ;;  %v4641_v55 = vsel %vm2485_vm6, %v18959_v42, %v4370_v13 }
 0x32e   : > { %v4805_v39 = vsel %vm2617_vm0, %v4770_v57, %v4558_v35  ;;  %v4676_v51 = vsel %vm2617_vm0, %v4641_v55, %v4450_v60  ;;  %v4644_v2 = vsel %vm2485_vm6, %v16278_v43, %v4372_v5  ;;  %v4773_v60 = vsel %vm2485_vm6, %v16339_v58, %v4525_v6 }
 0x32f   : > { %5165 = vmatmul.mubr.bf16.gmra.mrb[40].mxu1 %v4715_v9  ;;  %v4721_v28 = vsel %vm4683_vm2, %v4676_v51, %v4485_v26  ;;  %v4678_v26 = vsel %vm2617_vm0, %v4644_v2, %v4452_v10  ;;  %v4647_v10 = vsel %vm2485_vm6, %v16273_v21, %v4374_v47 }
 0x330   : > { %v4593_v24 = vpop.permute.xlu0 %4592  ;;  %v4724_v43 = vsel %vm4683_vm2, %v4678_v26, %v4487_v22 }
 0x331   : > { %v4849_v20 = vsel %vm4683_vm2, %v4805_v39, %v4593_v24  ;;  %v4454_v48 = vpop.permute.xlu1 %4453 }
 0x332   : > { %v4680_v34 = vsel %vm2617_vm0, %v4647_v10, %v4454_v48  ;;  %v5520_v48 = vlaneseq }
 0x334   : > { %v4591_v33 = vpop.permute.xlu0 %4590 }
 0x335   : > { %v4846_v41 = vsel %vm4683_vm2, %v4803_v8, %v4591_v33 }
 0x336   : > { %5172 = vmatprep.mubr.bf16.mxu1 %v4846_v41 }
 0x337   : > { %5173 = vmatmul.mubr.bf16.gmra.mrb[44].mxu1 %v4718_v36 }
 0x338   : > { %5180 = vmatprep.mubr.bf16.mxu1 %v4849_v20 }
 0x339   : > { %v4560_v29 = vpop.permute.xlu0 %4559  ;;  %v4489_v13 = vpop.permute.xlu1 %4488 }
 0x33a   : > { %v4807_v54 = vsel %vm2617_vm0, %v4773_v60, %v4560_v29  ;;  %v4727_v9 = vsel %vm4683_vm2, %v4680_v34, %v4489_v13  ;;  %v5521_v60 = vshrl.u32 %v5520_v48, 7 }
 0x33d   : > { %v4562_v59 = vpop.permute.xlu0 %4561 }
 0x33f   : > { %5181 = vmatmul.mubr.bf16.gmra.mrb[48].mxu1 %v4721_v28  ;;  %v16602_v12 = vpop.f32.mrb[44].mxu0  ;;  %v4456_v32 = vpop.permute.xlu1 %4455 }
 0x340   : > { %v16604_v52 = vpop.f32.mrb[45].mxu0 }
 0x341   : > { %v16606_v35 = vpop.f32.mrb[46].mxu0  ;;  %v4527_v25 = vpop.permute.xlu0 %4526 }
 0x342   : > { %v16610_v56 = vpop.f32.mrb[47].mxu0  ;;  %v4776_v27 = vsel %vm2485_vm6, %v16456_v16, %v4527_v25 }
 0x343   : > { %v4809_v4 = vsel %vm2617_vm0, %v4776_v27, %v4562_v59  ;;  %v13724_v59 = vmov 1983009808  }
 0x344   : > { %v4376_v16 = vpop.permute.xlu1 %4375  ;;  %v5518_v28 = vunpack.c.l.s4 %v13724_v59 }
 0x345   : > { %v4595_v14 = vpop.permute.xlu0 %4594  ;;  %v4650_v18 = vsel %vm2485_vm6, %v16416_v61, %v4376_v16 }
 0x346   : > { %v4852_v53 = vsel %vm4683_vm2, %v4807_v54, %v4595_v14  ;;  %v4682_v20 = vsel %vm2617_vm0, %v4650_v18, %v4456_v32  ;;  %v5519_v13 = vunpack.c.0.s8 %v5518_v28 }
 0x347   : > { %5188 = vmatprep.mubr.bf16.mxu1 %v4852_v53 }
 0x348   : > { %5189 = vmatmul.mubr.bf16.gmra.mrb[52].mxu1 %v4724_v43  ;;  %v4491_v17 = vpop.permute.xlu1 %4490  ;;  %v16658_v14 = vsub.s32 %v5519_v13, %v5521_v60 }
 0x349   : > { %v4597_v40 = vpop.permute.xlu0 %4596  ;;  %v4730_v61 = vsel %vm4683_vm2, %v4682_v20, %v4491_v17 }
 0x34a   : > { %v4855_v58 = vsel %vm4683_vm2, %v4809_v4, %v4597_v40 }
 0x34b   : > { %5196 = vmatprep.mubr.bf16.mxu1 %v4855_v58 }
 0x34d   : > { %v4529_v6 = vpop.permute.xlu0 %4528 }
 0x34e   : > { %v4779_v57 = vsel %vm2485_vm6, %v16472_v45, %v4529_v6 }
 0x350   : > { %5197 = vmatmul.mubr.bf16.gmra.mrb[56].mxu1 %v4727_v9 }
 0x351   : > { %v4564_v37 = vpop.permute.xlu0 %4563 }
 0x352   : > { %v12738_v22 = vpop.f32.mrb[0].mxu1  ;;  %v4811_v21 = vsel %vm2617_vm0, %v4779_v57, %v4564_v37 }
 0x353   : > { %v12739_v24 = vpop.f32.mrb[1].mxu1 }
 0x354   : > { %v12740_v0 = vadd.f32 %v12739_v24, %v12738_v22  ;;  %v12741_v8 = vpop.f32.mrb[2].mxu1 }
 0x355   : > { %v12742_v47 = vpop.f32.mrb[3].mxu1  ;;  %v4599_v33 = vpop.permute.xlu0 %4598 }
 0x356   : > { %v5248_v41 = vadd.f32 %v12740_v0, %v16497_v23  ;;  %v12743_v36 = vadd.f32 %v12742_v47, %v12741_v8  ;;  %v4858_v39 = vsel %vm4683_vm2, %v4811_v21, %v4599_v33  ;;  %v16647_v23 = vld [vmem:[%s18961_s8] ss:$0 sm:$0xff] }
 0x357   : > { %5204 = vmatprep.mubr.bf16.mxu1 %v4858_v39 }
 0x358   : > { %v5251_v5 = vadd.f32 %v12743_v36, %v16501_v3  ;;  %5205 = vmatmul.mubr.bf16.gmra.mrb[60].mxu1 %v4730_v61  ;;  %v5381_v51 = vmul.f32 %v16647_v23, %v5248_v41  ;;  %v16653_v3 = vld [vmem:[%s18821_s14] ss:$0 sm:$0xff] }
 0x35a   : > { %v5382_v2 = vmul.f32 %v16647_v23, %v5251_v5  ;;  %v5420_v25 = vadd.f32 %v16653_v3, %v5381_v51 }
 0x35c   : > { %v5421_v26 = vadd.f32 %v16653_v3, %v5382_v2  ;;  %v5452_v54 = vmax.f32 %v5420_v25, 0.0 }
 0x35e   : > { %v5453_v27 = vmax.f32 %v5421_v26, 0.0  ;;  %v5516_v53 = vcombine.high %v5452_v54, %v5452_v54  ;;  %v5523_v43 = vrot.slane %v5452_v54, %v16658_v14 }
 0x35f   : > { %v16636_v45 = vpop.f32.mrb[48].mxu0 }
 0x360   : > { %v16638_v42 = vpop.f32.mrb[49].mxu0  ;;  %v5533_v32 = vcombine.high %v5453_v27, %v5453_v27  ;;  %v5530_v4 = vrot.slane %v5516_v53, %v16658_v14  ;;  %v5540_v58 = vrot.slane %v5453_v27, %v16658_v14  ;;  %v5531_v16 = vcombine.high %v5523_v43, %v5523_v43 }
 0x361   : > { %v16640_v55 = vpop.f32.mrb[50].mxu0  ;;  %v12008_v8 = vrot.slane %v5523_v43, 9 }
 0x362   : > { %18960 = vst [vmem:[#allocation17_spill] sm:$0xff] %v16640_v55  ;;  %v16642_v29 = vpop.f32.mrb[51].mxu0  ;;  %v5547_v9 = vrot.slane %v5533_v32, %v16658_v14  ;;  %v5532_v17 = vcombine.high %v5530_v4, %v5530_v4  ;;  %v5548_v57 = vcombine.high %v5540_v58, %v5540_v58  ;;  %v12009_v41 = vrot.slane %v5531_v16, 9 }
 0x363   : > { %v12010_v36 = vrot.slane %v5530_v4, 9  ;;  %v12012_v20 = vrot.slane %v5540_v58, 9  ;;  %v6572_v25 = vadd.f32 %v12008_v8, %v5523_v43 }
 0x364   : > { %v5549_v39 = vcombine.high %v5547_v9, %v5547_v9  ;;  %v12011_v59 = vrot.slane %v5532_v17, 9  ;;  %v12013_v28 = vrot.slane %v5548_v57, 9  ;;  %v12014_v48 = vrot.slane %v5547_v9, 9 }
 0x365   : > { %v6573_v54 = vadd.f32 %v12009_v41, %v5531_v16  ;;  %v6574_v27 = vadd.f32 %v12010_v36, %v5530_v4  ;;  %v6576_v32 = vadd.f32 %v12012_v20, %v5540_v58 }
 0x366   : > { %v12015_v53 = vrot.slane %v5549_v39, 9 }
 0x368   : > { %v6579_v16 = vadd.f32 %v12015_v53, %v5549_v39 }
 0x37a   : > { %v12744_v40 = vpop.f32.mrb[4].mxu1 }
 0x37b   : > { %v12745_v10 = vpop.f32.mrb[5].mxu1 }
 0x37c   : > { %v12746_v6 = vadd.f32 %v12745_v10, %v12744_v40  ;;  %v12747_v34 = vpop.f32.mrb[6].mxu1 }
 0x37d   : > { %v12748_v37 = vpop.f32.mrb[7].mxu1 }
 0x37e   : > { %v5256_v22 = vadd.f32 %v16491_v63, %v12746_v6  ;;  %v12749_v18 = vadd.f32 %v12748_v37, %v12747_v34 }
 0x37f   : > { %v16665_v24 = vpop.f32.mrb[52].mxu0 }
 0x380   : > { %18962 = vst [vmem:[#allocation22_spill] sm:$0xff] %v16665_v24  ;;  %v16667_v0 = vpop.f32.mrb[53].mxu0  ;;  %v5383_v21 = vmul.f32 %v16647_v23, %v5256_v22  ;;  %v5259_v47 = vadd.f32 %v16499_v46, %v12749_v18  ;;  %v6575_v22 = vadd.f32 %v12011_v59, %v5532_v17  ;;  %v6577_v18 = vadd.f32 %v12013_v28, %v5548_v57 }
 0x381   : > { %18963 = vst [vmem:[#allocation15_spill] sm:$0xff] %v16667_v0  ;;  %v16671_v33 = vpop.f32.mrb[54].mxu0 }
 0x382   : > { %18964 = vst [vmem:[#allocation18_spill] sm:$0xff] %v16671_v33  ;;  %v16673_v61 = vpop.f32.mrb[55].mxu0  ;;  %v5422_v63 = vadd.f32 %v16653_v3, %v5383_v21  ;;  %v5384_v5 = vmul.f32 %v16647_v23, %v5259_v47  ;;  %v12750_v51 = vpop.f32.mrb[8].mxu1  ;;  %v6578_v21 = vadd.f32 %v12014_v48, %v5547_v9 }
 0x383   : > { %18965 = vst [vmem:[#allocation20_spill] sm:$0xff] %v16673_v61  ;;  %v12751_v2 = vpop.f32.mrb[9].mxu1 }
 0x384   : > { %v5454_v13 = vmax.f32 %v5422_v63, 0.0  ;;  %v5423_v46 = vadd.f32 %v16653_v3, %v5384_v5  ;;  %v12752_v60 = vadd.f32 %v12751_v2, %v12750_v51  ;;  %v12753_v26 = vpop.f32.mrb[10].mxu1 }
 0x385   : > { %v12754_v40 = vpop.f32.mrb[11].mxu1 }
 0x386   : > { %v5550_v10 = vcombine.high %v5454_v13, %v5454_v13  ;;  %v5557_v6 = vrot.slane %v5454_v13, %v16658_v14  ;;  %v5455_v34 = vmax.f32 %v5423_v46, 0.0  ;;  %v5264_v37 = vadd.f32 %v12752_v60, %v16534_v11 }
 0x387   : > { %v12755_v43 = vadd.f32 %v12754_v40, %v12753_v26 }
 0x388   : > { %v5564_v8 = vrot.slane %v5550_v10, %v16658_v14  ;;  %v5565_v47 = vcombine.high %v5557_v6, %v5557_v6  ;;  %v12016_v63 = vrot.slane %v5557_v6, 9  ;;  %v5567_v5 = vcombine.high %v5455_v34, %v5455_v34 }
 0x389   : > { %v5574_v4 = vrot.slane %v5455_v34, %v16658_v14  ;;  %v5385_v58 = vmul.f32 %v16647_v23, %v5264_v37  ;;  %v16684_v41 = vadd.f32 %v12755_v43, %v16538_v50 }
 0x38a   : > { %v5566_v36 = vcombine.high %v5564_v8, %v5564_v8  ;;  %v12017_v20 = vrot.slane %v5565_v47, 9  ;;  %v12018_v11 = vrot.slane %v5564_v8, 9  ;;  %v6580_v17 = vadd.f32 %v12016_v63, %v5557_v6 }
 0x38b   : > { %v5581_v9 = vrot.slane %v5567_v5, %v16658_v14  ;;  %v5582_v57 = vcombine.high %v5574_v4, %v5574_v4  ;;  %v12020_v51 = vrot.slane %v5574_v4, 9  ;;  %v5424_v59 = vadd.f32 %v16653_v3, %v5385_v58 }
 0x38c   : > { %v12019_v28 = vrot.slane %v5566_v36, 9  ;;  %v6581_v48 = vadd.f32 %v12017_v20, %v5565_v47  ;;  %v6582_v39 = vadd.f32 %v12018_v11, %v5564_v8  ;;  %v6700_v2 = vadd.f32 %v6580_v17, %v6572_v25 }
 0x38d   : > { %v5583_v13 = vcombine.high %v5581_v9, %v5581_v9  ;;  %v12021_v46 = vrot.slane %v5582_v57, 9  ;;  %v12022_v60 = vrot.slane %v5581_v9, 9  ;;  %v6584_v50 = vadd.f32 %v12020_v51, %v5574_v4 }
 0x38e   : > { %v6583_v26 = vadd.f32 %v12019_v28, %v5566_v36  ;;  %v6701_v53 = vadd.f32 %v6581_v48, %v6573_v54  ;;  %v6702_v40 = vadd.f32 %v6582_v39, %v6574_v27  ;;  %v6764_v10 = vmul.f32 0.25, %v6700_v2 }
 0x38f   : > { %v12023_v6 = vrot.slane %v5583_v13, 9  ;;  %v6585_v34 = vadd.f32 %v12021_v46, %v5582_v57  ;;  %v6586_v37 = vadd.f32 %v12022_v60, %v5581_v9  ;;  %v6704_v43 = vadd.f32 %v6584_v50, %v6576_v32 }
 0x390   : > { %v6703_v63 = vadd.f32 %v6583_v26, %v6575_v22  ;;  %v6765_v5 = vmul.f32 0.25, %v6701_v53  ;;  %v6766_v47 = vmul.f32 0.25, %v6702_v40  ;;  %v12601_v8 = vpack.c.bf16 %v6764_v10, %v6764_v10  ;;  %v7359_v53 = vld [vmem:[#allocation4] sm:$0xf] }
 0x391   : > { %v6587_v25 = vadd.f32 %v12023_v6, %v5583_v13  ;;  %v6705_v58 = vadd.f32 %v6585_v34, %v6577_v18  ;;  %v6706_v20 = vadd.f32 %v6586_v37, %v6578_v21  ;;  %v6768_v11 = vmul.f32 0.25, %v6704_v43  ;;  %v7314_v18 = vld [vmem:[#allocation4 + $0xc] sm:$0x1] }
 0x392   : > { %v6767_v4 = vmul.f32 0.25, %v6703_v63  ;;  %v12602_v54 = vpack.c.bf16 %v6765_v5, %v6765_v5  ;;  %v12603_v27 = vpack.c.bf16 %v6766_v47, %v6766_v47  ;;  %v7104_v36 = vunpack.c.l.b16 %v12601_v8 }
 0x393   : > { %v6707_v17 = vadd.f32 %v6587_v25, %v6579_v16  ;;  %v6769_v51 = vmul.f32 0.25, %v6705_v58  ;;  %v6770_v57 = vmul.f32 0.25, %v6706_v20  ;;  %v12605_v9 = vpack.c.bf16 %v6768_v11, %v6768_v11  ;;  %v7360_v20 = vld [vmem:[#allocation4 + $0x4] sm:$0x1] }
 0x394   : > { %v12604_v32 = vpack.c.bf16 %v6767_v4, %v6767_v4  ;;  %v7105_v28 = vunpack.c.l.b16 %v12602_v54  ;;  %v7106_v22 = vunpack.c.l.b16 %v12603_v27  ;;  %v7168_v48 = vrot.slane %v7104_v36, 7 }
 0x395   : > { %v6771_v39 = vmul.f32 0.25, %v6707_v17  ;;  %v12606_v2 = vpack.c.bf16 %v6769_v51, %v6769_v51  ;;  %v12607_v46 = vpack.c.bf16 %v6770_v57, %v6770_v57  ;;  %v7108_v13 = vunpack.c.l.b16 %v12605_v9 }
 0x396   : > { %v7107_v21 = vunpack.c.l.b16 %v12604_v32  ;;  %v7169_v60 = vrot.slane %v7105_v28, 6  ;;  %v7172_v50 = vrot.slane %v7106_v22, 5  ;;  %v5456_v26 = vmax.f32 %v5424_v59, 0.0  ;;  %v7311_v28 = vld [vmem:[#allocation4 + $0x8] sm:$0xf] }
 0x397   : > { %v7109_v40 = vunpack.c.l.b16 %v12606_v2  ;;  %v7110_v10 = vunpack.c.l.b16 %v12607_v46  ;;  %v12665_v16 = vpack.c.bf16 %v6771_v39, %v6771_v39  ;;  %v7178_v5 = vrot.slane %v7108_v13, 3 }
 0x398   : > { %v7171_v6 = vsel %vm7170_vm4, %v7169_v60, %v7168_v48  ;;  %v7175_v34 = vrot.slane %v7107_v21, 4  ;;  %v5584_v37 = vcombine.high %v5456_v26, %v5456_v26  ;;  %v5591_v43 = vrot.slane %v5456_v26, %v16658_v14 }
 0x399   : > { %v7174_v63 = vsel %vm7173_vm13, %v7172_v50, %v7171_v6  ;;  %v7315_v47 = vsel %vm15480_vm3, %v12665_v16, %v7314_v18  ;;  %v7380_v8 = vshrl.u32 %v7359_v53, 16  ;;  %v7181_v25 = vrot.slane %v7109_v40, 2 }
 0x39a   : > { %v7177_v59 = vsel %vm7176_vm5, %v7175_v34, %v7174_v63  ;;  %7316 = vst [vmem:[#allocation4 + $0xc] sm:$0x1] %v7315_v47  ;;  %v5598_v58 = vrot.slane %v5584_v37, %v16658_v14  ;;  %v7383_v11 = vshll.u32 %v7359_v53, 16  ;;  %v7184_v54 = vrot.slane %v7110_v10, 1 }
 0x39b   : > { %v7180_v4 = vsel %vm7179_vm9, %v7178_v5, %v7177_v59  ;;  %v5386_v27 = vmul.f32 %v16647_v23, %v16684_v41  ;;  %v12756_v36 = vpop.f32.mrb[12].mxu1  ;;  %v5599_v51 = vcombine.high %v5591_v43, %v5591_v43  ;;  %v12208_v9 = vrot.slane %v7359_v53, 9 }
 0x39c   : > { %v7183_v17 = vsel %vm7182_vm11, %v7181_v25, %v7180_v4  ;;  %v12757_v57 = vpop.f32.mrb[13].mxu1  ;;  %v7509_v2 = vrot.slane %v7360_v20, 5  ;;  %v5600_v13 = vcombine.high %v5598_v58, %v5598_v58  ;;  %v16701_v21 = vrot.slane %v7380_v8, 4 }
 0x39d   : > { %v7186_v32 = vsel %vm7185_vm14, %v7184_v54, %v7183_v17  ;;  %v5425_v22 = vadd.f32 %v16653_v3, %v5386_v27  ;;  %v12758_v48 = vadd.f32 %v12757_v57, %v12756_v36  ;;  %v12759_v39 = vpop.f32.mrb[14].mxu1  ;;  %v16703_v41 = vrot.slane %v7383_v11, 5 }
 0x39e   : > { %v7278_v46 = vpack.c.b16 %v7186_v32, %v7186_v32  ;;  %v12760_v18 = vpop.f32.mrb[15].mxu1  ;;  %v7389_v53 = vshll.u32 %v7360_v20, 16  ;;  %v12024_v10 = vrot.slane %v5591_v43, 9  ;;  %v12025_v16 = vrot.slane %v5599_v51, 9 }
 0x39f   : > { %v5457_v60 = vmax.f32 %v5425_v22, 0.0  ;;  %v5272_v50 = vadd.f32 %v16530_v62, %v12758_v48  ;;  %v12761_v26 = vadd.f32 %v12760_v18, %v12759_v39  ;;  %v12026_v6 = vrot.slane %v5598_v58, 9 }
 0x3a0   : > { %v7312_v40 = vsel %vm15474_vm1, %v7278_v46, %v7311_v28  ;;  %v16708_v34 = vpop.f32.mrb[56].mxu0  ;;  %v12027_v62 = vrot.slane %v5600_v13, 9  ;;  %v16719_v25 = vsel %vm14100_vm8, %v12208_v9, %v7509_v2  ;;  %v6588_v17 = vadd.f32 %v12024_v10, %v5591_v43 }
 0x3a1   : > { %18966 = vst [vmem:[#allocation26_spill] sm:$0xff] %v16708_v34  ;;  %7313 = vst [vmem:[#allocation4 + $0x8] sm:$0xf] %v7312_v40  ;;  %v5601_v37 = vcombine.high %v5457_v60, %v5457_v60  ;;  %v5608_v63 = vrot.slane %v5457_v60, %v16658_v14  ;;  %v5387_v5 = vmul.f32 %v16647_v23, %v5272_v50  ;;  %v16713_v8 = vpop.f32.mrb[57].mxu0  ;;  %v16728_v22 = vld [vmem:[#allocation4 + $0xc] sm:$0x1] }
 0x3a2   : > { %v5275_v47 = vadd.f32 %v16536_v30, %v12761_v26  ;;  %18967 = vst [vmem:[#allocation16_spill] sm:$0xff] %v16713_v8  ;;  %v16715_v59 = vpop.f32.mrb[58].mxu0  ;;  %v6589_v57 = vadd.f32 %v12025_v16, %v5599_v51  ;;  %v16730_v9 = vrot.slane %v7389_v53, 5  ;;  %v6590_v48 = vadd.f32 %v12026_v6, %v5598_v58 }
 0x3a3   : > { %18968 = vst [vmem:[#allocation21_spill] sm:$0xff] %v16715_v59  ;;  %v5615_v11 = vrot.slane %v5601_v37, %v16658_v14  ;;  %v5616_v4 = vcombine.high %v5608_v63, %v5608_v63  ;;  %v12028_v54 = vrot.slane %v5608_v63, 9  ;;  %v5426_v27 = vadd.f32 %v16653_v3, %v5387_v5  ;;  %v12762_v36 = vpop.f32.mrb[16].mxu1  ;;  %v16725_v30 = vpop.f32.mrb[59].mxu0 }
 0x3a4   : > { %18969 = vst [vmem:[#allocation24_spill] sm:$0xff] %v16725_v30  ;;  %v5388_v32 = vmul.f32 %v16647_v23, %v5275_v47  ;;  %v12763_v28 = vpop.f32.mrb[17].mxu1  ;;  %v6591_v60 = vadd.f32 %v12027_v62, %v5600_v13 }
 0x3a5   : > { %v5617_v39 = vcombine.high %v5615_v11, %v5615_v11  ;;  %v12029_v2 = vrot.slane %v5616_v4, 9  ;;  %v12030_v46 = vrot.slane %v5615_v11, 9  ;;  %v12765_v18 = vpop.f32.mrb[18].mxu1  ;;  %v5458_v50 = vmax.f32 %v5426_v27, 0.0 }
 0x3a6   : > { %v5427_v26 = vadd.f32 %v16653_v3, %v5388_v32  ;;  %v12764_v40 = vadd.f32 %v12763_v28, %v12762_v36  ;;  %v12766_v37 = vpop.f32.mrb[19].mxu1  ;;  %v6592_v51 = vadd.f32 %v12028_v54, %v5608_v63 }
 0x3a7   : > { %v12031_v43 = vrot.slane %v5617_v39, 9  ;;  %v12767_v10 = vadd.f32 %v12766_v37, %v12765_v18  ;;  %v5618_v5 = vcombine.high %v5458_v50, %v5458_v50  ;;  %v5625_v53 = vrot.slane %v5458_v50, %v16658_v14 }
 0x3a8   : > { %v5459_v47 = vmax.f32 %v5427_v26, 0.0  ;;  %v5280_v58 = vadd.f32 %v12764_v40, %v16563_v19  ;;  %v16736_v6 = vld [vmem:[#allocation4 + $0x8] sm:$0xf]  ;;  %v6593_v20 = vadd.f32 %v12029_v2, %v5616_v4  ;;  %v6594_v13 = vadd.f32 %v12030_v46, %v5615_v11 }
 0x3a9   : > { %v6595_v62 = vadd.f32 %v12031_v43, %v5617_v39  ;;  %v5283_v27 = vadd.f32 %v12767_v10, %v16571_v7  ;;  %v5632_v36 = vrot.slane %v5618_v5, %v16658_v14  ;;  %v5633_v32 = vcombine.high %v5625_v53, %v5625_v53 }
 0x3aa   : > { %v12032_v63 = vrot.slane %v5625_v53, 9  ;;  %v5635_v54 = vcombine.high %v5459_v47, %v5459_v47  ;;  %v5642_v28 = vrot.slane %v5459_v47, %v16658_v14  ;;  %v5389_v18 = vmul.f32 %v16647_v23, %v5280_v58 }
 0x3ab   : > { %v16743_v50 = vmul.f32 %v16647_v23, %v5283_v27  ;;  %v12209_v19 = vrot.slane %v16736_v6, 9  ;;  %v5634_v26 = vcombine.high %v5632_v36, %v5632_v36  ;;  %v12033_v4 = vrot.slane %v5633_v32, 9 }
 0x3ac   : > { %v12034_v11 = vrot.slane %v5632_v36, 9  ;;  %v6596_v39 = vadd.f32 %v12032_v63, %v5625_v53  ;;  %v5649_v7 = vrot.slane %v5635_v54, %v16658_v14  ;;  %v5650_v2 = vcombine.high %v5642_v28, %v5642_v28 }
 0x3ad   : > { %v12036_v46 = vrot.slane %v5642_v28, 9  ;;  %v5428_v40 = vadd.f32 %v16653_v3, %v5389_v18  ;;  %v12035_v37 = vrot.slane %v5634_v26, 9  ;;  %v6597_v43 = vadd.f32 %v12033_v4, %v5633_v32 }
 0x3ae   : > { %v6598_v10 = vadd.f32 %v12034_v11, %v5632_v36  ;;  %v6708_v5 = vadd.f32 %v6596_v39, %v6588_v17  ;;  %v5651_v47 = vcombine.high %v5649_v7, %v5649_v7  ;;  %v12037_v58 = vrot.slane %v5650_v2, 9 }
 0x3af   : > { %v12038_v27 = vrot.slane %v5649_v7, 9  ;;  %v6600_v16 = vadd.f32 %v12036_v46, %v5642_v28  ;;  %v6599_v59 = vadd.f32 %v12035_v37, %v5634_v26  ;;  %v6709_v34 = vadd.f32 %v6597_v43, %v6589_v57 }
 0x3b0   : > { %v6710_v30 = vadd.f32 %v6598_v10, %v6590_v48  ;;  %v6772_v8 = vmul.f32 0.25, %v6708_v5  ;;  %v12039_v33 = vrot.slane %v5651_v47, 9  ;;  %v6601_v53 = vadd.f32 %v12037_v58, %v5650_v2 }
 0x3b1   : > { %v6602_v63 = vadd.f32 %v12038_v27, %v5649_v7  ;;  %v6712_v54 = vadd.f32 %v6600_v16, %v6592_v51  ;;  %v6711_v24 = vadd.f32 %v6599_v59, %v6591_v60  ;;  %v6773_v61 = vmul.f32 0.25, %v6709_v34  ;;  %v7320_v16 = vld [vmem:[#allocation4 + $0x14] sm:$0x1] }
 0x3b2   : > { %v6774_v0 = vmul.f32 0.25, %v6710_v30  ;;  %v12609_v18 = vpack.c.bf16 %v6772_v8, %v6772_v8  ;;  %v6603_v55 = vadd.f32 %v12039_v33, %v5651_v47  ;;  %v6713_v32 = vadd.f32 %v6601_v53, %v6593_v20 }
 0x3b3   : > { %v6714_v36 = vadd.f32 %v6602_v63, %v6594_v13  ;;  %v6776_v17 = vmul.f32 0.25, %v6712_v54  ;;  %v6775_v4 = vmul.f32 0.25, %v6711_v24  ;;  %v12610_v11 = vpack.c.bf16 %v6773_v61, %v6773_v61 }
 0x3b4   : > { %v12611_v39 = vpack.c.bf16 %v6774_v0, %v6774_v0  ;;  %v7112_v28 = vunpack.c.l.b16 %v12609_v18  ;;  %v6715_v26 = vadd.f32 %v6603_v55, %v6595_v62  ;;  %v6777_v57 = vmul.f32 0.25, %v6713_v32 }
 0x3b5   : > { %v6778_v48 = vmul.f32 0.25, %v6714_v36  ;;  %v12613_v46 = vpack.c.bf16 %v6776_v17, %v6776_v17  ;;  %v12612_v37 = vpack.c.bf16 %v6775_v4, %v6775_v4  ;;  %v7113_v2 = vunpack.c.l.b16 %v12610_v11 }
 0x3b6   : > { %v7114_v7 = vunpack.c.l.b16 %v12611_v39  ;;  %v7187_v51 = vrot.slane %v7112_v28, 7  ;;  %v6779_v59 = vmul.f32 0.25, %v6715_v26  ;;  %v12614_v34 = vpack.c.bf16 %v6777_v57, %v6777_v57 }
 0x3b7   : > { %v12615_v30 = vpack.c.bf16 %v6778_v48, %v6778_v48  ;;  %v7116_v8 = vunpack.c.l.b16 %v12613_v46  ;;  %v7115_v33 = vunpack.c.l.b16 %v12612_v37  ;;  %v7188_v20 = vrot.slane %v7113_v2, 6 }
 0x3b8   : > { %v7190_v60 = vrot.slane %v7114_v7, 5  ;;  %v5460_v24 = vmax.f32 %v5428_v40, 0.0  ;;  %v7117_v61 = vunpack.c.l.b16 %v12614_v34  ;;  %v12666_v13 = vpack.c.bf16 %v6779_v59, %v6779_v59 }
 0x3b9   : > { %v7118_v0 = vunpack.c.l.b16 %v12615_v30  ;;  %v18970_v55 = vrot.slane %v16728_v22, 5  ;;  %v7189_v43 = vsel %vm7170_vm4, %v7188_v20, %v7187_v51  ;;  %v7192_v10 = vrot.slane %v7115_v33, 4  ;;  %v7317_v51 = vld [vmem:[#allocation4 + $0x10] sm:$0xf] }
 0x3ba   : > { %v5652_v5 = vcombine.high %v5460_v24, %v5460_v24  ;;  %v5659_v47 = vrot.slane %v5460_v24, %v16658_v14  ;;  %v12768_v58 = vpop.f32.mrb[20].mxu1  ;;  %v7191_v27 = vsel %vm7173_vm13, %v7190_v60, %v7189_v43  ;;  %v7194_v53 = vrot.slane %v7116_v8, 3 }
 0x3bb   : > { %v16752_v62 = vsel %vm14100_vm8, %v12209_v19, %v18970_v55  ;;  %v7321_v40 = vsel %vm15480_vm3, %v12666_v13, %v7320_v16  ;;  %v7394_v63 = vshrl.u32 %v16736_v6, 16  ;;  %v12769_v54 = vpop.f32.mrb[21].mxu1  ;;  %v7193_v18 = vsel %vm7176_vm5, %v7192_v10, %v7191_v27 }
 0x3bc   : > { %v7196_v19 = vrot.slane %v7117_v61, 2  ;;  %7322 = vst [vmem:[#allocation4 + $0x14] sm:$0x1] %v7321_v40  ;;  %v5666_v32 = vrot.slane %v5652_v5, %v16658_v14  ;;  %v5667_v36 = vcombine.high %v5659_v47, %v5659_v47  ;;  %v12771_v17 = vpop.f32.mrb[22].mxu1  ;;  %v7195_v4 = vsel %vm7179_vm9, %v7194_v53, %v7193_v18 }
 0x3bd   : > { %v7198_v11 = vrot.slane %v7118_v0, 1  ;;  %v5429_v39 = vadd.f32 %v16653_v3, %v16743_v50  ;;  %v12226_v28 = vcombine.low %v16719_v25, %v16752_v62  ;;  %v12772_v26 = vpop.f32.mrb[23].mxu1  ;;  %v12040_v48 = vrot.slane %v5659_v47, 9 }
 0x3be   : > { %v7197_v57 = vsel %vm7182_vm11, %v7196_v19, %v7195_v4  ;;  %v18971_v46 = vor.u32 %v16703_v41, %v16701_v21  ;;  %v7403_v2 = vshll.u32 %v16728_v22, 16  ;;  %v7396_v50 = vrot.slane %v7394_v63, 4 }
 0x3bf   : > { %v7199_v7 = vsel %vm7185_vm14, %v7198_v11, %v7197_v57  ;;  %v5461_v59 = vmax.f32 %v5429_v39, 0.0  ;;  %7623 = vrot.lane.b32.xlu1 %v12226_v28, %s18910_s26  ;;  %v7397_v34 = vshll.u32 %v16736_v6, 16  ;;  %v5668_v30 = vcombine.high %v5666_v32, %v5666_v32 }
 0x3c0   : > { %v7387_v37 = vrot.slane %v18971_v46, 4  ;;  %v7280_v25 = vpack.c.b16 %v7199_v7, %v7199_v7  ;;  %v12041_v8 = vrot.slane %v5667_v36, 9  ;;  %v12042_v33 = vrot.slane %v5666_v32, 9 }
 0x3c1   : > { %v5669_v20 = vcombine.high %v5461_v59, %v5461_v59  ;;  %v5676_v60 = vrot.slane %v5461_v59, %v16658_v14  ;;  %v7399_v21 = vrot.slane %v7397_v34, 5  ;;  %v12770_v41 = vadd.f32 %v12769_v54, %v12768_v58 }
 0x3c2   : > { %v7318_v22 = vsel %vm15474_vm1, %v7280_v25, %v7317_v51  ;;  %v7392_v16 = vsel %vm14135_vm12, %v7387_v37, %v16730_v9  ;;  %v12773_v24 = vadd.f32 %v12772_v26, %v12771_v17  ;;  %v12774_v61 = vpop.f32.mrb[24].mxu1  ;;  %v7405_v43 = vrot.slane %v7403_v2, 5 }
 0x3c3   : > { %7319 = vst [vmem:[#allocation4 + $0x10] sm:$0xf] %v7318_v22  ;;  %v5683_v0 = vrot.slane %v5669_v20, %v16658_v14  ;;  %v5684_v13 = vcombine.high %v5676_v60, %v5676_v60  ;;  %v7400_v55 = vor.u32 %v7399_v21, %v7396_v50  ;;  %v12775_v10 = vpop.f32.mrb[25].mxu1  ;;  %v16782_v5 = vadd.f32 %v12040_v48, %v5659_v47  ;;  %v16793_v26 = vld [vmem:[#allocation4 + $0x14] sm:$0x1] }
 0x3c4   : > { %v5288_v58 = vadd.f32 %v16561_v31, %v12770_v41  ;;  %v5291_v27 = vadd.f32 %v16565_v49, %v12773_v24  ;;  %v12776_v53 = vadd.f32 %v12775_v10, %v12774_v61  ;;  %v12777_v40 = vpop.f32.mrb[26].mxu1  ;;  %v12043_v63 = vrot.slane %v5668_v30, 9 }
 0x3c5   : > { %v16786_v54 = vadd.f32 %v12041_v8, %v5667_v36  ;;  %v16788_v9 = vadd.f32 %v12042_v33, %v5666_v32  ;;  %v5685_v18 = vcombine.high %v5683_v0, %v5683_v0  ;;  %v12778_v19 = vpop.f32.mrb[27].mxu1  ;;  %v7401_v17 = vrot.slane %v7400_v55, 4 }
 0x3c6   : > { %v5391_v4 = vmul.f32 %v16647_v23, %v5288_v58  ;;  %v5392_v11 = vmul.f32 %v16647_v23, %v5291_v27  ;;  %v5296_v47 = vadd.f32 %v12776_v53, %v16604_v52  ;;  %v12044_v39 = vrot.slane %v5676_v60, 9 }
 0x3c7   : > { %v12045_v31 = vrot.slane %v5684_v13, 9  ;;  %v12046_v28 = vrot.slane %v5683_v0, 9  ;;  %v12779_v49 = vadd.f32 %v12778_v19, %v12777_v40  ;;  %v16797_v36 = vsel %vm14135_vm12, %v7401_v17, %v7405_v43 }
 0x3c8   : > { %v5430_v32 = vadd.f32 %v16653_v3, %v5391_v4  ;;  %v5431_v57 = vadd.f32 %v16653_v3, %v5392_v11  ;;  %v5393_v48 = vmul.f32 %v16647_v23, %v5296_v47  ;;  %v6607_v46 = vadd.f32 %v12043_v63, %v5668_v30 }
 0x3c9   : > { %v12047_v37 = vrot.slane %v5685_v18, 9  ;;  %v12222_v52 = vcombine.low %v7392_v16, %v16797_v36  ;;  %v5299_v2 = vadd.f32 %v12779_v49, %v16610_v56  ;;  %v7517_v34 = vrot.slane %v16793_v26, 5 }
 0x3ca   : > { %v5462_v7 = vmax.f32 %v5430_v32, 0.0  ;;  %v5463_v51 = vmax.f32 %v5431_v57, 0.0  ;;  %v5432_v59 = vadd.f32 %v16653_v3, %v5393_v48  ;;  %v16805_v50 = vld [vmem:[#allocation4 + $0x10] sm:$0xf]  ;;  %v6608_v25 = vadd.f32 %v12044_v39, %v5676_v60 }
 0x3cb   : > { %v6609_v8 = vadd.f32 %v12045_v31, %v5684_v13  ;;  %v6610_v33 = vadd.f32 %v12046_v28, %v5683_v0  ;;  %7603 = vrot.lane.b32.xlu1 %v12222_v52, %s18912_s22  ;;  %v12230_v30 = vcombine.low %v16736_v6, %v16805_v50  ;;  %v6611_v22 = vadd.f32 %v12047_v37, %v5685_v18 }
 0x3cc   : > { %v5686_v20 = vcombine.high %v5462_v7, %v5462_v7  ;;  %v5693_v21 = vrot.slane %v5462_v7, %v16658_v14  ;;  %v5703_v56 = vcombine.high %v5463_v51, %v5463_v51  ;;  %v5710_v41 = vrot.slane %v5463_v51, %v16658_v14 }
 0x3cd   : > { %v16813_v16 = vmax.f32 %v5432_v59, 0.0  ;;  %v5394_v24 = vmul.f32 %v16647_v23, %v5299_v2  ;;  %v12210_v60 = vrot.slane %v16805_v50, 9  ;;  %v7408_v58 = vshrl.u32 %v16805_v50, 16 }
 0x3ce   : > { %v5700_v61 = vrot.slane %v5686_v20, %v16658_v14  ;;  %v5701_v0 = vcombine.high %v5693_v21, %v5693_v21  ;;  %v12048_v13 = vrot.slane %v5693_v21, 9  ;;  %v5717_v55 = vrot.slane %v5703_v56, %v16658_v14 }
 0x3cf   : > { %v5718_v6 = vcombine.high %v5710_v41, %v5710_v41  ;;  %v12052_v43 = vrot.slane %v5710_v41, 9  ;;  %v5720_v10 = vcombine.high %v16813_v16, %v16813_v16  ;;  %7636 = vrot.lane.b32.xlu1 %v12230_v30, %s18935_s4 }
 0x3d0   : > { %v5702_v27 = vcombine.high %v5700_v61, %v5700_v61  ;;  %v12049_v53 = vrot.slane %v5701_v0, 9  ;;  %v12050_v40 = vrot.slane %v5700_v61, 9  ;;  %v6612_v63 = vadd.f32 %v12048_v13, %v5693_v21 }
 0x3d1   : > { %v5719_v18 = vcombine.high %v5717_v55, %v5717_v55  ;;  %v12053_v19 = vrot.slane %v5718_v6, 9  ;;  %v12054_v17 = vrot.slane %v5717_v55, 9  ;;  %v6616_v4 = vadd.f32 %v12052_v43, %v5710_v41 }
 0x3d2   : > { %v12051_v11 = vrot.slane %v5702_v27, 9  ;;  %v6613_v47 = vadd.f32 %v12049_v53, %v5701_v0  ;;  %v6614_v39 = vadd.f32 %v12050_v40, %v5700_v61  ;;  %v6716_v31 = vadd.f32 %v6612_v63, %v16782_v5  ;;  %v13455_v5 = vld [vmem:[%s18972_s30 + $0x80] sm:$0xff]  }
 0x3d3   : > { %v12055_v28 = vrot.slane %v5719_v18, 9  ;;  %v6617_v49 = vadd.f32 %v12053_v19, %v5718_v6  ;;  %v6618_v32 = vadd.f32 %v12054_v17, %v5717_v55  ;;  %v6720_v57 = vadd.f32 %v6616_v4, %v6608_v25  ;;  %13227 = vmatprep.subr.bf16.mxu1 %v13455_v5  ;;  %v7326_v19 = vld [vmem:[#allocation4 + $0x1c] sm:$0x1] }
 0x3d4   : > { %v6615_v48 = vadd.f32 %v12051_v11, %v5702_v27  ;;  %v6717_v37 = vadd.f32 %v6613_v47, %v16786_v54  ;;  %v6718_v52 = vadd.f32 %v6614_v39, %v16788_v9  ;;  %v6780_v2 = vmul.f32 0.25, %v6716_v31  ;;  %v16829_v54 = vpop.f32.mrb[60].mxu0  ;;  %13228 = vmatpush3.bf16.msra.mxu1 %v13455_v5 }
 0x3d5   : > { %v6619_v7 = vadd.f32 %v12055_v28, %v5719_v18  ;;  %v6721_v51 = vadd.f32 %v6617_v49, %v6609_v8  ;;  %v6722_v59 = vadd.f32 %v6618_v32, %v6610_v33  ;;  %v6784_v30 = vmul.f32 0.25, %v6720_v57  ;;  %v16831_v33 = vpop.f32.mrb[61].mxu0 }
 0x3d6   : > { %v6719_v20 = vadd.f32 %v6615_v48, %v6607_v46  ;;  %v6781_v21 = vmul.f32 0.25, %v6717_v37  ;;  %v6782_v56 = vmul.f32 0.25, %v6718_v52  ;;  %v12617_v41 = vpack.c.bf16 %v6780_v2, %v6780_v2  ;;  %v16835_v40 = vpop.f32.mrb[62].mxu0 }
 0x3d7   : > { %v6723_v61 = vadd.f32 %v6619_v7, %v6611_v22  ;;  %v6785_v25 = vmul.f32 0.25, %v6721_v51  ;;  %v6786_v0 = vmul.f32 0.25, %v6722_v59  ;;  %v12621_v13 = vpack.c.bf16 %v6784_v30, %v6784_v30  ;;  %v16838_v11 = vpop.f32.mrb[63].mxu0 }
 0x3d8   : > { %v6783_v9 = vmul.f32 0.25, %v6719_v20  ;;  %v12618_v55 = vpack.c.bf16 %v6781_v21, %v6781_v21  ;;  %v12619_v6 = vpack.c.bf16 %v6782_v56, %v6782_v56  ;;  %v7120_v8 = vunpack.c.l.b16 %v12617_v41 }
 0x3d9   : > { %v6787_v46 = vmul.f32 0.25, %v6723_v61  ;;  %v12622_v43 = vpack.c.bf16 %v6785_v25, %v6785_v25  ;;  %v12623_v27 = vpack.c.bf16 %v6786_v0, %v6786_v0  ;;  %v5727_v53 = vrot.slane %v16813_v16, %v16658_v14 }
 0x3da   : > { %v12620_v22 = vpack.c.bf16 %v6783_v9, %v6783_v9  ;;  %v7121_v63 = vunpack.c.l.b16 %v12618_v55  ;;  %v7122_v18 = vunpack.c.l.b16 %v12619_v6  ;;  %v5433_v17 = vadd.f32 %v16653_v3, %v5394_v24  ;;  %v13457_v24 = vld [vmem:[%s18972_s30 + $0x88] sm:$0xff]  }
 0x3db   : > { %v12780_v4 = vpop.f32.mrb[28].mxu1  ;;  %v7200_v47 = vrot.slane %v7120_v8, 7  ;;  %v7124_v39 = vunpack.c.l.b16 %v12621_v13  ;;  %v7125_v31 = vunpack.c.l.b16 %v12622_v43  ;;  %v12667_v28 = vpack.c.bf16 %v6787_v46, %v6787_v46  ;;  %13229 = vmatprep.subr.bf16.mxu1 %v13457_v24 }
 0x3dc   : > { %v12781_v49 = vpop.f32.mrb[29].mxu1  ;;  %v7123_v32 = vunpack.c.l.b16 %v12620_v22  ;;  %v7201_v57 = vrot.slane %v7121_v63, 6  ;;  %v7203_v48 = vrot.slane %v7122_v18, 5  ;;  %v5734_v37 = vrot.slane %v5720_v10, %v16658_v14  ;;  %13230 = vmatpush3.bf16.msra.mxu1 %v13457_v24  ;;  %v7323_v63 = vld [vmem:[#allocation4 + $0x18] sm:$0xf] }
 0x3dd   : > { %v12783_v52 = vpop.f32.mrb[30].mxu1  ;;  %v7126_v2 = vunpack.c.l.b16 %v12623_v27  ;;  %v7327_v7 = vsel %vm15480_vm3, %v12667_v28, %v7326_v19  ;;  %v5735_v51 = vcombine.high %v5727_v53, %v5727_v53  ;;  %v16855_v59 = vsel %vm14100_vm8, %v12210_v60, %v7517_v34 }
 0x3de   : > { %v12784_v16 = vpop.f32.mrb[31].mxu1  ;;  %v7202_v10 = vsel %vm7170_vm4, %v7201_v57, %v7200_v47  ;;  %v7205_v30 = vrot.slane %v7123_v32, 4  ;;  %7328 = vst [vmem:[#allocation4 + $0x1c] sm:$0x1] %v7327_v7  ;;  %v16860_v20 = vrot.slane %v7408_v58, 4  ;;  %v7417_v21 = vshll.u32 %v16793_v26, 16 }
 0x3df   : > { %v7204_v56 = vsel %vm7173_vm13, %v7203_v48, %v7202_v10  ;;  %v7207_v41 = vrot.slane %v7124_v39, 3  ;;  %v5736_v5 = vcombine.high %v5734_v37, %v5734_v37  ;;  %v5465_v61 = vmax.f32 %v5433_v17, 0.0 }
 0x3e0   : > { %v7206_v34 = vsel %vm7176_vm5, %v7205_v30, %v7204_v56  ;;  %v7209_v60 = vrot.slane %v7125_v31, 2  ;;  %v12056_v25 = vrot.slane %v5727_v53, 9  ;;  %v12238_v0 = vcombine.low %v16752_v62, %v16855_v59 }
 0x3e1   : > { %v7208_v13 = vsel %vm7179_vm9, %v7207_v41, %v7206_v34  ;;  %v7211_v58 = vrot.slane %v7126_v2, 1  ;;  %v12057_v9 = vrot.slane %v5735_v51, 9  ;;  %v5737_v55 = vcombine.high %v5465_v61, %v5465_v61 }
 0x3e2   : > { %v7210_v6 = vsel %vm7182_vm11, %v7209_v60, %v7208_v13  ;;  %v12058_v8 = vrot.slane %v5734_v37, 9  ;;  %v5744_v46 = vrot.slane %v5465_v61, %v16658_v14  ;;  %7654 = vrot.lane.b32.xlu0 %v12238_v0, %s18912_s22  ;;  %v12782_v43 = vadd.f32 %v12781_v49, %v12780_v4 }
 0x3e3   : > { %v12786_v27 = vpop.f32.mrb[32].mxu1  ;;  %v7212_v22 = vsel %vm7185_vm14, %v7211_v58, %v7210_v6  ;;  %v12059_v18 = vrot.slane %v5736_v5, 9  ;;  %v5751_v62 = vrot.slane %v5737_v55, %v16658_v14  ;;  %v12785_v19 = vadd.f32 %v12784_v16, %v12783_v52 }
 0x3e4   : > { %v12787_v17 = vpop.f32.mrb[33].mxu1  ;;  %v7282_v47 = vpack.c.b16 %v7212_v22, %v7212_v22  ;;  %v16873_v39 = vadd.f32 %v12056_v25, %v5727_v53  ;;  %v5752_v31 = vcombine.high %v5744_v46, %v5744_v46  ;;  %v5304_v28 = vadd.f32 %v16602_v12, %v12782_v43  ;;  %v16889_v25 = vld [vmem:[%s18821_s14] ss:$0 sm:$0xff] }
 0x3e5   : > { %v12789_v32 = vpop.f32.mrb[34].mxu1  ;;  %v5753_v57 = vcombine.high %v5751_v62, %v5751_v62  ;;  %v5307_v48 = vadd.f32 %v16606_v35, %v12785_v19  ;;  %v12788_v4 = vadd.f32 %v12787_v17, %v12786_v27  ;;  %v7411_v24 = vshll.u32 %v16805_v50, 16  ;;  %v16884_v34 = vld [vmem:[#allocation4 + $0x1c] sm:$0x1] }
 0x3e6   : > { %v12790_v49 = vpop.f32.mrb[35].mxu1  ;;  %v7324_v2 = vsel %vm15474_vm1, %v7282_v47, %v7323_v63  ;;  %v12060_v7 = vrot.slane %v5744_v46, 9  ;;  %v12062_v52 = vrot.slane %v5751_v62, 9  ;;  %v5395_v16 = vmul.f32 %v16647_v23, %v5304_v28 }
 0x3e7   : > { %7325 = vst [vmem:[#allocation4 + $0x18] sm:$0xf] %v7324_v2  ;;  %v6621_v53 = vadd.f32 %v12057_v9, %v5735_v51  ;;  %v12061_v10 = vrot.slane %v5752_v31, 9  ;;  %v5396_v12 = vmul.f32 %v16647_v23, %v5307_v48  ;;  %v5312_v30 = vadd.f32 %v12788_v4, %v16638_v42  ;;  %v16895_v23 = vld [vmem:[%s18961_s8] ss:$0 sm:$0xff] }
 0x3e8   : > { %v6622_v56 = vadd.f32 %v12058_v8, %v5734_v37  ;;  %v12063_v35 = vrot.slane %v5753_v57, 9  ;;  %v5434_v41 = vadd.f32 %v16653_v3, %v5395_v16  ;;  %v12791_v61 = vadd.f32 %v12790_v49, %v12789_v32 }
 0x3e9   : > { %v6623_v60 = vadd.f32 %v12059_v18, %v5736_v5  ;;  %v5435_v51 = vadd.f32 %v16889_v25, %v5396_v12  ;;  %v5397_v42 = vmul.f32 %v16895_v23, %v5312_v30  ;;  %v16898_v37 = vrot.slane %v7411_v24, 5 }
 0x3ea   : > { %v6624_v3 = vadd.f32 %v12060_v7, %v5744_v46  ;;  %v6626_v0 = vadd.f32 %v12062_v52, %v5751_v62  ;;  %v5466_v13 = vmax.f32 %v5434_v41, 0.0  ;;  %v5315_v5 = vadd.f32 %v12791_v61, %v16642_v29 }
 0x3eb   : > { %v6625_v58 = vadd.f32 %v12061_v10, %v5752_v31  ;;  %v5467_v9 = vmax.f32 %v5435_v51, 0.0  ;;  %v5436_v55 = vadd.f32 %v16889_v25, %v5397_v42  ;;  %v7521_v6 = vrot.slane %v16884_v34, 5 }
 0x3ec   : > { %v6627_v8 = vadd.f32 %v12063_v35, %v5753_v57  ;;  %v5754_v43 = vcombine.high %v5466_v13, %v5466_v13  ;;  %v5761_v27 = vrot.slane %v5466_v13, %v16658_v14  ;;  %v16906_v22 = vrot.slane %v7417_v21, 5 }
 0x3ed   : > { %v5771_v63 = vcombine.high %v5467_v9, %v5467_v9  ;;  %v5778_v46 = vrot.slane %v5467_v9, %v16658_v14  ;;  %v7414_v29 = vor.u32 %v16898_v37, %v16860_v20  ;;  %v7431_v18 = vshll.u32 %v16884_v34, 16 }
 0x3ee   : > { %v5768_v62 = vrot.slane %v5754_v43, %v16658_v14  ;;  %v5769_v19 = vcombine.high %v5761_v27, %v5761_v27  ;;  %v12064_v17 = vrot.slane %v5761_v27, 9  ;;  %v5398_v47 = vmul.f32 %v16895_v23, %v5315_v5 }
 0x3ef   : > { %v5785_v31 = vrot.slane %v5771_v63, %v16658_v14  ;;  %v5786_v28 = vcombine.high %v5778_v46, %v5778_v46  ;;  %v12068_v26 = vrot.slane %v5778_v46, 9  ;;  %v5468_v21 = vmax.f32 %v5436_v55, 0.0 }
 0x3f0   : > { %v5770_v32 = vcombine.high %v5768_v62, %v5768_v62  ;;  %v12065_v57 = vrot.slane %v5769_v19, 9  ;;  %v12066_v48 = vrot.slane %v5768_v62, 9  ;;  %v6628_v4 = vadd.f32 %v12064_v17, %v5761_v27 }
 0x3f1   : > { %v5787_v49 = vcombine.high %v5785_v31, %v5785_v31  ;;  %v12069_v24 = vrot.slane %v5786_v28, 9  ;;  %v12070_v2 = vrot.slane %v5785_v31, 9  ;;  %v6632_v7 = vadd.f32 %v12068_v26, %v5778_v46 }
 0x3f2   : > { %v12067_v52 = vrot.slane %v5770_v32, 9  ;;  %v6629_v16 = vadd.f32 %v12065_v57, %v5769_v19  ;;  %v6630_v10 = vadd.f32 %v12066_v48, %v5768_v62  ;;  %v6724_v12 = vadd.f32 %v6628_v4, %v16873_v39 }
 0x3f3   : > { %v12071_v30 = vrot.slane %v5787_v49, 9  ;;  %v6633_v35 = vadd.f32 %v12069_v24, %v5786_v28  ;;  %v6634_v41 = vadd.f32 %v12070_v2, %v5785_v31  ;;  %v6728_v61 = vadd.f32 %v6632_v7, %v6624_v3  ;;  %v7332_v2 = vld [vmem:[#allocation4 + $0x24] sm:$0x1] }
 0x3f4   : > { %v6631_v51 = vadd.f32 %v12067_v52, %v5770_v32  ;;  %v6725_v42 = vadd.f32 %v6629_v16, %v6621_v53  ;;  %v6726_v13 = vadd.f32 %v6630_v10, %v6622_v56  ;;  %v6788_v5 = vmul.f32 0.25, %v6724_v12 }
 0x3f5   : > { %v6635_v9 = vadd.f32 %v12071_v30, %v5787_v49  ;;  %v6729_v55 = vadd.f32 %v6633_v35, %v6625_v58  ;;  %v6730_v43 = vadd.f32 %v6634_v41, %v6626_v0  ;;  %v6792_v27 = vmul.f32 0.25, %v6728_v61 }
 0x3f6   : > { %v6727_v63 = vadd.f32 %v6631_v51, %v6623_v60  ;;  %v6789_v17 = vmul.f32 0.25, %v6725_v42  ;;  %v6790_v46 = vmul.f32 0.25, %v6726_v13  ;;  %v12625_v26 = vpack.c.bf16 %v6788_v5, %v6788_v5 }
 0x3f7   : > { %v6731_v19 = vadd.f32 %v6635_v9, %v6627_v8  ;;  %v6793_v62 = vmul.f32 0.25, %v6729_v55  ;;  %v6794_v57 = vmul.f32 0.25, %v6730_v43  ;;  %v12629_v39 = vpack.c.bf16 %v6792_v27, %v6792_v27  ;;  %v16927_v9 = vld [vmem:[#allocation4 + $0x18] sm:$0xf] }
 0x3f8   : > { %v6791_v48 = vmul.f32 0.25, %v6727_v63  ;;  %v12626_v28 = vpack.c.bf16 %v6789_v17, %v6789_v17  ;;  %v12627_v31 = vpack.c.bf16 %v6790_v46, %v6790_v46  ;;  %v7128_v3 = vunpack.c.l.b16 %v12625_v26 }
 0x3f9   : > { %v6795_v32 = vmul.f32 0.25, %v6731_v19  ;;  %v12630_v53 = vpack.c.bf16 %v6793_v62, %v6793_v62  ;;  %v12631_v56 = vpack.c.bf16 %v6794_v57, %v6794_v57  ;;  %v5788_v4 = vcombine.high %v5468_v21, %v5468_v21 }
 0x3fa   : > { %v16916_v49 = vpop.f32.mrb[36].mxu1  ;;  %v12628_v0 = vpack.c.bf16 %v6791_v48, %v6791_v48  ;;  %v7129_v58 = vunpack.c.l.b16 %v12626_v28  ;;  %v7130_v60 = vunpack.c.l.b16 %v12627_v31  ;;  %v7132_v24 = vunpack.c.l.b16 %v12629_v39 }
 0x3fb   : > { %v16918_v7 = vpop.f32.mrb[37].mxu1  ;;  %v7213_v8 = vrot.slane %v7128_v3, 7  ;;  %v7133_v52 = vunpack.c.l.b16 %v12630_v53  ;;  %v12668_v16 = vpack.c.bf16 %v6795_v32, %v6795_v32  ;;  %v5437_v10 = vadd.f32 %v16889_v25, %v5398_v47 }
 0x3fc   : > { %v16921_v12 = vpop.f32.mrb[38].mxu1  ;;  %v7131_v30 = vunpack.c.l.b16 %v12628_v0  ;;  %v7214_v35 = vrot.slane %v7129_v58, 6  ;;  %v7216_v41 = vrot.slane %v7130_v60, 5  ;;  %v5795_v61 = vrot.slane %v5468_v21, %v16658_v14  ;;  %v7329_v58 = vld [vmem:[#allocation4 + $0x20] sm:$0xf] }
 0x3fd   : > { %v12796_v51 = vpop.f32.mrb[39].mxu1  ;;  %v7134_v42 = vunpack.c.l.b16 %v12631_v56  ;;  %v7333_v13 = vsel %vm15480_vm3, %v12668_v16, %v7332_v2  ;;  %v5802_v5 = vrot.slane %v5788_v4, %v16658_v14  ;;  %v16931_v55 = vrot.slane %v7431_v18, 5 }
 0x3fe   : > { %v7215_v47 = vsel %vm7170_vm4, %v7214_v35, %v7213_v8  ;;  %v7218_v43 = vrot.slane %v7131_v30, 4  ;;  %v7220_v27 = vrot.slane %v7132_v24, 3  ;;  %7334 = vst [vmem:[#allocation4 + $0x24] sm:$0x1] %v7333_v13  ;;  %v5803_v63 = vcombine.high %v5795_v61, %v5795_v61 }
 0x3ff   : > { %v7217_v21 = vsel %vm7173_vm13, %v7216_v41, %v7215_v47  ;;  %v5804_v17 = vcombine.high %v5802_v5, %v5802_v5  ;;  %v12072_v46 = vrot.slane %v5795_v61, 9  ;;  %v5469_v26 = vmax.f32 %v5437_v10, 0.0 }
 0x400   : > { %v7219_v19 = vsel %vm7176_vm5, %v7218_v43, %v7217_v21  ;;  %v7222_v62 = vrot.slane %v7133_v52, 2  ;;  %v12074_v57 = vrot.slane %v5802_v5, 9  ;;  %v16938_v39 = vcombine.low %v16805_v50, %v16927_v9 }
 0x401   : > { %v7221_v18 = vsel %vm7179_vm9, %v7220_v27, %v7219_v19  ;;  %v7224_v48 = vrot.slane %v7134_v42, 1  ;;  %v5805_v28 = vcombine.high %v5469_v26, %v5469_v26  ;;  %v7415_v31 = vrot.slane %v7414_v29, 4 }
 0x402   : > { %18973 = vst [vmem:[#allocation19_spill] sm:$0xff] %v16938_v39  ;;  %v12798_v3 = vpop.f32.mrb[40].mxu1  ;;  %v7223_v32 = vsel %vm7182_vm11, %v7222_v62, %v7221_v18  ;;  %v12073_v53 = vrot.slane %v5803_v63, 9  ;;  %v5812_v56 = vrot.slane %v5469_v26, %v16658_v14  ;;  %7664 = vrot.lane.b32.xlu0 %v16938_v39, %s18910_s26  ;;  %v12211_v50 = vrot.slane %v16927_v9, 9 }
 0x403   : > { %v12799_v4 = vpop.f32.mrb[41].mxu1  ;;  %v7225_v0 = vsel %vm7185_vm14, %v7224_v48, %v7223_v32  ;;  %v12075_v60 = vrot.slane %v5804_v17, 9  ;;  %v16950_v24 = vadd.f32 %v12072_v46, %v5795_v61  ;;  %v5819_v20 = vrot.slane %v5805_v28, %v16658_v14  ;;  %v18974_v48 = vld [vmem:[#allocation17_spill] sm:$0xff] }
 0x404   : > { %v12801_v37 = vpop.f32.mrb[42].mxu1  ;;  %v7284_v29 = vpack.c.b16 %v7225_v0, %v7225_v0  ;;  %v16953_v2 = vadd.f32 %v12074_v57, %v5802_v5  ;;  %v5820_v8 = vcombine.high %v5812_v56, %v5812_v56  ;;  %v16959_v52 = vsel %vm14100_vm8, %v12211_v50, %v7521_v6  ;;  %v13460_v6 = vld [vmem:[%s18972_s30 + $0x40] sm:$0xff]  }
 0x405   : > { %v12802_v16 = vpop.f32.mrb[43].mxu1  ;;  %v5821_v10 = vcombine.high %v5819_v20, %v5819_v20  ;;  %v12076_v30 = vrot.slane %v5812_v56, 9  ;;  %v12227_v35 = vcombine.low %v16855_v59, %v16959_v52  ;;  %v7422_v41 = vshrl.u32 %v16927_v9, 16  ;;  %v13461_v5 = vld [vmem:[%s18972_s30] sm:$0xff]   ;;  %12852 = vmatprep.subr.bf16.mxu0 %v13460_v6 }
 0x406   : > { %v7330_v61 = vsel %vm15474_vm1, %v7284_v29, %v7329_v58  ;;  %v16966_v42 = vadd.f32 %v12073_v53, %v5803_v63  ;;  %v12078_v13 = vrot.slane %v5819_v20, 9  ;;  %v7425_v34 = vshll.u32 %v16927_v9, 16  ;;  %12853 = vmatpush3.bf16.msra.mxu0 %v13461_v5  ;;  %v17007_v58 = vld [vmem:[#allocation4 + $0x24] sm:$0x1] }
 0x407   : > { %7331 = vst [vmem:[#allocation4 + $0x20] sm:$0xf] %v7330_v61  ;;  %v16975_v59 = vadd.f32 %v12075_v60, %v5804_v17  ;;  %v12077_v47 = vrot.slane %v5820_v8, 9  ;;  %7625 = vrot.lane.b32.xlu1 %v12227_v35, %s18910_s26  ;;  %13231 = vmatprep.mubr.msk.bf16.mxu1 %vm2485_vm6, %v12227_v35  ;;  %v7424_v43 = vrot.slane %v7422_v41, 4  ;;  %v12794_v27 = vadd.f32 %v16918_v7, %v16916_v49  ;;  %v13463_v17 = vld [vmem:[%s18972_s30 + $0x48] sm:$0xff]   ;;  %v18977_v35 = vld [vmem:[#allocation22_spill] sm:$0xff] }
 0x408   : > { %v12079_v63 = vrot.slane %v5821_v10, 9  ;;  %v7427_v21 = vrot.slane %v7425_v34, 5  ;;  %v12797_v46 = vadd.f32 %v12796_v51, %v16921_v12  ;;  %v12800_v26 = vadd.f32 %v12799_v4, %v12798_v3  ;;  %v13464_v12 = vld [vmem:[%s18972_s30 + $0x8] sm:$0xff]   ;;  %12854 = vmatprep.subr.bf16.mxu0 %v13463_v17 }
 0x409   : > { %v16985_v19 = vadd.f32 %v12076_v30, %v5812_v56  ;;  %v16990_v62 = vsel %vm14135_vm12, %v7415_v31, %v16906_v22  ;;  %v5320_v57 = vadd.f32 %v16636_v45, %v12794_v27  ;;  %v12803_v49 = vadd.f32 %v12802_v16, %v12801_v37  ;;  %v18975_v3 = vld [vmem:[#allocation15_spill] sm:$0xff]  ;;  %v13465_v45 = vld [vmem:[%s18972_s30 + $0x50] sm:$0xff]  }
 0x40a   : > { %v12804_v7 = vpop.f32.mrb[44].mxu1  ;;  %v16996_v51 = vadd.f32 %v12078_v13, %v5819_v20  ;;  %v7428_v18 = vor.u32 %v7427_v21, %v7424_v43  ;;  %v5323_v28 = vadd.f32 %v18974_v48, %v12797_v46  ;;  %v5328_v32 = vadd.f32 %v12800_v26, %v18975_v3  ;;  %v18976_v56 = vld [vmem:[#allocation20_spill] sm:$0xff]  ;;  %12855 = vmatpush3.bf16.msra.mxu0 %v13464_v12  ;;  %v13467_v21 = vld [vmem:[%s18972_s30 + $0x58] sm:$0xff]  }
 0x40b   : > { %v12805_v53 = vpop.f32.mrb[45].mxu1  ;;  %v17003_v22 = vadd.f32 %v12077_v47, %v5820_v8  ;;  %v5399_v31 = vmul.f32 %v16895_v23, %v5320_v57  ;;  %v5331_v50 = vadd.f32 %v12803_v49, %v18976_v56  ;;  %v17009_v60 = vadd.f32 %v12079_v63, %v5821_v10  ;;  %12856 = vmatprep.subr.bf16.mxu0 %v13465_v45  ;;  %v13466_v47 = vld [vmem:[%s18972_s30 + $0x10] sm:$0xff]   ;;  %v18978_v57 = vld [vmem:[#allocation18_spill] sm:$0xff] }
 0x40c   : > { %v12806_v4 = vadd.f32 %v12805_v53, %v12804_v7  ;;  %v12807_v0 = vpop.f32.mrb[46].mxu1  ;;  %v7429_v20 = vrot.slane %v7428_v18, 4  ;;  %v5400_v37 = vmul.f32 %v16895_v23, %v5323_v28  ;;  %v5401_v29 = vmul.f32 %v16895_v23, %v5328_v32 }
 0x40d   : > { %v12808_v16 = vpop.f32.mrb[47].mxu1  ;;  %v5438_v30 = vadd.f32 %v16889_v25, %v5399_v31  ;;  %v5402_v8 = vmul.f32 %v16895_v23, %v5331_v50  ;;  %v7525_v5 = vrot.slane %v17007_v58, 5  ;;  %v13468_v31 = vld [vmem:[%s18972_s30 + $0x18] sm:$0xff]   ;;  %v12234_v15 = vcombine.low %v16797_v36, %v16990_v62 }
 0x40e   : > { %v5336_v41 = vadd.f32 %v18977_v35, %v12806_v4  ;;  %v12809_v61 = vadd.f32 %v12808_v16, %v12807_v0  ;;  %v17019_v13 = vsel %vm14135_vm12, %v7429_v20, %v16931_v55  ;;  %v5439_v10 = vadd.f32 %v16889_v25, %v5400_v37  ;;  %v17023_v6 = vld [vmem:[#allocation4 + $0x20] sm:$0xf]  ;;  %12857 = vmatpush3.bf16.msra.mxu0 %v13466_v47  ;;  %v13469_v37 = vld [vmem:[%s18972_s30 + $0x60] sm:$0xff]  }
 0x40f   : > { %v5440_v34 = vadd.f32 %v16889_v25, %v5401_v29  ;;  %v12223_v43 = vcombine.low %v16990_v62, %v17019_v13  ;;  %v5470_v27 = vmax.f32 %v5438_v30, 0.0  ;;  %v5441_v55 = vadd.f32 %v16889_v25, %v5402_v8  ;;  %12858 = vmatprep.subr.bf16.mxu0 %v13467_v21  ;;  %v13470_v21 = vld [vmem:[%s18972_s30 + $0x20] sm:$0xff]  }
 0x410   : > { %v12231_v63 = vcombine.low %v16927_v9, %v17023_v6  ;;  %v5471_v46 = vmax.f32 %v5439_v10, 0.0  ;;  %v17038_v17 = vmul.f32 %v16895_v23, %v5336_v41  ;;  %v17041_v49 = vadd.f32 %v18978_v57, %v12809_v61 }
 0x411   : > { %v5472_v26 = vmax.f32 %v5440_v34, 0.0  ;;  %7605 = vrot.lane.b32.xlu1 %v12223_v43, %s18912_s22  ;;  %7674 = vrot.lane.b32.xlu0 %v12223_v43, %s18935_s4  ;;  %v5822_v7 = vcombine.high %v5470_v27, %v5470_v27  ;;  %v5829_v12 = vrot.slane %v5470_v27, %v16658_v14  ;;  %v17046_v9 = vmax.f32 %v5441_v55, 0.0 }
 0x412   : > { %v17049_v48 = vpop.f32.mrb[48].mxu1  ;;  %v5839_v28 = vcombine.high %v5471_v46, %v5471_v46  ;;  %v5846_v3 = vrot.slane %v5471_v46, %v16658_v14  ;;  %12859 = vmatpush3.bf16.msra.mxu0 %v13468_v31 }
 0x413   : > { %v5856_v32 = vcombine.high %v5472_v26, %v5472_v26  ;;  %v17053_v53 = vrot.slane %v5472_v26, %v16658_v14  ;;  %v17055_v45 = vpop.f32.mrb[49].mxu1  ;;  %v5836_v56 = vrot.slane %v5822_v7, %v16658_v14  ;;  %v5837_v50 = vcombine.high %v5829_v12, %v5829_v12  ;;  %12860 = vmatprep.subr.bf16.mxu0 %v13469_v37 }
 0x414   : > { %v12080_v4 = vrot.slane %v5829_v12, 9  ;;  %v5873_v0 = vcombine.high %v17046_v9, %v17046_v9  ;;  %v17063_v20 = vpop.f32.mrb[50].mxu1  ;;  %v5853_v29 = vrot.slane %v5839_v28, %v16658_v14  ;;  %v5854_v16 = vcombine.high %v5846_v3, %v5846_v3 }
 0x415   : > { %v12084_v30 = vrot.slane %v5846_v3, 9  ;;  %v17070_v8 = vrot.slane %v5856_v32, %v16658_v14  ;;  %v17072_v35 = vpop.f32.mrb[51].mxu1  ;;  %v5838_v41 = vcombine.high %v5836_v56, %v5836_v56  ;;  %v12081_v61 = vrot.slane %v5837_v50, 9  ;;  %7638 = vrot.lane.b32.xlu1 %v12231_v63, %s18935_s4 }
 0x416   : > { %v12082_v10 = vrot.slane %v5836_v56, 9  ;;  %v6644_v34 = vadd.f32 %v12080_v4, %v5829_v12  ;;  %v5855_v47 = vcombine.high %v5853_v29, %v5853_v29  ;;  %v12085_v43 = vrot.slane %v5854_v16, 9  ;;  %v13473_v12 = vld [vmem:[%s18972_s30 + $0x68] sm:$0xff]   ;;  %12861 = vmatpush3.bf16.msra.mxu0 %v13470_v21 }
 0x417   : > { %v12086_v27 = vrot.slane %v5853_v29, 9  ;;  %v6648_v55 = vadd.f32 %v12084_v30, %v5846_v3  ;;  %v12083_v46 = vrot.slane %v5838_v41, 9  ;;  %v6645_v26 = vadd.f32 %v12081_v61, %v5837_v50  ;;  %12862 = vmatprep.subr.bf16.mxu0 %v13473_v12 }
 0x418   : > { %v6646_v57 = vadd.f32 %v12082_v10, %v5836_v56  ;;  %v6732_v7 = vadd.f32 %v6644_v34, %v16950_v24  ;;  %v12087_v63 = vrot.slane %v5855_v47, 9  ;;  %v6649_v28 = vadd.f32 %v12085_v43, %v5854_v16  ;;  %v13474_v16 = vld [vmem:[%s18972_s30 + $0x28] sm:$0xff]  }
 0x419   : > { %v6650_v32 = vadd.f32 %v12086_v27, %v5853_v29  ;;  %v6736_v3 = vadd.f32 %v6648_v55, %v16985_v19  ;;  %v6647_v31 = vadd.f32 %v12083_v46, %v5838_v41  ;;  %v6733_v4 = vadd.f32 %v6645_v26, %v16966_v42 }
 0x41a   : > { %v6734_v30 = vadd.f32 %v6646_v57, %v16953_v2  ;;  %v6796_v18 = vmul.f32 0.25, %v6732_v7  ;;  %v6651_v50 = vadd.f32 %v12087_v63, %v5855_v47  ;;  %v6737_v56 = vadd.f32 %v6649_v28, %v17003_v22  ;;  %v13475_v2 = vld [vmem:[%s18972_s30 + $0x70] sm:$0xff]   ;;  %12863 = vmatpush3.bf16.msra.mxu0 %v13474_v16 }
 0x41b   : > { %v6738_v24 = vadd.f32 %v6650_v32, %v16996_v51  ;;  %v6800_v37 = vmul.f32 0.25, %v6736_v3  ;;  %v6735_v29 = vadd.f32 %v6647_v31, %v16975_v59  ;;  %v6797_v19 = vmul.f32 0.25, %v6733_v4  ;;  %v17091_v42 = vpop.f32.mrb[52].mxu1  ;;  %v7338_v3 = vld [vmem:[#allocation4 + $0x2c] sm:$0x1]  ;;  %12864 = vmatprep.subr.bf16.mxu0 %v13475_v2 }
 0x41c   : > { %v6798_v41 = vmul.f32 0.25, %v6734_v30  ;;  %v12633_v61 = vpack.c.bf16 %v6796_v18, %v6796_v18  ;;  %v6739_v51 = vadd.f32 %v6651_v50, %v17009_v60  ;;  %v6801_v22 = vmul.f32 0.25, %v6737_v56  ;;  %v17097_v47 = vpop.f32.mrb[53].mxu1  ;;  %v13476_v60 = vld [vmem:[%s18972_s30 + $0x30] sm:$0xff]   ;;  %v13477_v31 = vld [vmem:[%s18972_s30 + $0x78] sm:$0xff]  }
 0x41d   : > { %v6802_v10 = vmul.f32 0.25, %v6738_v24  ;;  %v12637_v34 = vpack.c.bf16 %v6800_v37, %v6800_v37  ;;  %v6799_v43 = vmul.f32 0.25, %v6735_v29  ;;  %v12634_v27 = vpack.c.bf16 %v6797_v19, %v6797_v19  ;;  %v17099_v21 = vpop.f32.mrb[54].mxu1 }
 0x41e   : > { %v12635_v59 = vpack.c.bf16 %v6798_v41, %v6798_v41  ;;  %v7136_v55 = vunpack.c.l.b16 %v12633_v61  ;;  %v6803_v18 = vmul.f32 0.25, %v6739_v51  ;;  %v12638_v46 = vpack.c.bf16 %v6801_v22, %v6801_v22  ;;  %v17101_v7 = vpop.f32.mrb[55].mxu1  ;;  %12865 = vmatpush3.bf16.msra.mxu0 %v13476_v60  ;;  %v13478_v51 = vld [vmem:[%s18972_s30 + $0x38] sm:$0xff]  }
 0x41f   : > { %v12639_v26 = vpack.c.bf16 %v6802_v10, %v6802_v10  ;;  %v7140_v57 = vunpack.c.l.b16 %v12637_v34  ;;  %v12636_v12 = vpack.c.bf16 %v6799_v43, %v6799_v43  ;;  %v7137_v63 = vunpack.c.l.b16 %v12634_v27  ;;  %12866 = vmatprep.subr.bf16.mxu0 %v13477_v31 }
 0x420   : > { %v7138_v28 = vunpack.c.l.b16 %v12635_v59  ;;  %v7226_v32 = vrot.slane %v7136_v55, 7  ;;  %v7141_v4 = vunpack.c.l.b16 %v12638_v46  ;;  %v12669_v56 = vpack.c.bf16 %v6803_v18, %v6803_v18 }
 0x421   : > { %v7142_v30 = vunpack.c.l.b16 %v12639_v26  ;;  %v7233_v50 = vrot.slane %v7140_v57, 3  ;;  %v7139_v24 = vunpack.c.l.b16 %v12636_v12  ;;  %v7227_v37 = vrot.slane %v7137_v63, 6 }
 0x422   : > { %v7229_v16 = vrot.slane %v7138_v28, 5  ;;  %v5871_v29 = vcombine.high %v17053_v53, %v17053_v53  ;;  %v7235_v19 = vrot.slane %v7141_v4, 2  ;;  %v7339_v61 = vsel %vm15480_vm3, %v12669_v56, %v7338_v3  ;;  %12867 = vmatpush3.bf16.msra.mxu0 %v13478_v51 }
 0x423   : > { %v7237_v41 = vrot.slane %v7142_v30, 1  ;;  %v5872_v2 = vcombine.high %v17070_v8, %v17070_v8  ;;  %v7228_v22 = vsel %vm7170_vm4, %v7227_v37, %v7226_v32  ;;  %v7231_v10 = vrot.slane %v7139_v24, 4  ;;  %7340 = vst [vmem:[#allocation4 + $0x2c] sm:$0x1] %v7339_v61  ;;  %v12822_v27 = vpop.f32.mrb[56].mxu1 }
 0x424   : > { %v12088_v34 = vrot.slane %v17053_v53, 9  ;;  %v12089_v43 = vrot.slane %v5871_v29, 9  ;;  %v7230_v59 = vsel %vm7173_vm13, %v7229_v16, %v7228_v22  ;;  %v12090_v55 = vrot.slane %v17070_v8, 9  ;;  %v12823_v26 = vpop.f32.mrb[57].mxu1 }
 0x425   : > { %v12091_v18 = vrot.slane %v5872_v2, 9  ;;  %v5880_v46 = vrot.slane %v17046_v9, %v16658_v14  ;;  %v7232_v57 = vsel %vm7176_vm5, %v7231_v10, %v7230_v59  ;;  %v5887_v63 = vrot.slane %v5873_v0, %v16658_v14  ;;  %v17134_v28 = vpop.f32.mrb[58].mxu1  ;;  %v7335_v0 = vld [vmem:[#allocation4 + $0x28] sm:$0xf] }
 0x426   : > { %v17126_v60 = vadd.f32 %v12088_v34, %v17053_v53  ;;  %v17128_v12 = vadd.f32 %v12089_v43, %v5871_v29  ;;  %v7234_v32 = vsel %vm7179_vm9, %v7233_v50, %v7232_v57  ;;  %v17138_v3 = vadd.f32 %v12090_v55, %v17070_v8  ;;  %v17142_v30 = vpop.f32.mrb[59].mxu1 }
 0x427   : > { %v17140_v31 = vadd.f32 %v12091_v18, %v5872_v2  ;;  %v5888_v4 = vcombine.high %v5880_v46, %v5880_v46  ;;  %v7236_v53 = vsel %vm7182_vm11, %v7235_v19, %v7234_v32  ;;  %v5889_v56 = vcombine.high %v5887_v63, %v5887_v63  ;;  %v18980_v32 = vld [vmem:[#allocation16_spill] sm:$0xff] }
 0x428   : > { %v12092_v24 = vrot.slane %v5880_v46, 9  ;;  %v12094_v37 = vrot.slane %v5887_v63, 9  ;;  %v7238_v9 = vsel %vm7185_vm14, %v7237_v41, %v7236_v53  ;;  %v5442_v50 = vadd.f32 %v16889_v25, %v17038_v17 }
 0x429   : > { %v12093_v16 = vrot.slane %v5888_v4, 9  ;;  %v5404_v8 = vmul.f32 %v16895_v23, %v17041_v49  ;;  %v7286_v29 = vpack.c.b16 %v7238_v9, %v7238_v9  ;;  %v12095_v61 = vrot.slane %v5889_v56, 9 }
 0x42a   : > { %v6656_v2 = vadd.f32 %v12092_v24, %v5880_v46  ;;  %v6658_v22 = vadd.f32 %v12094_v37, %v5887_v63  ;;  %v5474_v10 = vmax.f32 %v5442_v50, 0.0  ;;  %v18979_v41 = vrot.slane %v17023_v6, 9 }
 0x42b   : > { %v6657_v51 = vadd.f32 %v12093_v16, %v5888_v4  ;;  %v5443_v19 = vadd.f32 %v16889_v25, %v5404_v8  ;;  %v7336_v17 = vsel %vm15474_vm1, %v7286_v29, %v7335_v0  ;;  %v6659_v49 = vadd.f32 %v12095_v61, %v5889_v56  ;;  %v17165_v55 = vpop.f32.mrb[60].mxu1 }
 0x42c   : > { %v17157_v34 = vsel %vm14100_vm8, %v18979_v41, %v7525_v5  ;;  %v12812_v59 = vadd.f32 %v17055_v45, %v17049_v48  ;;  %7337 = vst [vmem:[#allocation4 + $0x28] sm:$0xf] %v7336_v17  ;;  %v5890_v18 = vcombine.high %v5474_v10, %v5474_v10  ;;  %v5897_v46 = vrot.slane %v5474_v10, %v16658_v14  ;;  %v17170_v63 = vpop.f32.mrb[61].mxu1 }
 0x42d   : > { %v12239_v43 = vcombine.low %v16959_v52, %v17157_v34  ;;  %v5475_v57 = vmax.f32 %v5443_v19, 0.0  ;;  %v12815_v5 = vadd.f32 %v17072_v35, %v17063_v20  ;;  %v12818_v52 = vadd.f32 %v17097_v47, %v17091_v42  ;;  %v17182_v53 = vpop.f32.mrb[62].mxu1  ;;  %v18981_v42 = vld [vmem:[#allocation24_spill] sm:$0xff] }
 0x42e   : > { %v5344_v4 = vadd.f32 %v12812_v59, %v18980_v32  ;;  %v17178_v48 = vadd.f32 %v17101_v7, %v17099_v21  ;;  %v17180_v45 = vadd.f32 %v12823_v26, %v12822_v27  ;;  %v5904_v56 = vrot.slane %v5890_v18, %v16658_v14  ;;  %v17185_v37 = vpop.f32.mrb[63].mxu1  ;;  %v18982_v21 = vld [vmem:[#allocation26_spill] sm:$0xff] }
 0x42f   : > { %7656 = vrot.lane.b32.xlu0 %v12239_v43, %s18912_s22  ;;  %v5905_v20 = vcombine.high %v5897_v46, %v5897_v46  ;;  %v12096_v35 = vrot.slane %v5897_v46, 9  ;;  %v5907_v24 = vcombine.high %v5475_v57, %v5475_v57  ;;  %v5914_v9 = vrot.slane %v5475_v57, %v16658_v14 }
 0x430   : > { %v5405_v0 = vmul.f32 %v16895_v23, %v5344_v4  ;;  %v17190_v47 = vadd.f32 %v12815_v5, %v18981_v42  ;;  %v17193_v7 = vadd.f32 %v18982_v21, %v12818_v52  ;;  %v5906_v27 = vcombine.high %v5904_v56, %v5904_v56 }
 0x431   : > { %v12097_v26 = vrot.slane %v5905_v20, 9  ;;  %v12098_v16 = vrot.slane %v5904_v56, 9  ;;  %v6660_v50 = vadd.f32 %v12096_v35, %v5897_v46  ;;  %v5921_v8 = vrot.slane %v5907_v24, %v16658_v14 }
 0x432   : > { %v5922_v29 = vcombine.high %v5914_v9, %v5914_v9  ;;  %v12100_v61 = vrot.slane %v5914_v9, 9  ;;  %v5444_v10 = vadd.f32 %v16889_v25, %v5405_v0  ;;  %v12099_v19 = vrot.slane %v5906_v27, 9 }
 0x433   : > { %v6661_v41 = vadd.f32 %v12097_v26, %v5905_v20  ;;  %v6662_v17 = vadd.f32 %v12098_v16, %v5904_v56  ;;  %v6740_v43 = vadd.f32 %v6660_v50, %v17126_v60  ;;  %v5923_v59 = vcombine.high %v5921_v8, %v5921_v8 }
 0x434   : > { %v12101_v18 = vrot.slane %v5922_v29, 9  ;;  %v12102_v57 = vrot.slane %v5921_v8, 9  ;;  %v6664_v5 = vadd.f32 %v12100_v61, %v5914_v9  ;;  %v6663_v32 = vadd.f32 %v12099_v19, %v5906_v27 }
 0x435   : > { %v6741_v4 = vadd.f32 %v6661_v41, %v17128_v12  ;;  %v6742_v46 = vadd.f32 %v6662_v17, %v17138_v3  ;;  %v6804_v52 = vmul.f32 0.25, %v6740_v43  ;;  %v12103_v35 = vrot.slane %v5923_v59, 9 }
 0x436   : > { %v6665_v24 = vadd.f32 %v12101_v18, %v5922_v29  ;;  %v6666_v42 = vadd.f32 %v12102_v57, %v5921_v8  ;;  %v6744_v21 = vadd.f32 %v6664_v5, %v6656_v2  ;;  %v6743_v0 = vadd.f32 %v6663_v32, %v17140_v31  ;;  %v7344_v32 = vld [vmem:[#allocation4 + $0x34] sm:$0x1] }
 0x437   : > { %v6805_v20 = vmul.f32 0.25, %v6741_v4  ;;  %v6806_v56 = vmul.f32 0.25, %v6742_v46  ;;  %v12641_v26 = vpack.c.bf16 %v6804_v52, %v6804_v52  ;;  %v6667_v60 = vadd.f32 %v12103_v35, %v5923_v59 }
 0x438   : > { %v6745_v16 = vadd.f32 %v6665_v24, %v6657_v51  ;;  %v6746_v50 = vadd.f32 %v6666_v42, %v6658_v22  ;;  %v6808_v39 = vmul.f32 0.25, %v6744_v21  ;;  %v6807_v9 = vmul.f32 0.25, %v6743_v0 }
 0x439   : > { %v12642_v27 = vpack.c.bf16 %v6805_v20, %v6805_v20  ;;  %v12643_v61 = vpack.c.bf16 %v6806_v56, %v6806_v56  ;;  %v7144_v12 = vunpack.c.l.b16 %v12641_v26  ;;  %v6747_v19 = vadd.f32 %v6667_v60, %v6659_v49 }
 0x43a   : > { %v6809_v3 = vmul.f32 0.25, %v6745_v16  ;;  %v6810_v41 = vmul.f32 0.25, %v6746_v50  ;;  %v12645_v17 = vpack.c.bf16 %v6808_v39, %v6808_v39  ;;  %v12644_v29 = vpack.c.bf16 %v6807_v9, %v6807_v9 }
 0x43b   : > { %v7145_v8 = vunpack.c.l.b16 %v12642_v27  ;;  %v7146_v2 = vunpack.c.l.b16 %v12643_v61  ;;  %v7239_v43 = vrot.slane %v7144_v12, 7  ;;  %v6811_v31 = vmul.f32 0.25, %v6747_v19  ;;  %v18983_v12 = vld [vmem:[#allocation21_spill] sm:$0xff] }
 0x43c   : > { %v12646_v18 = vpack.c.bf16 %v6809_v3, %v6809_v3  ;;  %v12647_v57 = vpack.c.bf16 %v6810_v41, %v6810_v41  ;;  %v7148_v5 = vunpack.c.l.b16 %v12645_v17  ;;  %v7147_v59 = vunpack.c.l.b16 %v12644_v29 }
 0x43d   : > { %v7240_v51 = vrot.slane %v7145_v8, 6  ;;  %v7242_v22 = vrot.slane %v7146_v2, 5  ;;  %v5476_v4 = vmax.f32 %v5444_v10, 0.0  ;;  %v12670_v49 = vpack.c.bf16 %v6811_v31, %v6811_v31  ;;  %v7341_v2 = vld [vmem:[#allocation4 + $0x30] sm:$0xf] }
 0x43e   : > { %v7149_v46 = vunpack.c.l.b16 %v12646_v18  ;;  %v7150_v52 = vunpack.c.l.b16 %v12647_v57  ;;  %v7246_v35 = vrot.slane %v7148_v5, 3  ;;  %v7244_v39 = vrot.slane %v7147_v59, 4 }
 0x43f   : > { %v7241_v24 = vsel %vm7170_vm4, %v7240_v51, %v7239_v43  ;;  %v5924_v42 = vcombine.high %v5476_v4, %v5476_v4  ;;  %v5931_v21 = vrot.slane %v5476_v4, %v16658_v14  ;;  %v7345_v26 = vsel %vm15480_vm3, %v12670_v49, %v7344_v32 }
 0x440   : > { %v7243_v0 = vsel %vm7173_vm13, %v7242_v22, %v7241_v24  ;;  %v7248_v20 = vrot.slane %v7149_v46, 2  ;;  %v7250_v56 = vrot.slane %v7150_v52, 1  ;;  %7346 = vst [vmem:[#allocation4 + $0x34] sm:$0x1] %v7345_v26  ;;  %v5406_v27 = vmul.f32 %v16895_v23, %v17190_v47  ;;  %v17222_v22 = vld [vmem:[#allocation4 + $0x28] sm:$0xf] }
 0x441   : > { %v7245_v60 = vsel %vm7176_vm5, %v7244_v39, %v7243_v0  ;;  %v5938_v10 = vrot.slane %v5924_v42, %v16658_v14  ;;  %v5939_v16 = vcombine.high %v5931_v21, %v5931_v21  ;;  %v12104_v50 = vrot.slane %v5931_v21, 9 }
 0x442   : > { %v7247_v9 = vsel %vm7179_vm9, %v7246_v35, %v7245_v60  ;;  %v5407_v61 = vmul.f32 %v16895_v23, %v17193_v7  ;;  %v5355_v19 = vadd.f32 %v18983_v12, %v17178_v48  ;;  %v5445_v43 = vadd.f32 %v16889_v25, %v5406_v27 }
 0x443   : > { %v7249_v3 = vsel %vm7182_vm11, %v7248_v20, %v7247_v9  ;;  %v5940_v41 = vcombine.high %v5938_v10, %v5938_v10  ;;  %v12105_v17 = vrot.slane %v5939_v16, 9  ;;  %v12106_v29 = vrot.slane %v5938_v10, 9 }
 0x444   : > { %v7251_v8 = vsel %vm7185_vm14, %v7250_v56, %v7249_v3  ;;  %v5446_v31 = vadd.f32 %v16889_v25, %v5407_v61  ;;  %v6668_v57 = vadd.f32 %v12104_v50, %v5931_v21  ;;  %v5477_v7 = vmax.f32 %v5445_v43, 0.0 }
 0x445   : > { %v7288_v18 = vpack.c.b16 %v7251_v8, %v7251_v8  ;;  %v12107_v47 = vrot.slane %v5940_v41, 9  ;;  %v6669_v5 = vadd.f32 %v12105_v17, %v5939_v16  ;;  %v5408_v48 = vmul.f32 %v16895_v23, %v5355_v19 }
 0x446   : > { %v5478_v59 = vmax.f32 %v5446_v31, 0.0  ;;  %v5360_v51 = vadd.f32 %v17180_v45, %v16831_v33  ;;  %v6670_v4 = vadd.f32 %v12106_v29, %v5938_v10  ;;  %v12827_v52 = vadd.f32 %v17142_v30, %v17134_v28 }
 0x447   : > { %v7342_v32 = vsel %vm15474_vm1, %v7288_v18, %v7341_v2  ;;  %v6671_v46 = vadd.f32 %v12107_v47, %v5940_v41  ;;  %v5941_v35 = vcombine.high %v5477_v7, %v5477_v7  ;;  %v5948_v49 = vrot.slane %v5477_v7, %v16658_v14 }
 0x448   : > { %7343 = vst [vmem:[#allocation4 + $0x30] sm:$0xf] %v7342_v32  ;;  %v5958_v24 = vcombine.high %v5478_v59, %v5478_v59  ;;  %v5965_v39 = vrot.slane %v5478_v59, %v16658_v14  ;;  %v5447_v42 = vadd.f32 %v16889_v25, %v5408_v48  ;;  %v5409_v33 = vmul.f32 %v16895_v23, %v5360_v51 }
 0x449   : > { %v17233_v45 = vadd.f32 %v12827_v52, %v16838_v11  ;;  %v17237_v21 = vcombine.low %v17023_v6, %v17222_v22  ;;  %v5955_v28 = vrot.slane %v5941_v35, %v16658_v14  ;;  %v5956_v30 = vcombine.high %v5948_v49, %v5948_v49 }
 0x44a   : > { %v12108_v0 = vrot.slane %v5948_v49, 9  ;;  %v5972_v20 = vrot.slane %v5958_v24, %v16658_v14  ;;  %v5973_v56 = vcombine.high %v5965_v39, %v5965_v39  ;;  %v12112_v26 = vrot.slane %v5965_v39, 9 }
 0x44b   : > { %v5479_v60 = vmax.f32 %v5447_v42, 0.0  ;;  %v5448_v10 = vadd.f32 %v16889_v25, %v5409_v33  ;;  %7666 = vrot.lane.b32.xlu0 %v17237_v21, %s18910_s26  ;;  %v5957_v11 = vcombine.high %v5955_v28, %v5955_v28  ;;  %v12109_v23 = vrot.slane %v5956_v30, 9 }
 0x44c   : > { %v12110_v16 = vrot.slane %v5955_v28, 9  ;;  %v6672_v50 = vadd.f32 %v12108_v0, %v5948_v49  ;;  %v5974_v9 = vcombine.high %v5972_v20, %v5972_v20  ;;  %v12113_v27 = vrot.slane %v5973_v56, 9 }
 0x44d   : > { %v12114_v61 = vrot.slane %v5972_v20, 9  ;;  %v6676_v12 = vadd.f32 %v12112_v26, %v5965_v39  ;;  %v12111_v19 = vrot.slane %v5957_v11, 9  ;;  %v6673_v3 = vadd.f32 %v12109_v23, %v5956_v30 }
 0x44e   : > { %v6674_v41 = vadd.f32 %v12110_v16, %v5955_v28  ;;  %v5975_v17 = vcombine.high %v5479_v60, %v5479_v60  ;;  %v12115_v29 = vrot.slane %v5974_v9, 9  ;;  %v6677_v8 = vadd.f32 %v12113_v27, %v5973_v56 }
 0x44f   : > { %v6678_v2 = vadd.f32 %v12114_v61, %v5972_v20  ;;  %v6748_v43 = vadd.f32 %v6676_v12, %v6668_v57  ;;  %v6675_v25 = vadd.f32 %v12111_v19, %v5957_v11  ;;  %v5982_v31 = vrot.slane %v5479_v60, %v16658_v14 }
 0x450   : > { %v5989_v18 = vrot.slane %v5975_v17, %v16658_v14  ;;  %v5480_v47 = vmax.f32 %v5448_v10, 0.0  ;;  %v6679_v7 = vadd.f32 %v12115_v29, %v5974_v9  ;;  %v6749_v59 = vadd.f32 %v6677_v8, %v6669_v5 }
 0x451   : > { %v6750_v48 = vadd.f32 %v6678_v2, %v6670_v4  ;;  %v6812_v51 = vmul.f32 0.25, %v6748_v43  ;;  %v5990_v32 = vcombine.high %v5982_v31, %v5982_v31  ;;  %v12116_v35 = vrot.slane %v5982_v31, 9 }
 0x452   : > { %v5991_v52 = vcombine.high %v5989_v18, %v5989_v18  ;;  %v12118_v49 = vrot.slane %v5989_v18, 9  ;;  %v6751_v24 = vadd.f32 %v6679_v7, %v6671_v46  ;;  %v6813_v39 = vmul.f32 0.25, %v6749_v59 }
 0x453   : > { %v6814_v42 = vmul.f32 0.25, %v6750_v48  ;;  %v12649_v33 = vpack.c.bf16 %v6812_v51, %v6812_v51  ;;  %v12117_v28 = vrot.slane %v5990_v32, 9  ;;  %v6680_v30 = vadd.f32 %v12116_v35, %v5982_v31 }
 0x454   : > { %v12119_v57 = vrot.slane %v5991_v52, 9  ;;  %v6682_v0 = vadd.f32 %v12118_v49, %v5989_v18  ;;  %v6815_v20 = vmul.f32 0.25, %v6751_v24  ;;  %v12650_v56 = vpack.c.bf16 %v6813_v39, %v6813_v39 }
 0x455   : > { %v12651_v26 = vpack.c.bf16 %v6814_v42, %v6814_v42  ;;  %v7152_v60 = vunpack.c.l.b16 %v12649_v33  ;;  %v6681_v10 = vadd.f32 %v12117_v28, %v5990_v32  ;;  %v6752_v4 = vadd.f32 %v6680_v30, %v6672_v50 }
 0x456   : > { %v6683_v5 = vadd.f32 %v12119_v57, %v5991_v52  ;;  %v6754_v11 = vadd.f32 %v6682_v0, %v6674_v41  ;;  %v12652_v23 = vpack.c.bf16 %v6815_v20, %v6815_v20  ;;  %v7153_v16 = vunpack.c.l.b16 %v12650_v56  ;;  %v7350_v52 = vld [vmem:[#allocation4 + $0x3c] sm:$0x1]  ;;  %v17254_v56 = vld [vmem:[#allocation4 + $0x2c] sm:$0x1] }
 0x457   : > { %v7154_v9 = vunpack.c.l.b16 %v12651_v26  ;;  %v7252_v27 = vrot.slane %v7152_v60, 7  ;;  %v6753_v46 = vadd.f32 %v6681_v10, %v6673_v3  ;;  %v6816_v12 = vmul.f32 0.25, %v6752_v4 }
 0x458   : > { %v6755_v61 = vadd.f32 %v6683_v5, %v6675_v25  ;;  %v6818_v19 = vmul.f32 0.25, %v6754_v11  ;;  %v7155_v17 = vunpack.c.l.b16 %v12652_v23  ;;  %v7253_v29 = vrot.slane %v7153_v16, 6  ;;  %v13646_v5 = vld [vmem:[%s18961_s8] ss:$0 sm:$0xff] }
 0x459   : > { %v7255_v8 = vrot.slane %v7154_v9, 5  ;;  %v5992_v2 = vcombine.high %v5480_v47, %v5480_v47  ;;  %v6817_v43 = vmul.f32 0.25, %v6753_v46  ;;  %v12653_v18 = vpack.c.bf16 %v6816_v12, %v6816_v12  ;;  %v13647_v46 = vld [vmem:[%s18821_s14] ss:$0 sm:$0xff] }
 0x45a   : > { %v6819_v31 = vmul.f32 0.25, %v6755_v61  ;;  %v12655_v7 = vpack.c.bf16 %v6818_v19, %v6818_v19  ;;  %v7254_v59 = vsel %vm7170_vm4, %v7253_v29, %v7252_v27  ;;  %v7257_v50 = vrot.slane %v7155_v17, 4  ;;  %v7347_v17 = vld [vmem:[#allocation4 + $0x38] sm:$0xf] }
 0x45b   : > { %v5999_v41 = vrot.slane %v5480_v47, %v16658_v14  ;;  %v6006_v48 = vrot.slane %v5992_v2, %v16658_v14  ;;  %v7256_v3 = vsel %vm7173_vm13, %v7255_v8, %v7254_v59  ;;  %v12654_v25 = vpack.c.bf16 %v6817_v43, %v6817_v43 }
 0x45c   : > { %v7156_v51 = vunpack.c.l.b16 %v12653_v18  ;;  %v7158_v32 = vunpack.c.l.b16 %v12655_v7  ;;  %v7258_v35 = vsel %vm7176_vm5, %v7257_v50, %v7256_v3  ;;  %v12671_v49 = vpack.c.bf16 %v6819_v31, %v6819_v31 }
 0x45d   : > { %v6007_v24 = vcombine.high %v5999_v41, %v5999_v41  ;;  %v6008_v39 = vcombine.high %v6006_v48, %v6006_v48  ;;  %v7157_v42 = vunpack.c.l.b16 %v12654_v25  ;;  %v12120_v28 = vrot.slane %v5999_v41, 9 }
 0x45e   : > { %v7259_v33 = vrot.slane %v7156_v51, 3  ;;  %v7445_v57 = vshll.u32 %v17007_v58, 16  ;;  %v7263_v30 = vrot.slane %v7158_v32, 1  ;;  %v7351_v47 = vsel %vm15480_vm3, %v12671_v49, %v7350_v52 }
 0x45f   : > { %v12121_v0 = vrot.slane %v6007_v24, 9  ;;  %v12122_v20 = vrot.slane %v6006_v48, 9  ;;  %v7261_v60 = vrot.slane %v7157_v42, 2  ;;  %7352 = vst [vmem:[#allocation4 + $0x3c] sm:$0x1] %v7351_v47  ;;  %v12123_v10 = vrot.slane %v6008_v39, 9 }
 0x460   : > { %v7260_v26 = vsel %vm7179_vm9, %v7259_v33, %v7258_v35  ;;  %v5410_v4 = vmul.f32 %v13646_v5, %v17233_v45  ;;  %v17261_v11 = vadd.f32 %v12120_v28, %v5999_v41  ;;  %v12830_v9 = vadd.f32 %v17170_v63, %v17165_v55 }
 0x461   : > { %v17263_v23 = vadd.f32 %v12121_v0, %v6007_v24  ;;  %v17265_v16 = vadd.f32 %v12122_v20, %v6006_v48  ;;  %v7262_v27 = vsel %vm7182_vm11, %v7261_v60, %v7260_v26  ;;  %v12213_v12 = vrot.slane %v17222_v22, 9 }
 0x462   : > { %v5449_v61 = vadd.f32 %v13647_v46, %v5410_v4  ;;  %v7529_v45 = vrot.slane %v17254_v56, 5  ;;  %v7264_v19 = vsel %vm7185_vm14, %v7263_v30, %v7262_v27  ;;  %v5368_v29 = vadd.f32 %v16829_v54, %v12830_v9 }
 0x463   : > { %v12833_v8 = vadd.f32 %v17185_v37, %v17182_v53  ;;  %v7436_v55 = vshrl.u32 %v17023_v6, 16  ;;  %v7290_v63 = vpack.c.b16 %v7264_v19, %v7264_v19  ;;  %v7439_v31 = vshll.u32 %v17023_v6, 16 }
 0x464   : > { %v5481_v2 = vmax.f32 %v5449_v61, 0.0  ;;  %v17282_v43 = vsel %vm14100_vm8, %v12213_v12, %v7529_v45  ;;  %v5411_v18 = vmul.f32 %v13646_v5, %v5368_v29  ;;  %v7450_v6 = vshrl.u32 %v17222_v22, 16 }
 0x465   : > { %v12228_v7 = vcombine.low %v17157_v34, %v17282_v43  ;;  %v5371_v59 = vadd.f32 %v16835_v40, %v12833_v8  ;;  %v7438_v54 = vrot.slane %v7436_v55, 4  ;;  %v7348_v53 = vsel %vm15474_vm1, %v7290_v63, %v7347_v17 }
 0x466   : > { %v6009_v37 = vcombine.high %v5481_v2, %v5481_v2  ;;  %v6016_v50 = vrot.slane %v5481_v2, %v16658_v14  ;;  %v7441_v41 = vrot.slane %v7439_v31, 5  ;;  %7349 = vst [vmem:[#allocation4 + $0x38] sm:$0xf] %v7348_v53  ;;  %v5450_v48 = vadd.f32 %v13647_v46, %v5411_v18 }
 0x467   : > { %7627 = vrot.lane.b32.xlu1 %v12228_v7, %s18910_s26  ;;  %v5412_v3 = vmul.f32 %v13646_v5, %v5371_v59  ;;  %13232 = vmatmul.mubr.msk.bf16.vlgmr.msra.gmra.mrb[64].mxu1 %vm2485_vm6, %v12228_v7  ;;  %v7453_v34 = vshll.u32 %v17222_v22, 16  ;;  %v7452_v49 = vrot.slane %v7450_v6, 4  ;;  %v6687_v42 = vadd.f32 %v12123_v10, %v6008_v39 }
 0x468   : > { %v6023_v40 = vrot.slane %v6009_v37, %v16658_v14  ;;  %v6024_v25 = vcombine.high %v6016_v50, %v6016_v50  ;;  %v12124_v51 = vrot.slane %v6016_v50, 9  ;;  %v7442_v32 = vor.u32 %v7441_v41, %v7438_v54 }
 0x469   : > { %v5482_v52 = vmax.f32 %v5450_v48, 0.0  ;;  %v5451_v35 = vadd.f32 %v13647_v46, %v5412_v3  ;;  %v7455_v24 = vrot.slane %v7453_v34, 5  ;;  %v7459_v18 = vshll.u32 %v17254_v56, 16 }
 0x46a   : > { %v6025_v33 = vcombine.high %v6023_v40, %v6023_v40  ;;  %v12125_v28 = vrot.slane %v6024_v25, 9  ;;  %v12126_v30 = vrot.slane %v6023_v40, 9  ;;  %v6688_v47 = vadd.f32 %v12124_v51, %v6016_v50 }
 0x46b   : > { %v6026_v0 = vcombine.high %v5482_v52, %v5482_v52  ;;  %v6033_v20 = vrot.slane %v5482_v52, %v16658_v14  ;;  %v5483_v26 = vmax.f32 %v5451_v35, 0.0  ;;  %v17297_v4 = vrot.slane %v7442_v32, 4 }
 0x46c   : > { %v12127_v60 = vrot.slane %v6025_v33, 9  ;;  %v6689_v5 = vadd.f32 %v12125_v28, %v6024_v25  ;;  %v7456_v9 = vor.u32 %v7455_v24, %v7452_v49  ;;  %v6690_v45 = vadd.f32 %v12126_v30, %v6023_v40 }
 0x46d   : > { %v6040_v27 = vrot.slane %v6026_v0, %v16658_v14  ;;  %v6041_v61 = vcombine.high %v6033_v20, %v6033_v20  ;;  %v12128_v46 = vrot.slane %v6033_v20, 9  ;;  %v6043_v12 = vcombine.high %v5483_v26, %v5483_v26 }
 0x46e   : > { %v6691_v39 = vadd.f32 %v12127_v60, %v6025_v33  ;;  %v6050_v10 = vrot.slane %v5483_v26, %v16658_v14  ;;  %v7457_v19 = vrot.slane %v7456_v9, 4 }
 0x46f   : > { %v6042_v17 = vcombine.high %v6040_v27, %v6040_v27  ;;  %v12129_v29 = vrot.slane %v6041_v61, 9  ;;  %v12130_v8 = vrot.slane %v6040_v27, 9  ;;  %v6692_v55 = vadd.f32 %v12128_v46, %v6033_v20 }
 0x470   : > { %v6057_v63 = vrot.slane %v6043_v12, %v16658_v14  ;;  %v6058_v2 = vcombine.high %v6050_v10, %v6050_v10  ;;  %v12132_v31 = vrot.slane %v6050_v10, 9 }
 0x471   : > { %v12131_v7 = vrot.slane %v6042_v17, 9  ;;  %v6693_v59 = vadd.f32 %v12129_v29, %v6041_v61  ;;  %v6694_v54 = vadd.f32 %v12130_v8, %v6040_v27  ;;  %v6756_v53 = vadd.f32 %v6692_v55, %v17261_v11  ;;  %v7356_v55 = vld [vmem:[#allocation4 + $0x44] sm:$0x1] }
 0x472   : > { %v6059_v37 = vcombine.high %v6057_v63, %v6057_v63  ;;  %v12133_v50 = vrot.slane %v6058_v2, 9  ;;  %v12134_v41 = vrot.slane %v6057_v63, 9  ;;  %v6696_v48 = vadd.f32 %v12132_v31, %v6050_v10 }
 0x473   : > { %v6695_v3 = vadd.f32 %v12131_v7, %v6042_v17  ;;  %v6757_v6 = vadd.f32 %v6693_v59, %v17263_v23  ;;  %v6758_v34 = vadd.f32 %v6694_v54, %v17265_v16  ;;  %v6820_v40 = vmul.f32 0.25, %v6756_v53  ;;  %v7371_v59 = vld [vmem:[#allocation4 + $0x30] sm:$0xf] }
 0x474   : > { %v12135_v25 = vrot.slane %v6059_v37, 9  ;;  %v6697_v51 = vadd.f32 %v12133_v50, %v6058_v2  ;;  %v6698_v32 = vadd.f32 %v12134_v41, %v6057_v63  ;;  %v6760_v52 = vadd.f32 %v6696_v48, %v6688_v47  ;;  %v7372_v50 = vld [vmem:[#allocation4 + $0x34] sm:$0x1] }
 0x475   : > { %v6759_v56 = vadd.f32 %v6695_v3, %v6687_v42  ;;  %v6821_v35 = vmul.f32 0.25, %v6757_v6  ;;  %v6822_v49 = vmul.f32 0.25, %v6758_v34  ;;  %v12657_v24 = vpack.c.bf16 %v6820_v40, %v6820_v40  ;;  %v17323_v3 = vld [vmem:[#allocation4 + $0x3c] sm:$0x1] }
 0x476   : > { %v6699_v33 = vadd.f32 %v12135_v25, %v6059_v37  ;;  %v6761_v11 = vadd.f32 %v6697_v51, %v6689_v5  ;;  %v6762_v28 = vadd.f32 %v6698_v32, %v6690_v45  ;;  %v6824_v30 = vmul.f32 0.25, %v6760_v52  ;;  %v7655_v32 = vpop.permute.xlu0 %7654  ;;  %v7624_v52 = vpop.permute.xlu1 %7623 }
 0x477   : > { %v6823_v0 = vmul.f32 0.25, %v6759_v56  ;;  %v12658_v20 = vpack.c.bf16 %v6821_v35, %v6821_v35  ;;  %v12659_v26 = vpack.c.bf16 %v6822_v49, %v6822_v49  ;;  %v7160_v60 = vunpack.c.l.b16 %v12657_v24 }
 0x478   : > { %v6763_v23 = vadd.f32 %v6699_v33, %v6691_v39  ;;  %v6825_v9 = vmul.f32 0.25, %v6761_v11  ;;  %v6826_v16 = vmul.f32 0.25, %v6762_v28  ;;  %v12661_v27 = vpack.c.bf16 %v6824_v30, %v6824_v30  ;;  %v7353_v33 = vld [vmem:[#allocation4 + $0x40] sm:$0xf] }
 0x479   : > { %v12660_v61 = vpack.c.bf16 %v6823_v0, %v6823_v0  ;;  %v7161_v46 = vunpack.c.l.b16 %v12658_v20  ;;  %v7162_v12 = vunpack.c.l.b16 %v12659_v26  ;;  %v7265_v47 = vrot.slane %v7160_v60, 7  ;;  %v17343_v60 = vld [vmem:[#allocation4 + $0x48] sm:$0xf] }
 0x47a   : > { %v6827_v42 = vmul.f32 0.25, %v6763_v23  ;;  %v12662_v10 = vpack.c.bf16 %v6825_v9, %v6825_v9  ;;  %v12663_v17 = vpack.c.bf16 %v6826_v16, %v6826_v16  ;;  %v7164_v29 = vunpack.c.l.b16 %v12661_v27 }
 0x47b   : > { %v7163_v8 = vunpack.c.l.b16 %v12660_v61  ;;  %v7266_v5 = vrot.slane %v7161_v46, 6  ;;  %v7268_v45 = vrot.slane %v7162_v12, 5  ;;  %v7461_v63 = vrot.slane %v7459_v18, 5  ;;  %v7665_v61 = vpop.permute.xlu0 %7664  ;;  %v13648_v46 = vld [vmem:[#allocation4] sm:$0xf] }
 0x47c   : > { %v7165_v2 = vunpack.c.l.b16 %v12662_v10  ;;  %v7166_v31 = vunpack.c.l.b16 %v12663_v17  ;;  %v12672_v7 = vpack.c.bf16 %v6827_v42, %v6827_v42  ;;  %v7447_v39 = vrot.slane %v7445_v57, 5  ;;  %v17321_v57 = vld [vmem:[#allocation4 + $0x38] sm:$0xf]  ;;  %v13649_v12 = vld [vmem:[#allocation4 + $0x8] sm:$0xf]  ;;  %v7604_v42 = vpop.permute.xlu1 %7603 }
 0x47d   : > { %v7267_v54 = vsel %vm7170_vm4, %v7266_v5, %v7265_v47  ;;  %v7270_v53 = vrot.slane %v7163_v8, 4  ;;  %v17311_v37 = vsel %vm14135_vm12, %v7457_v19, %v7461_v63  ;;  %v7272_v48 = vrot.slane %v7164_v29, 3 }
 0x47e   : > { %v7269_v41 = vsel %vm7173_vm13, %v7268_v45, %v7267_v54  ;;  %v7357_v18 = vsel %vm15480_vm3, %v12672_v7, %v7356_v55  ;;  %v17319_v58 = vsel %vm14135_vm12, %v17297_v4, %v7447_v39  ;;  %v7274_v19 = vrot.slane %v7165_v2, 2  ;;  %v7378_v2 = vld [vmem:[#allocation4 + $0x4c] sm:$0x1] }
 0x47f   : > { %v7271_v6 = vsel %vm7176_vm5, %v7270_v53, %v7269_v41  ;;  %7358 = vst [vmem:[#allocation4 + $0x44] sm:$0x1] %v7357_v18  ;;  %v12224_v34 = vcombine.low %v17319_v58, %v17311_v37  ;;  %v12214_v40 = vrot.slane %v7371_v59, 9  ;;  %v7276_v25 = vrot.slane %v7166_v31, 1 }
 0x480   : > { %v7273_v44 = vsel %vm7179_vm9, %v7272_v48, %v7271_v6  ;;  %v7533_v51 = vrot.slane %v7372_v50, 5  ;;  %v12232_v56 = vcombine.low %v17222_v22, %v7371_v59  ;;  %v12215_v35 = vrot.slane %v17321_v57, 9  ;;  %v7637_v54 = vpop.permute.xlu1 %7636 }
 0x481   : > { %v7275_v4 = vsel %vm7182_vm11, %v7274_v19, %v7273_v44  ;;  %7607 = vrot.lane.b32.xlu1 %v12224_v34, %s18912_s22  ;;  %7676 = vrot.lane.b32.xlu0 %v12224_v34, %s18935_s4  ;;  %v7537_v49 = vrot.slane %v17323_v3, 5  ;;  %v7464_v28 = vshrl.u32 %v7371_v59, 16  ;;  %v7467_v30 = vshll.u32 %v7371_v59, 16 }
 0x482   : > { %v7277_v24 = vsel %vm7185_vm14, %v7276_v25, %v7275_v4  ;;  %v7534_v11 = vsel %vm14100_vm8, %v12214_v40, %v7533_v51  ;;  %v7473_v22 = vshll.u32 %v7372_v50, 16  ;;  %v7478_v27 = vshrl.u32 %v17321_v57, 16 }
 0x483   : > { %v7292_v0 = vpack.c.b16 %v7277_v24, %v7277_v24  ;;  %v12240_v20 = vcombine.low %v17282_v43, %v7534_v11  ;;  %v17341_v26 = vsel %vm14100_vm8, %v12215_v35, %v7537_v49  ;;  %v7466_v9 = vrot.slane %v7464_v28, 4 }
 0x484   : > { %v12229_v23 = vcombine.low %v7534_v11, %v17341_v26  ;;  %v7469_v16 = vrot.slane %v7467_v30, 5  ;;  %v12218_v47 = vcombine.low %v13648_v46, %v13649_v12  ;;  %v17352_v10 = vcombine.low %v7371_v59, %v17321_v57  ;;  %v7675_v59 = vpop.permute.xlu0 %7674 }
 0x485   : > { %v7354_v43 = vsel %vm15474_vm1, %v7292_v0, %v7353_v33  ;;  %7640 = vrot.lane.b32.xlu1 %v12232_v56, %s18935_s4  ;;  %7658 = vrot.lane.b32.xlu0 %v12240_v20, %s18912_s22  ;;  %v7481_v17 = vshll.u32 %v17321_v57, 16  ;;  %v7480_v8 = vrot.slane %v7478_v27, 4  ;;  %v7560_v5 = vshrl.u32 %v17343_v60, 16 }
 0x486   : > { %7355 = vst [vmem:[#allocation4 + $0x40] sm:$0xf] %v7354_v43  ;;  %13235 = vmatprep.mubr.msk.bf16.mxu1 %vm2485_vm6, %v12229_v23  ;;  %v7470_v29 = vor.u32 %v7469_v16, %v7466_v9  ;;  %v7563_v45 = vshll.u32 %v17343_v60, 16  ;;  %v7487_v63 = vshll.u32 %v17323_v3, 16  ;;  %v7686_v31 = vsel %vm2485_vm6, %v12218_v47, %v7604_v42  ;;  %v7376_v40 = vld [vmem:[#allocation4 + $0x44] sm:$0x1] }
 0x487   : > { %v7483_v55 = vrot.slane %v7481_v17, 5  ;;  %v7475_v39 = vrot.slane %v7473_v22, 5  ;;  %v7718_v53 = vsel %vm2485_vm6, %v12234_v15, %v7655_v32  ;;  %v7562_v41 = vrot.slane %v7560_v5, 4 }
 0x488   : > { %v7471_v7 = vrot.slane %v7470_v29, 4  ;;  %v7565_v36 = vrot.slane %v7563_v45, 5  ;;  %v7729_v48 = vsel %vm2617_vm0, %v7718_v53, %v7665_v61  ;;  %v12217_v18 = vrot.slane %v17343_v60, 9  ;;  %v7626_v29 = vpop.permute.xlu1 %7625 }
 0x489   : > { %7668 = vrot.lane.b32.xlu0 %v17352_v10, %s18910_s26  ;;  %7629 = vrot.lane.b32.xlu1 %v12229_v23, %s18910_s26  ;;  %v7484_v50 = vor.u32 %v7483_v55, %v7480_v8  ;;  %v7577_v3 = vrot.slane %v7378_v2, 5  ;;  %v7697_v6 = vsel %vm2617_vm0, %v7686_v31, %v7624_v52  ;;  %v7489_v34 = vrot.slane %v7487_v63, 5  ;;  %v18985_v55 = vld [vmem:[#allocation19_spill] sm:$0xff] }
 0x48a   : > { %v17368_v62 = vsel %vm14135_vm12, %v7471_v7, %v7475_v39  ;;  %v7737_v44 = vsel %vm4683_vm2, %v7729_v48, %v7675_v59  ;;  %v7705_v25 = vsel %vm4683_vm2, %v7697_v6, %v7637_v54  ;;  %v7569_v51 = vshll.u32 %v7378_v2, 16 }
 0x48b   : > { %v7485_v19 = vrot.slane %v7484_v50, 4  ;;  %7936 = vmatprep.mubr.bf16.mxu0 %v7737_v44  ;;  %v12236_v32 = vcombine.low %v17311_v37, %v17368_v62  ;;  %v7566_v35 = vor.u32 %v7565_v36, %v7562_v41  ;;  %v7557_v24 = vrot.slane %v7376_v40, 5 }
 0x48c   : > { %7937 = vmatmul.mubr.bf16.vlgmr.msra.gmra.mrb[64].mxu0 %v7705_v25  ;;  %v7578_v33 = vsel %vm14100_vm8, %v12217_v18, %v7577_v3  ;;  %v7549_v30 = vshll.u32 %v7376_v40, 16  ;;  %v7571_v23 = vrot.slane %v7569_v51, 5  ;;  %vm8074_vm1 = vcmask 516096   ;;  %v7606_v5 = vpop.permute.xlu1 %7605 }
 0x48d   : > { %v17379_v4 = vsel %vm14135_vm12, %v7485_v19, %v7489_v34  ;;  %v7375_v56 = vld [vmem:[#allocation4 + $0x40] sm:$0xf]  ;;  %v7567_v61 = vrot.slane %v7566_v35, 4  ;;  %v12235_v15 = vcombine.low %v17019_v13, %v17319_v58  ;;  %v7689_v63 = vsel %vm2485_vm6, %v18985_v55, %v7606_v5  ;;  %vm17504_vm3 = vmand %vm8074_vm1, %vm839_vm7 }
 0x48e   : > { %v12225_v52 = vcombine.low %v17368_v62, %v17379_v4  ;;  %v12216_v49 = vrot.slane %v7375_v56, 9  ;;  %v7540_v11 = vshrl.u32 %v7375_v56, 16  ;;  %v7543_v28 = vshll.u32 %v7375_v56, 16 }
 0x48f   : > { %v12242_v0 = vcombine.low %v7375_v56, %v17343_v60  ;;  %v12233_v20 = vcombine.low %v17321_v57, %v7375_v56  ;;  %v7551_v47 = vrot.slane %v7549_v30, 5  ;;  %v7572_v57 = vsel %vm14135_vm12, %v7567_v61, %v7571_v23 }
 0x490   : > { %7609 = vrot.lane.b32.xlu1 %v12225_v52, %s18912_s22  ;;  %7678 = vrot.lane.b32.xlu0 %v12225_v52, %s18935_s4  ;;  %v7558_v22 = vsel %vm14100_vm8, %v12216_v49, %v7557_v24  ;;  %v7542_v16 = vrot.slane %v7540_v11, 4  ;;  %v7545_v27 = vrot.slane %v7543_v28, 5  ;;  %v7639_v2 = vpop.permute.xlu1 %7638  ;;  %v7699_v54 = vsel %vm2617_vm0, %v7689_v63, %v7626_v29 }
 0x491   : > { %v12244_v9 = vcombine.low %v7558_v22, %v7578_v33  ;;  %v12241_v12 = vcombine.low %v17341_v26, %v7558_v22  ;;  %v18984_v26 = vmov 0   ;;  %v7708_v53 = vsel %vm4683_vm2, %v7699_v54, %v7639_v2  ;;  %v17475_v22 = vld [vmem:[%s18986_s9] ss:$0 sm:$0xff] }
 0x492   : > { %v7546_v46 = vor.u32 %v7545_v27, %v7542_v16  ;;  %8076 = vst.msk [vmem:[#allocation5 + $0x8] sm:$0xf] %vm8072_vm15, %v18984_v26  ;;  %8073 = vst.msk [vmem:[#allocation5] sm:$0xf] %vm8072_vm15, %v18984_v26  ;;  %v17480_v27 = vld [vmem:[%s18822_s15] ss:$0 sm:$0xff] }
 0x493   : > { %13236 = vmatmul.mubr.msk.bf16.gmra.mrb[68].mxu1 %vm2485_vm6, %v12244_v9  ;;  %8077 = vst.msk [vmem:[#allocation5 + $0xc] sm:$0x1] %vm8074_vm1, %v18984_v26  ;;  %8075 = vst.msk [vmem:[#allocation5 + $0x4] sm:$0x1] %vm8074_vm1, %v18984_v26  ;;  %vm9480_vm7 = vcmask 518144  }
 0x494   : > { %7670 = vrot.lane.b32.xlu0 %v12242_v0, %s18910_s26  ;;  %7642 = vrot.lane.b32.xlu1 %v12233_v20, %s18935_s4  ;;  %v7547_v60 = vrot.slane %v7546_v46, 4  ;;  %8078 = vst.msk [vmem:[#allocation5 + $0x10] sm:$0xf] %vm8072_vm15, %v18984_v26  ;;  %8080 = vst.msk [vmem:[#allocation5 + $0x18] sm:$0xf] %vm8072_vm15, %v18984_v26 }
 0x495   : > { %8079 = vst.msk [vmem:[#allocation5 + $0x14] sm:$0x1] %vm8074_vm1, %v18984_v26  ;;  %8081 = vst.msk [vmem:[#allocation5 + $0x1c] sm:$0x1] %vm8074_vm1, %v18984_v26  ;;  %vm9605_vm9 = vsmask.f32 2306 }
 0x496   : > { %v7552_v42 = vsel %vm14135_vm12, %v7547_v60, %v7551_v47  ;;  %8082 = vst.msk [vmem:[#allocation5 + $0x20] sm:$0xf] %vm8072_vm15, %v18984_v26  ;;  %8084 = vst.msk [vmem:[#allocation5 + $0x28] sm:$0xf] %vm8072_vm15, %v18984_v26  ;;  %vm9661_vm14 = vsmask.f32 1280 }
 0x497   : > { %v12243_v43 = vcombine.low %v7552_v42, %v7572_v57  ;;  %v12237_v17 = vcombine.low %v17379_v4, %v7552_v42  ;;  %8083 = vst.msk [vmem:[#allocation5 + $0x24] sm:$0x1] %vm8074_vm1, %v18984_v26  ;;  %8085 = vst.msk [vmem:[#allocation5 + $0x2c] sm:$0x1] %vm8074_vm1, %v18984_v26 }
 0x498   : > { %7660 = vrot.lane.b32.xlu0 %v12241_v12, %s18912_s22  ;;  %8086 = vst.msk [vmem:[#allocation5 + $0x30] sm:$0xf] %vm8072_vm15, %v18984_v26  ;;  %8088 = vst.msk [vmem:[#allocation5 + $0x38] sm:$0xf] %vm8072_vm15, %v18984_v26  ;;  %s18991_s22 = sld [smem:[#allocation31_spill]] }
 0x499   : > { %8087 = vst.msk [vmem:[#allocation5 + $0x34] sm:$0x1] %vm8074_vm1, %v18984_v26  ;;  %8089 = vst.msk [vmem:[#allocation5 + $0x3c] sm:$0x1] %vm8074_vm1, %v18984_v26  ;;  %v17494_v55 = vld [vmem:[#allocation5] sm:$0xf] }
 0x49a   : > { %8090 = vst.msk [vmem:[#allocation5 + $0x40] sm:$0xf] %vm8072_vm15, %v18984_v26  ;;  %8092 = vst.msk [vmem:[#allocation5 + $0x48] sm:$0xf] %vm8072_vm15, %v18984_v26  ;;  %v8214_v54 = vld [vmem:[#allocation5 + $0xc] sm:$0x1] }
 0x49b   : > { %8091 = vst.msk [vmem:[#allocation5 + $0x44] sm:$0x1] %vm8074_vm1, %v18984_v26  ;;  %8093 = vst.msk [vmem:[#allocation5 + $0x4c] sm:$0x1] %vm8074_vm1, %v18984_v26  ;;  %vm9664_vm1 = vsmask.f32 5392 }
 0x49c   : > { %7680 = vrot.lane.b32.xlu0 %v12243_v43, %s18935_s4  ;;  %9481 = vst.msk [vmem:[#allocation6] sm:$0x7] %vm9480_vm7, %v18984_v26  ;;  %9483 = vst.msk [vmem:[#allocation6 + $0x8] sm:$0x7] %vm9480_vm7, %v18984_v26  ;;  %s18765_s4 = scalar_lea.hbm %s18828_s21, %s12533_s1 }
 0x49d   : > { %9486 = vst.msk [vmem:[#allocation6 + $0x14] sm:$0x7] %vm9480_vm7, %v18984_v26  ;;  %9482 = vst.msk [vmem:[#allocation6 + $0x4] sm:$0x7] %vm9480_vm7, %v18984_v26 }
 0x49e   : > { %9484 = vst.msk [vmem:[#allocation6 + $0xc] sm:$0x7] %vm9480_vm7, %v18984_v26  ;;  %9485 = vst.msk [vmem:[#allocation6 + $0x10] sm:$0x7] %vm9480_vm7, %v18984_v26 }
 0x4a1   : > { %v7657_v8 = vpop.permute.xlu0 %7656 }
 0x4a2   : > { %v7721_v31 = vsel %vm2485_vm6, %v12235_v15, %v7657_v8 }
 0x4bd   : > { %v7667_v45 = vpop.permute.xlu0 %7666 }
 0x4be   : > { %v7731_v7 = vsel %vm2617_vm0, %v7721_v31, %v7667_v45 }
 0x4d9   : > { %v7628_v50 = vpop.permute.xlu1 %7627 }
 0x4f3   : > { %v7677_v39 = vpop.permute.xlu0 %7676  ;;  %v7608_v13 = vpop.permute.xlu1 %7607 }
 0x4f4   : > { %v7740_v59 = vsel %vm4683_vm2, %v7731_v7, %v7677_v39  ;;  %v7692_v36 = vsel %vm2485_vm6, %v17237_v21, %v7608_v13  ;;  %v8209_v39 = vld [vmem:[#allocation5 + $0x8] sm:$0xf] }
 0x4f5   : > { %7944 = vmatprep.mubr.bf16.mxu0 %v7740_v59  ;;  %v7701_v34 = vsel %vm2617_vm0, %v7692_v36, %v7628_v50  ;;  %v8283_v50 = vshll.u32 %v17494_v55, 16 }
 0x4f6   : > { %7945 = vmatmul.mubr.bf16.gmra.mrb[68].mxu0 %v7708_v53  ;;  %v8280_v53 = vshrl.u32 %v17494_v55, 16 }
 0x4f7   : > { %v7659_v41 = vpop.permute.xlu0 %7658  ;;  %v7641_v48 = vpop.permute.xlu1 %7640 }
 0x4f8   : > { %v7724_v18 = vsel %vm2485_vm6, %v12236_v32, %v7659_v41  ;;  %v7711_v40 = vsel %vm4683_vm2, %v7701_v34, %v7641_v48  ;;  %v8217_v48 = vld [vmem:[#allocation5 + $0x10] sm:$0xf] }
 0x4fb   : > { %v7669_v58 = vpop.permute.xlu0 %7668  ;;  %v7630_v44 = vpop.permute.xlu1 %7629 }
 0x4fc   : > { %v7733_v3 = vsel %vm2617_vm0, %v7724_v18, %v7669_v58  ;;  %v8220_v18 = vld [vmem:[#allocation5 + $0x14] sm:$0x1] }
 0x502   : > { %v7679_v6 = vpop.permute.xlu0 %7678  ;;  %v7610_v21 = vpop.permute.xlu1 %7609 }
 0x503   : > { %v7743_v19 = vsel %vm4683_vm2, %v7733_v3, %v7679_v6  ;;  %v7695_v37 = vsel %vm2485_vm6, %v17352_v10, %v7610_v21  ;;  %v8285_v21 = vrot.slane %v8283_v50, 5  ;;  %v13493_v50 = vld [vmem:[%s18991_s22 + $0x28] sm:$0xff]  }
 0x504   : > { %7952 = vmatprep.mubr.bf16.mxu0 %v7743_v19  ;;  %v7703_v52 = vsel %vm2617_vm0, %v7695_v37, %v7630_v44 }
 0x505   : > { %7953 = vmatmul.mubr.bf16.gmra.mrb[72].mxu0 %v7711_v40 }
 0x506   : > { %v7671_v25 = vpop.permute.xlu0 %7670  ;;  %v7643_v62 = vpop.permute.xlu1 %7642 }
 0x507   : > { %v7714_v49 = vsel %vm4683_vm2, %v7703_v52, %v7643_v62 }
 0x50a   : > { %v7661_v51 = vpop.permute.xlu0 %7660 }
 0x50b   : > { %v7727_v4 = vsel %vm2485_vm6, %v12237_v17, %v7661_v51  ;;  %vm17498_vm6 = vmand %vm8072_vm15, %vm1164_vm10  ;;  %v17518_v51 = vld [vmem:[#allocation5 + $0x4] sm:$0x1]  ;;  %vm9662_vm15 = vsmask.f32 3336 }
 0x50c   : > { %v7735_v56 = vsel %vm2617_vm0, %v7727_v4, %v7671_v25  ;;  %v8282_v25 = vrot.slane %v8280_v53, 4  ;;  %v8289_v37 = vshll.u32 %v17518_v51, 16  ;;  %v13492_v53 = vld [vmem:[%s18991_s22 + $0x68] sm:$0xff]  }
 0x50e   : > { %v7681_v32 = vpop.permute.xlu0 %7680  ;;  %v8286_v4 = vor.u32 %v8285_v21, %v8282_v25 }
 0x50f   : > { %v7746_v35 = vsel %vm4683_vm2, %v7735_v56, %v7681_v32 }
 0x510   : > { %7960 = vmatprep.mubr.bf16.mxu0 %v7746_v35 }
 0x511   : > { %7961 = vmatmul.mubr.bf16.gmra.mrb[76].mxu0 %v7714_v49  ;;  %v8287_v49 = vrot.slane %v8286_v4, 4 }
 0x53a   : > { %v17468_v24 = vpop.f32.mrb[64].mxu1 }
 0x53b   : > { %v8003_v33 = vpop.f32.mrb[65].mxu1 }
 0x53c   : > { %v17470_v11 = vpop.f32.mrb[66].mxu1 }
 0x53d   : > { %v8006_v28 = vpop.f32.mrb[67].mxu1 }
 0x55f   : > { %v12868_v30 = vpop.f32.mrb[64].mxu0 }
 0x560   : > { %v12869_v10 = vpop.f32.mrb[65].mxu0 }
 0x561   : > { %v12870_v0 = vadd.f32 %v12869_v10, %v12868_v30  ;;  %v12871_v20 = vpop.f32.mrb[66].mxu0 }
 0x562   : > { %v12872_v23 = vpop.f32.mrb[67].mxu0 }
 0x563   : > { %v8004_v9 = vadd.f32 %v12870_v0, %v8003_v33  ;;  %v12873_v16 = vadd.f32 %v12872_v23, %v12871_v20  ;;  %v8291_v33 = vrot.slane %v8289_v37, 5  ;;  %v13481_v20 = vld [vmem:[%s18991_s22 + $0x40] sm:$0xff]  }
 0x564   : > { %v13482_v23 = vld [vmem:[%s18991_s22] sm:$0xff]   ;;  %12898 = vmatprep.subr.bf16.mxu0 %v13481_v20 }
 0x565   : > { %v8041_v46 = vmul.f32 %v17475_v22, %v8004_v9  ;;  %v8007_v12 = vadd.f32 %v12873_v16, %v8006_v28  ;;  %v13483_v9 = vld [vmem:[%s18991_s22 + $0x48] sm:$0xff]   ;;  %12899 = vmatpush3.bf16.msra.mxu0 %v13482_v23 }
 0x566   : > { %v17482_v61 = vpop.f32.mrb[68].mxu1  ;;  %12900 = vmatprep.subr.bf16.mxu0 %v13483_v9 }
 0x567   : > { %v17485_v60 = vpop.f32.mrb[69].mxu1  ;;  %v8056_v57 = vadd.f32 %v17480_v27, %v8041_v46  ;;  %v8042_v42 = vmul.f32 %v17475_v22, %v8007_v12 }
 0x568   : > { %v17487_v47 = vpop.f32.mrb[70].mxu1 }
 0x569   : > { %v17491_v43 = vpop.f32.mrb[71].mxu1  ;;  %v8064_v17 = vmax.f32 %v8056_v57, 0.0  ;;  %v8057_v29 = vadd.f32 %v17480_v27, %v8042_v42  ;;  %v13484_v57 = vld [vmem:[%s18991_s22 + $0x8] sm:$0xff]   ;;  %v8292_v42 = vsel %vm14135_vm12, %v8287_v49, %v8291_v33 }
 0x56a   : > { %12901 = vmatpush3.bf16.msra.mxu0 %v13484_v57 }
 0x56b   : > { %v12673_v8 = vpack.c.bf16 %v8064_v17, %v8064_v17  ;;  %v8065_v5 = vmax.f32 %v8057_v29, 0.0 }
 0x56d   : > { %v8127_v45 = vshrl.u32 %v12673_v8, 16  ;;  %v12674_v15 = vpack.c.bf16 %v8065_v5, %v8065_v5  ;;  %v8130_v2 = vshll.u32 %v12673_v8, 16  ;;  %v13486_v8 = vld [vmem:[%s18991_s22 + $0x50] sm:$0xff]  }
 0x56e   : > { %12902 = vmatprep.subr.bf16.mxu0 %v13486_v8 }
 0x56f   : > { %v8129_v63 = vrot.slane %v8127_v45, 7  ;;  %v8135_v7 = vshrl.u32 %v12674_v15, 16  ;;  %v8138_v36 = vshll.u32 %v12674_v15, 16 }
 0x571   : > { %v8132_v41 = vor.u32 %v8130_v2, %v8129_v63  ;;  %v8133_v13 = vrot.slane %v8129_v63, 4  ;;  %v8137_v58 = vrot.slane %v8135_v7, 7  ;;  %v13487_v63 = vld [vmem:[%s18991_s22 + $0x10] sm:$0xff]   ;;  %v13488_v2 = vld [vmem:[%s18991_s22 + $0x58] sm:$0xff]  }
 0x572   : > { %12903 = vmatpush3.bf16.msra.mxu0 %v13487_v63  ;;  %v13489_v7 = vld [vmem:[%s18991_s22 + $0x18] sm:$0xff]   ;;  %v8229_v63 = vld [vmem:[#allocation5 + $0x20] sm:$0xf] }
 0x573   : > { %v8210_v3 = vsel %vm17498_vm6, %v8132_v41, %v8209_v39  ;;  %v8215_v6 = vsel %vm17504_vm3, %v8133_v13, %v8214_v54  ;;  %v8140_v19 = vor.u32 %v8138_v36, %v8137_v58  ;;  %v8141_v34 = vrot.slane %v8137_v58, 4  ;;  %12904 = vmatprep.subr.bf16.mxu0 %v13488_v2  ;;  %v13490_v39 = vld [vmem:[%s18991_s22 + $0x60] sm:$0xff]   ;;  %v13495_v41 = vld [vmem:[%s18991_s22 + $0x70] sm:$0xff]   ;;  %v13497_v58 = vld [vmem:[%s18991_s22 + $0x78] sm:$0xff]  }
 0x574   : > { %8211 = vst [vmem:[#allocation5 + $0x8] sm:$0xf] %v8210_v3  ;;  %8216 = vst [vmem:[#allocation5 + $0xc] sm:$0x1] %v8215_v6  ;;  %v13491_v54 = vld [vmem:[%s18991_s22 + $0x20] sm:$0xff]   ;;  %v13496_v13 = vld [vmem:[%s18991_s22 + $0x30] sm:$0xff]  }
 0x575   : > { %v8218_v40 = vsel %vm17498_vm6, %v8140_v19, %v8217_v48  ;;  %v8221_v44 = vsel %vm17504_vm3, %v8141_v34, %v8220_v18  ;;  %v13498_v36 = vld [vmem:[%s18991_s22 + $0x38] sm:$0xff]   ;;  %v8232_v2 = vld [vmem:[#allocation5 + $0x24] sm:$0x1] }
 0x576   : > { %8219 = vst [vmem:[#allocation5 + $0x10] sm:$0xf] %v8218_v40  ;;  %8222 = vst [vmem:[#allocation5 + $0x14] sm:$0x1] %v8221_v44  ;;  %12905 = vmatpush3.bf16.msra.mxu0 %v13489_v7 }
 0x577   : > { %12906 = vmatprep.subr.bf16.mxu0 %v13490_v39 }
 0x57a   : > { %12907 = vmatpush3.bf16.msra.mxu0 %v13491_v54 }
 0x57b   : > { %v17521_v62 = vld [vmem:[#allocation5 + $0x8] sm:$0xf]  ;;  %v8262_v32 = vld [vmem:[#allocation5 + $0xc] sm:$0x1]  ;;  %12908 = vmatprep.subr.bf16.mxu0 %v13492_v53 }
 0x57c   : > { %v8294_v56 = vshrl.u32 %v17521_v62, 16  ;;  %v8297_v35 = vshll.u32 %v17521_v62, 16  ;;  %v8303_v28 = vshll.u32 %v8262_v32, 16  ;;  %v12278_v16 = vrot.slane %v17521_v62, 9 }
 0x57d   : > { %v17525_v52 = vld [vmem:[#allocation5 + $0x10] sm:$0xf]  ;;  %v8413_v12 = vrot.slane %v8262_v32, 5  ;;  %v8264_v54 = vld [vmem:[#allocation5 + $0x14] sm:$0x1] }
 0x57e   : > { %v12299_v30 = vcombine.low %v17521_v62, %v17525_v52  ;;  %v8296_v10 = vrot.slane %v8294_v56, 4  ;;  %v8299_v0 = vrot.slane %v8297_v35, 5  ;;  %v8305_v29 = vrot.slane %v8303_v28, 5  ;;  %12909 = vmatpush3.bf16.msra.mxu0 %v13493_v50 }
 0x57f   : > { %v17550_v5 = vsel %vm14100_vm8, %v12278_v16, %v8413_v12  ;;  %12910 = vmatprep.subr.bf16.mxu0 %v13495_v41  ;;  %v8308_v56 = vshrl.u32 %v17525_v52, 16  ;;  %v8311_v35 = vshll.u32 %v17525_v52, 16  ;;  %v8223_v16 = vld [vmem:[#allocation5 + $0x18] sm:$0xf] }
 0x580   : > { %8528 = vrot.lane.b32.xlu0 %v12299_v30, %s18910_s26  ;;  %v8300_v46 = vor.u32 %v8299_v0, %v8296_v10 }
 0x581   : > { %v8310_v10 = vrot.slane %v8308_v56, 4  ;;  %v8313_v0 = vrot.slane %v8311_v35, 5  ;;  %v17619_v56 = vld [vmem:[#allocation5 + $0x48] sm:$0xf] }
 0x582   : > { %v8301_v17 = vrot.slane %v8300_v46, 4  ;;  %12911 = vmatpush3.bf16.msra.mxu0 %v13496_v13  ;;  %v8226_v46 = vld [vmem:[#allocation5 + $0x1c] sm:$0x1] }
 0x583   : > { %12912 = vmatprep.subr.bf16.mxu0 %v13497_v58  ;;  %v8314_v53 = vor.u32 %v8313_v0, %v8310_v10 }
 0x584   : > { %v17554_v45 = vsel %vm14135_vm12, %v8301_v17, %v8305_v29 }
 0x585   : > { %v12291_v15 = vcombine.low %v8292_v42, %v17554_v45 }
 0x586   : > { %12913 = vmatpush3.bf16.msra.mxu0 %v13498_v36 }
 0x587   : > { %8503 = vrot.lane.b32.xlu1 %v12291_v15, %s18910_s26 }
 0x5c9   : > { %v12874_v48 = vpop.f32.mrb[68].mxu0 }
 0x5ca   : > { %v12875_v18 = vpop.f32.mrb[69].mxu0 }
 0x5cb   : > { %v12876_v3 = vadd.f32 %v12875_v18, %v12874_v48  ;;  %v12877_v6 = vpop.f32.mrb[70].mxu0 }
 0x5cc   : > { %v12878_v19 = vpop.f32.mrb[71].mxu0 }
 0x5cd   : > { %v8012_v34 = vadd.f32 %v17468_v24, %v12876_v3  ;;  %v12879_v40 = vadd.f32 %v12878_v19, %v12877_v6  ;;  %v8317_v6 = vshll.u32 %v8264_v54, 16 }
 0x5cf   : > { %v8043_v44 = vmul.f32 %v17475_v22, %v8012_v34  ;;  %v8015_v25 = vadd.f32 %v17470_v11, %v12879_v40  ;;  %v12277_v40 = vrot.slane %v17494_v55, 9 }
 0x5d1   : > { %v8058_v21 = vadd.f32 %v17480_v27, %v8043_v44  ;;  %v8044_v4 = vmul.f32 %v17475_v22, %v8015_v25  ;;  %v12279_v44 = vrot.slane %v17525_v52, 9  ;;  %v8417_v25 = vrot.slane %v8264_v54, 5  ;;  %v8238_v54 = vld [vmem:[#allocation5 + $0x2c] sm:$0x1] }
 0x5d3   : > { %v8066_v37 = vmax.f32 %v8058_v21, 0.0  ;;  %v8059_v32 = vadd.f32 %v17480_v27, %v8044_v4  ;;  %v8409_v21 = vrot.slane %v17518_v51, 5  ;;  %v17634_v0 = vsel %vm14100_vm8, %v12279_v44, %v8417_v25 }
 0x5d5   : > { %v12675_v49 = vpack.c.bf16 %v8066_v37, %v8066_v37  ;;  %v8067_v33 = vmax.f32 %v8059_v32, 0.0  ;;  %v8319_v32 = vrot.slane %v8317_v6, 5 }
 0x5d7   : > { %v8143_v28 = vshrl.u32 %v12675_v49, 16  ;;  %v12676_v24 = vpack.c.bf16 %v8067_v33, %v8067_v33  ;;  %v8146_v11 = vshll.u32 %v12675_v49, 16 }
 0x5d8   : > { %v12880_v30 = vpop.f32.mrb[72].mxu0 }
 0x5d9   : > { %v8145_v20 = vrot.slane %v8143_v28, 7  ;;  %v8151_v23 = vshrl.u32 %v12676_v24, 16  ;;  %v12881_v9 = vpop.f32.mrb[73].mxu0  ;;  %v8154_v8 = vshll.u32 %v12676_v24, 16  ;;  %v13501_v28 = vld [vmem:[%s18991_s22 + $0x80] sm:$0xff]  }
 0x5da   : > { %v12882_v12 = vadd.f32 %v12881_v9, %v12880_v30  ;;  %v12883_v57 = vpop.f32.mrb[74].mxu0 }
 0x5db   : > { %v8148_v42 = vor.u32 %v8146_v11, %v8145_v20  ;;  %v8149_v17 = vrot.slane %v8145_v20, 4  ;;  %v8153_v29 = vrot.slane %v8151_v23, 7  ;;  %v12884_v15 = vpop.f32.mrb[75].mxu0  ;;  %v17638_v20 = vsel %vm14100_vm8, %v12277_v40, %v8409_v21  ;;  %v13505_v40 = vld [vmem:[%s18991_s22 + $0x90] sm:$0xff]  }
 0x5dc   : > { %v8020_v7 = vadd.f32 %v12882_v12, %v17485_v60  ;;  %v12885_v39 = vadd.f32 %v12884_v15, %v12883_v57  ;;  %v13500_v60 = vld [vmem:[%s18991_s22 + $0xc0] sm:$0xff]   ;;  %v13502_v12 = vld [vmem:[%s18991_s22 + $0xc8] sm:$0xff]  }
 0x5dd   : > { %v8224_v50 = vsel %vm17498_vm6, %v8148_v42, %v8223_v16  ;;  %v8227_v41 = vsel %vm17504_vm3, %v8149_v17, %v8226_v46  ;;  %v8156_v13 = vor.u32 %v8154_v8, %v8153_v29  ;;  %v8157_v58 = vrot.slane %v8153_v29, 4  ;;  %12938 = vmatprep.subr.bf16.mxu1 %v13500_v60  ;;  %v13503_v57 = vld [vmem:[%s18991_s22 + $0x88] sm:$0xff]  }
 0x5de   : > { %8225 = vst [vmem:[#allocation5 + $0x18] sm:$0xf] %v8224_v50  ;;  %8228 = vst [vmem:[#allocation5 + $0x1c] sm:$0x1] %v8227_v41  ;;  %v8045_v36 = vmul.f32 %v17475_v22, %v8020_v7  ;;  %v8023_v48 = vadd.f32 %v12885_v39, %v17491_v43  ;;  %v8315_v43 = vrot.slane %v8314_v53, 4  ;;  %v8460_v46 = vshrl.u32 %v17619_v56, 16  ;;  %12939 = vmatpush3.bf16.msra.mxu1 %v13501_v28 }
 0x5df   : > { %v8230_v18 = vsel %vm17498_vm6, %v8156_v13, %v8229_v63  ;;  %v8233_v3 = vsel %vm17504_vm3, %v8157_v58, %v8232_v2  ;;  %v8235_v29 = vld [vmem:[#allocation5 + $0x28] sm:$0xf]  ;;  %12940 = vmatprep.subr.bf16.mxu1 %v13502_v12  ;;  %v13504_v41 = vld [vmem:[%s18991_s22 + $0xd0] sm:$0xff]  }
 0x5e0   : > { %8231 = vst [vmem:[#allocation5 + $0x20] sm:$0xf] %v8230_v18  ;;  %8234 = vst [vmem:[#allocation5 + $0x24] sm:$0x1] %v8233_v3  ;;  %v8060_v19 = vadd.f32 %v17480_v27, %v8045_v36  ;;  %v8046_v34 = vmul.f32 %v17475_v22, %v8023_v48  ;;  %v17630_v51 = vsel %vm14135_vm12, %v8315_v43, %v8319_v32  ;;  %v8241_v13 = vld [vmem:[#allocation5 + $0x30] sm:$0xf] }
 0x5e2   : > { %v8068_v4 = vmax.f32 %v8060_v19, 0.0  ;;  %v8061_v37 = vadd.f32 %v17480_v27, %v8046_v34  ;;  %v8244_v19 = vld [vmem:[#allocation5 + $0x34] sm:$0x1]  ;;  %12941 = vmatpush3.bf16.msra.mxu1 %v13503_v57 }
 0x5e3   : > { %12942 = vmatprep.subr.bf16.mxu1 %v13504_v41 }
 0x5e4   : > { %v12677_v35 = vpack.c.bf16 %v8068_v4, %v8068_v4  ;;  %v8069_v49 = vmax.f32 %v8061_v37, 0.0  ;;  %v12886_v33 = vpop.f32.mrb[76].mxu0  ;;  %v13506_v4 = vld [vmem:[%s18991_s22 + $0xd8] sm:$0xff]  }
 0x5e5   : > { %v17624_v24 = vld [vmem:[#allocation5 + $0x18] sm:$0xf]  ;;  %v17626_v30 = vld [vmem:[#allocation5 + $0x1c] sm:$0x1]  ;;  %v12887_v10 = vpop.f32.mrb[77].mxu0 }
 0x5e6   : > { %v8159_v11 = vshrl.u32 %v12677_v35, 16  ;;  %v12678_v23 = vpack.c.bf16 %v8069_v49, %v8069_v49  ;;  %v8322_v9 = vshrl.u32 %v17624_v24, 16  ;;  %v12889_v16 = vpop.f32.mrb[78].mxu0  ;;  %v8162_v17 = vshll.u32 %v12677_v35, 16  ;;  %12943 = vmatpush3.bf16.msra.mxu1 %v13505_v40 }
 0x5e7   : > { %v17648_v42 = vld [vmem:[#allocation5 + $0x20] sm:$0xf]  ;;  %v8325_v8 = vshll.u32 %v17624_v24, 16  ;;  %v8331_v15 = vshll.u32 %v17626_v30, 16  ;;  %v12888_v63 = vadd.f32 %v12887_v10, %v12886_v33  ;;  %v12890_v2 = vpop.f32.mrb[79].mxu0  ;;  %12944 = vmatprep.subr.bf16.mxu1 %v13506_v4  ;;  %v12288_v38 = vcombine.low %v17525_v52, %v17624_v24 }
 0x5e8   : > { %v12300_v7 = vcombine.low %v17624_v24, %v17648_v42  ;;  %v8161_v39 = vrot.slane %v8159_v11, 7  ;;  %v8167_v53 = vshrl.u32 %v12678_v23, 16  ;;  %v8170_v50 = vshll.u32 %v12678_v23, 16  ;;  %v17663_v25 = vld [vmem:[#allocation5 + $0x24] sm:$0x1] }
 0x5e9   : > { %v8324_v58 = vrot.slane %v8322_v9, 4  ;;  %v8327_v36 = vrot.slane %v8325_v8, 5  ;;  %v8333_v48 = vrot.slane %v8331_v15, 5  ;;  %v8028_v60 = vadd.f32 %v17482_v61, %v12888_v63  ;;  %v17677_v33 = vld [vmem:[%s18991_s22 + $0x100] sm:$0xff]   ;;  %v8250_v4 = vld [vmem:[#allocation5 + $0x3c] sm:$0x1] }
 0x5ea   : > { %8530 = vrot.lane.b32.xlu0 %v12300_v7, %s18910_s26  ;;  %v8164_v18 = vor.u32 %v8162_v17, %v8161_v39  ;;  %v8165_v3 = vrot.slane %v8161_v39, 4  ;;  %v8169_v6 = vrot.slane %v8167_v53, 7  ;;  %v12891_v34 = vadd.f32 %v12890_v2, %v12889_v16  ;;  %v13507_v17 = vld [vmem:[%s18991_s22 + $0x98] sm:$0xff]   ;;  %13239 = vmatprep.subr.bf16.mxu0 %v17677_v33  ;;  %v13508_v63 = vld [vmem:[%s18991_s22 + $0xe0] sm:$0xff]  }
 0x5eb   : > { %v8328_v43 = vor.u32 %v8327_v36, %v8324_v58  ;;  %v8047_v44 = vmul.f32 %v17475_v22, %v8028_v60  ;;  %v8336_v21 = vshrl.u32 %v17648_v42, 16  ;;  %v8339_v61 = vshll.u32 %v17648_v42, 16  ;;  %12945 = vmatpush3.bf16.msra.mxu1 %v13507_v17 }
 0x5ec   : > { %v8236_v37 = vsel %vm17498_vm6, %v8164_v18, %v8235_v29  ;;  %v8239_v32 = vsel %vm17504_vm3, %v8165_v3, %v8238_v54  ;;  %v8172_v35 = vor.u32 %v8170_v50, %v8169_v6  ;;  %v8173_v49 = vrot.slane %v8169_v6, 4  ;;  %v17706_v50 = vld [vmem:[#allocation5 + $0x4c] sm:$0x1]  ;;  %12946 = vmatprep.subr.bf16.mxu1 %v13508_v63 }
 0x5ed   : > { %8237 = vst [vmem:[#allocation5 + $0x28] sm:$0xf] %v8236_v37  ;;  %8240 = vst [vmem:[#allocation5 + $0x2c] sm:$0x1] %v8239_v32  ;;  %v8329_v28 = vrot.slane %v8328_v43, 4  ;;  %v8062_v10 = vadd.f32 %v17480_v27, %v8047_v44  ;;  %v8031_v11 = vadd.f32 %v17487_v47, %v12891_v34  ;;  %v8338_v23 = vrot.slane %v8336_v21, 4 }
 0x5ee   : > { %v8242_v9 = vsel %vm17498_vm6, %v8172_v35, %v8241_v13  ;;  %v8245_v16 = vsel %vm17504_vm3, %v8173_v49, %v8244_v19  ;;  %v8341_v12 = vrot.slane %v8339_v61, 5  ;;  %v8345_v57 = vshll.u32 %v17663_v25, 16  ;;  %v8247_v34 = vld [vmem:[#allocation5 + $0x38] sm:$0xf] }
 0x5ef   : > { %8243 = vst [vmem:[#allocation5 + $0x30] sm:$0xf] %v8242_v9  ;;  %8246 = vst [vmem:[#allocation5 + $0x34] sm:$0x1] %v8245_v16  ;;  %v17692_v47 = vsel %vm14135_vm12, %v8329_v28, %v8333_v48  ;;  %v8070_v29 = vmax.f32 %v8062_v10, 0.0  ;;  %v8048_v8 = vmul.f32 %v17475_v22, %v8031_v11  ;;  %v8463_v15 = vshll.u32 %v17619_v56, 16 }
 0x5f0   : > { %v12292_v2 = vcombine.low %v17630_v51, %v17692_v47  ;;  %v8342_v7 = vor.u32 %v8341_v12, %v8338_v23  ;;  %v12307_v53 = vcombine.low %v17550_v5, %v17634_v0  ;;  %v12287_v22 = vcombine.low %v17494_v55, %v17521_v62  ;;  %v13511_v11 = vld [vmem:[%s18991_s22 + $0xa8] sm:$0xff]  }
 0x5f1   : > { %v12679_v39 = vpack.c.bf16 %v8070_v29, %v8070_v29  ;;  %v8063_v54 = vadd.f32 %v17480_v27, %v8048_v8  ;;  %v8347_v13 = vrot.slane %v8345_v57, 5  ;;  %v12295_v58 = vcombine.low %v17638_v20, %v17550_v5  ;;  %v13509_v27 = vld [vmem:[%s18991_s22 + $0xa0] sm:$0xff]   ;;  %v13510_v20 = vld [vmem:[%s18991_s22 + $0xe8] sm:$0xff]  }
 0x5f2   : > { %8505 = vrot.lane.b32.xlu1 %v12292_v2, %s18910_s26  ;;  %v8343_v41 = vrot.slane %v8342_v7, 4  ;;  %v8469_v36 = vshll.u32 %v17706_v50, 16  ;;  %v8529_v18 = vpop.permute.xlu0 %8528  ;;  %v17717_v3 = vrot.slane %v8460_v46, 4  ;;  %v17719_v6 = vrot.slane %v8463_v15, 5  ;;  %12947 = vmatpush3.bf16.msra.mxu1 %v13509_v27 }
 0x5f3   : > { %v8175_v48 = vshrl.u32 %v12679_v39, 16  ;;  %v8071_v60 = vmax.f32 %v8063_v54, 0.0  ;;  %v8178_v19 = vshll.u32 %v12679_v39, 16  ;;  %v8580_v21 = vsel %vm2617_vm0, %v12295_v58, %v8529_v18  ;;  %12948 = vmatprep.subr.bf16.mxu1 %v13510_v20  ;;  %v8253_v54 = vld [vmem:[#allocation5 + $0x40] sm:$0xf] }
 0x5f4   : > { %v17724_v40 = vld [vmem:[#allocation5 + $0x28] sm:$0xf]  ;;  %v8270_v43 = vld [vmem:[#allocation5 + $0x2c] sm:$0x1]  ;;  %v17728_v44 = vsel %vm14135_vm12, %v8343_v41, %v8347_v13  ;;  %v12281_v46 = vrot.slane %v17648_v42, 9  ;;  %8943 = vmatprep.mubr.bf16.mxu0 %v8580_v21  ;;  %v8425_v10 = vrot.slane %v17663_v25, 5 }
 0x5f5   : > { %v8177_v61 = vrot.slane %v8175_v48, 7  ;;  %v12680_v37 = vpack.c.bf16 %v8071_v60, %v8071_v60  ;;  %v8350_v32 = vshrl.u32 %v17724_v40, 16  ;;  %v8353_v35 = vshll.u32 %v17724_v40, 16  ;;  %v13512_v25 = vld [vmem:[%s18991_s22 + $0xf0] sm:$0xff]   ;;  %v8256_v58 = vld [vmem:[#allocation5 + $0x44] sm:$0x1] }
 0x5f6   : > { %v17734_v49 = vld [vmem:[#allocation5 + $0x30] sm:$0xf]  ;;  %v8359_v28 = vshll.u32 %v8270_v43, 16  ;;  %v12289_v23 = vcombine.low %v17648_v42, %v17724_v40  ;;  %v12304_v9 = vcombine.low %v17692_v47, %v17728_v44  ;;  %v12282_v17 = vrot.slane %v17724_v40, 9  ;;  %v17754_v41 = vld [vmem:[#allocation5 + $0x34] sm:$0x1]  ;;  %12949 = vmatpush3.bf16.msra.mxu1 %v13511_v11 }
 0x5f7   : > { %v8180_v16 = vor.u32 %v8178_v19, %v8177_v61  ;;  %v8181_v12 = vrot.slane %v8177_v61, 4  ;;  %v8183_v57 = vshrl.u32 %v12680_v37, 16  ;;  %v8186_v29 = vshll.u32 %v12680_v37, 16  ;;  %v13513_v19 = vld [vmem:[%s18991_s22 + $0xb0] sm:$0xff]   ;;  %12950 = vmatprep.subr.bf16.mxu1 %v13512_v25  ;;  %v13515_v37 = vld [vmem:[%s18991_s22 + $0xf8] sm:$0xff]  }
 0x5f8   : > { %v12301_v8 = vcombine.low %v17724_v40, %v17734_v49  ;;  %v8352_v15 = vrot.slane %v8350_v32, 4  ;;  %v8355_v63 = vrot.slane %v8353_v35, 5  ;;  %v8364_v13 = vshrl.u32 %v17734_v49, 16 }
 0x5f9   : > { %v8248_v2 = vsel %vm17498_vm6, %v8180_v16, %v8247_v34  ;;  %v8251_v7 = vsel %vm17504_vm3, %v8181_v12, %v8250_v4  ;;  %v8185_v39 = vrot.slane %v8183_v57, 7  ;;  %v8361_v48 = vrot.slane %v8359_v28, 5  ;;  %v8504_v18 = vpop.permute.xlu1 %8503 }
 0x5fa   : > { %8249 = vst [vmem:[#allocation5 + $0x38] sm:$0xf] %v8248_v2  ;;  %8252 = vst [vmem:[#allocation5 + $0x3c] sm:$0x1] %v8251_v7  ;;  %8532 = vrot.lane.b32.xlu0 %v12301_v8, %s18910_s26  ;;  %v8356_v27 = vor.u32 %v8355_v63, %v8352_v15  ;;  %v8367_v60 = vshll.u32 %v17734_v49, 16  ;;  %v8429_v20 = vrot.slane %v8270_v43, 5  ;;  %v8564_v4 = vsel %vm2617_vm0, %v12287_v22, %v8504_v18 }
 0x5fb   : > { %v8188_v34 = vor.u32 %v8186_v29, %v8185_v39  ;;  %v8189_v21 = vrot.slane %v8185_v39, 4  ;;  %v8366_v61 = vrot.slane %v8364_v13, 4  ;;  %v13517_v43 = vld [vmem:[%s18991_s22 + $0x108] sm:$0xff]   ;;  %v8373_v28 = vshll.u32 %v17754_v41, 16  ;;  %8944 = vmatmul.mubr.bf16.vlgmr.msra.gmra.mrb[80].mxu0 %v8564_v4  ;;  %12951 = vmatpush3.bf16.msra.mxu1 %v13513_v19 }
 0x5fc   : > { %v8357_v32 = vrot.slane %v8356_v27, 4  ;;  %v8369_v35 = vrot.slane %v8367_v60, 5  ;;  %v17775_v11 = vsel %vm14100_vm8, %v12282_v17, %v8429_v20  ;;  %v17783_v22 = vsel %vm14100_vm8, %v12281_v46, %v8425_v10  ;;  %13240 = vmatpush3.bf16.msra.mxu0 %v17677_v33  ;;  %v13516_v33 = vld [vmem:[%s18991_s22 + $0xb8] sm:$0xff]   ;;  %v13518_v46 = vld [vmem:[%s18991_s22 + $0x110] sm:$0xff]   ;;  %12952 = vmatprep.subr.bf16.mxu1 %v13515_v37 }
 0x5fd   : > { %v8254_v55 = vsel %vm17498_vm6, %v8188_v34, %v8253_v54  ;;  %v8257_v62 = vsel %vm17504_vm3, %v8189_v21, %v8256_v58  ;;  %v17796_v59 = vcombine.low %v17783_v22, %v17775_v11  ;;  %v17810_v10 = vrot.slane %v8469_v36, 5  ;;  %13241 = vmatprep.subr.bf16.mxu0 %v13517_v43  ;;  %vm18160_vm3 = vmor %vm9661_vm14, %vm9662_vm15 }
 0x5fe   : > { %8255 = vst [vmem:[#allocation5 + $0x40] sm:$0xf] %v8254_v55  ;;  %8258 = vst [vmem:[#allocation5 + $0x44] sm:$0x1] %v8257_v62  ;;  %8546 = vrot.lane.b32.xlu0 %v12307_v53, %s18910_s26  ;;  %v17792_v31 = vsel %vm14135_vm12, %v8357_v32, %v8361_v48  ;;  %v8370_v16 = vor.u32 %v8369_v35, %v8366_v61  ;;  %v8466_v53 = vor.u32 %v17719_v6, %v17717_v3  ;;  %vm9666_vm6 = vsmask.f32 7448 }
 0x5ff   : > { %v12293_v5 = vcombine.low %v17728_v44, %v17792_v31  ;;  %v8375_v57 = vrot.slane %v8373_v28, 5  ;;  %v12286_v17 = vrot.slane %v17619_v56, 9  ;;  %v8477_v25 = vrot.slane %v17706_v50, 5  ;;  %12953 = vmatpush3.bf16.msra.mxu1 %v13516_v33  ;;  %v13519_v50 = vld [vmem:[%s18991_s22 + $0x118] sm:$0xff]  }
 0x600   : > { %v8371_v12 = vrot.slane %v8370_v16, 4  ;;  %v12283_v15 = vrot.slane %v17734_v49, 9  ;;  %v8433_v3 = vrot.slane %v17754_v41, 5  ;;  %13242 = vmatpush3.bf16.msra.mxu0 %v13517_v43  ;;  %v8467_v27 = vrot.slane %v8466_v53, 4 }
 0x601   : > { %8507 = vrot.lane.b32.xlu1 %v12293_v5, %s18910_s26  ;;  %v17815_v29 = vld [vmem:[#allocation5 + $0x38] sm:$0xf]  ;;  %v8274_v8 = vld [vmem:[#allocation5 + $0x3c] sm:$0x1]  ;;  %13243 = vmatprep.subr.bf16.mxu0 %v13518_v46  ;;  %v17835_v48 = vsel %vm14100_vm8, %v12286_v17, %v8477_v25  ;;  %v12280_v18 = vrot.slane %v17624_v24, 9  ;;  %v8421_v20 = vrot.slane %v17626_v30, 5 }
 0x602   : > { %v17821_v36 = vsel %vm14135_vm12, %v8371_v12, %v8375_v57  ;;  %v8378_v6 = vshrl.u32 %v17815_v29, 16  ;;  %v8381_v63 = vshll.u32 %v17815_v29, 16  ;;  %v8387_v2 = vshll.u32 %v8274_v8, 16 }
 0x603   : > { %v12284_v7 = vrot.slane %v17815_v29, 9  ;;  %v8437_v39 = vrot.slane %v8274_v8, 5  ;;  %v12290_v54 = vcombine.low %v17734_v49, %v17815_v29  ;;  %v12305_v41 = vcombine.low %v17792_v31, %v17821_v36 }
 0x604   : > { %v8380_v13 = vrot.slane %v8378_v6, 4  ;;  %v8383_v58 = vrot.slane %v8381_v63, 5  ;;  %v8434_v34 = vsel %vm14100_vm8, %v12283_v15, %v8433_v3  ;;  %13244 = vmatpush3.bf16.msra.mxu0 %v13518_v46  ;;  %v8389_v32 = vrot.slane %v8387_v2, 5 }
 0x605   : > { %v17837_v60 = vld [vmem:[#allocation5 + $0x40] sm:$0xf]  ;;  %v8276_v19 = vld [vmem:[#allocation5 + $0x44] sm:$0x1]  ;;  %v8438_v21 = vsel %vm14100_vm8, %v12284_v7, %v8437_v39  ;;  %13245 = vmatprep.subr.bf16.mxu0 %v13519_v50  ;;  %v8422_v46 = vsel %vm14100_vm8, %v12280_v18, %v8421_v20  ;;  %v8472_v1 = vsel %vm14135_vm12, %v8467_v27, %v17810_v10  ;;  %v12309_v6 = vcombine.low %v17775_v11, %v8434_v34 }
 0x606   : > { %v12302_v61 = vcombine.low %v17815_v29, %v17837_v60  ;;  %v8384_v4 = vor.u32 %v8383_v58, %v8380_v13  ;;  %v8440_v37 = vshrl.u32 %v17837_v60, 16  ;;  %v8443_v43 = vshll.u32 %v17837_v60, 16 }
 0x607   : > { %v12285_v30 = vrot.slane %v17837_v60, 9  ;;  %v8457_v35 = vrot.slane %v8276_v19, 5  ;;  %v17850_v28 = vcombine.low %v8434_v34, %v8438_v21  ;;  %v8449_v33 = vshll.u32 %v8276_v19, 16 }
 0x608   : > { %8534 = vrot.lane.b32.xlu1 %v12302_v61, %s18910_s26  ;;  %v8385_v55 = vrot.slane %v8384_v4, 4  ;;  %v8442_v62 = vrot.slane %v8440_v37, 4  ;;  %v8445_v16 = vrot.slane %v8443_v43, 5  ;;  %13246 = vmatpush3.bf16.msra.mxu0 %v13519_v50  ;;  %v12308_v53 = vcombine.low %v8422_v46, %v17783_v22  ;;  %v17931_v37 = vld [vmem:[#allocation6 + $0x14] sm:$0x7] }
 0x609   : > { %v17857_v5 = vsel %vm14100_vm8, %v12285_v30, %v8457_v35  ;;  %v8451_v15 = vrot.slane %v8449_v33, 5  ;;  %v12296_v50 = vcombine.low %v17634_v0, %v8422_v46  ;;  %v12303_v0 = vcombine.low %v17554_v45, %v17630_v51  ;;  %v13524_v35 = vld [vmem:[%s18992_s29 + $0x40] sm:$0xff]  }
 0x60a   : > { %v8390_v12 = vsel %vm14135_vm12, %v8385_v55, %v8389_v32  ;;  %v8446_v57 = vor.u32 %v8445_v16, %v8442_v62  ;;  %v12313_v17 = vcombine.low %v17857_v5, %v17835_v48  ;;  %v12310_v2 = vcombine.low %v8438_v21, %v17857_v5  ;;  %v13526_v62 = vld [vmem:[%s18992_s29 + $0x48] sm:$0xff]   ;;  %12986 = vmatprep.subr.bf16.mxu1 %v13524_v35  ;;  %v13528_v33 = vld [vmem:[%s18992_s29 + $0xc0] sm:$0xff]   ;;  %v17967_v5 = vld [vmem:[#allocation6] sm:$0x7] }
 0x60b   : > { %v12294_v25 = vcombine.low %v17821_v36, %v8390_v12  ;;  %v12311_v44 = vcombine.low %v17837_v60, %v17619_v56  ;;  %v17937_v32 = vrot.slane %v17931_v37, %v16658_v14  ;;  %vm9724_vm8 = vcmask 1040384   ;;  %v13529_v46 = vld [vmem:[%s18992_s29 + $0x80] sm:$0xff]   ;;  %13008 = vmatprep.subr.bf16.mxu0 %v13528_v33 }
 0x60c   : > { %8548 = vrot.lane.b32.xlu1 %v12308_v53, %s18910_s26  ;;  %v8447_v8 = vrot.slane %v8446_v57, 4  ;;  %vm9726_vm10 = vmor %vm9724_vm8, %vm7170_vm4  ;;  %v13532_v57 = vld [vmem:[%s18992_s29 + $0xc8] sm:$0xff]   ;;  %vm11665_vm8 = vcmask 73728  }
 0x60d   : > { %8509 = vrot.lane.b32.xlu0 %v12294_v25, %s18910_s26  ;;  %v17942_v26 = vcombine.high %v17937_v32, %v17937_v32  ;;  %v12409_v30 = vrot.slane %v17937_v32, 9 }
 0x60e   : > { %v8452_v22 = vsel %vm14135_vm12, %v8447_v8, %v8451_v15  ;;  %vm9728_vm12 = vmor %vm9726_vm10, %vm7176_vm5  ;;  %v13533_v8 = vld [vmem:[%s18992_s29 + $0x88] sm:$0xff]  }
 0x60f   : > { %v12312_v3 = vcombine.low %v8452_v22, %v8472_v1  ;;  %v12306_v63 = vcombine.low %v8390_v12, %v8452_v22  ;;  %v9799_v55 = vrot.slane %v17942_v26, 7  ;;  %vm17957_vm2 = vmor %vm9728_vm12, %vm7182_vm11  ;;  %v13527_v12 = vld [vmem:[%s18992_s29 + $0x8] sm:$0xff]   ;;  %v17987_v1 = vrot.slane %v17967_v5, %v16658_v14  ;;  %v13536_v22 = vld [vmem:[%s18992_s29 + $0xd0] sm:$0xff]  }
 0x610   : > { %vm18099_vm11 = vmand %vm9480_vm7, %vm9605_vm9 }
 0x611   : > { %8558 = vrot.lane.b32.xlu1 %v12312_v3, %s18910_s26  ;;  %8550 = vrot.lane.b32.xlu0 %v12309_v6, %s18910_s26  ;;  %v17971_v53 = vsel %vm17957_vm2, %v12409_v30, %v9799_v55 }
 0x615   : > { %8552 = vrot.lane.b32.xlu0 %v12310_v2, %s18910_s26 }
 0x65c   : > { %v8531_v10 = vpop.permute.xlu0 %8530 }
 0x65d   : > { %v8584_v7 = vsel %vm2617_vm0, %v12296_v50, %v8531_v10  ;;  %v13534_v10 = vld [vmem:[%s18992_s29 + $0x58] sm:$0xff]  }
 0x65e   : > { %8951 = vmatprep.mubr.bf16.mxu0 %v8584_v7 }
 0x664   : > { %v8506_v39 = vpop.permute.xlu1 %8505 }
 0x665   : > { %v8568_v11 = vsel %vm2617_vm0, %v12288_v38, %v8506_v39 }
 0x666   : > { %8952 = vmatmul.mubr.bf16.gmra.mrb[84].mxu0 %v8568_v11  ;;  %9008 = vmatprep.mubr.bf16.mxu1 %v8568_v11  ;;  %v13537_v11 = vld [vmem:[%s18992_s29 + $0x90] sm:$0xff]  }
 0x66c   : > { %v8533_v13 = vpop.permute.xlu0 %8532 }
 0x66d   : > { %v8588_v58 = vsel %vm2617_vm0, %v17796_v59, %v8533_v13 }
 0x66e   : > { %8959 = vmatprep.mubr.bf16.mxu0 %v8588_v58 }
 0x670   : > { %v8547_v27 = vpop.permute.xlu0 %8546 }
 0x671   : > { %v8596_v48 = vsel %vm2617_vm0, %v12303_v0, %v8547_v27  ;;  %v18003_v0 = vcombine.high %v17987_v1, %v17987_v1  ;;  %v13540_v27 = vld [vmem:[%s18992_s29 + $0xd8] sm:$0xff]  }
 0x672   : > { %9009 = vmatmul.mubr.bf16.vlgmr.msra.gmra.mrb[72].mxu1 %v8596_v48 }
 0x673   : > { %v8508_v18 = vpop.permute.xlu1 %8507 }
 0x674   : > { %v8572_v52 = vsel %vm2617_vm0, %v12289_v23, %v8508_v18 }
 0x675   : > { %8960 = vmatmul.mubr.bf16.gmra.mrb[88].mxu0 %v8572_v52  ;;  %9016 = vmatprep.mubr.bf16.mxu1 %v8572_v52  ;;  %v13535_v52 = vld [vmem:[%s18992_s29 + $0x18] sm:$0xff]  }
 0x67a   : > { %v8535_v24 = vpop.permute.xlu1 %8534 }
 0x67b   : > { %v8592_v20 = vsel %vm2617_vm0, %v17850_v28, %v8535_v24 }
 0x67c   : > { %8967 = vmatprep.mubr.bf16.mxu0 %v8592_v20  ;;  %v13538_v20 = vld [vmem:[%s18992_s29 + $0x60] sm:$0xff]  }
 0x67e   : > { %v8549_v19 = vpop.permute.xlu1 %8548 }
 0x67f   : > { %v8600_v45 = vsel %vm2617_vm0, %v12304_v9, %v8549_v19  ;;  %v8510_v51 = vpop.permute.xlu0 %8509  ;;  %v13541_v19 = vld [vmem:[%s18992_s29 + $0x98] sm:$0xff]  }
 0x680   : > { %9017 = vmatmul.mubr.bf16.gmra.mrb[76].mxu1 %v8600_v45  ;;  %v8576_v42 = vsel %vm2617_vm0, %v12290_v54, %v8510_v51  ;;  %v13544_v45 = vld [vmem:[%s18992_s29 + $0xe0] sm:$0xff]   ;;  %v12404_v51 = vrot.slane %v17987_v1, 9 }
 0x681   : > { %8968 = vmatmul.mubr.bf16.gmra.mrb[92].mxu0 %v8576_v42  ;;  %9024 = vmatprep.mubr.bf16.mxu1 %v8576_v42  ;;  %v9733_v42 = vrot.slane %v18003_v0, 7 }
 0x682   : > { %13247 = vmatprep.mubr.msk.bf16.mxu0 %vm2617_vm0, %v12296_v50 }
 0x683   : > { %v8551_v40 = vpop.permute.xlu0 %8550  ;;  %v8559_v23 = vpop.permute.xlu1 %8558 }
 0x684   : > { %v8604_v47 = vsel %vm2617_vm0, %v12305_v41, %v8551_v40  ;;  %v8612_v9 = vsel %vm2617_vm0, %v12311_v44, %v8559_v23  ;;  %v13539_v40 = vld [vmem:[%s18992_s29 + $0x20] sm:$0xff]   ;;  %v13542_v23 = vld [vmem:[%s18992_s29 + $0x68] sm:$0xff]  }
 0x687   : > { %v8553_v49 = vpop.permute.xlu0 %8552 }
 0x688   : > { %9025 = vmatmul.mubr.bf16.gmra.mrb[80].mxu1 %v8604_v47  ;;  %v8608_v29 = vsel %vm2617_vm0, %v12306_v63, %v8553_v49  ;;  %v13531_v63 = vld [vmem:[%s18992_s29 + $0x10] sm:$0xff]   ;;  %v18031_v47 = vsel %vm17957_vm2, %v12404_v51, %v9733_v42  ;;  %v9784_v51 = vshrl.u32 %v17937_v32, 16 }
 0x689   : > { %9032 = vmatprep.mubr.bf16.mxu1 %v8612_v9  ;;  %13248 = vmatmul.mubr.msk.bf16.vlgmr.msra.gmra.mrb[96].mxu0 %vm2617_vm0, %v17796_v59  ;;  %v13543_v9 = vld [vmem:[%s18992_s29 + $0x28] sm:$0xff]  }
 0x68a   : > { %13251 = vmatprep.mubr.msk.bf16.mxu0 %vm2617_vm0, %v17850_v28  ;;  %v13525_v28 = vld [vmem:[%s18992_s29] sm:$0xff]   ;;  %13009 = vmatpush3.bf16.msra.mxu0 %v13529_v46 }
 0x68b   : > { %12987 = vmatpush3.bf16.msra.mxu1 %v13525_v28  ;;  %13010 = vmatprep.subr.bf16.mxu0 %v13532_v57 }
 0x68c   : > { %12988 = vmatprep.subr.bf16.mxu1 %v13526_v62  ;;  %v18045_v62 = vld [vmem:[%s18995_s10] ss:$0 sm:$0xff]  ;;  %s647_s10 = sand.u32 1, %s13704_s25  }
 0x68d   : > { %s648_s28 = scalar_lea.vmem [#allocation8], %s647_s10 }
 0x68e   : > { %13011 = vmatpush3.bf16.msra.mxu0 %v13533_v8  ;;  %v9669_v8 = vshrl.u32 %v17987_v1, 16  ;;  %s11680_s7 = sshll.u32 %s648_s28, 4  ;;  %s18767_s7 = int_to_ptr.vmem [resolvable:$true] %s11680_s7 }
 0x68f   : > { %12989 = vmatpush3.bf16.msra.mxu1 %v13527_v12  ;;  %13012 = vmatprep.subr.bf16.mxu0 %v13536_v22  ;;  %s13650_s9 = scalar_lea.vmem %s18767_s7, 16  ;;  %p13657_p0 = scmp.lt.s32.totalorder %s18767_s7, %s13655_s13 }
 0x690   : > { %9033 = vmatmul.mubr.bf16.gmra.mrb[84].mxu1 %v8608_v29  ;;  %p13651_p11 = scmp.ne.s32.totalorder %s18767_s7, %s13650_s9  ;;  %p13658_p1 = scmp.lt.s32.totalorder %s13656_s24, %s13650_s9 }
 0x691   : > { %13252 = vmatmul.mubr.msk.bf16.gmra.mrb[100].mxu0 %vm2617_vm0, %v12313_v17  ;;  %v13530_v17 = vld [vmem:[%s18992_s29 + $0x50] sm:$0xff]  }
 0x692   : > { %12990 = vmatprep.subr.bf16.mxu1 %v13530_v17  ;;  %13013 = vmatpush3.bf16.msra.mxu0 %v13537_v11  ;;  %p13652_p12 = pnand %p13651_p11, %p13877_p5  ;;  %p13659_p2 = por %p13658_p1, %p13657_p0 }
 0x693   : > { %12991 = vmatpush3.bf16.msra.mxu1 %v13531_v63  ;;  %13014 = vmatprep.subr.bf16.mxu0 %v13540_v27 }
 0x694   : > { %12992 = vmatprep.subr.bf16.mxu1 %v13534_v10  ;;  %p13653_p13 = pneg %p13652_p12 }
 0x696   : > { %13015 = vmatpush3.bf16.msra.mxu0 %v13541_v19  ;;  %p13660_p3 = pnand %p13659_p2, %p13653_p13 }
 0x697   : > { %12993 = vmatpush3.bf16.msra.mxu1 %v13535_v52  ;;  %13016 = vmatprep.subr.bf16.mxu0 %v13544_v45  ;;  %v18063_v52 = vrot.slane %v9669_v8, 6 }
 0x698   : > { %12994 = vmatprep.subr.bf16.mxu1 %v13538_v20 }
 0x69b   : > { %12995 = vmatpush3.bf16.msra.mxu1 %v13539_v40 }
 0x69c   : > { %12996 = vmatprep.subr.bf16.mxu1 %v13542_v23 }
 0x69f   : > { %12997 = vmatpush3.bf16.msra.mxu1 %v13543_v9 }
 0x6ce   : > { %v12914_v31 = vpop.f32.mrb[80].mxu0 }
 0x6cf   : > { %v12915_v36 = vpop.f32.mrb[81].mxu0 }
 0x6d0   : > { %v12916_v54 = vadd.f32 %v12915_v36, %v12914_v31  ;;  %v12917_v56 = vpop.f32.mrb[82].mxu0 }
 0x6d1   : > { %v12918_v41 = vpop.f32.mrb[83].mxu0 }
 0x6d2   : > { %v17915_v60 = vadd.f32 %v12918_v41, %v12917_v56 }
 0x739   : > { %v12920_v59 = vpop.f32.mrb[84].mxu0 }
 0x73a   : > { %v12921_v34 = vpop.f32.mrb[85].mxu0 }
 0x73b   : > { %v17929_v21 = vadd.f32 %v12921_v34, %v12920_v59  ;;  %v12923_v61 = vpop.f32.mrb[86].mxu0 }
 0x73c   : > { %v12924_v4 = vpop.f32.mrb[87].mxu0 }
 0x73d   : > { %v17933_v43 = vadd.f32 %v12924_v4, %v12923_v61 }
 0x745   : > { %v12954_v25 = vpop.f32.mrb[72].mxu1 }
 0x746   : > { %v12955_v15 = vpop.f32.mrb[73].mxu1 }
 0x747   : > { %v12956_v3 = vadd.f32 %v12955_v15, %v12954_v25  ;;  %v12957_v6 = vpop.f32.mrb[74].mxu1  ;;  %v9672_v15 = vshll.u32 %v17987_v1, 16 }
 0x748   : > { %v12926_v2 = vpop.f32.mrb[88].mxu0  ;;  %v12958_v50 = vpop.f32.mrb[75].mxu1 }
 0x749   : > { %v12959_v7 = vadd.f32 %v12958_v50, %v12957_v6  ;;  %v12927_v38 = vpop.f32.mrb[89].mxu0  ;;  %v9011_v39 = vadd.f32 %v12956_v3, %v12916_v54 }
 0x74a   : > { %v12928_v13 = vadd.f32 %v12927_v38, %v12926_v2  ;;  %v12929_v58 = vpop.f32.mrb[90].mxu0 }
 0x74b   : > { %v12930_v48 = vpop.f32.mrb[91].mxu0  ;;  %v9014_v18 = vadd.f32 %v12959_v7, %v17915_v60 }
 0x74c   : > { %v12931_v24 = vadd.f32 %v12930_v48, %v12929_v58 }
 0x753   : > { %v12960_v44 = vpop.f32.mrb[76].mxu1 }
 0x754   : > { %v12961_v49 = vpop.f32.mrb[77].mxu1  ;;  %v12932_v29 = vpop.f32.mrb[92].mxu0 }
 0x755   : > { %v12962_v31 = vadd.f32 %v12961_v49, %v12960_v44  ;;  %v12963_v36 = vpop.f32.mrb[78].mxu1  ;;  %v12933_v54 = vpop.f32.mrb[93].mxu0 }
 0x756   : > { %v12964_v56 = vpop.f32.mrb[79].mxu1  ;;  %v18036_v41 = vadd.f32 %v12933_v54, %v12932_v29  ;;  %v12935_v60 = vpop.f32.mrb[94].mxu0 }
 0x757   : > { %v12965_v59 = vadd.f32 %v12964_v56, %v12963_v36  ;;  %v12936_v34 = vpop.f32.mrb[95].mxu0  ;;  %v9019_v61 = vadd.f32 %v12962_v31, %v17929_v21  ;;  %v18050_v21 = vld [vmem:[%s18823_s16] ss:$0 sm:$0xff] }
 0x758   : > { %v18039_v4 = vadd.f32 %v12936_v34, %v12935_v60 }
 0x759   : > { %v9022_v30 = vadd.f32 %v12965_v59, %v17933_v43 }
 0x75b   : > { %v12966_v35 = vpop.f32.mrb[80].mxu1 }
 0x75c   : > { %v12967_v28 = vpop.f32.mrb[81].mxu1  ;;  %v13249_v55 = vpop.f32.mrb[96].mxu0 }
 0x75d   : > { %v12968_v33 = vadd.f32 %v12967_v28, %v12966_v35  ;;  %v12969_v46 = vpop.f32.mrb[82].mxu1  ;;  %v9084_v12 = vadd.f32 %v13249_v55, %v9019_v61  ;;  %v9075_v57 = vpop.f32.mrb[97].mxu0 }
 0x75e   : > { %v12970_v17 = vpop.f32.mrb[83].mxu1  ;;  %v9076_v25 = vadd.f32 %v9075_v57, %v9011_v39  ;;  %v13250_v43 = vpop.f32.mrb[98].mxu0 }
 0x75f   : > { %v12971_v22 = vadd.f32 %v12970_v17, %v12969_v46  ;;  %v9115_v3 = vmul.f32 %v18045_v62, %v9084_v12  ;;  %v9087_v6 = vadd.f32 %v13250_v43, %v9022_v30  ;;  %v9078_v63 = vpop.f32.mrb[99].mxu0  ;;  %v9027_v2 = vadd.f32 %v12968_v33, %v12928_v13 }
 0x760   : > { %v9113_v50 = vmul.f32 %v18045_v62, %v9076_v25  ;;  %v9079_v10 = vadd.f32 %v9078_v63, %v9014_v18  ;;  %v18065_v13 = vrot.slane %v9672_v15, 7 }
 0x761   : > { %v9130_v7 = vadd.f32 %v18050_v21, %v9115_v3  ;;  %v9116_v38 = vmul.f32 %v18045_v62, %v9087_v6  ;;  %v18058_v11 = vadd.f32 %v12971_v22, %v12931_v24  ;;  %v9678_v24 = vshll.u32 %v18003_v0, 16 }
 0x762   : > { %v9128_v39 = vadd.f32 %v18050_v21, %v9113_v50  ;;  %v9114_v58 = vmul.f32 %v18045_v62, %v9079_v10 }
 0x763   : > { %v9138_v1 = vmax.f32 %v9130_v7, 0.0  ;;  %v9131_v27 = vadd.f32 %v18050_v21, %v9116_v38  ;;  %v12972_v48 = vpop.f32.mrb[84].mxu1 }
 0x764   : > { %v9136_v20 = vmax.f32 %v9128_v39, 0.0  ;;  %v9129_v18 = vadd.f32 %v18050_v21, %v9114_v58  ;;  %v12973_v19 = vpop.f32.mrb[85].mxu1  ;;  %v18068_v45 = vpop.f32.mrb[100].mxu0 }
 0x765   : > { %v9186_v42 = vcombine.high %v9138_v1, %v9138_v1  ;;  %v9193_v40 = vrot.slane %v9138_v1, %v16658_v14  ;;  %v9139_v23 = vmax.f32 %v9131_v27, 0.0  ;;  %v12974_v44 = vadd.f32 %v12973_v19, %v12972_v48  ;;  %v12975_v9 = vpop.f32.mrb[86].mxu1  ;;  %v9091_v49 = vpop.f32.mrb[101].mxu0 }
 0x766   : > { %v9152_v29 = vcombine.high %v9136_v20, %v9136_v20  ;;  %v9159_v31 = vrot.slane %v9136_v20, %v16658_v14  ;;  %v9137_v36 = vmax.f32 %v9129_v18, 0.0  ;;  %v12976_v54 = vpop.f32.mrb[87].mxu1  ;;  %v18074_v56 = vadd.f32 %v9091_v49, %v9027_v2  ;;  %v18076_v60 = vpop.f32.mrb[102].mxu0 }
 0x767   : > { %v9200_v59 = vrot.slane %v9186_v42, %v16658_v14  ;;  %v9201_v34 = vcombine.high %v9193_v40, %v9193_v40  ;;  %v12364_v61 = vrot.slane %v9193_v40, 9  ;;  %v9203_v30 = vcombine.high %v9139_v23, %v9139_v23  ;;  %v18079_v35 = vpop.f32.mrb[103].mxu0 }
 0x768   : > { %v9166_v28 = vrot.slane %v9152_v29, %v16658_v14  ;;  %v9167_v55 = vcombine.high %v9159_v31, %v9159_v31  ;;  %v12356_v33 = vrot.slane %v9159_v31, 9  ;;  %v9210_v46 = vrot.slane %v9139_v23, %v16658_v14 }
 0x769   : > { %v9202_v12 = vcombine.high %v9200_v59, %v9200_v59  ;;  %v12365_v57 = vrot.slane %v9201_v34, 9  ;;  %v12366_v17 = vrot.slane %v9200_v59, 9  ;;  %v9424_v25 = vadd.f32 %v12364_v61, %v9193_v40 }
 0x76a   : > { %v9168_v43 = vcombine.high %v9166_v28, %v9166_v28  ;;  %v12357_v8 = vrot.slane %v9167_v55, 9  ;;  %v12358_v15 = vrot.slane %v9166_v28, 9  ;;  %v9416_v22 = vadd.f32 %v12356_v33, %v9159_v31 }
 0x76b   : > { %v12367_v3 = vrot.slane %v9202_v12, 9  ;;  %v9425_v6 = vadd.f32 %v12365_v57, %v9201_v34  ;;  %v9426_v63 = vadd.f32 %v12366_v17, %v9200_v59  ;;  %v9217_v2 = vrot.slane %v9203_v30, %v16658_v14 }
 0x76c   : > { %v12359_v50 = vrot.slane %v9168_v43, 9  ;;  %v9417_v10 = vadd.f32 %v12357_v8, %v9167_v55  ;;  %v9418_v7 = vadd.f32 %v12358_v15, %v9166_v28  ;;  %v9218_v38 = vcombine.high %v9210_v46, %v9210_v46 }
 0x76d   : > { %v9427_v39 = vadd.f32 %v12367_v3, %v9202_v12  ;;  %v9219_v58 = vcombine.high %v9217_v2, %v9217_v2  ;;  %v12368_v1 = vrot.slane %v9210_v46, 9  ;;  %v12370_v27 = vrot.slane %v9217_v2, 9 }
 0x76e   : > { %v9419_v48 = vadd.f32 %v12359_v50, %v9168_v43  ;;  %v12369_v20 = vrot.slane %v9218_v38, 9  ;;  %v9169_v18 = vcombine.high %v9137_v36, %v9137_v36  ;;  %v9176_v19 = vrot.slane %v9137_v36, %v16658_v14 }
 0x76f   : > { %v12371_v42 = vrot.slane %v9219_v58, 9  ;;  %v9428_v40 = vadd.f32 %v12368_v1, %v9210_v46  ;;  %v9430_v23 = vadd.f32 %v12370_v27, %v9217_v2  ;;  %v18085_v49 = vadd.f32 %v12976_v54, %v12975_v9 }
 0x770   : > { %v9429_v29 = vadd.f32 %v12369_v20, %v9218_v38  ;;  %v9183_v31 = vrot.slane %v9169_v18, %v16658_v14  ;;  %v9184_v59 = vcombine.high %v9176_v19, %v9176_v19  ;;  %v12360_v34 = vrot.slane %v9176_v19, 9 }
 0x771   : > { %v9431_v61 = vadd.f32 %v12371_v42, %v9219_v58  ;;  %v9452_v30 = vadd.f32 %v9428_v40, %v9424_v25  ;;  %v9454_v28 = vadd.f32 %v9430_v23, %v9426_v63  ;;  %v9035_v55 = vadd.f32 %v12974_v44, %v18036_v41 }
 0x772   : > { %v9453_v33 = vadd.f32 %v9429_v29, %v9425_v6  ;;  %v9185_v12 = vcombine.high %v9183_v31, %v9183_v31  ;;  %v12361_v57 = vrot.slane %v9184_v59, 9  ;;  %v12362_v17 = vrot.slane %v9183_v31, 9 }
 0x773   : > { %v9455_v36 = vadd.f32 %v9431_v61, %v9427_v39  ;;  %v9468_v43 = vmul.f32 0.25, %v9452_v30  ;;  %v9470_v46 = vmul.f32 0.25, %v9454_v28  ;;  %v9420_v9 = vadd.f32 %v12360_v34, %v9176_v19 }
 0x774   : > { %v9469_v54 = vmul.f32 0.25, %v9453_v33  ;;  %v12363_v8 = vrot.slane %v9185_v12, 9  ;;  %v9421_v15 = vadd.f32 %v12361_v57, %v9184_v59  ;;  %v9422_v3 = vadd.f32 %v12362_v17, %v9183_v31 }
 0x775   : > { %v9471_v2 = vmul.f32 0.25, %v9455_v36  ;;  %v12685_v50 = vpack.c.bf16 %v9468_v43, %v9468_v43  ;;  %v12687_v38 = vpack.c.bf16 %v9470_v46, %v9470_v46  ;;  %v9448_v25 = vadd.f32 %v9420_v9, %v9416_v22 }
 0x776   : > { %v12686_v63 = vpack.c.bf16 %v9469_v54, %v9469_v54  ;;  %v9423_v58 = vadd.f32 %v12363_v8, %v9185_v12  ;;  %v9449_v41 = vadd.f32 %v9421_v15, %v9417_v10  ;;  %v9450_v44 = vadd.f32 %v9422_v3, %v9418_v7 }
 0x777   : > { %v12688_v6 = vpack.c.bf16 %v9471_v2, %v9471_v2  ;;  %v9555_v1 = vunpack.c.l.b16 %v12685_v50  ;;  %v9557_v27 = vunpack.c.l.b16 %v12687_v38  ;;  %v9464_v39 = vmul.f32 0.25, %v9448_v25 }
 0x778   : > { %v9556_v20 = vunpack.c.l.b16 %v12686_v63  ;;  %v9451_v18 = vadd.f32 %v9423_v58, %v9419_v48  ;;  %v9465_v42 = vmul.f32 0.25, %v9449_v41  ;;  %v9466_v19 = vmul.f32 0.25, %v9450_v44 }
 0x779   : > { %v9558_v40 = vunpack.c.l.b16 %v12688_v6  ;;  %v9574_v23 = vrot.slane %v9555_v1, 7  ;;  %v9577_v29 = vrot.slane %v9557_v27, 5  ;;  %v12681_v31 = vpack.c.bf16 %v9464_v39, %v9464_v39  ;;  %v9607_v39 = vld [vmem:[#allocation6 + $0x4] sm:$0x7] }
 0x77a   : > { %v9575_v59 = vrot.slane %v9556_v20, 6  ;;  %v9467_v34 = vmul.f32 0.25, %v9451_v18  ;;  %v12682_v61 = vpack.c.bf16 %v9465_v42, %v9465_v42  ;;  %v12683_v22 = vpack.c.bf16 %v9466_v19, %v9466_v19 }
 0x77b   : > { %v9579_v30 = vrot.slane %v9558_v40, 4  ;;  %v9551_v28 = vunpack.c.l.b16 %v12681_v31  ;;  %v9100_v10 = vadd.f32 %v18068_v45, %v9035_v55  ;;  %v9117_v7 = vmul.f32 %v18045_v62, %v18074_v56  ;;  %v9610_v56 = vld [vmem:[#allocation6 + $0x8] sm:$0x7]  ;;  %v13545_v45 = vld [vmem:[%s18992_s29 + $0xa0] sm:$0xff]  }
 0x77c   : > { %v9576_v33 = vsel %vm7170_vm4, %v9575_v59, %v9574_v23  ;;  %v12684_v48 = vpack.c.bf16 %v9467_v34, %v9467_v34  ;;  %v9552_v12 = vunpack.c.l.b16 %v12682_v61  ;;  %v9553_v57 = vunpack.c.l.b16 %v12683_v22  ;;  %13017 = vmatpush3.bf16.msra.mxu0 %v13545_v45 }
 0x77d   : > { %v9578_v17 = vsel %vm7173_vm13, %v9577_v29, %v9576_v33  ;;  %v9567_v36 = vrot.slane %v9551_v28, 7  ;;  %v9119_v43 = vmul.f32 %v18045_v62, %v9100_v10  ;;  %v9132_v46 = vadd.f32 %v18050_v21, %v9117_v7 }
 0x77e   : > { %v9580_v9 = vsel %vm7176_vm5, %v9579_v30, %v9578_v17  ;;  %v9554_v55 = vunpack.c.l.b16 %v12684_v48  ;;  %v9568_v54 = vrot.slane %v9552_v12, 6  ;;  %v9570_v8 = vrot.slane %v9553_v57, 5 }
 0x77f   : > { %v9596_v15 = vpack.c.b16 %v9580_v9, %v9580_v9  ;;  %v9134_v3 = vadd.f32 %v18050_v21, %v9119_v43  ;;  %v9140_v2 = vmax.f32 %v9132_v46, 0.0  ;;  %v9038_v50 = vadd.f32 %v18085_v49, %v18039_v4 }
 0x780   : > { %v9569_v38 = vsel %vm7170_vm4, %v9568_v54, %v9567_v36  ;;  %v9572_v25 = vrot.slane %v9554_v55, 4  ;;  %v9095_v63 = vadd.f32 %v18079_v35, %v18058_v11  ;;  %v9787_v58 = vshll.u32 %v17937_v32, 16 }
 0x781   : > { %v9611_v41 = vsel %vm18099_vm11, %v9596_v15, %v9610_v56  ;;  %v9571_v44 = vsel %vm7173_vm13, %v9570_v8, %v9569_v38  ;;  %v9142_v6 = vmax.f32 %v9134_v3, 0.0  ;;  %v9220_v1 = vcombine.high %v9140_v2, %v9140_v2 }
 0x782   : > { %9612 = vst [vmem:[#allocation6 + $0x8] sm:$0x7] %v9611_v41  ;;  %v9573_v27 = vsel %vm7176_vm5, %v9572_v25, %v9571_v44  ;;  %v9227_v4 = vrot.slane %v9140_v2, %v16658_v14  ;;  %v9103_v49 = vadd.f32 %v18076_v60, %v9038_v50  ;;  %v9118_v20 = vmul.f32 %v18045_v62, %v9095_v63 }
 0x783   : > { %v9595_v11 = vpack.c.b16 %v9573_v27, %v9573_v27  ;;  %v9254_v35 = vcombine.high %v9142_v6, %v9142_v6  ;;  %v9261_v18 = vrot.slane %v9142_v6, %v16658_v14  ;;  %v9234_v42 = vrot.slane %v9220_v1, %v16658_v14 }
 0x784   : > { %v9235_v19 = vcombine.high %v9227_v4, %v9227_v4  ;;  %v12372_v40 = vrot.slane %v9227_v4, 9  ;;  %v9120_v23 = vmul.f32 %v18045_v62, %v9103_v49  ;;  %v9133_v29 = vadd.f32 %v18050_v21, %v9118_v20 }
 0x785   : > { %v9608_v31 = vsel %vm18099_vm11, %v9595_v11, %v9607_v39  ;;  %v9268_v59 = vrot.slane %v9254_v35, %v16658_v14  ;;  %v9269_v60 = vcombine.high %v9261_v18, %v9261_v18  ;;  %v12380_v34 = vrot.slane %v9261_v18, 9 }
 0x786   : > { %9609 = vst [vmem:[#allocation6 + $0x4] sm:$0x7] %v9608_v31  ;;  %v9236_v61 = vcombine.high %v9234_v42, %v9234_v42  ;;  %v12373_v22 = vrot.slane %v9235_v19, 9  ;;  %v12374_v30 = vrot.slane %v9234_v42, 9  ;;  %v9675_v28 = vor.u32 %v18065_v13, %v18063_v52  ;;  %v13546_v52 = vld [vmem:[%s18992_s29 + $0x70] sm:$0xff]   ;;  %v13548_v13 = vld [vmem:[%s18992_s29 + $0xe8] sm:$0xff]  }
 0x787   : > { %v9270_v10 = vcombine.high %v9268_v59, %v9268_v59  ;;  %v12381_v7 = vrot.slane %v9269_v60, 9  ;;  %v12382_v33 = vrot.slane %v9268_v59, 9  ;;  %v18128_v62 = vrot.slane %v9784_v51, 6  ;;  %12998 = vmatprep.subr.bf16.mxu1 %v13546_v52  ;;  %13018 = vmatprep.subr.bf16.mxu0 %v13548_v13 }
 0x788   : > { %v12375_v48 = vrot.slane %v9236_v61, 9  ;;  %v9135_v12 = vadd.f32 %v18050_v21, %v9120_v23  ;;  %v18131_v57 = vrot.slane %v9787_v58, 7  ;;  %v9793_v17 = vshll.u32 %v17942_v26, 16 }
 0x789   : > { %v12383_v36 = vrot.slane %v9270_v10, 9  ;;  %v9440_v43 = vadd.f32 %v12380_v34, %v9261_v18  ;;  %v9432_v46 = vadd.f32 %v12372_v40, %v9227_v4  ;;  %v9141_v9 = vmax.f32 %v9133_v29, 0.0  ;;  %v18134_v56 = vld [vmem:[#allocation6 + $0x8] sm:$0x7] }
 0x78a   : > { %v9433_v55 = vadd.f32 %v12373_v22, %v9235_v19  ;;  %v9434_v54 = vadd.f32 %v12374_v30, %v9234_v42  ;;  %v9143_v8 = vmax.f32 %v9135_v12, 0.0  ;;  %v18138_v32 = vrot.slane %v18134_v56, %v16658_v14 }
 0x78b   : > { %v9441_v51 = vadd.f32 %v12381_v7, %v9269_v60  ;;  %v9442_v15 = vadd.f32 %v12382_v33, %v9268_v59  ;;  %v9237_v21 = vcombine.high %v9141_v9, %v9141_v9  ;;  %v9244_v3 = vrot.slane %v9141_v9, %v16658_v14 }
 0x78c   : > { %v9443_v2 = vadd.f32 %v12383_v36, %v9270_v10  ;;  %v9435_v50 = vadd.f32 %v12375_v48, %v9236_v61  ;;  %v9271_v38 = vcombine.high %v9143_v8, %v9143_v8  ;;  %v9278_v25 = vrot.slane %v9143_v8, %v16658_v14 }
 0x78d   : > { %v9251_v63 = vrot.slane %v9237_v21, %v16658_v14  ;;  %v9252_v58 = vcombine.high %v9244_v3, %v9244_v3  ;;  %v12376_v41 = vrot.slane %v9244_v3, 9  ;;  %v18143_v44 = vld [vmem:[#allocation6 + $0x4] sm:$0x7]  ;;  %v18147_v6 = vcombine.high %v18138_v32, %v18138_v32 }
 0x78e   : > { %v9285_v1 = vrot.slane %v9271_v38, %v16658_v14  ;;  %v9286_v27 = vcombine.high %v9278_v25, %v9278_v25  ;;  %v12384_v39 = vrot.slane %v9278_v25, 9  ;;  %v18152_v4 = vrot.slane %v18143_v44, %v16658_v14 }
 0x78f   : > { %v9253_v49 = vcombine.high %v9251_v63, %v9251_v63  ;;  %v12377_v20 = vrot.slane %v9252_v58, 9  ;;  %v12378_v11 = vrot.slane %v9251_v63, 9  ;;  %v9436_v35 = vadd.f32 %v12376_v41, %v9244_v3 }
 0x790   : > { %v9287_v18 = vcombine.high %v9285_v1, %v9285_v1  ;;  %v12385_v42 = vrot.slane %v9286_v27, 9  ;;  %v12386_v19 = vrot.slane %v9285_v1, 9  ;;  %v9444_v40 = vadd.f32 %v12384_v39, %v9278_v25 }
 0x791   : > { %v12379_v23 = vrot.slane %v9253_v49, 9  ;;  %v9437_v29 = vadd.f32 %v12377_v20, %v9252_v58  ;;  %v9438_v31 = vadd.f32 %v12378_v11, %v9251_v63  ;;  %v9456_v59 = vadd.f32 %v9436_v35, %v9432_v46 }
 0x792   : > { %v12387_v60 = vrot.slane %v9287_v18, 9  ;;  %v9445_v34 = vadd.f32 %v12385_v42, %v9286_v27  ;;  %v9446_v61 = vadd.f32 %v12386_v19, %v9285_v1  ;;  %v9460_v22 = vadd.f32 %v9444_v40, %v9440_v43 }
 0x793   : > { %v9439_v30 = vadd.f32 %v12379_v23, %v9253_v49  ;;  %v9457_v10 = vadd.f32 %v9437_v29, %v9433_v55  ;;  %v9458_v7 = vadd.f32 %v9438_v31, %v9434_v54  ;;  %v9472_v33 = vmul.f32 0.25, %v9456_v59 }
 0x794   : > { %v9447_v48 = vadd.f32 %v12387_v60, %v9287_v18  ;;  %v9461_v12 = vadd.f32 %v9445_v34, %v9441_v51  ;;  %v9462_v36 = vadd.f32 %v9446_v61, %v9442_v15  ;;  %v9476_v9 = vmul.f32 0.25, %v9460_v22 }
 0x795   : > { %v9459_v8 = vadd.f32 %v9439_v30, %v9435_v50  ;;  %v9473_v21 = vmul.f32 0.25, %v9457_v10  ;;  %v9474_v3 = vmul.f32 0.25, %v9458_v7  ;;  %v12689_v38 = vpack.c.bf16 %v9472_v33, %v9472_v33 }
 0x796   : > { %v9463_v46 = vadd.f32 %v9447_v48, %v9443_v2  ;;  %v9477_v25 = vmul.f32 0.25, %v9461_v12  ;;  %v9478_v63 = vmul.f32 0.25, %v9462_v36  ;;  %v12693_v58 = vpack.c.bf16 %v9476_v9, %v9476_v9 }
 0x797   : > { %v9475_v43 = vmul.f32 0.25, %v9459_v8  ;;  %v12690_v41 = vpack.c.bf16 %v9473_v21, %v9473_v21  ;;  %v12691_v1 = vpack.c.bf16 %v9474_v3, %v9474_v3  ;;  %v9559_v27 = vunpack.c.l.b16 %v12689_v38  ;;  %v9613_v8 = vld [vmem:[#allocation6 + $0xc] sm:$0x7] }
 0x798   : > { %v9479_v55 = vmul.f32 0.25, %v9463_v46  ;;  %v12694_v54 = vpack.c.bf16 %v9477_v25, %v9477_v25  ;;  %v12695_v39 = vpack.c.bf16 %v9478_v63, %v9478_v63  ;;  %v9563_v49 = vunpack.c.l.b16 %v12693_v58  ;;  %v9616_v46 = vld [vmem:[#allocation6 + $0x10] sm:$0x7] }
 0x799   : > { %v12692_v51 = vpack.c.bf16 %v9475_v43, %v9475_v43  ;;  %v9560_v15 = vunpack.c.l.b16 %v12690_v41  ;;  %v9561_v50 = vunpack.c.l.b16 %v12691_v1  ;;  %v9697_v20 = vshrl.u32 %v18138_v32, 16 }
 0x79a   : > { %v12696_v11 = vpack.c.bf16 %v9479_v55, %v9479_v55  ;;  %v9564_v35 = vunpack.c.l.b16 %v12694_v54  ;;  %v9565_v2 = vunpack.c.l.b16 %v12695_v39  ;;  %v9581_v18 = vrot.slane %v9559_v27, 7 }
 0x79b   : > { %v9588_v42 = vrot.slane %v9563_v49, 7  ;;  %v9562_v19 = vunpack.c.l.b16 %v12692_v51  ;;  %v9582_v40 = vrot.slane %v9560_v15, 6  ;;  %v9584_v23 = vrot.slane %v9561_v50, 5  ;;  %v13613_v15 = vld [vmem:[%s18813_s6 + $0x1e0] sm:$0xff]  }
 0x79c   : > { %v9566_v29 = vunpack.c.l.b16 %v12696_v11  ;;  %v9589_v31 = vrot.slane %v9564_v35, 6  ;;  %v9591_v59 = vrot.slane %v9565_v2, 5  ;;  %v9644_v60 = vcombine.high %v18152_v4, %v18152_v4 }
 0x79d   : > { %v9583_v34 = vsel %vm7170_vm4, %v9582_v40, %v9581_v18  ;;  %v9586_v61 = vrot.slane %v9562_v19, 4  ;;  %v9683_v30 = vshrl.u32 %v18152_v4, 16  ;;  %v9700_v10 = vshll.u32 %v18138_v32, 16  ;;  %v13550_v40 = vld [vmem:[%s18992_s29 + $0x78] sm:$0xff]  }
 0x79e   : > { %v9590_v7 = vsel %vm7170_vm4, %v9589_v31, %v9588_v42  ;;  %v9593_v33 = vrot.slane %v9566_v29, 4  ;;  %v9585_v48 = vsel %vm7173_vm13, %v9584_v23, %v9583_v34  ;;  %v9686_v12 = vshll.u32 %v18152_v4, 16  ;;  %vm9665_vm4 = vmor %vm18160_vm3, %vm9664_vm1  ;;  %v13552_v29 = vld [vmem:[%s18992_s29 + $0xf0] sm:$0xff]  }
 0x79f   : > { %v9592_v36 = vsel %vm7173_vm13, %v9591_v59, %v9590_v7  ;;  %v9587_v9 = vsel %vm7176_vm5, %v9586_v61, %v9585_v48  ;;  %v9685_v21 = vrot.slane %v9683_v30, 6  ;;  %v9692_v3 = vshll.u32 %v9644_v60, 16  ;;  %vm18184_vm13 = vmor %vm9665_vm4, %vm9666_vm6  ;;  %v13553_v61 = vld [vmem:[%s18992_s29 + $0xb0] sm:$0xff]  }
 0x7a0   : > { %v9594_v38 = vsel %vm7176_vm5, %v9593_v33, %v9592_v36  ;;  %v9597_v25 = vpack.c.b16 %v9587_v9, %v9587_v9  ;;  %v9688_v63 = vrot.slane %v9686_v12, 7  ;;  %v9699_v58 = vrot.slane %v9697_v20, 6 }
 0x7a1   : > { %v9598_v43 = vpack.c.b16 %v9594_v38, %v9594_v38  ;;  %v9702_v41 = vrot.slane %v9700_v10, 7  ;;  %v9706_v1 = vshll.u32 %v18147_v6, 16  ;;  %v9790_v27 = vor.u32 %v18131_v57, %v18128_v62 }
 0x7a2   : > { %v9614_v55 = vsel %vm18099_vm11, %v9597_v25, %v9613_v8  ;;  %v9689_v54 = vor.u32 %v9688_v63, %v9685_v21  ;;  %v12405_v39 = vrot.slane %v18152_v4, 9  ;;  %v9737_v49 = vrot.slane %v9644_v60, 7  ;;  %v13551_v60 = vld [vmem:[%s18992_s29 + $0x38] sm:$0xff]  }
 0x7a3   : > { %v9617_v51 = vsel %vm18099_vm11, %v9598_v43, %v9616_v46  ;;  %9615 = vst [vmem:[#allocation6 + $0xc] sm:$0x7] %v9614_v55  ;;  %v9703_v50 = vor.u32 %v9702_v41, %v9699_v58  ;;  %v9680_v62 = vrot.slane %v9678_v24, 7  ;;  %v9694_v20 = vrot.slane %v9692_v3, 7 }
 0x7a4   : > { %9618 = vst [vmem:[#allocation6 + $0x10] sm:$0x7] %v9617_v51  ;;  %v9690_v57 = vrot.slane %v9689_v54, 2  ;;  %v18192_v4 = vsel %vm17957_vm2, %v12405_v39, %v9737_v49  ;;  %v9676_v11 = vrot.slane %v9675_v28, 2  ;;  %v9708_v2 = vrot.slane %v9706_v1, 7 }
 0x7a5   : > { %v9704_v35 = vrot.slane %v9703_v50, 2  ;;  %v9837_v0 = vcombine.low %v18031_v47, %v18192_v4  ;;  %v9854_v24 = vcombine.low %v18143_v44, %v18134_v56  ;;  %v18208_v42 = vrot.slane %v9790_v27, 2  ;;  %v13547_v47 = vld [vmem:[%s18992_s29 + $0x30] sm:$0xff]  }
 0x7a6   : > { %v18206_v18 = vsel %vm18184_vm13, %v9690_v57, %v9694_v20  ;;  %v18212_v19 = vrot.slane %v9793_v17, 7  ;;  %v9741_v26 = vrot.slane %v18147_v6, 7  ;;  %v13549_v17 = vld [vmem:[%s18992_s29 + $0xa8] sm:$0xff]   ;;  %v9801_v23 = vcombine.low %v17967_v5, %v18143_v44  ;;  %12999 = vmatpush3.bf16.msra.mxu1 %v13547_v47 }
 0x7a7   : > { %v18225_v28 = vsel %vm18184_vm13, %v9704_v35, %v9708_v2  ;;  %v9681_v31 = vsel %vm18184_vm13, %v9676_v11, %v9680_v62  ;;  %v12406_v59 = vrot.slane %v18138_v32, 9  ;;  %v9862_v44 = vrot.slane %v9854_v24, %v16658_v14  ;;  %13019 = vmatpush3.bf16.msra.mxu0 %v13549_v17  ;;  %13000 = vmatprep.subr.bf16.mxu1 %v13550_v40  ;;  %v13558_v62 = vld [vmem:[%s18992_s29 + $0xb8] sm:$0xff]  }
 0x7a8   : > { %v9873_v6 = vcombine.low %v18206_v18, %v18225_v28  ;;  %v9796_v34 = vsel %vm18184_vm13, %v18208_v42, %v18212_v19  ;;  %13020 = vmatprep.subr.bf16.mxu0 %v13552_v29  ;;  %v18262_v7 = vrot.slane %v9801_v23, %v16658_v14  ;;  %v9818_v12 = vcombine.low %v9681_v31, %v18206_v18 }
 0x7a9   : > { %v18258_v30 = vsel %vm17957_vm2, %v12406_v59, %v9741_v26  ;;  %v9845_v50 = vrot.slane %v9837_v0, %v16658_v14  ;;  %v13725_v47 = vmov 0.0   ;;  %vm13726_vm5 = vmmov 0  }
 0x7aa   : > { %v9622_v5 = vld [vmem:[#allocation6 + $0xc] sm:$0x7]  ;;  %13001 = vmatpush3.bf16.msra.mxu1 %v13551_v60 }
 0x7ab   : > { %v9623_v32 = vld [vmem:[#allocation6 + $0x10] sm:$0x7]  ;;  %v9659_v22 = vrot.slane %v9622_v5, %v16658_v14  ;;  %v9802_v10 = vcombine.low %v18134_v56, %v9622_v5  ;;  %13021 = vmatpush3.bf16.msra.mxu0 %v13553_v61  ;;  %13255 = vmatprep.subr.bf16.mxu1 %v13725_v47  ;;  %v9826_v61 = vrot.slane %v9818_v12, %v16658_v14 }
 0x7ac   : > { %v9855_v33 = vcombine.low %v9622_v5, %v9623_v32  ;;  %v9754_v48 = vrot.slane %v9623_v32, %v16658_v14  ;;  %v9909_v36 = vcombine.low %v9623_v32, %v17931_v37  ;;  %v13556_v37 = vld [vmem:[%s18992_s29 + $0xf8] sm:$0xff]  }
 0x7ad   : > { %v9660_v9 = vcombine.high %v9659_v22, %v9659_v22  ;;  %v9711_v8 = vshrl.u32 %v9659_v22, 16  ;;  %v9714_v21 = vshll.u32 %v9659_v22, 16  ;;  %v12407_v3 = vrot.slane %v9659_v22, 9  ;;  %13022 = vmatprep.subr.bf16.mxu0 %v13556_v37  ;;  %v13569_v37 = vld [vmem:[%s18813_s6 + $0xd0] sm:$0xff]  }
 0x7ae   : > { %v9869_v38 = vrot.slane %v9855_v33, %v16658_v14  ;;  %v9755_v46 = vcombine.high %v9754_v48, %v9754_v48  ;;  %v9757_v25 = vshrl.u32 %v9754_v48, 16  ;;  %v9760_v56 = vshll.u32 %v9754_v48, 16 }
 0x7af   : > { %v9713_v63 = vrot.slane %v9711_v8, 6  ;;  %v9716_v58 = vrot.slane %v9714_v21, 7  ;;  %v9720_v43 = vshll.u32 %v9660_v9, 16  ;;  %v9745_v41 = vrot.slane %v9660_v9, 7  ;;  %13023 = vmatpush3.bf16.msra.mxu0 %v13558_v62  ;;  %v13576_v62 = vld [vmem:[%s18813_s6 + $0x10] sm:$0xff]  }
 0x7b0   : > { %v9870_v1 = vcombine.low %v9862_v44, %v9869_v38  ;;  %v9759_v27 = vrot.slane %v9757_v25, 6  ;;  %v9762_v55 = vrot.slane %v9760_v56, 7  ;;  %v9766_v54 = vshll.u32 %v9755_v46, 16  ;;  %v13560_v38 = vld [vmem:[%s18992_s29 + $0x108] sm:$0xff]   ;;  %v13561_v56 = vld [vmem:[%s18992_s29 + $0x110] sm:$0xff]  }
 0x7b1   : > { %v9717_v39 = vor.u32 %v9716_v58, %v9713_v63  ;;  %v9722_v49 = vrot.slane %v9720_v43, 7  ;;  %v9746_v51 = vsel %vm17957_vm2, %v12407_v3, %v9745_v41  ;;  %v12408_v20 = vrot.slane %v9754_v48, 9  ;;  %v13562_v63 = vld [vmem:[%s18992_s29 + $0x118] sm:$0xff]   ;;  %v13563_v58 = vld [vmem:[%s18813_s6 + $0xc0] sm:$0xff]   ;;  %v13565_v41 = vld [vmem:[%s18813_s6 + $0xc8] sm:$0xff]  }
 0x7b2   : > { %9871 = vrot.lane.b32.xlu1 %v9870_v1, %s18910_s26  ;;  %v9763_v57 = vor.u32 %v9762_v55, %v9759_v27  ;;  %v9772_v45 = vrot.slane %v9755_v46, 7  ;;  %v9838_v11 = vcombine.low %v18258_v30, %v9746_v51  ;;  %v9816_v2 = vrot.slane %v9802_v10, %v16658_v14  ;;  %v13564_v43 = vld [vmem:[%s18813_s6 + $0x80] sm:$0xff]   ;;  %13057 = vmatprep.subr.bf16.mxu0 %v13563_v58  ;;  %v13570_v55 = vld [vmem:[%s18813_s6 + $0x48] sm:$0xff]  }
 0x7b3   : > { %v9718_v35 = vrot.slane %v9717_v39, 2  ;;  %v9916_v24 = vrot.slane %v9909_v36, %v16658_v14  ;;  %v9768_v0 = vrot.slane %v9766_v54, 7  ;;  %v13566_v1 = vld [vmem:[%s18813_s6 + $0x40] sm:$0xff]   ;;  %v13567_v54 = vld [vmem:[%s18813_s6 + $0x88] sm:$0xff]  }
 0x7b4   : > { %v9764_v42 = vrot.slane %v9763_v57, 2  ;;  %v9773_v19 = vsel %vm17957_vm2, %v12408_v20, %v9772_v45  ;;  %v9852_v52 = vrot.slane %v9838_v11, %v16658_v14  ;;  %v9817_v40 = vcombine.low %v18262_v7, %v9816_v2  ;;  %v13568_v27 = vld [vmem:[%s18813_s6] sm:$0xff]   ;;  %v13572_v39 = vld [vmem:[%s18813_s6 + $0x8] sm:$0xff]   ;;  %v13578_v57 = vld [vmem:[%s18813_s6 + $0x58] sm:$0xff]  }
 0x7b5   : > { %v9723_v13 = vsel %vm18184_vm13, %v9718_v35, %v9722_v49  ;;  %v9891_v26 = vcombine.low %v9746_v51, %v9773_v19  ;;  %v9929_v17 = vcombine.low %v9773_v19, %v17971_v53  ;;  %v9917_v59 = vcombine.low %v9816_v2, %v9916_v24  ;;  %v13574_v49 = vld [vmem:[%s18813_s6 + $0x50] sm:$0xff]   ;;  %v13575_v20 = vld [vmem:[%s18813_s6 + $0x98] sm:$0xff]   ;;  %v13577_v45 = vld [vmem:[%s18813_s6 + $0xe0] sm:$0xff]  }
 0x7b6   : > { %v9819_v23 = vcombine.low %v18225_v28, %v9723_v13  ;;  %v9769_v29 = vsel %vm18184_vm13, %v9764_v42, %v9768_v0  ;;  %v9853_v31 = vcombine.low %v9845_v50, %v9852_v52  ;;  %v9890_v53 = vcombine.low %v18192_v4, %v18258_v30  ;;  %v13557_v28 = vld [vmem:[%s18992_s29 + $0x100] sm:$0xff]   ;;  %v13571_v51 = vld [vmem:[%s18813_s6 + $0x90] sm:$0xff]   ;;  %v13573_v50 = vld [vmem:[%s18813_s6 + $0xd8] sm:$0xff]  }
 0x7b7   : > { %v9918_v60 = vcombine.low %v9769_v29, %v9796_v34  ;;  %v9936_v5 = vrot.slane %v9929_v17, %v16658_v14  ;;  %v9874_v44 = vcombine.low %v9723_v13, %v9769_v29  ;;  %v9881_v7 = vrot.slane %v9873_v6, %v16658_v14  ;;  %v13580_v11 = vld [vmem:[%s18813_s6 + $0x18] sm:$0xff]   ;;  %v13582_v35 = vld [vmem:[%s18813_s6 + $0x60] sm:$0xff]   ;;  %v13581_v24 = vld [vmem:[%s18813_s6 + $0xe8] sm:$0xff]  }
 0x7b8   : > { %v9833_v32 = vrot.slane %v9819_v23, %v16658_v14  ;;  %v9905_v48 = vrot.slane %v9891_v26, %v16658_v14  ;;  %v9898_v9 = vrot.slane %v9890_v53, %v16658_v14  ;;  %v13579_v2 = vld [vmem:[%s18813_s6 + $0xa0] sm:$0xff]   ;;  %v13586_v0 = vld [vmem:[%s18813_s6 + $0x68] sm:$0xff]   ;;  %v13592_v26 = vld [vmem:[%s18813_s6 + $0x70] sm:$0xff]  }
 0x7b9   : > { %v9925_v22 = vrot.slane %v9918_v60, %v16658_v14  ;;  %v9937_v10 = vcombine.low %v9852_v52, %v9936_v5  ;;  %v9888_v34 = vrot.slane %v9874_v44, %v16658_v14  ;;  %v13584_v42 = vld [vmem:[%s18813_s6 + $0x20] sm:$0xff]   ;;  %v13583_v19 = vld [vmem:[%s18813_s6 + $0xa8] sm:$0xff]   ;;  %v13585_v52 = vld [vmem:[%s18813_s6 + $0xf0] sm:$0xff]  }
 0x7ba   : > { %v9834_v33 = vcombine.low %v9826_v61, %v9833_v32  ;;  %v9906_v4 = vcombine.low %v9898_v9, %v9905_v48  ;;  %v13588_v13 = vld [vmem:[%s18813_s6 + $0x28] sm:$0xff]   ;;  %v13587_v17 = vld [vmem:[%s18813_s6 + $0xb0] sm:$0xff]   ;;  %v13596_v29 = vld [vmem:[%s18813_s6 + $0x78] sm:$0xff]  }
 0x7bb   : > { %v9926_v36 = vcombine.low %v9833_v32, %v9925_v22  ;;  %v9889_v12 = vcombine.low %v9881_v7, %v9888_v34  ;;  %v13594_v23 = vld [vmem:[%s18813_s6 + $0x30] sm:$0xff]   ;;  %v13598_v60 = vld [vmem:[%s18813_s6 + $0x38] sm:$0xff]   ;;  %v13600_v5 = vld [vmem:[%s18813_s6 + $0x140] sm:$0xff]  }
 0x7bc   : > { %9835 = vrot.lane.b32.xlu0 %v9834_v33, %s18910_s26 }
 0x7bd   : > { %9927 = vrot.lane.b32.xlu1 %v9926_v36, %s18910_s26 }
 0x7c0   : > { %9907 = vrot.lane.b32.xlu0 %v9906_v4, %s18910_s26  ;;  %s11668_s26 = scalar_lea.sflag [#allocation9], %s647_s10 }
 0x824   : > { %v9872_v30 = vpop.permute.xlu1 %9871 }
 0x825   : > { %v9944_v18 = vsel %vm2617_vm0, %v9853_v31, %v9872_v30  ;;  %v13593_v31 = vld [vmem:[%s18813_s6 + $0xb8] sm:$0xff]  }
 0x826   : > { %10277 = vmatprep.mubr.bf16.mxu1 %v9944_v18  ;;  %v12447_v18 = vld [vmem:[%s18818_s11] ss:$0 sm:$0xff] }
 0x82e   : > { %v9836_v6 = vpop.permute.xlu0 %9835 }
 0x82f   : > { %v9940_v8 = vsel %vm2617_vm0, %v9817_v40, %v9836_v6  ;;  %v9928_v21 = vpop.permute.xlu1 %9927  ;;  %v13589_v40 = vld [vmem:[%s18813_s6 + $0xf8] sm:$0xff]  }
 0x830   : > { %10278 = vmatmul.mubr.bf16.vlgmr.msra.gmra.mrb[88].mxu1 %v9940_v8  ;;  %v9952_v3 = vsel %vm2617_vm0, %v9917_v59, %v9928_v21  ;;  %v13595_v59 = vld [vmem:[%s18813_s6 + $0x1c0] sm:$0xff]  }
 0x831   : > { %13256 = vmatpush3.bf16.msra.mxu1 %v13557_v28  ;;  %10318 = vmatprep.mubr.bf16.mxu0 %v9952_v3  ;;  %v12448_v8 = vld [vmem:[%s18824_s17] ss:$0 sm:$0xff] }
 0x832   : > { %v9908_v46 = vpop.permute.xlu0 %9907  ;;  %13257 = vmatprep.subr.bf16.mxu1 %v13725_v47  ;;  %13263 = vmatprep.mubr.msk.bf16.mxu1 %vm13726_vm5, %v13725_v47 }
 0x833   : > { %v9948_v25 = vsel %vm2617_vm0, %v9889_v12, %v9908_v46 }
 0x834   : > { %10319 = vmatmul.mubr.bf16.vlgmr.msra.gmra.mrb[104].mxu0 %v9948_v25  ;;  %v18438_v25 = vld [vmem:[#allocation7] sm:$0x7] }
 0x835   : > { %13258 = vmatpush3.bf16.msra.mxu1 %v13560_v38  ;;  %13058 = vmatpush3.bf16.msra.mxu0 %v13564_v43  ;;  %v10478_v58 = vrot.slane %v18438_v25, %v16658_v14 }
 0x836   : > { %13259 = vmatprep.subr.bf16.mxu1 %v13725_v47  ;;  %13059 = vmatprep.subr.bf16.mxu0 %v13565_v41 }
 0x839   : > { %13260 = vmatpush3.bf16.msra.mxu1 %v13561_v56  ;;  %13060 = vmatpush3.bf16.msra.mxu0 %v13567_v54  ;;  %v10505_v54 = vshrl.u32 %v10478_v58, 16 }
 0x83a   : > { %13261 = vmatprep.subr.bf16.mxu1 %v13725_v47  ;;  %13061 = vmatprep.subr.bf16.mxu0 %v13569_v37  ;;  %v10508_v37 = vshll.u32 %v10478_v58, 16 }
 0x83d   : > { %13262 = vmatpush3.bf16.msra.mxu1 %v13562_v63  ;;  %13062 = vmatpush3.bf16.msra.mxu0 %v13571_v51 }
 0x83e   : > { %13035 = vmatprep.subr.bf16.mxu1 %v13566_v1  ;;  %13063 = vmatprep.subr.bf16.mxu0 %v13573_v50 }
 0x840   : > { %13264 = vmatmul.mubr.msk.bf16.vlgmr.msra.gmra.mrb[92].mxu1 %vm2617_vm0, %v9937_v10  ;;  %vm19002_vm0 = vcmask 1042432  }
 0x841   : > { %13036 = vmatpush3.bf16.msra.mxu1 %v13568_v27  ;;  %13064 = vmatpush3.bf16.msra.mxu0 %v13575_v20  ;;  %vm18444_vm7 = vmand %vm19002_vm0, %vm9605_vm9 }
 0x842   : > { %13037 = vmatprep.subr.bf16.mxu1 %v13570_v55  ;;  %13065 = vmatprep.subr.bf16.mxu0 %v13577_v45 }
 0x845   : > { %13038 = vmatpush3.bf16.msra.mxu1 %v13572_v39  ;;  %13066 = vmatpush3.bf16.msra.mxu0 %v13579_v2 }
 0x846   : > { %13039 = vmatprep.subr.bf16.mxu1 %v13574_v49  ;;  %13067 = vmatprep.subr.bf16.mxu0 %v13581_v24  ;;  %v10507_v24 = vrot.slane %v10505_v54, 6 }
 0x849   : > { %13040 = vmatpush3.bf16.msra.mxu1 %v13576_v62  ;;  %13068 = vmatpush3.bf16.msra.mxu0 %v13583_v19 }
 0x84a   : > { %13041 = vmatprep.subr.bf16.mxu1 %v13578_v57  ;;  %13069 = vmatprep.subr.bf16.mxu0 %v13585_v52 }
 0x84d   : > { %13042 = vmatpush3.bf16.msra.mxu1 %v13580_v11  ;;  %13070 = vmatpush3.bf16.msra.mxu0 %v13587_v17 }
 0x84e   : > { %13043 = vmatprep.subr.bf16.mxu1 %v13582_v35  ;;  %13071 = vmatprep.subr.bf16.mxu0 %v13589_v40  ;;  %v10450_v35 = vld [vmem:[#allocation7 + $0x4] sm:$0x7] }
 0x851   : > { %13044 = vmatpush3.bf16.msra.mxu1 %v13584_v42  ;;  %13072 = vmatpush3.bf16.msra.mxu0 %v13593_v31  ;;  %v10510_v42 = vrot.slane %v10508_v37, 7 }
 0x852   : > { %13045 = vmatprep.subr.bf16.mxu1 %v13586_v0  ;;  %13101 = vmatprep.subr.bf16.mxu0 %v13595_v59 }
 0x855   : > { %13046 = vmatpush3.bf16.msra.mxu1 %v13588_v13 }
 0x856   : > { %13047 = vmatprep.subr.bf16.mxu1 %v13592_v26  ;;  %v10453_v26 = vld [vmem:[#allocation7 + $0x8] sm:$0x7] }
 0x859   : > { %13048 = vmatpush3.bf16.msra.mxu1 %v13594_v23  ;;  %v10479_v23 = vcombine.high %v10478_v58, %v10478_v58 }
 0x85a   : > { %13049 = vmatprep.subr.bf16.mxu1 %v13596_v29  ;;  %v18448_v29 = vld [vmem:[#allocation7 + $0x14] sm:$0x7] }
 0x85d   : > { %13050 = vmatpush3.bf16.msra.mxu1 %v13598_v60 }
 0x85e   : > { %13079 = vmatprep.subr.bf16.mxu1 %v13600_v5 }
 0x903   : > { %v13002_v44 = vpop.f32.mrb[88].mxu1 }
 0x904   : > { %v13003_v61 = vpop.f32.mrb[89].mxu1 }
 0x905   : > { %v13004_v32 = vadd.f32 %v13003_v61, %v13002_v44  ;;  %v13005_v53 = vpop.f32.mrb[90].mxu1  ;;  %v10456_v44 = vld [vmem:[#allocation7 + $0xc] sm:$0x7] }
 0x906   : > { %v13006_v22 = vpop.f32.mrb[91].mxu1 }
 0x907   : > { %v13007_v10 = vadd.f32 %v13006_v22, %v13005_v53  ;;  %v13024_v7 = vpop.f32.mrb[104].mxu0  ;;  %v10514_v53 = vshll.u32 %v10479_v23, 16 }
 0x908   : > { %v13025_v34 = vpop.f32.mrb[105].mxu0 }
 0x909   : > { %v13026_v33 = vadd.f32 %v13025_v34, %v13024_v7  ;;  %v13027_v48 = vpop.f32.mrb[106].mxu0  ;;  %v10511_v7 = vor.u32 %v10510_v42, %v10507_v24  ;;  %v10610_v34 = vrot.slane %v18448_v29, %v16658_v14 }
 0x90a   : > { %v13028_v36 = vpop.f32.mrb[107].mxu0 }
 0x90b   : > { %v13029_v12 = vadd.f32 %v13028_v36, %v13027_v48  ;;  %v10321_v9 = vadd.f32 %v13026_v33, %v13004_v32  ;;  %v10459_v32 = vld [vmem:[#allocation7 + $0x10] sm:$0x7]  ;;  %v12453_v36 = vrot.slane %v10478_v58, 9 }
 0x90d   : > { %v10324_v4 = vadd.f32 %v13029_v12, %v13007_v10  ;;  %v10562_v12 = vrot.slane %v10479_v23, 7 }
 0x913   : > { %v10361_v30 = vpop.f32.mrb[92].mxu1 }
 0x914   : > { %v10362_v28 = vadd.f32 %v10361_v30, %v10321_v9  ;;  %v13265_v6 = vpop.f32.mrb[93].mxu1  ;;  %v18460_v9 = vrot.slane %v10511_v7, 2  ;;  %v10611_v30 = vcombine.high %v10610_v34, %v10610_v34 }
 0x915   : > { %v10364_v21 = vpop.f32.mrb[94].mxu1 }
 0x916   : > { %v10375_v3 = vmul.f32 %v12447_v18, %v10362_v28  ;;  %v10365_v38 = vadd.f32 %v10364_v21, %v10324_v4  ;;  %v13266_v46 = vpop.f32.mrb[95].mxu1  ;;  %v18462_v4 = vrot.slane %v10514_v53, 7  ;;  %v10616_v28 = vshll.u32 %v10610_v34, 16 }
 0x917   : > { %v10563_v21 = vsel %vm17957_vm2, %v12453_v36, %v10562_v12  ;;  %v12458_v46 = vrot.slane %v10610_v34, 9 }
 0x918   : > { %v10384_v56 = vadd.f32 %v12448_v8, %v10375_v3  ;;  %v10376_v63 = vmul.f32 %v12447_v18, %v10365_v38  ;;  %v10613_v18 = vshrl.u32 %v10610_v34, 16  ;;  %v10517_v38 = vsel %vm18184_vm13, %v18460_v9, %v18462_v4 }
 0x91a   : > { %v10386_v43 = vmax.f32 %v10384_v56, 0.0  ;;  %v10385_v41 = vadd.f32 %v12448_v8, %v10376_v63  ;;  %v10628_v56 = vrot.slane %v10611_v30, 7  ;;  %v10615_v63 = vrot.slane %v10613_v18, 6  ;;  %v13597_v18 = vld [vmem:[%s18813_s6 + $0x180] sm:$0xff]  }
 0x91c   : > { %v10390_v1 = vcombine.high %v10386_v43, %v10386_v43  ;;  %v12697_v27 = vpack.c.bf16 %v10386_v43, %v10386_v43  ;;  %v10387_v55 = vmax.f32 %v10385_v41, 0.0 }
 0x91e   : > { %v12698_v39 = vpack.c.bf16 %v10390_v1, %v10390_v1  ;;  %v10417_v49 = vshrl.u32 %v12697_v27, 16  ;;  %v10391_v51 = vcombine.high %v10387_v55, %v10387_v55  ;;  %v12699_v50 = vpack.c.bf16 %v10387_v55, %v10387_v55 }
 0x91f   : > { %v10420_v57 = vshll.u32 %v12697_v27, 16  ;;  %v10618_v27 = vrot.slane %v10616_v28, 7 }
 0x920   : > { %v10419_v62 = vrot.slane %v10417_v49, 7  ;;  %v10424_v20 = vshrl.u32 %v12698_v39, 16  ;;  %v12700_v45 = vpack.c.bf16 %v10391_v51, %v10391_v51  ;;  %v10431_v2 = vshrl.u32 %v12699_v50, 16 }
 0x921   : > { %v10427_v52 = vshll.u32 %v12698_v39, 16  ;;  %v10434_v40 = vshll.u32 %v12699_v50, 16  ;;  %v10622_v49 = vshll.u32 %v10611_v30, 16 }
 0x922   : > { %v10422_v0 = vor.u32 %v10420_v57, %v10419_v62  ;;  %v10426_v19 = vrot.slane %v10424_v20, 7  ;;  %v10438_v13 = vshrl.u32 %v12700_v45, 16  ;;  %v10433_v17 = vrot.slane %v10431_v2, 7 }
 0x923   : > { %v10441_v5 = vshll.u32 %v12700_v45, 16  ;;  %v18510_v30 = vrot.slane %v10622_v49, 7 }
 0x924   : > { %v10429_v31 = vor.u32 %v10427_v52, %v10426_v19  ;;  %v10451_v59 = vsel %vm18444_vm7, %v10422_v0, %v10450_v35  ;;  %v10440_v60 = vrot.slane %v10438_v13, 7  ;;  %v10436_v61 = vor.u32 %v10434_v40, %v10433_v17 }
 0x925   : > { %10452 = vst [vmem:[#allocation7 + $0x4] sm:$0x7] %v10451_v59 }
 0x926   : > { %v10454_v22 = vsel %vm18444_vm7, %v10429_v31, %v10453_v26  ;;  %v10443_v10 = vor.u32 %v10441_v5, %v10440_v60  ;;  %v10457_v33 = vsel %vm18444_vm7, %v10436_v61, %v10456_v44  ;;  %v10629_v44 = vsel %vm17957_vm2, %v12458_v46, %v10628_v56 }
 0x927   : > { %10455 = vst [vmem:[#allocation7 + $0x8] sm:$0x7] %v10454_v22  ;;  %10458 = vst [vmem:[#allocation7 + $0xc] sm:$0x7] %v10457_v33  ;;  %v10619_v22 = vor.u32 %v10618_v27, %v10615_v63  ;;  %v13599_v63 = vld [vmem:[%s18813_s6 + $0x1c8] sm:$0xff]  }
 0x928   : > { %v10460_v48 = vsel %vm18444_vm7, %v10443_v10, %v10459_v32 }
 0x929   : > { %10461 = vst [vmem:[#allocation7 + $0x10] sm:$0x7] %v10460_v48 }
 0x92c   : > { %v18464_v6 = vld [vmem:[#allocation7 + $0x4] sm:$0x7] }
 0x92d   : > { %v10486_v8 = vrot.slane %v18464_v6, %v16658_v14 }
 0x92e   : > { %v18470_v3 = vld [vmem:[#allocation7 + $0x8] sm:$0x7]  ;;  %v18476_v58 = vld [vmem:[#allocation7 + $0xc] sm:$0x7] }
 0x92f   : > { %v10494_v43 = vrot.slane %v18470_v3, %v16658_v14  ;;  %v10684_v41 = vcombine.low %v18464_v6, %v18470_v3  ;;  %v10487_v1 = vcombine.high %v10486_v8, %v10486_v8  ;;  %v10502_v54 = vrot.slane %v18476_v58, %v16658_v14 }
 0x930   : > { %v18482_v55 = vld [vmem:[#allocation7 + $0x10] sm:$0x7]  ;;  %v10519_v37 = vshrl.u32 %v10486_v8, 16  ;;  %v10522_v39 = vshll.u32 %v10486_v8, 16  ;;  %v12454_v57 = vrot.slane %v10486_v8, 9  ;;  %v10631_v49 = vcombine.low %v18470_v3, %v18476_v58 }
 0x931   : > { %v10685_v51 = vcombine.low %v18476_v58, %v18482_v55  ;;  %v10692_v50 = vrot.slane %v10684_v41, %v16658_v14  ;;  %v10495_v62 = vcombine.high %v10494_v43, %v10494_v43  ;;  %v10503_v20 = vcombine.high %v10502_v54, %v10502_v54 }
 0x932   : > { %v10566_v45 = vrot.slane %v10487_v1, 7  ;;  %v12455_v11 = vrot.slane %v10494_v43, 9  ;;  %v12456_v35 = vrot.slane %v10502_v54, 9  ;;  %v10521_v42 = vrot.slane %v10519_v37, 6 }
 0x933   : > { %v10699_v2 = vrot.slane %v10685_v51, %v16658_v14  ;;  %v10570_v24 = vrot.slane %v10495_v62, 7  ;;  %v10524_v0 = vrot.slane %v10522_v39, 7  ;;  %v10574_v52 = vrot.slane %v10503_v20, 7 }
 0x934   : > { %v18492_v19 = vsel %vm17957_vm2, %v12454_v57, %v10566_v45  ;;  %v10528_v13 = vshll.u32 %v10487_v1, 16  ;;  %v10533_v26 = vshrl.u32 %v10494_v43, 16  ;;  %v10536_v5 = vshll.u32 %v10494_v43, 16 }
 0x935   : > { %v10700_v17 = vcombine.low %v10692_v50, %v10699_v2  ;;  %v18496_v40 = vsel %vm17957_vm2, %v12455_v11, %v10570_v24  ;;  %v10666_v23 = vcombine.low %v10563_v21, %v18492_v19  ;;  %v10525_v31 = vor.u32 %v10524_v0, %v10521_v42  ;;  %v13605_v2 = vld [vmem:[%s18813_s6 + $0x1d0] sm:$0xff]  }
 0x936   : > { %v10575_v59 = vsel %vm17957_vm2, %v12456_v35, %v10574_v52  ;;  %v10535_v60 = vrot.slane %v10533_v26, 6  ;;  %v10583_v61 = vrot.slane %v18482_v55, %v16658_v14  ;;  %v10538_v10 = vrot.slane %v10536_v5, 7 }
 0x937   : > { %11417 = vmatprep.mubr.bf16.mxu0 %v10700_v17  ;;  %v10667_v32 = vcombine.low %v18496_v40, %v10575_v59  ;;  %v10526_v53 = vrot.slane %v10525_v31, 2  ;;  %v10542_v7 = vshll.u32 %v10495_v62, 16  ;;  %v10547_v34 = vshrl.u32 %v10502_v54, 16 }
 0x938   : > { %v10550_v33 = vshll.u32 %v10502_v54, 16  ;;  %v10674_v48 = vrot.slane %v10666_v23, %v16658_v14  ;;  %v10530_v12 = vrot.slane %v10528_v13, 7  ;;  %v10539_v28 = vor.u32 %v10538_v10, %v10535_v60  ;;  %v13607_v13 = vld [vmem:[%s18813_s6 + $0x190] sm:$0xff]  }
 0x939   : > { %v18508_v36 = vrot.slane %v10667_v32, %v16658_v14  ;;  %v10549_v8 = vrot.slane %v10547_v34, 6  ;;  %v10556_v46 = vshll.u32 %v10503_v20, 16  ;;  %v10630_v43 = vcombine.low %v18438_v25, %v18464_v6  ;;  %v13601_v20 = vld [vmem:[%s18813_s6 + $0x188] sm:$0xff]   ;;  %v13604_v32 = vld [vmem:[%s18813_s6 + $0x100] sm:$0xff]   ;;  %v13611_v34 = vld [vmem:[%s18813_s6 + $0x198] sm:$0xff]  }
 0x93a   : > { %v10552_v21 = vrot.slane %v10550_v33, 7  ;;  %v10584_v41 = vcombine.high %v10583_v61, %v10583_v61  ;;  %v10620_v1 = vrot.slane %v10619_v22, 2  ;;  %v18523_v27 = vsel %vm18184_vm13, %v10526_v53, %v10530_v12 }
 0x93b   : > { %v10682_v56 = vcombine.low %v10674_v48, %v18508_v36  ;;  %v10540_v54 = vrot.slane %v10539_v28, 2  ;;  %v10544_v37 = vrot.slane %v10542_v7, 7  ;;  %v12457_v51 = vrot.slane %v10583_v61, 9  ;;  %v13606_v7 = vld [vmem:[%s18813_s6 + $0x148] sm:$0xff]   ;;  %v13615_v28 = vld [vmem:[%s18813_s6 + $0x1a0] sm:$0xff]  }
 0x93c   : > { %v10553_v39 = vor.u32 %v10552_v21, %v10549_v8  ;;  %v10601_v50 = vrot.slane %v10584_v41, 7  ;;  %v10586_v62 = vshrl.u32 %v10583_v61, 16  ;;  %v10558_v57 = vrot.slane %v10556_v46, 7  ;;  %v13617_v21 = vld [vmem:[%s18813_s6 + $0x1e8] sm:$0xff]   ;;  %v13612_v46 = vld [vmem:[%s18813_s6 + $0x110] sm:$0xff]  }
 0x93d   : > { %11418 = vmatmul.mubr.bf16.vlgmr.msra.gmra.mrb[108].mxu0 %v10682_v56  ;;  %v18529_v25 = vsel %vm18184_vm13, %v10540_v54, %v10544_v37  ;;  %v10589_v45 = vshll.u32 %v10583_v61, 16  ;;  %v10648_v3 = vcombine.low %v10517_v38, %v18523_v27  ;;  %v10595_v35 = vshll.u32 %v10584_v41, 16  ;;  %v13614_v56 = vld [vmem:[%s18813_s6 + $0x158] sm:$0xff]   ;;  %v13623_v54 = vld [vmem:[%s18813_s6 + $0x1b0] sm:$0xff]  }
 0x93e   : > { %13102 = vmatpush3.bf16.msra.mxu0 %v13597_v18  ;;  %v10554_v6 = vrot.slane %v10553_v39, 2  ;;  %v10602_v58 = vsel %vm17957_vm2, %v12457_v51, %v10601_v50  ;;  %v10588_v11 = vrot.slane %v10586_v62, 6  ;;  %v10720_v16 = vcombine.low %v18492_v19, %v18496_v40  ;;  %v13609_v40 = vld [vmem:[%s18813_s6 + $0x1d8] sm:$0xff]   ;;  %v13610_v18 = vld [vmem:[%s18813_s6 + $0x150] sm:$0xff]   ;;  %v13622_v51 = vld [vmem:[%s18813_s6 + $0x168] sm:$0xff]  }
 0x93f   : > { %13103 = vmatprep.subr.bf16.mxu0 %v13599_v63  ;;  %v10721_v42 = vcombine.low %v10575_v59, %v10602_v58  ;;  %v10758_v0 = vcombine.low %v10602_v58, %v10629_v44  ;;  %v10591_v52 = vrot.slane %v10589_v45, 7  ;;  %v18554_v4 = vrot.slane %v10631_v49, %v16658_v14  ;;  %v13619_v63 = vld [vmem:[%s18813_s6 + $0x1a8] sm:$0xff]   ;;  %v13616_v41 = vld [vmem:[%s18813_s6 + $0x118] sm:$0xff]   ;;  %v13620_v49 = vld [vmem:[%s18813_s6 + $0x120] sm:$0xff]  }
 0x940   : > { %v18547_v24 = vsel %vm18184_vm13, %v10554_v6, %v10558_v57  ;;  %v10656_v17 = vrot.slane %v10648_v3, %v16658_v14  ;;  %v10625_v19 = vsel %vm18184_vm13, %v10620_v1, %v18510_v30  ;;  %v10638_v59 = vrot.slane %v10630_v43, %v16658_v14  ;;  %v13608_v30 = vld [vmem:[%s18813_s6 + $0x108] sm:$0xff]   ;;  %v13621_v43 = vld [vmem:[%s18813_s6 + $0x1f0] sm:$0xff]   ;;  %v13618_v1 = vld [vmem:[%s18813_s6 + $0x160] sm:$0xff]  }
 0x941   : > { %v10649_v9 = vcombine.low %v18529_v25, %v18547_v24  ;;  %v10592_v38 = vor.u32 %v10591_v52, %v10588_v11  ;;  %v18560_v26 = vrot.slane %v10758_v0, %v16658_v14  ;;  %v10735_v31 = vrot.slane %v10721_v42, %v16658_v14  ;;  %v13625_v37 = vld [vmem:[%s18813_s6 + $0x1f8] sm:$0xff]   ;;  %v13628_v57 = vld [vmem:[%s18813_s6 + $0x130] sm:$0xff]   ;;  %v13636_v42 = vld [vmem:[%s18813_s6 + $0x220] sm:$0xff]  }
 0x942   : > { %13104 = vmatpush3.bf16.msra.mxu0 %v13601_v20  ;;  %v10597_v5 = vrot.slane %v10595_v35, 7  ;;  %v10728_v53 = vrot.slane %v10720_v16, %v16658_v14  ;;  %v10646_v22 = vcombine.low %v10638_v59, %v18554_v4  ;;  %v10738_v39 = vcombine.low %v18482_v55, %v18448_v29  ;;  %v13627_v50 = vld [vmem:[%s18813_s6 + $0x1b8] sm:$0xff]   ;;  %v13624_v29 = vld [vmem:[%s18813_s6 + $0x128] sm:$0xff]   ;;  %v13626_v55 = vld [vmem:[%s18813_s6 + $0x170] sm:$0xff]  }
 0x943   : > { %v10663_v23 = vrot.slane %v10649_v9, %v16658_v14  ;;  %13105 = vmatprep.subr.bf16.mxu0 %v13605_v2  ;;  %v10593_v60 = vrot.slane %v10592_v38, 2  ;;  %v10766_v44 = vcombine.low %v18508_v36, %v18560_v26  ;;  %v13630_v45 = vld [vmem:[%s18813_s6 + $0x178] sm:$0xff]   ;;  %v10702_v3 = vcombine.low %v18523_v27, %v18529_v25  ;;  %v13632_v2 = vld [vmem:[%s18813_s6 + $0x200] sm:$0xff]   ;;  %v13633_v27 = vld [vmem:[%s18813_s6 + $0x208] sm:$0xff]  }
 0x944   : > { %v10736_v33 = vcombine.low %v10728_v53, %v10735_v31  ;;  %v10745_v62 = vrot.slane %v10738_v39, %v16658_v14  ;;  %v13631_v58 = vld [vmem:[%s18813_s6 + $0x138] sm:$0xff]   ;;  %v13637_v0 = vld [vmem:[%s18813_s6 + $0x228] sm:$0xff]   ;;  %v13638_v52 = vld [vmem:[%s18813_s6 + $0x230] sm:$0xff]   ;;  %v13727_v38 = vmov 0.0|0.0  }
 0x945   : > { %v10664_v61 = vcombine.low %v10656_v17, %v10663_v23  ;;  %v18581_v10 = vsel %vm18184_vm13, %v10593_v60, %v10597_v5  ;;  %v10710_v35 = vrot.slane %v10702_v3, %v16658_v14  ;;  %v13635_v25 = vld [vmem:[%s18813_s6 + $0x218] sm:$0xff]   ;;  %v11578_v16 = vld [vmem:[%s18826_s19] sm:$0xff]  ;;  %v11584_v31 = vld [vmem:[%s18826_s19 + $0x30] sm:$0xff] }
 0x946   : > { %13106 = vmatpush3.bf16.msra.mxu0 %v13607_v13  ;;  %v10748_v48 = vcombine.low %v18581_v10, %v10625_v19  ;;  %v10746_v6 = vcombine.low %v18554_v4, %v10745_v62  ;;  %v10703_v20 = vcombine.low %v18547_v24, %v18581_v10  ;;  %v13639_v9 = vld [vmem:[%s18813_s6 + $0x238] sm:$0xff]   ;;  %v11579_v4 = vld [vmem:[%s18826_s19 + $0x8] sm:$0xff]  ;;  %v11582_v17 = vld [vmem:[%s18826_s19 + $0x20] sm:$0xff] }
 0x947   : > { %11376 = vmatprep.mubr.bf16.mxu1 %v10664_v61  ;;  %13107 = vmatprep.subr.bf16.mxu0 %v13609_v40  ;;  %v13323_v13 = vpack.c.bf16 %v11579_v4, %v11578_v16  ;;  %v11581_v36 = vld [vmem:[%s18826_s19 + $0x18] sm:$0xff]  ;;  %v11586_v60 = vld [vmem:[%s18826_s19 + $0x40] sm:$0xff]  ;;  %v11587_v5 = vld [vmem:[%s18826_s19 + $0x48] sm:$0xff] }
 0x948   : > { %11377 = vmatmul.mubr.bf16.vlgmr.msra.gmra.mrb[96].mxu1 %v10646_v22  ;;  %v10755_v12 = vrot.slane %v10748_v48, %v16658_v14  ;;  %v10717_v11 = vrot.slane %v10703_v20, %v16658_v14  ;;  %v13634_v14 = vld [vmem:[%s18813_s6 + $0x210] sm:$0xff]   ;;  %v11585_v40 = vld [vmem:[%s18826_s19 + $0x38] sm:$0xff]  ;;  %v11590_v22 = vld [vmem:[%s18826_s19 + $0x60] sm:$0xff] }
 0x949   : > { %13080 = vmatpush3.bf16.msra.mxu1 %v13604_v32  ;;  %11458 = vmatprep.mubr.bf16.mxu1 %v10736_v33  ;;  %v13332_v59 = vpack.c.bf16 %v11585_v40, %v11584_v31  ;;  %v11588_v61 = vld [vmem:[%s18826_s19 + $0x50] sm:$0xff]  ;;  %v11589_v32 = vld [vmem:[%s18826_s19 + $0x58] sm:$0xff]  ;;  %v11591_v10 = vld [vmem:[%s18826_s19 + $0x68] sm:$0xff] }
 0x94a   : > { %13081 = vmatprep.subr.bf16.mxu1 %v13606_v7  ;;  %13108 = vmatpush3.bf16.msra.mxu0 %v13611_v34  ;;  %v10756_v8 = vcombine.low %v10663_v23, %v10755_v12  ;;  %v10718_v24 = vcombine.low %v10710_v35, %v10717_v11  ;;  %v11583_v23 = vld [vmem:[%s18826_s19 + $0x28] sm:$0xff]  ;;  %v13338_v53 = vpack.c.bf16 %v11589_v32, %v11588_v61  ;;  %v11592_v34 = vld [vmem:[%s18826_s19 + $0x70] sm:$0xff]  ;;  %v11593_v33 = vld [vmem:[%s18826_s19 + $0x78] sm:$0xff] }
 0x94b   : > { %13109 = vmatprep.subr.bf16.mxu0 %v13613_v15  ;;  %v13329_v19 = vpack.c.bf16 %v11583_v23, %v11582_v17  ;;  %v13341_v7 = vpack.c.bf16 %v11591_v10, %v11590_v22  ;;  %v13344_v48 = vpack.c.bf16 %v11593_v33, %v11592_v34 }
 0x94c   : > { %11499 = vmatprep.mubr.bf16.mxu0 %v10756_v8 }
 0x94d   : > { %13082 = vmatpush3.bf16.msra.mxu1 %v13608_v30 }
 0x94e   : > { %13083 = vmatprep.subr.bf16.mxu1 %v13610_v18  ;;  %13110 = vmatpush3.bf16.msra.mxu0 %v13615_v28 }
 0x94f   : > { %13111 = vmatprep.subr.bf16.mxu0 %v13617_v21 }
 0x951   : > { %13084 = vmatpush3.bf16.msra.mxu1 %v13612_v46 }
 0x952   : > { %13085 = vmatprep.subr.bf16.mxu1 %v13614_v56  ;;  %13112 = vmatpush3.bf16.msra.mxu0 %v13619_v63 }
 0x953   : > { %13113 = vmatprep.subr.bf16.mxu0 %v13621_v43 }
 0x955   : > { %13086 = vmatpush3.bf16.msra.mxu1 %v13616_v41 }
 0x956   : > { %13087 = vmatprep.subr.bf16.mxu1 %v13618_v1  ;;  %13114 = vmatpush3.bf16.msra.mxu0 %v13623_v54 }
 0x957   : > { %13115 = vmatprep.subr.bf16.mxu0 %v13625_v37 }
 0x959   : > { %13088 = vmatpush3.bf16.msra.mxu1 %v13620_v49 }
 0x95a   : > { %13089 = vmatprep.subr.bf16.mxu1 %v13622_v51  ;;  %13116 = vmatpush3.bf16.msra.mxu0 %v13627_v50 }
 0x95b   : > { %13322 = vmatprep.subr.bf16.mxu0 %v13727_v38 }
 0x95d   : > { %13090 = vmatpush3.bf16.msra.mxu1 %v13624_v29  ;;  %11500 = vmatmul.mubr.bf16.vlgmr.msra.gmra.mrb[112].mxu0 %v10746_v6 }
 0x95e   : > { %13091 = vmatprep.subr.bf16.mxu1 %v13626_v55  ;;  %13319 = vmatprep.mubr.msk.f32.mxu0 %vm13726_vm5, %v13725_v47 }
 0x95f   : > { %13324 = vmatpush3.bf16.msra.mxu0 %v13323_v13 }
 0x960   : > { %13325 = vmatprep.subr.bf16.mxu0 %v13727_v38 }
 0x961   : > { %13092 = vmatpush3.bf16.msra.mxu1 %v13628_v57 }
 0x962   : > { %13093 = vmatprep.subr.bf16.mxu1 %v13630_v45 }
 0x965   : > { %13094 = vmatpush3.bf16.msra.mxu1 %v13631_v58 }
 0x966   : > { %13267 = vmatprep.subr.bf16.mxu1 %v13725_v47 }
 0x968   : > { %11459 = vmatmul.mubr.bf16.vlgmr.msra.gmra.mrb[100].mxu1 %v10718_v24  ;;  %v12531_v24 = vld [vmem:[%s18819_s12] ss:$0 sm:$0xff] }
 0x969   : > { %13268 = vmatpush3.bf16.msra.mxu1 %v13632_v2  ;;  %13283 = vmatprep.mubr.msk.bf16.mxu1 %vm13726_vm5, %v13725_v47 }
 0x96a   : > { %13269 = vmatprep.subr.bf16.mxu1 %v13725_v47 }
 0x96d   : > { %13270 = vmatpush3.bf16.msra.mxu1 %v13633_v27 }
 0x96e   : > { %13271 = vmatprep.subr.bf16.mxu1 %v13725_v47 }
 0x971   : > { %13272 = vmatpush3.bf16.msra.mxu1 %v13634_v14 }
 0x972   : > { %13273 = vmatprep.subr.bf16.mxu1 %v13725_v47 }
 0x975   : > { %13274 = vmatpush3.bf16.msra.mxu1 %v13635_v25  ;;  %v12532_v25 = vld [vmem:[%s18825_s18] ss:$0 sm:$0xff] }
 0x976   : > { %13275 = vmatprep.subr.bf16.mxu1 %v13725_v47 }
 0x979   : > { %13276 = vmatpush3.bf16.msra.mxu1 %v13636_v42 }
 0x97a   : > { %13277 = vmatprep.subr.bf16.mxu1 %v13725_v47 }
 0x97d   : > { %13278 = vmatpush3.bf16.msra.mxu1 %v13637_v0 }
 0x97e   : > { %13279 = vmatprep.subr.bf16.mxu1 %v13725_v47 }
 0x981   : > { %13280 = vmatpush3.bf16.msra.mxu1 %v13638_v52 }
 0x982   : > { %13281 = vmatprep.subr.bf16.mxu1 %v13725_v47  ;;  %v11580_v47 = vld [vmem:[%s18826_s19 + $0x10] sm:$0xff] }
 0x983   : > { %v13326_v26 = vpack.c.bf16 %v11581_v36, %v11580_v47 }
 0x985   : > { %13282 = vmatpush3.bf16.msra.mxu1 %v13639_v9  ;;  %13327 = vmatpush3.bf16.msra.mxu0 %v13326_v26 }
 0x986   : > { %13328 = vmatprep.subr.bf16.mxu0 %v13727_v38 }
 0x988   : > { %13284 = vmatmul.mubr.bf16.vlgmr.msra.gmra.mrb[104].mxu1 %v10766_v44  ;;  %v13335_v44 = vpack.c.bf16 %v11587_v5, %v11586_v60  ;;  %v11594_v60 = vld [vmem:[%s18827_s20] sm:$0x1] }
 0x989   : > { %13330 = vmatpush3.bf16.msra.mxu0 %v13329_v19 }
 0x98a   : > { %13331 = vmatprep.subr.bf16.mxu0 %v13727_v38 }
 0x98d   : > { %13333 = vmatpush3.bf16.msra.mxu0 %v13332_v59 }
 0x98e   : > { %13334 = vmatprep.subr.bf16.mxu0 %v13727_v38 }
 0x991   : > { %13336 = vmatpush3.bf16.msra.mxu0 %v13335_v44 }
 0x992   : > { %13337 = vmatprep.subr.bf16.mxu0 %v13727_v38 }
 0x995   : > { %13339 = vmatpush3.bf16.msra.mxu0 %v13338_v53 }
 0x996   : > { %13340 = vmatprep.subr.bf16.mxu0 %v13727_v38 }
 0x999   : > { %13342 = vmatpush3.bf16.msra.mxu0 %v13341_v7 }
 0x99a   : > { %13343 = vmatprep.subr.bf16.mxu0 %v13727_v38 }
 0x99d   : > { %13345 = vmatpush3.bf16.msra.mxu0 %v13344_v48 }
 0xa10   : > { %v13073_v15 = vpop.f32.mrb[108].mxu0 }
 0xa11   : > { %v13074_v12 = vpop.f32.mrb[109].mxu0 }
 0xa12   : > { %v13075_v30 = vadd.f32 %v13074_v12, %v13073_v15  ;;  %v13076_v18 = vpop.f32.mrb[110].mxu0 }
 0xa13   : > { %v13077_v28 = vpop.f32.mrb[111].mxu0 }
 0xa14   : > { %v13078_v8 = vadd.f32 %v13077_v28, %v13076_v18 }
 0xa1b   : > { %v13051_v21 = vpop.f32.mrb[96].mxu1 }
 0xa1c   : > { %v13052_v46 = vpop.f32.mrb[97].mxu1 }
 0xa1d   : > { %v13053_v56 = vadd.f32 %v13052_v46, %v13051_v21  ;;  %v13054_v63 = vpop.f32.mrb[98].mxu1 }
 0xa1e   : > { %v13055_v43 = vpop.f32.mrb[99].mxu1 }
 0xa1f   : > { %v11420_v41 = vadd.f32 %v13075_v30, %v13053_v56  ;;  %v13056_v1 = vadd.f32 %v13055_v43, %v13054_v63 }
 0xa21   : > { %v11423_v54 = vadd.f32 %v13078_v8, %v13056_v1 }
 0xa30   : > { %v13117_v37 = vpop.f32.mrb[112].mxu0 }
 0xa31   : > { %v13118_v39 = vpop.f32.mrb[113].mxu0 }
 0xa32   : > { %v13119_v49 = vadd.f32 %v13118_v39, %v13117_v37  ;;  %v13120_v51 = vpop.f32.mrb[114].mxu0 }
 0xa33   : > { %v13121_v50 = vpop.f32.mrb[115].mxu0 }
 0xa34   : > { %v13122_v62 = vadd.f32 %v13121_v50, %v13120_v51 }
 0xa3b   : > { %v13095_v29 = vpop.f32.mrb[100].mxu1 }
 0xa3c   : > { %v13096_v55 = vpop.f32.mrb[101].mxu1 }
 0xa3d   : > { %v13097_v6 = vadd.f32 %v13096_v55, %v13095_v29  ;;  %v13098_v57 = vpop.f32.mrb[102].mxu1 }
 0xa3e   : > { %v13099_v20 = vpop.f32.mrb[103].mxu1 }
 0xa3f   : > { %v11461_v45 = vadd.f32 %v13097_v6, %v11420_v41  ;;  %v13100_v3 = vadd.f32 %v13099_v20, %v13098_v57 }
 0xa41   : > { %v11464_v58 = vadd.f32 %v13100_v3, %v11423_v54  ;;  %v11502_v11 = vadd.f32 %v13119_v49, %v11461_v45 }
 0xa43   : > { %v11505_v35 = vadd.f32 %v13122_v62, %v11464_v58 }
 0xa5b   : > { %v11542_v2 = vpop.f32.mrb[104].mxu1 }
 0xa5c   : > { %v11543_v27 = vadd.f32 %v11542_v2, %v11502_v11  ;;  %v13285_v14 = vpop.f32.mrb[105].mxu1 }
 0xa5d   : > { %v11545_v42 = vpop.f32.mrb[106].mxu1 }
 0xa5e   : > { %v11556_v0 = vmul.f32 %v12531_v24, %v11543_v27  ;;  %v11546_v52 = vadd.f32 %v11545_v42, %v11505_v35  ;;  %v13286_v9 = vpop.f32.mrb[107].mxu1 }
 0xa60   : > { %v11565_v16 = vadd.f32 %v12532_v25, %v11556_v0  ;;  %v11557_v4 = vmul.f32 %v12531_v24, %v11546_v52 }
 0xa62   : > { %v11566_v38 = vadd.f32 %v12532_v25, %v11557_v4  ;;  %v11567_v13 = vmax.f32 %v11565_v16, 0.0 }
 0xa64   : > { %v11568_v47 = vmax.f32 %v11566_v38, 0.0 }
 0xa66   : > { %v11569_v36 = vadd.f32 %v11568_v47, %v11567_v13 }
 0xa68   : > { %v11570_v26 = vrot.slane %v11569_v36, 4 }
 0xa6a   : > { %v11571_v17 = vadd.f32 %v11570_v26, %v11569_v36 }
 0xa6c   : > { %v11572_v23 = vrot.slane %v11571_v17, 2 }
 0xa6e   : > { %v11573_v31 = vadd.f32 %v11572_v23, %v11571_v17 }
 0xa70   : > { %v11574_v19 = vrot.slane %v11573_v31, 1 }
 0xa72   : > { %v11575_v40 = vadd.f32 %v11574_v19, %v11573_v31 }
 0xa74   : > { %v11577_v59 = vmul.f32 0.0625, %v11575_v40 }
 0xa76   : > { %13320 = vmatmul.mubr.f32.vlgmr.msra.gmra.mrb[116].mxu0 %v11577_v59 }
 0xb49   : > { %v11661_v5 = vpop.f32.mrb[116].mxu0 }
 0xb4a   : > { %v11662_v44 = vadd.f32 %v11661_v5, %v11594_v60  ;;  %v13321_v61 = vpop.f32.mrb[117].mxu0 }
 0xb4c   : > { %11666 = vst.msk [vmem:[%s648_s28] sm:$0x1] %vm11665_vm8, %v11662_v44 }
 0xb4d   : > { %13663 = shalt.err (!%p13660_p3)
}
 0xb4e   : > { %s13664_s10 = scalar_lea.hbm %s18765_s4, 16  ;;  %s13668_s8 = scalar_lea.hbm %s18828_s21, 32 }
 0xb4f   : > { %p13665_p4 = scmp.ne.s32.totalorder %s18765_s4, %s13664_s10  ;;  %p13669_p9 = scmp.lt.u32.totalorder %s18765_s4, %s18828_s21 }
 0xb50   : > { %p13670_p10 = scmp.lt.u32.totalorder %s13668_s8, %s13664_s10  ;;  %p13672_p12 = scmp.lt.u32.totalorder %s13664_s10, %s18765_s4 }
 0xb51   : > { %p13666_p7 = pnand %p13665_p4, %p13877_p5 }
 0xb52   : > { %p13671_p11 = por %p13670_p10, %p13669_p9 }
 0xb53   : > { %p13667_p8 = pneg %p13666_p7 }
 0xb54   : > { %p13673_p13 = por %p13672_p12, %p13671_p11 }
 0xb56   : > { %p13674_p0 = pnand %p13673_p13, %p13667_p8 }
 0xb58   : > { %13677 = shalt.err (!%p13674_p0)
}
 0xb59   : > { %13347 = dma.vmem_to_hbm [thread:$0]  (%p13877_p5), %s18767_s7, 16, %s18765_s4, %s11668_s26  }
 0xb5a PF: > { %p13353_p1 = scmp.ge.s32.totalorder %s13712_s27, 2  ;;  %s11692_s13 = sand.u32 1, %s13700_s2  }
 0xb5b   : > { %s11693_s24 = scalar_lea.sflag [#allocation9], %s11692_s13 }
 0xb5c   : > { %p13350_p2 = pnand %p13353_p1, %p13881_p6 }
 0xb5e   : > { %13695 = dma.done.wait (!%p13350_p2), %s11693_s24, 16  }
 0xb5f   : > { %13697 = vsyncadd (!%p13350_p2), %s11693_s24, 4294967280  ;;  %s19006_s27 = sld [smem:[#allocation12_spill]]  ;;  %s19007_s10 = sld [smem:[#allocation11_spill]] }
 0xb60   : > { %s19008_s26 = sld [smem:[#allocation13_spill]]  ;;  %s19009_s2 = smov %s13704_s25 }
 0xb65   : > { %p31_p3 = scmp.ge.s32.totalorder %s19006_s27, 4   ;;  %s19010_s25 = smov %s19007_s10 }
 0xb67   :  { %33 = sbr.rel (!%p31_p3) target bundleno = 15 (0xf), region = 145 }
 0xb6e   :  { %11697 = vsyncpa [#allocation9], 1 }
 0xb6f   :  { %11699 = vsyncpa [#allocation9 + $0x1], 1 }

</bundles_post_ra>
